<compile_context>
chip_gen: v7x
topology: tpu7x:2x2x1
jax: 0.10.0
libtpu: 0.0.40
codegen_flags: <defaults>
</compile_context>

<pallas_src>
import numpy as np
import jax
import jax.numpy as jnp
from jax.experimental import pallas as pl
from jax.experimental.pallas import tpu as pltpu

IMG_SHAPE = (1, 128, 128)
IMG_PIX = int(np.prod(IMG_SHAPE))   # 16384 (lane-aligned: 128 * 128)
N_CLASSES = 4
HID = 512
OUT_PAD = 128                        # final Linear(512, 4) padded to 128 lanes


def _leaky(x):
    return jnp.where(x > 0, x, 0.2 * x)


# ----------------------------------------------------------------------------
# Fused Pallas kernel
# ----------------------------------------------------------------------------
def disc_kernel(img_ref, w1_ref, embb_ref,
                w2_ref, b2_ref, w3_ref, b3_ref, w4_ref, b4_ref,
                out_ref, acc_ref):
    k = pl.program_id(0)

    @pl.when(k == 0)
    def _():
        # Accumulator starts at (label_embedding @ W1_emb + b1), precomputed
        # per-sample in the wrapper (tiny), so the in-kernel reduction only
        # covers the lane-aligned 16384 image columns.
        acc_ref[...] = embb_ref[...]

    # Layer-1 partial product for this K tile.  Weight lives in HBM as bf16;
    # cast the (small) activation tile to bf16 for the native MXU path and
    # accumulate in f32.
    x = img_ref[...].astype(jnp.bfloat16)
    acc_ref[...] += jnp.dot(x, w1_ref[...], preferred_element_type=jnp.float32)

    @pl.when(k == pl.num_programs(0) - 1)
    def _():
        # TODO(synk): train-mode Dropout(0.4) (stochastic mask) not implemented;
        # forward matches eval()/inference where Dropout is the identity.
        h = _leaky(acc_ref[...]).astype(jnp.bfloat16)
        h = _leaky(jnp.dot(h, w2_ref[...], preferred_element_type=jnp.float32)
                   + b2_ref[...]).astype(jnp.bfloat16)
        h = _leaky(jnp.dot(h, w3_ref[...], preferred_element_type=jnp.float32)
                   + b3_ref[...]).astype(jnp.bfloat16)
        out_ref[...] = (jnp.dot(h, w4_ref[...], preferred_element_type=jnp.float32)
                        + b4_ref[...])


# ----------------------------------------------------------------------------
# Wrapper
# ----------------------------------------------------------------------------
def discriminator_forward(img, labels, params, *, tk=4096):
    B = img.shape[0]
    assert IMG_PIX % tk == 0, (IMG_PIX, tk)

    img_flat = img.reshape(B, IMG_PIX).astype(jnp.float32)          # (B, 16384)

    # Embedding gather + 4-wide projection folded into a per-sample bias.
    emb = jnp.take(params["label_emb"], labels, axis=0)             # (B, 4)
    emb_bias = emb @ params["w1_emb"] + params["b1"]                # (B, 512) f32

    grid = (IMG_PIX // tk,)
    flops = 2 * B * (IMG_PIX * HID + 2 * HID * HID + HID * OUT_PAD)
    bytes_accessed = (IMG_PIX * HID * 2            # w1 (bf16)
                      + B * IMG_PIX * 4            # img (f32)
                      + 2 * HID * HID * 2          # w2, w3 (bf16)
                      + HID * OUT_PAD * 2          # w4 padded (bf16)
                      + (2 * HID + OUT_PAD) * 4    # biases
                      + B * HID * 4                # emb_bias
                      + B * OUT_PAD * 4)           # output

    out = pl.pallas_call(
        disc_kernel,
        out_shape=jax.ShapeDtypeStruct((B, OUT_PAD), jnp.float32),
        grid=grid,
        in_specs=[
            pl.BlockSpec((B, tk), lambda k: (0, k)),        # img columns (streamed)
            pl.BlockSpec((tk, HID), lambda k: (k, 0)),      # w1 rows (streamed, bf16)
            pl.BlockSpec((B, HID), lambda k: (0, 0)),       # emb_bias (resident)
            pl.BlockSpec((HID, HID), lambda k: (0, 0)),     # w2 (bf16, resident)
            pl.BlockSpec((1, HID), lambda k: (0, 0)),       # b2
            pl.BlockSpec((HID, HID), lambda k: (0, 0)),     # w3 (bf16, resident)
            pl.BlockSpec((1, HID), lambda k: (0, 0)),       # b3
            pl.BlockSpec((HID, OUT_PAD), lambda k: (0, 0)), # w4 (bf16, padded)
            pl.BlockSpec((1, OUT_PAD), lambda k: (0, 0)),   # b4 (padded)
        ],
        out_specs=pl.BlockSpec((B, OUT_PAD), lambda k: (0, 0)),
        scratch_shapes=[pltpu.VMEM((B, HID), jnp.float32)],  # layer-1 accumulator
        compiler_params=pltpu.CompilerParams(
            dimension_semantics=("arbitrary",),              # K is a reduction axis
            vmem_limit_bytes=32 * 1024 * 1024),
        cost_estimate=pl.CostEstimate(
            flops=flops, transcendentals=0, bytes_accessed=bytes_accessed),
    )(img_flat, params["w1_img"], emb_bias,
      params["w2"], params["b2"], params["w3"], params["b3"],
      params["w4_pad"], params["b4_pad"])

    return out[:, :N_CLASSES]                                       # (B, 4)


# ----------------------------------------------------------------------------
# Deterministic parameter init (PyTorch-style uniform fan-in bounds)
# ----------------------------------------------------------------------------
def init_params(key):
    def linear(k, fan_in, fan_out):
        kw, kb = jax.random.split(k)
        bound = 1.0 / np.sqrt(fan_in)
        w = jax.random.uniform(kw, (fan_in, fan_out), jnp.float32, -bound, bound)
        b = jax.random.uniform(kb, (1, fan_out), jnp.float32, -bound, bound)
        return w, b

    ks = jax.random.split(key, 5)
    params = {}
    params["label_emb"] = jax.random.normal(ks[0], (N_CLASSES, N_CLASSES),
                                            jnp.float32)

    # Layer 1: Linear(16384 + 4, 512). PyTorch concat order is
    # [img_flat, label_embedding], so rows [:16384] multiply the image and
    # rows [16384:] multiply the embedding.
    w1, b1 = linear(ks[1], IMG_PIX + N_CLASSES, HID)
    params["w1_img"] = w1[:IMG_PIX].astype(jnp.bfloat16)   # big weight stored bf16
    params["w1_emb"] = w1[IMG_PIX:]                        # (4, 512) f32
    params["b1"] = b1

    w2, b2 = linear(ks[2], HID, HID)
    w3, b3 = linear(ks[3], HID, HID)
    params["w2"], params["b2"] = w2.astype(jnp.bfloat16), b2
    params["w3"], params["b3"] = w3.astype(jnp.bfloat16), b3

    w4, b4 = linear(ks[4], HID, N_CLASSES)
    params["w4"], params["b4"] = w4, b4
    w4_pad = jnp.zeros((HID, OUT_PAD), jnp.float32).at[:, :N_CLASSES].set(w4)
    b4_pad = jnp.zeros((1, OUT_PAD), jnp.float32).at[:, :N_CLASSES].set(b4)
    params["w4_pad"] = w4_pad.astype(jnp.bfloat16)
    params["b4_pad"] = b4_pad
    return params


# ----------------------------------------------------------------------------
# Pure-JAX reference (f32 math; bf16-stored weights dequantized to f32)
# ----------------------------------------------------------------------------
def reference_forward(img, labels, params):
    B = img.shape[0]
    img_flat = img.reshape(B, IMG_PIX).astype(jnp.float32)
    emb = jnp.take(params["label_emb"], labels, axis=0)
    w1_img = params["w1_img"].astype(jnp.float32)
    h = _leaky(img_flat @ w1_img + emb @ params["w1_emb"] + params["b1"])
    h = _leaky(h @ params["w2"].astype(jnp.float32) + params["b2"])   # Dropout = id (eval)
    h = _leaky(h @ params["w3"].astype(jnp.float32) + params["b3"])   # Dropout = id (eval)
    return h @ params["w4"] + params["b4"]


if __name__ == "__main__":
    B = 8
    key = jax.random.PRNGKey(0)
    kp, ki, kl = jax.random.split(key, 3)

    params = init_params(kp)
    img = jax.random.normal(ki, (B, *IMG_SHAPE), jnp.float32)
    labels = jax.random.randint(kl, (B,), 0, N_CLASSES, jnp.int32)

    validity = discriminator_forward(img, labels, params)
    validity = jax.block_until_ready(validity)
    assert validity.shape == (B, N_CLASSES), validity.shape

    ref = jax.block_until_ready(reference_forward(img, labels, params))
    # Tolerance relaxed deliberately: activations/weights go through bf16 on
    # the MXU inside the kernel (f32 accumulation).
    np.testing.assert_allclose(np.asarray(validity), np.asarray(ref),
                               rtol=1e-2, atol=1e-2)

    print("KERNEL_OK")
</pallas_src>

<mosaic_0001>
module attributes {stable_mosaic.version = 11 : i64} {
  func.func @disc_kernel(%arg0: i32, %arg1: memref<8x4096xf32, #tpu.memory_space<vmem>>, %arg2: memref<4096x512xbf16, #tpu.memory_space<vmem>>, %arg3: memref<8x512xf32, #tpu.memory_space<vmem>>, %arg4: memref<512x512xbf16, #tpu.memory_space<vmem>>, %arg5: memref<1x512xf32, #tpu.memory_space<vmem>>, %arg6: memref<512x512xbf16, #tpu.memory_space<vmem>>, %arg7: memref<1x512xf32, #tpu.memory_space<vmem>>, %arg8: memref<512x128xbf16, #tpu.memory_space<vmem>>, %arg9: memref<1x128xf32, #tpu.memory_space<vmem>>, %arg10: memref<8x128xf32, #tpu.memory_space<vmem>>, %arg11: memref<8x512xf32, #tpu.memory_space<vmem>>) attributes {dimension_semantics = [#tpu.dimension_semantics<arbitrary>], iteration_bounds = array<i64: 4>, scalar_prefetch = 0 : i64, scratch_operands = 1 : i64, tpu.core_type = #tpu.core_type<tc>, window_params = [{transform_indices = @transform_0, window_bounds = array<i64: 8, 4096>}, {transform_indices = @transform_1, window_bounds = array<i64: 4096, 512>}, {pipeline_mode = #tpu.pipeline_mode<synchronous>, transform_indices = @transform_2, window_bounds = array<i64: 8, 512>}, {pipeline_mode = #tpu.pipeline_mode<synchronous>, transform_indices = @transform_3, window_bounds = array<i64: 512, 512>}, {pipeline_mode = #tpu.pipeline_mode<synchronous>, transform_indices = @transform_4, window_bounds = array<i64: 1, 512>}, {pipeline_mode = #tpu.pipeline_mode<synchronous>, transform_indices = @transform_5, window_bounds = array<i64: 512, 512>}, {pipeline_mode = #tpu.pipeline_mode<synchronous>, transform_indices = @transform_6, window_bounds = array<i64: 1, 512>}, {pipeline_mode = #tpu.pipeline_mode<synchronous>, transform_indices = @transform_7, window_bounds = array<i64: 512, 128>}, {pipeline_mode = #tpu.pipeline_mode<synchronous>, transform_indices = @transform_8, window_bounds = array<i64: 1, 128>}, {pipeline_mode = #tpu.pipeline_mode<synchronous>, transform_indices = @transform_9, window_bounds = array<i64: 8, 128>}]} {
    %c0_i32 = arith.constant 0 : i32
    %0 = arith.cmpi eq, %arg0, %c0_i32 : i32
    %1 = arith.extui %0 : i1 to i32
    %c0_i32_0 = arith.constant 0 : i32
    %2 = arith.cmpi ne, %1, %c0_i32_0 : i32
    scf.if %2 {
      %c0_9 = arith.constant 0 : index
      %c0_10 = arith.constant 0 : index
      %13 = vector.load %arg3[%c0_9, %c0_10] : memref<8x512xf32, #tpu.memory_space<vmem>>, vector<8x512xf32>
      %c0_11 = arith.constant 0 : index
      %c0_12 = arith.constant 0 : index
      %14 = vector.load %arg11[%c0_11, %c0_12] : memref<8x512xf32, #tpu.memory_space<vmem>>, vector<8x512xf32>
      tpu.vector_store %arg11[%c0_11, %c0_12], %13 {strides = array<i32>} : memref<8x512xf32, #tpu.memory_space<vmem>>, vector<8x512xf32>,
    } else {
    }
    %c0 = arith.constant 0 : index
    %c0_1 = arith.constant 0 : index
    %3 = vector.load %arg1[%c0, %c0_1] : memref<8x4096xf32, #tpu.memory_space<vmem>>, vector<8x4096xf32>
    %4 = arith.truncf %3 : vector<8x4096xf32> to vector<8x4096xbf16>
    %c0_2 = arith.constant 0 : index
    %c0_3 = arith.constant 0 : index
    %5 = vector.load %arg11[%c0_2, %c0_3] : memref<8x512xf32, #tpu.memory_space<vmem>>, vector<8x512xf32>
    %c0_4 = arith.constant 0 : index
    %c0_5 = arith.constant 0 : index
    %6 = vector.load %arg2[%c0_4, %c0_5] : memref<4096x512xbf16, #tpu.memory_space<vmem>>, vector<4096x512xbf16>
    %cst = arith.constant dense<0.000000e+00> : vector<8x512xf32>
    %7 = tpu.matmul %4, %6, %cst {dimension_numbers = #tpu.dot_dimension_numbers<[1], [0], [0], [1], [0, 0, 1, 1], [], []>} : vector<8x4096xbf16>, vector<4096x512xbf16>, vector<8x512xf32> -> vector<8x512xf32>
    %8 = arith.addf %5, %7 : vector<8x512xf32>
    %c0_6 = arith.constant 0 : index
    %c0_7 = arith.constant 0 : index
    %9 = vector.load %arg11[%c0_6, %c0_7] : memref<8x512xf32, #tpu.memory_space<vmem>>, vector<8x512xf32>
    tpu.vector_store %arg11[%c0_6, %c0_7], %8 {strides = array<i32>} : memref<8x512xf32, #tpu.memory_space<vmem>>, vector<8x512xf32>,
    %c3_i32 = arith.constant 3 : i32
    %10 = arith.cmpi eq, %arg0, %c3_i32 : i32
    %11 = arith.extui %10 : i1 to i32
    %c0_i32_8 = arith.constant 0 : i32
    %12 = arith.cmpi ne, %11, %c0_i32_8 : i32
    scf.if %12 {
      %c0_9 = arith.constant 0 : index
      %c0_10 = arith.constant 0 : index
      %13 = vector.load %arg11[%c0_9, %c0_10] : memref<8x512xf32, #tpu.memory_space<vmem>>, vector<8x512xf32>
      %cst_11 = arith.constant 0.000000e+00 : f32
      %14 = vector.broadcast %cst_11 : f32 to vector<8x512xf32>
      %15 = arith.cmpf ogt, %13, %14 : vector<8x512xf32>
      %cst_12 = arith.constant 2.000000e-01 : f32
      %16 = vector.broadcast %cst_12 : f32 to vector<8x512xf32>
      %17 = arith.mulf %16, %13 : vector<8x512xf32>
      %18 = arith.select %15, %13, %17 : vector<8x512xi1>, vector<8x512xf32>
      %19 = arith.truncf %18 : vector<8x512xf32> to vector<8x512xbf16>
      %c0_13 = arith.constant 0 : index
      %c0_14 = arith.constant 0 : index
      %20 = vector.load %arg4[%c0_13, %c0_14] : memref<512x512xbf16, #tpu.memory_space<vmem>>, vector<512x512xbf16>
      %cst_15 = arith.constant dense<0.000000e+00> : vector<8x512xf32>
      %21 = tpu.matmul %19, %20, %cst_15 {dimension_numbers = #tpu.dot_dimension_numbers<[1], [0], [0], [1], [0, 0, 1, 1], [], []>} : vector<8x512xbf16>, vector<512x512xbf16>, vector<8x512xf32> -> vector<8x512xf32>
      %c0_16 = arith.constant 0 : index
      %c0_17 = arith.constant 0 : index
      %22 = vector.load %arg5[%c0_16, %c0_17] : memref<1x512xf32, #tpu.memory_space<vmem>>, vector<1x512xf32>
      %23 = vector.broadcast %22 : vector<1x512xf32> to vector<8x512xf32>
      %24 = arith.addf %21, %23 : vector<8x512xf32>
      %cst_18 = arith.constant 0.000000e+00 : f32
      %25 = vector.broadcast %cst_18 : f32 to vector<8x512xf32>
      %26 = arith.cmpf ogt, %24, %25 : vector<8x512xf32>
      %cst_19 = arith.constant 2.000000e-01 : f32
      %27 = vector.broadcast %cst_19 : f32 to vector<8x512xf32>
      %28 = arith.mulf %27, %24 : vector<8x512xf32>
      %29 = arith.select %26, %24, %28 : vector<8x512xi1>, vector<8x512xf32>
      %30 = arith.truncf %29 : vector<8x512xf32> to vector<8x512xbf16>
      %c0_20 = arith.constant 0 : index
      %c0_21 = arith.constant 0 : index
      %31 = vector.load %arg6[%c0_20, %c0_21] : memref<512x512xbf16, #tpu.memory_space<vmem>>, vector<512x512xbf16>
      %cst_22 = arith.constant dense<0.000000e+00> : vector<8x512xf32>
      %32 = tpu.matmul %30, %31, %cst_22 {dimension_numbers = #tpu.dot_dimension_numbers<[1], [0], [0], [1], [0, 0, 1, 1], [], []>} : vector<8x512xbf16>, vector<512x512xbf16>, vector<8x512xf32> -> vector<8x512xf32>
      %c0_23 = arith.constant 0 : index
      %c0_24 = arith.constant 0 : index
      %33 = vector.load %arg7[%c0_23, %c0_24] : memref<1x512xf32, #tpu.memory_space<vmem>>, vector<1x512xf32>
      %34 = vector.broadcast %33 : vector<1x512xf32> to vector<8x512xf32>
      %35 = arith.addf %32, %34 : vector<8x512xf32>
      %cst_25 = arith.constant 0.000000e+00 : f32
      %36 = vector.broadcast %cst_25 : f32 to vector<8x512xf32>
      %37 = arith.cmpf ogt, %35, %36 : vector<8x512xf32>
      %cst_26 = arith.constant 2.000000e-01 : f32
      %38 = vector.broadcast %cst_26 : f32 to vector<8x512xf32>
      %39 = arith.mulf %38, %35 : vector<8x512xf32>
      %40 = arith.select %37, %35, %39 : vector<8x512xi1>, vector<8x512xf32>
      %41 = arith.truncf %40 : vector<8x512xf32> to vector<8x512xbf16>
      %c0_27 = arith.constant 0 : index
      %c0_28 = arith.constant 0 : index
      %42 = vector.load %arg8[%c0_27, %c0_28] : memref<512x128xbf16, #tpu.memory_space<vmem>>, vector<512x128xbf16>
      %cst_29 = arith.constant dense<0.000000e+00> : vector<8x128xf32>
      %43 = tpu.matmul %41, %42, %cst_29 {dimension_numbers = #tpu.dot_dimension_numbers<[1], [0], [0], [1], [0, 0, 1, 1], [], []>} : vector<8x512xbf16>, vector<512x128xbf16>, vector<8x128xf32> -> vector<8x128xf32>
      %c0_30 = arith.constant 0 : index
      %c0_31 = arith.constant 0 : index
      %44 = vector.load %arg9[%c0_30, %c0_31] : memref<1x128xf32, #tpu.memory_space<vmem>>, vector<1x128xf32>
      %45 = vector.broadcast %44 : vector<1x128xf32> to vector<8x128xf32>
      %46 = arith.addf %43, %45 : vector<8x128xf32>
      %c0_32 = arith.constant 0 : index
      %c0_33 = arith.constant 0 : index
      %47 = vector.load %arg10[%c0_32, %c0_33] : memref<8x128xf32, #tpu.memory_space<vmem>>, vector<8x128xf32>
      tpu.vector_store %arg10[%c0_32, %c0_33], %46 {strides = array<i32>} : memref<8x128xf32, #tpu.memory_space<vmem>>, vector<8x128xf32>,
    } else {
    }
    return
  }
  func.func @transform_0(%arg0: i32) -> (i32, i32) {
    %c0_i32 = arith.constant 0 : i32
    %c0_i32_0 = arith.constant 0 : i32
    return %c0_i32, %arg0 : i32, i32
  }
  func.func @transform_1(%arg0: i32) -> (i32, i32) {
    %c0_i32 = arith.constant 0 : i32
    %c0_i32_0 = arith.constant 0 : i32
    return %arg0, %c0_i32 : i32, i32
  }
  func.func @transform_2(%arg0: i32) -> (i32, i32) {
    %c0_i32 = arith.constant 0 : i32
    %c0_i32_0 = arith.constant 0 : i32
    %c0_i32_1 = arith.constant 0 : i32
    return %c0_i32, %c0_i32_0 : i32, i32
  }
  func.func @transform_3(%arg0: i32) -> (i32, i32) {
    %c0_i32 = arith.constant 0 : i32
    %c0_i32_0 = arith.constant 0 : i32
    %c0_i32_1 = arith.constant 0 : i32
    return %c0_i32, %c0_i32_0 : i32, i32
  }
  func.func @transform_4(%arg0: i32) -> (i32, i32) {
    %c0_i32 = arith.constant 0 : i32
    %c0_i32_0 = arith.constant 0 : i32
    %c0_i32_1 = arith.constant 0 : i32
    return %c0_i32, %c0_i32_0 : i32, i32
  }
  func.func @transform_5(%arg0: i32) -> (i32, i32) {
    %c0_i32 = arith.constant 0 : i32
    %c0_i32_0 = arith.constant 0 : i32
    %c0_i32_1 = arith.constant 0 : i32
    return %c0_i32, %c0_i32_0 : i32, i32
  }
  func.func @transform_6(%arg0: i32) -> (i32, i32) {
    %c0_i32 = arith.constant 0 : i32
    %c0_i32_0 = arith.constant 0 : i32
    %c0_i32_1 = arith.constant 0 : i32
    return %c0_i32, %c0_i32_0 : i32, i32
  }
  func.func @transform_7(%arg0: i32) -> (i32, i32) {
    %c0_i32 = arith.constant 0 : i32
    %c0_i32_0 = arith.constant 0 : i32
    %c0_i32_1 = arith.constant 0 : i32
    return %c0_i32, %c0_i32_0 : i32, i32
  }
  func.func @transform_8(%arg0: i32) -> (i32, i32) {
    %c0_i32 = arith.constant 0 : i32
    %c0_i32_0 = arith.constant 0 : i32
    %c0_i32_1 = arith.constant 0 : i32
    return %c0_i32, %c0_i32_0 : i32, i32
  }
  func.func @transform_9(%arg0: i32) -> (i32, i32) {
    %c0_i32 = arith.constant 0 : i32
    %c0_i32_0 = arith.constant 0 : i32
    %c0_i32_1 = arith.constant 0 : i32
    return %c0_i32, %c0_i32_0 : i32, i32
  }
}

</mosaic_0001>

<bundles_post_ra>
// kernel: tpu_custom_call.1
= control target key start
LH: loop header
LB: loop body
LE: loop exit
PB: predicated region body
PF: predicated region fallthrough
CT: control target
= control target key end

     0   :  { %s16029_s0 = inlined_call_operand.hbm [shape: f32[8,16384], index: 0, kind: input, shape index: {}]   ;;  %s16030_s1 = inlined_call_operand.hbm [shape: bf16[16384,512], index: 1, kind: input, shape index: {}]   ;;  %s16031_s2 = inlined_call_operand.hbm [shape: f32[8,512], index: 2, kind: input, shape index: {}]   ;;  %s16032_s3 = inlined_call_operand.hbm [shape: bf16[512,512], index: 3, kind: input, shape index: {}]   ;;  %s16033_s4 = inlined_call_operand.hbm [shape: f32[1,512], index: 4, kind: input, shape index: {}]   ;;  %s16034_s5 = inlined_call_operand.hbm [shape: bf16[512,512], index: 5, kind: input, shape index: {}]   ;;  %s16035_s6 = inlined_call_operand.hbm [shape: f32[1,512], index: 6, kind: input, shape index: {}]   ;;  %s16036_s7 = inlined_call_operand.hbm [shape: bf16[512,128], index: 7, kind: input, shape index: {}]   ;;  %s16037_s8 = inlined_call_operand.hbm [shape: f32[1,128], index: 8, kind: input, shape index: {}]   ;;  %s16038_s9 = inlined_call_operand.hbm [shape: f32[8,128], index: 9, kind: output, shape index: {}]  }
   0x1   :  { %16043 = sst [smem:[#allocation26_spill]] %s16029_s0 }
   0x2   :  { %16044 = sst [smem:[#allocation27_spill]] %s16031_s2 }
   0x3   :  { %14 = vsyncpa [#allocation4], 0 }
   0x4   :  { %16 = vsyncpa [#allocation4 + $0x1], 0 }
   0x5   :  { %17 = vsyncpa [#allocation7], 0 }
   0x6   :  { %19 = vsyncpa [#allocation7 + $0x1], 0 }
   0x7   :  { %20 = vsyncpa [#allocation10], 0 }
   0x8   :  { %21 = vsyncpa [#allocation13], 0 }
   0x9   :  { %22 = vsyncpa [#allocation16], 0 }
   0xa   :  { %23 = vsyncpa [#allocation5], 0  ;;  %s14373_s30 = smov 0   ;;  %s14375_s10 = smov 0  }
   0xb   :  { %s14377_s11 = smov 0   ;;  %s14379_s12 = smov 0  }
   0xc LB: > { %s14309_s13 = smov [#allocation8]   ;;  %s14394_s15 = sadd.s32 4294967295, %s14307_s12   ;;  %s14307_s12 = sphi %s14379_s12, %s16068_s12   ;;  %s14303_s11 = sphi %s14377_s11, %s16067_s11   ;;  %s14299_s10 = sphi %s14375_s10, %s16066_s10   ;;  %s14295_s30 = sphi %s14373_s30, %s16065_s30  }
   0xd   : > { %s267_s14 = sshll.u32 %s14309_s13, 4  ;;  %p10473_p0 = scmp.ge.s32.totalorder %s14307_s12, 1  ;;  %s268_s14 = int_to_ptr.vmem [resolvable:$true] %s267_s14 }
   0xe   : > { %p16039_p1 = scmp.eq.s32.totalorder %s14394_s15, 0  ;;  %p254_p2 = scmp.lt.s32.totalorder %s14307_s12, 5 }
   0xf   : > { %s14310_s17 = smov [#allocation9]   ;;  %s14311_s20 = smov [#allocation12]  }
  0x10   : > { %p14400_p4 = pnand %p10473_p0, %p254_p2  ;;  %s277_s18 = sshll.u32 %s14310_s17, 4  ;;  %s14406_s18 = int_to_ptr.vmem [resolvable:$true] %s277_s18 }
  0x11   : > { %s301_s21 = sshll.u32 %s14311_s20, 4  ;;  %s16047_s2 = sld [smem:[#allocation27_spill]]  ;;  %s14414_s21 = int_to_ptr.vmem [resolvable:$true] %s301_s21 }
  0x12   : > { %s16045_s16 = scalar_select %p14400_p4, 1, 0 }
  0x13   : > { %p11925_p5 = pneg %p14400_p4 }
  0x15   : > { %p14410_p6 = pnand %p11925_p5, %p16039_p1 }
  0x17   : > { %s13967_s24 = scalar_lea.hbm %s16047_s2, 512  ;;  %p14424_p8 = pneg %p14410_p6 }
  0x18   : > { %p13968_p7 = scmp.ne.s32.totalorder %s16047_s2, %s13967_s24  ;;  %p13974_p11 = scmp.lt.u32.totalorder %s13967_s24, %s16047_s2 }
  0x1a   : > { %p13970_p9 = pnand %p14424_p8, %p13968_p7 }
  0x1c   : > { %p13971_p10 = pneg %p13970_p9 }
  0x1e   : > { %p13976_p12 = pnand %p13974_p11, %p13971_p10 }
  0x20   : > { %13979 = shalt.err (!%p13976_p12)
}
  0x21   : > { %s13980_s13 = scalar_lea.vmem %s268_s14, 512  ;;  %p13988_p5 = scmp.lt.s32.totalorder %s268_s14, %s268_s14 }
  0x22   : > { %p13981_p13 = scmp.ne.s32.totalorder %s268_s14, %s13980_s13  ;;  %p13989_p3 = scmp.lt.s32.totalorder %s13980_s13, %s13980_s13 }
  0x24   : > { %p13983_p0 = pnand %p13981_p13, %p14424_p8  ;;  %p13990_p1 = por %p13989_p3, %p13988_p5 }
  0x26   : > { %p13984_p2 = pneg %p13983_p0 }
  0x28   : > { %p13991_p4 = pnand %p13990_p1, %p13984_p2 }
  0x2a   : > { %13994 = shalt.err (!%p13991_p4)
}
  0x2b   : > { %11928 = dma.hbm_to_vmem [thread:$0]  (!%p14410_p6), %s16047_s2, 512, %s268_s14, [#allocation7]  }
  0x2c   : > { %s13995_s24 = scalar_lea.hbm %s16032_s3, 16384 }
  0x2d   : > { %p13996_p7 = scmp.ne.s32.totalorder %s16032_s3, %s13995_s24  ;;  %p14002_p1 = scmp.lt.u32.totalorder %s13995_s24, %s16032_s3 }
  0x2f   : > { %p13998_p9 = pnand %p13996_p7, %p14424_p8 }
  0x31   : > { %p13999_p3 = pneg %p13998_p9 }
  0x33   : > { %p14004_p4 = pnand %p14002_p1, %p13999_p3 }
  0x35   : > { %14007 = shalt.err (!%p14004_p4)
}
  0x36   : > { %s14008_s14 = scalar_lea.vmem %s14406_s18, 16384  ;;  %p14016_p13 = scmp.lt.s32.totalorder %s14406_s18, %s14406_s18 }
  0x37   : > { %p14009_p10 = scmp.ne.s32.totalorder %s14406_s18, %s14008_s14  ;;  %p14017_p0 = scmp.lt.s32.totalorder %s14008_s14, %s14008_s14 }
  0x39   : > { %p14011_p11 = pnand %p14009_p10, %p14424_p8  ;;  %p14018_p2 = por %p14017_p0, %p14016_p13 }
  0x3b   : > { %p14012_p12 = pneg %p14011_p11 }
  0x3d   : > { %p14019_p5 = pnand %p14018_p2, %p14012_p12 }
  0x3f   : > { %14022 = shalt.err (!%p14019_p5)
}
  0x40   : > { %s16041_s13 = smov 256   ;;  %s16042_s17 = smov 16  }
  0x41   : > { %11931 = dma.hbm_to_vmem [thread:$0]  (!%p14410_p6), %s16032_s3, 16384, %s14406_s18, [#allocation10], %s16041_s13, %s16041_s13, %s16042_s17  }
  0x42   : > { %s14023_s25 = scalar_lea.hbm %s16034_s5, 16384 }
  0x43   : > { %p14024_p7 = scmp.ne.s32.totalorder %s16034_s5, %s14023_s25  ;;  %p14030_p1 = scmp.lt.u32.totalorder %s14023_s25, %s16034_s5 }
  0x45   : > { %p14026_p9 = pnand %p14024_p7, %p14424_p8 }
  0x47   : > { %p14027_p3 = pneg %p14026_p9 }
  0x49   : > { %p14032_p4 = pnand %p14030_p1, %p14027_p3 }
  0x4b   : > { %14035 = shalt.err (!%p14032_p4)
}
  0x4c   : > { %s14036_s18 = scalar_lea.vmem %s14414_s21, 16384  ;;  %p14044_p13 = scmp.lt.s32.totalorder %s14414_s21, %s14414_s21 }
  0x4d   : > { %p14037_p10 = scmp.ne.s32.totalorder %s14414_s21, %s14036_s18  ;;  %p14045_p0 = scmp.lt.s32.totalorder %s14036_s18, %s14036_s18 }
  0x4f   : > { %p14039_p11 = pnand %p14037_p10, %p14424_p8  ;;  %p14046_p2 = por %p14045_p0, %p14044_p13 }
  0x51   : > { %p14040_p12 = pneg %p14039_p11 }
  0x53   : > { %p14047_p5 = pnand %p14046_p2, %p14040_p12 }
  0x55   : > { %14050 = shalt.err (!%p14047_p5)
}
  0x56   : > { %11937 = dma.hbm_to_vmem [thread:$0]  (!%p14410_p6), %s16034_s5, 16384, %s14414_s21, [#allocation13], %s16041_s13, %s16041_s13, %s16042_s17  }
  0x57   : > { %s14314_s23 = smov [#allocation15]   ;;  %s14051_s28 = scalar_lea.hbm %s16036_s7, 4096 }
  0x58   : > { %s325_s24 = sshll.u32 %s14314_s23, 4  ;;  %p14052_p7 = scmp.ne.s32.totalorder %s16036_s7, %s14051_s28  ;;  %s326_s24 = int_to_ptr.vmem [resolvable:$true] %s325_s24 }
  0x59   : > { %p14058_p1 = scmp.lt.u32.totalorder %s14051_s28, %s16036_s7 }
  0x5a   : > { %p14054_p9 = pnand %p14052_p7, %p14424_p8 }
  0x5c   : > { %p14055_p3 = pneg %p14054_p9 }
  0x5e   : > { %p14060_p4 = pnand %p14058_p1, %p14055_p3 }
  0x60   : > { %14063 = shalt.err (!%p14060_p4)
}
  0x61   : > { %s14064_s21 = scalar_lea.vmem %s326_s24, 4096  ;;  %p14072_p13 = scmp.lt.s32.totalorder %s326_s24, %s326_s24 }
  0x62   : > { %p14065_p10 = scmp.ne.s32.totalorder %s326_s24, %s14064_s21  ;;  %p14073_p0 = scmp.lt.s32.totalorder %s14064_s21, %s14064_s21 }
  0x64   : > { %p14067_p11 = pnand %p14065_p10, %p14424_p8  ;;  %p14074_p2 = por %p14073_p0, %p14072_p13 }
  0x66   : > { %p14068_p12 = pneg %p14067_p11 }
  0x68   : > { %p14075_p5 = pnand %p14074_p2, %p14068_p12 }
  0x6a   : > { %14078 = shalt.err (!%p14075_p5)
}
  0x6b   : > { %s14315_s20 = smov 64   ;;  %s14316_s22 = smov 4  }
  0x6c   : > { %11943 = dma.hbm_to_vmem [thread:$0]  (!%p14410_p6), %s16036_s7, 4096, %s326_s24, [#allocation16], %s14315_s20, %s14315_s20, %s14316_s22  }
  0x6d   : > { %s14317_s25 = smov [#allocation11]   ;;  %s14318_s28 = smov [#allocation14]  }
  0x6e   : > { %s291_s26 = sshll.u32 %s14317_s25, 4  ;;  %s315_s29 = sshll.u32 %s14318_s28, 4  ;;  %s292_s26 = int_to_ptr.vmem [resolvable:$true] %s291_s26  ;;  %s14510_s29 = int_to_ptr.vmem [resolvable:$true] %s315_s29 }
  0x6f   : > { %s14079_s21 = scalar_lea.hbm %s16033_s4, 64 }
  0x70   : > { %p14080_p7 = scmp.ne.s32.totalorder %s16033_s4, %s14079_s21  ;;  %p14086_p1 = scmp.lt.u32.totalorder %s14079_s21, %s16033_s4 }
  0x72   : > { %p14082_p9 = pnand %p14080_p7, %p14424_p8 }
  0x74   : > { %p14083_p3 = pneg %p14082_p9 }
  0x76   : > { %p14088_p4 = pnand %p14086_p1, %p14083_p3 }
  0x78   : > { %14091 = shalt.err (!%p14088_p4)
}
  0x79   : > { %s14092_s20 = scalar_lea.vmem %s292_s26, 64  ;;  %p14100_p13 = scmp.lt.s32.totalorder %s292_s26, %s292_s26 }
  0x7a   : > { %p14093_p10 = scmp.ne.s32.totalorder %s292_s26, %s14092_s20  ;;  %p14101_p0 = scmp.lt.s32.totalorder %s14092_s20, %s14092_s20 }
  0x7c   : > { %p14095_p11 = pnand %p14093_p10, %p14424_p8  ;;  %p14102_p2 = por %p14101_p0, %p14100_p13 }
  0x7e   : > { %p14096_p12 = pneg %p14095_p11 }
  0x80   : > { %p14103_p5 = pnand %p14102_p2, %p14096_p12 }
  0x82   : > { %14106 = shalt.err (!%p14103_p5)
}
  0x83   : > { %11934 = dma.hbm_to_vmem [thread:$0]  (!%p14410_p6), %s16033_s4, 64, %s292_s26, [#allocation10]  }
  0x84   : > { %s14107_s25 = scalar_lea.hbm %s16035_s6, 64 }
  0x85   : > { %p14108_p7 = scmp.ne.s32.totalorder %s16035_s6, %s14107_s25  ;;  %p14114_p1 = scmp.lt.u32.totalorder %s14107_s25, %s16035_s6 }
  0x87   : > { %p14110_p9 = pnand %p14108_p7, %p14424_p8 }
  0x89   : > { %p14111_p3 = pneg %p14110_p9 }
  0x8b   : > { %p14116_p4 = pnand %p14114_p1, %p14111_p3 }
  0x8d   : > { %14119 = shalt.err (!%p14116_p4)
}
  0x8e   : > { %s14120_s26 = scalar_lea.vmem %s14510_s29, 64  ;;  %p14128_p13 = scmp.lt.s32.totalorder %s14510_s29, %s14510_s29 }
  0x8f   : > { %p14121_p10 = scmp.ne.s32.totalorder %s14510_s29, %s14120_s26  ;;  %p14129_p0 = scmp.lt.s32.totalorder %s14120_s26, %s14120_s26 }
  0x91   : > { %p14123_p11 = pnand %p14121_p10, %p14424_p8  ;;  %p14130_p2 = por %p14129_p0, %p14128_p13 }
  0x93   : > { %p14124_p12 = pneg %p14123_p11 }
  0x95   : > { %p14131_p5 = pnand %p14130_p2, %p14124_p12 }
  0x97   : > { %14134 = shalt.err (!%p14131_p5)
}
  0x98   : > { %11940 = dma.hbm_to_vmem [thread:$0]  (!%p14410_p6), %s16035_s6, 64, %s14510_s29, [#allocation13]  }
  0x99   : > { %s14319_s20 = smov [#allocation17]   ;;  %s14135_s23 = scalar_lea.hbm %s16037_s8, 16 }
  0x9a   : > { %s339_s13 = sshll.u32 %s14319_s20, 4  ;;  %p14136_p7 = scmp.ne.s32.totalorder %s16037_s8, %s14135_s23  ;;  %s340_s13 = int_to_ptr.vmem [resolvable:$true] %s339_s13 }
  0x9b   : > { %p14142_p1 = scmp.lt.u32.totalorder %s14135_s23, %s16037_s8 }
  0x9c   : > { %p14138_p9 = pnand %p14136_p7, %p14424_p8 }
  0x9e   : > { %p14139_p3 = pneg %p14138_p9 }
  0xa0   : > { %p14144_p4 = pnand %p14142_p1, %p14139_p3 }
  0xa2   : > { %14147 = shalt.err (!%p14144_p4)
}
  0xa3   : > { %s14148_s29 = scalar_lea.vmem %s340_s13, 16  ;;  %s14155_s21 = scalar_lea.vmem %s340_s13, 32 }
  0xa4   : > { %p14149_p10 = scmp.ne.s32.totalorder %s340_s13, %s14148_s29  ;;  %p14156_p13 = scmp.lt.s32.totalorder %s340_s13, %s340_s13 }
  0xa5   : > { %p14157_p0 = scmp.lt.s32.totalorder %s14155_s21, %s14148_s29 }
  0xa6   : > { %p14151_p11 = pnand %p14149_p10, %p14424_p8 }
  0xa7   : > { %p14158_p2 = por %p14157_p0, %p14156_p13 }
  0xa8   : > { %p14152_p12 = pneg %p14151_p11 }
  0xaa   : > { %p14159_p5 = pnand %p14158_p2, %p14152_p12 }
  0xac   : > { %14162 = shalt.err (!%p14159_p5)
}
  0xad   : > { %11946 = dma.hbm_to_vmem [thread:$0]  (!%p14410_p6), %s16037_s8, 16, %s340_s13, [#allocation16]  }
  0xae   : > { %s14572_s27 = sadd.s32 1, %s14307_s12   ;;  %s36_s24 = sadd.s32 1, %s14303_s11 }
  0xaf   : > { %s33_s19 = ssub.s32 %s14307_s12, %s14572_s27  ;;  %p43_p7 = scmp.ne.s32.totalorder %s14303_s11, %s14299_s10 }
  0xb0   : > { %p34_p8 = scmp.eq.s32.totalorder %s33_s19, 0  ;;  %p44_p9 = scmp.eq.s32.totalorder %s14307_s12, 0 }
  0xb1   : > { %p49_p3 = scmp.ne.s32.totalorder %s14299_s10, %s14295_s30  ;;  %p16049_p4 = scmp.eq.s32.totalorder %s14394_s15, 0 }
  0xb2   : > { %s14583_s20 = scalar_select %p34_p8, %s14303_s11, %s36_s24  }
  0xb3   : > { %p45_p1 = por %p44_p9, %p43_p7  ;;  %p14587_p10 = por %p16049_p4, %p49_p3 }
  0xb4   : > { %p11961_p11 = scmp.lt.s32.totalorder %s14307_s12, 4  ;;  %s14593_s13 = sand.u32 1, %s14303_s11  }
  0xb5   : > { %s10482_s22 = sshll.u32 %s14593_s13, 8  ;;  %s11818_s23 = sshll.u32 %s14307_s12, 12 }
  0xb6   : > { %s16051_s0 = sld [smem:[#allocation26_spill]]  ;;  %s354_s14 = scalar_lea.vmem [#allocation3], %s10482_s22 }
  0xb7   : > { %s362_s18 = sshll.u32 %s354_s14, 4  ;;  %p14604_p6 = pnand %p11961_p11, %p45_p1  ;;  %s14602_s18 = int_to_ptr.vmem [resolvable:$true] %s362_s18 }
  0xb8   : > { %s10485_s21 = sshll.u32 %s14593_s13, 13  ;;  %s369_s26 = sand.u32 1, %s14307_s12  }
  0xb9   : > { %s351_s2 = scalar_lea.sflag [#allocation4], %s14593_s13  ;;  %p14165_p13 = pneg %p14604_p6 }
  0xbc   : > { %s14600_s30 = scalar_lea.hbm %s16051_s0, %s11818_s23  ;;  %s14168_s23 = scalar_lea.hbm %s16051_s0, 16384 }
  0xbd   : > { %s14163_s19 = scalar_lea.hbm %s14600_s30, 4096  ;;  %p14169_p5 = scmp.lt.u32.totalorder %s14600_s30, %s16051_s0 }
  0xbe   : > { %p14164_p12 = scmp.ne.s32.totalorder %s14600_s30, %s14163_s19  ;;  %p14170_p8 = scmp.lt.u32.totalorder %s14168_s23, %s14163_s19 }
  0xbf   : > { %p14172_p9 = scmp.lt.u32.totalorder %s14163_s19, %s14600_s30 }
  0xc0   : > { %p14166_p0 = pnand %p14165_p13, %p14164_p12  ;;  %p14171_p7 = por %p14170_p8, %p14169_p5 }
  0xc2   : > { %p14167_p2 = pneg %p14166_p0  ;;  %p14173_p3 = por %p14172_p9, %p14171_p7 }
  0xc4   : > { %p14174_p1 = pnand %p14173_p3, %p14167_p2 }
  0xc6   : > { %14177 = shalt.err (!%p14174_p1)
}
  0xc7   : > { %s14178_s14 = scalar_lea.vmem %s14602_s18, 4096  ;;  %s14320_s24 = smov [#allocation3]  }
  0xc8   : > { %p14179_p4 = scmp.ne.s32.totalorder %s14602_s18, %s14178_s14  ;;  %s14183_s22 = sshll.u32 %s14320_s24, 4  ;;  %s14184_s22 = int_to_ptr.vmem [resolvable:$false] %s14183_s22 }
  0xc9   : > { %s14185_s25 = scalar_lea.vmem %s14184_s22, 8192  ;;  %p14186_p0 = scmp.lt.s32.totalorder %s14602_s18, %s14184_s22 }
  0xca   : > { %p14181_p11 = pnand %p14179_p4, %p14165_p13  ;;  %p14187_p5 = scmp.lt.s32.totalorder %s14185_s25, %s14178_s14 }
  0xcc   : > { %p14182_p12 = pneg %p14181_p11  ;;  %p14188_p8 = por %p14187_p5, %p14186_p0 }
  0xce   : > { %p14189_p7 = pnand %p14188_p8, %p14182_p12 }
  0xd0   : > { %14192 = shalt.err (!%p14189_p7)
}
  0xd1   : > { %11950 = dma.hbm_to_vmem [thread:$0]  (!%p14604_p6), %s14600_s30, 4096, %s14602_s18, %s351_s2  }
  0xd2   : > { %s373_s19 = scalar_lea.vmem [#allocation6], %s10485_s21  ;;  %s11820_s28 = sshll.u32 %s14307_s12, 17 }
  0xd3   : > { %s381_s23 = sshll.u32 %s373_s19, 4  ;;  %s14644_s22 = scalar_lea.hbm %s16030_s1, %s11820_s28  ;;  %s14638_s23 = int_to_ptr.vmem [resolvable:$true] %s381_s23 }
  0xd4   : > { %s14648_s25 = scalar_lea.sflag [#allocation7], %s369_s26  ;;  %s14193_s0 = scalar_lea.hbm %s14644_s22, 131072 }
  0xd5   : > { %p14194_p2 = scmp.ne.s32.totalorder %s14644_s22, %s14193_s0  ;;  %s14198_s18 = scalar_lea.hbm %s16030_s1, 524288 }
  0xd6   : > { %p14199_p1 = scmp.lt.u32.totalorder %s14644_s22, %s16030_s1  ;;  %p14200_p4 = scmp.lt.u32.totalorder %s14198_s18, %s14193_s0 }
  0xd7   : > { %p14196_p9 = pnand %p14194_p2, %p14165_p13  ;;  %p14202_p12 = scmp.lt.u32.totalorder %s14193_s0, %s14644_s22 }
  0xd8   : > { %p14201_p11 = por %p14200_p4, %p14199_p1 }
  0xd9   : > { %p14197_p3 = pneg %p14196_p9 }
  0xda   : > { %p14203_p0 = por %p14202_p12, %p14201_p11 }
  0xdc   : > { %p14204_p5 = pnand %p14203_p0, %p14197_p3 }
  0xde   : > { %14207 = shalt.err (!%p14204_p5)
}
  0xdf   : > { %s14208_s12 = scalar_lea.vmem %s14638_s23, 131072  ;;  %s14321_s26 = smov [#allocation6]  }
  0xe0   : > { %p14209_p8 = scmp.ne.s32.totalorder %s14638_s23, %s14208_s12  ;;  %s14213_s19 = sshll.u32 %s14321_s26, 4  ;;  %s14214_s19 = int_to_ptr.vmem [resolvable:$false] %s14213_s19 }
  0xe1   : > { %s14215_s28 = scalar_lea.vmem %s14214_s19, 262144  ;;  %p14216_p9 = scmp.lt.s32.totalorder %s14638_s23, %s14214_s19 }
  0xe2   : > { %p14211_p7 = pnand %p14209_p8, %p14165_p13  ;;  %p14217_p1 = scmp.lt.s32.totalorder %s14215_s28, %s14208_s12 }
  0xe4   : > { %p14212_p2 = pneg %p14211_p7  ;;  %p14218_p4 = por %p14217_p1, %p14216_p9 }
  0xe6   : > { %p14219_p11 = pnand %p14218_p4, %p14212_p2 }
  0xe8   : > { %14222 = shalt.err (!%p14219_p11)
}
  0xe9   : > { %s16053_s0 = smov 16   ;;  %s16054_s24 = smov 256  }
  0xea   : > { %11953 = dma.hbm_to_vmem [thread:$0]  (!%p14604_p6), %s14644_s22, 131072, %s14638_s23, %s14648_s25, %s16054_s24, %s16054_s24, %s16053_s0  }
  0xeb   : > { %p16055_p13 = scmp.ne.s32.totalorder %s16045_s16, 0 }
  0xec   : > { %s395_s14 = sand.u32 (!%p16055_p13), 1, %s14299_s10  }
  0xed   : > { %393 = sbr.rel (%p16055_p13) target bundleno = 2344 (0x928), region = 56  ;;  %s10490_s13 = sshll.u32 (!%p16055_p13), %s395_s14, 8 }
  0xee   : > { %s396_s30 = scalar_lea.sflag (!%p16055_p13), [#allocation4], %s395_s14  ;;  %s14680_s18 = scalar_lea.vmem (!%p16055_p13), [#allocation3], %s10490_s13 }
  0xf4   : > { %14266 = dma.done.wait (%p14587_p10), %s396_s30, 4096  }
  0xf5   : > { %14268 = vsyncadd (%p14587_p10), %s396_s30, 4294963200  ;;  %s404_s29 = sand.u32 1, %s14394_s15   ;;  %s10491_s21 = sshll.u32 %s395_s14, 13 }
  0xf6   : > { %s405_s23 = scalar_lea.sflag [#allocation7], %s404_s29  ;;  %s14687_s22 = scalar_lea.vmem [#allocation6], %s10491_s21 }
  0xf7   : > { %14270 = dma.done.wait (%p14587_p10), %s405_s23, 131072  }
  0xf8   : > { %14272 = vsyncadd (%p14587_p10), %s405_s23, 4294836224  ;;  %p16056_p6 = scmp.eq.s32.totalorder %s14394_s15, 0 }
  0xfa   : > { %14274 = dma.done.wait (%p16056_p6), [#allocation7], 512   ;;  %p16057_p3 = pmov %p16056_p6 }
  0xfc   : > { %14276 = vsyncadd (%p16057_p3), [#allocation7], 4294966784  ;;  %p16058_p12 = pmov %p16057_p3 }
  0xfd   : > { %p16059_p0 = pmov %p16057_p3 }
  0xfe   : > { %14278 = dma.done.wait (%p16058_p12), [#allocation10], 16448  }
  0xff   : > { %14280 = vsyncadd (%p16059_p0), [#allocation10], 4294950848  ;;  %p16060_p5 = pmov %p16059_p0 }
 0x100   : > { %p16061_p8 = pmov %p16059_p0 }
 0x101   : > { %14282 = dma.done.wait (%p16060_p5), [#allocation13], 16448  }
 0x102   : > { %14284 = vsyncadd (%p16061_p8), [#allocation13], 4294950848  ;;  %p16062_p10 = pmov %p16059_p0 }
 0x103   : > { %p16063_p7 = pmov %p16059_p0 }
 0x104   : > { %14286 = dma.done.wait (%p16062_p10), [#allocation16], 4112  }
 0x105   : > { %14288 = vsyncadd (%p16063_p7), [#allocation16], 4294963184  ;;  %p16064_p2 = scmp.ne.s32.totalorder %s14394_s15, 0 }
 0x106   : > { %v478_v0 = vld [vmem:[#allocation8] sm:$0xff] (!%p16064_p2)  ;;  %v479_v1 = vld [vmem:[#allocation8 + $0x8] sm:$0xff] (!%p16064_p2)  ;;  %v480_v2 = vld [vmem:[#allocation8 + $0x10] sm:$0xff] (!%p16064_p2) }
 0x107   : > { %477 = sbr.rel (%p16064_p2) target bundleno = 270 (0x10e), region = 96  ;;  %482 = vst [vmem:[#allocation2] sm:$0xff] (!%p16064_p2), %v478_v0  ;;  %483 = vst [vmem:[#allocation2 + $0x8] sm:$0xff] (!%p16064_p2), %v479_v1  ;;  %v481_v3 = vld [vmem:[#allocation8 + $0x18] sm:$0xff] (!%p16064_p2) }
 0x108   : > { %484 = vst [vmem:[#allocation2 + $0x10] sm:$0xff] (!%p16064_p2), %v480_v2  ;;  %485 = vst [vmem:[#allocation2 + $0x18] sm:$0xff] (!%p16064_p2), %v481_v3 }
 0x10e PF: > { %v12015_v4 = vld [vmem:[%s14687_s22 + $0x4] ss:$16 sps:$4 sm:$0xff]   ;;  %v12019_v6 = vld [vmem:[%s14687_s22] ss:$16 sps:$4 sm:$0xff]   ;;  %v487_v50 = vld [vmem:[%s14680_s18 + $0x8] sm:$0xff]  ;;  %p11524_p9 = scmp.ne.s32.totalorder %s14394_s15, 3 }
 0x10f   : > { %v12017_v5 = vld [vmem:[%s14687_s22 + $0x204] ss:$16 sps:$4 sm:$0xff]   ;;  %6698 = vmatprep.subr.bf16.mxu0 %v12015_v4  ;;  %v12020_v7 = vld [vmem:[%s14687_s22 + $0x200] ss:$16 sps:$4 sm:$0xff]   ;;  %v14760_v53 = vpack.c.bf16 %v487_v50, %v487_v50  ;;  %v489_v54 = vld [vmem:[%s14680_s18 + $0x18] sm:$0xff] }
 0x110   : > { %6739 = vmatprep.subr.bf16.mxu1 %v12017_v5  ;;  %v12021_v8 = vld [vmem:[%s14687_s22 + $0x24] ss:$16 sps:$4 sm:$0xff]   ;;  %6699 = vmatpush1.bf16.msra.mxu0 %v12019_v6  ;;  %v12025_v10 = vld [vmem:[%s14687_s22 + $0x20] ss:$16 sps:$4 sm:$0xff]   ;;  %v14764_v56 = vpack.c.bf16 %v489_v54, %v489_v54 }
 0x111   : > { %6740 = vmatpush1.bf16.msra.mxu1 %v12020_v7  ;;  %v12023_v9 = vld [vmem:[%s14687_s22 + $0x224] ss:$16 sps:$4 sm:$0xff]   ;;  %6700 = vmatprep.subr.bf16.mxu0 %v12021_v8  ;;  %v12026_v11 = vld [vmem:[%s14687_s22 + $0x220] ss:$16 sps:$4 sm:$0xff]  }
 0x112   : > { %6741 = vmatprep.subr.bf16.mxu1 %v12023_v9  ;;  %v12027_v12 = vld [vmem:[%s14687_s22 + $0x44] ss:$16 sps:$4 sm:$0xff]   ;;  %v12031_v14 = vld [vmem:[%s14687_s22 + $0x40] ss:$16 sps:$4 sm:$0xff]   ;;  %6730 = vmatprep.mubr.bf16.mxu0 %v14760_v53 }
 0x113   : > { %v12029_v13 = vld [vmem:[%s14687_s22 + $0x244] ss:$16 sps:$4 sm:$0xff]   ;;  %v12032_v15 = vld [vmem:[%s14687_s22 + $0x240] ss:$16 sps:$4 sm:$0xff]   ;;  %6771 = vmatprep.mubr.bf16.mxu1 %v14764_v56 }
 0x114   : > { %6701 = vmatpush1.bf16.msra.mxu0 %v12025_v10  ;;  %v12033_v16 = vld [vmem:[%s14687_s22 + $0x64] ss:$16 sps:$4 sm:$0xff]   ;;  %v12037_v18 = vld [vmem:[%s14687_s22 + $0x60] ss:$16 sps:$4 sm:$0xff]  }
 0x115   : > { %6742 = vmatpush1.bf16.msra.mxu1 %v12026_v11  ;;  %6702 = vmatprep.subr.bf16.mxu0 %v12027_v12  ;;  %v12035_v17 = vld [vmem:[%s14687_s22 + $0x264] ss:$16 sps:$4 sm:$0xff]   ;;  %v12038_v19 = vld [vmem:[%s14687_s22 + $0x260] ss:$16 sps:$4 sm:$0xff]  }
 0x116   : > { %6743 = vmatprep.subr.bf16.mxu1 %v12029_v13  ;;  %v12039_v20 = vld [vmem:[%s14687_s22 + $0x84] ss:$16 sps:$4 sm:$0xff]   ;;  %v12043_v22 = vld [vmem:[%s14687_s22 + $0x80] ss:$16 sps:$4 sm:$0xff]  }
 0x117   : > { %v12041_v21 = vld [vmem:[%s14687_s22 + $0x284] ss:$16 sps:$4 sm:$0xff]   ;;  %v12044_v23 = vld [vmem:[%s14687_s22 + $0x280] ss:$16 sps:$4 sm:$0xff]  }
 0x118   : > { %6703 = vmatpush1.bf16.msra.mxu0 %v12031_v14  ;;  %v12045_v24 = vld [vmem:[%s14687_s22 + $0xa4] ss:$16 sps:$4 sm:$0xff]   ;;  %v12049_v26 = vld [vmem:[%s14687_s22 + $0xa0] ss:$16 sps:$4 sm:$0xff]  }
 0x119   : > { %6744 = vmatpush1.bf16.msra.mxu1 %v12032_v15  ;;  %6704 = vmatprep.subr.bf16.mxu0 %v12033_v16  ;;  %v12047_v25 = vld [vmem:[%s14687_s22 + $0x2a4] ss:$16 sps:$4 sm:$0xff]   ;;  %v12050_v27 = vld [vmem:[%s14687_s22 + $0x2a0] ss:$16 sps:$4 sm:$0xff]  }
 0x11a   : > { %6745 = vmatprep.subr.bf16.mxu1 %v12035_v17  ;;  %v12051_v28 = vld [vmem:[%s14687_s22 + $0xc4] ss:$16 sps:$4 sm:$0xff]   ;;  %v12055_v30 = vld [vmem:[%s14687_s22 + $0xc0] ss:$16 sps:$4 sm:$0xff]  }
 0x11b   : > { %v12053_v29 = vld [vmem:[%s14687_s22 + $0x2c4] ss:$16 sps:$4 sm:$0xff]   ;;  %v12056_v31 = vld [vmem:[%s14687_s22 + $0x2c0] ss:$16 sps:$4 sm:$0xff]  }
 0x11c   : > { %6705 = vmatpush1.bf16.msra.mxu0 %v12037_v18  ;;  %v12057_v32 = vld [vmem:[%s14687_s22 + $0xe4] ss:$16 sps:$4 sm:$0xff]   ;;  %v12061_v34 = vld [vmem:[%s14687_s22 + $0xe0] ss:$16 sps:$4 sm:$0xff]  }
 0x11d   : > { %6746 = vmatpush1.bf16.msra.mxu1 %v12038_v19  ;;  %6706 = vmatprep.subr.bf16.mxu0 %v12039_v20  ;;  %v12059_v33 = vld [vmem:[%s14687_s22 + $0x2e4] ss:$16 sps:$4 sm:$0xff]   ;;  %v12062_v35 = vld [vmem:[%s14687_s22 + $0x2e0] ss:$16 sps:$4 sm:$0xff]  }
 0x11e   : > { %6747 = vmatprep.subr.bf16.mxu1 %v12041_v21  ;;  %v12063_v36 = vld [vmem:[%s14687_s22 + $0x104] ss:$16 sps:$4 sm:$0xff]   ;;  %v12067_v38 = vld [vmem:[%s14687_s22 + $0x100] ss:$16 sps:$4 sm:$0xff]  }
 0x11f   : > { %v12065_v37 = vld [vmem:[%s14687_s22 + $0x304] ss:$16 sps:$4 sm:$0xff]   ;;  %v12068_v39 = vld [vmem:[%s14687_s22 + $0x300] ss:$16 sps:$4 sm:$0xff]  }
 0x120   : > { %6707 = vmatpush1.bf16.msra.mxu0 %v12043_v22  ;;  %v12069_v40 = vld [vmem:[%s14687_s22 + $0x124] ss:$16 sps:$4 sm:$0xff]   ;;  %v12073_v42 = vld [vmem:[%s14687_s22 + $0x120] ss:$16 sps:$4 sm:$0xff]  }
 0x121   : > { %6748 = vmatpush1.bf16.msra.mxu1 %v12044_v23  ;;  %6708 = vmatprep.subr.bf16.mxu0 %v12045_v24  ;;  %v12071_v41 = vld [vmem:[%s14687_s22 + $0x324] ss:$16 sps:$4 sm:$0xff]   ;;  %v12074_v43 = vld [vmem:[%s14687_s22 + $0x320] ss:$16 sps:$4 sm:$0xff]  }
 0x122   : > { %6749 = vmatprep.subr.bf16.mxu1 %v12047_v25  ;;  %v12075_v44 = vld [vmem:[%s14687_s22 + $0x144] ss:$16 sps:$4 sm:$0xff]   ;;  %v12079_v46 = vld [vmem:[%s14687_s22 + $0x140] ss:$16 sps:$4 sm:$0xff]  }
 0x123   : > { %v12077_v45 = vld [vmem:[%s14687_s22 + $0x344] ss:$16 sps:$4 sm:$0xff]   ;;  %v12080_v47 = vld [vmem:[%s14687_s22 + $0x340] ss:$16 sps:$4 sm:$0xff]  }
 0x124   : > { %6709 = vmatpush1.bf16.msra.mxu0 %v12049_v26  ;;  %v12081_v48 = vld [vmem:[%s14687_s22 + $0x164] ss:$16 sps:$4 sm:$0xff]   ;;  %v12085_v51 = vld [vmem:[%s14687_s22 + $0x160] ss:$16 sps:$4 sm:$0xff]  }
 0x125   : > { %6750 = vmatpush1.bf16.msra.mxu1 %v12050_v27  ;;  %6710 = vmatprep.subr.bf16.mxu0 %v12051_v28  ;;  %v12083_v49 = vld [vmem:[%s14687_s22 + $0x364] ss:$16 sps:$4 sm:$0xff]   ;;  %v12086_v52 = vld [vmem:[%s14687_s22 + $0x360] ss:$16 sps:$4 sm:$0xff]  }
 0x126   : > { %6751 = vmatprep.subr.bf16.mxu1 %v12053_v29  ;;  %v12087_v55 = vld [vmem:[%s14687_s22 + $0x184] ss:$16 sps:$4 sm:$0xff]   ;;  %v12091_v58 = vld [vmem:[%s14687_s22 + $0x180] ss:$16 sps:$4 sm:$0xff]  }
 0x127   : > { %v12089_v57 = vld [vmem:[%s14687_s22 + $0x384] ss:$16 sps:$4 sm:$0xff]   ;;  %v12092_v59 = vld [vmem:[%s14687_s22 + $0x380] ss:$16 sps:$4 sm:$0xff]  }
 0x128   : > { %6711 = vmatpush1.bf16.msra.mxu0 %v12055_v30  ;;  %v12093_v60 = vld [vmem:[%s14687_s22 + $0x1a4] ss:$16 sps:$4 sm:$0xff]   ;;  %v12097_v62 = vld [vmem:[%s14687_s22 + $0x1a0] ss:$16 sps:$4 sm:$0xff]  }
 0x129   : > { %6752 = vmatpush1.bf16.msra.mxu1 %v12056_v31  ;;  %6712 = vmatprep.subr.bf16.mxu0 %v12057_v32  ;;  %v12095_v61 = vld [vmem:[%s14687_s22 + $0x3a4] ss:$16 sps:$4 sm:$0xff]   ;;  %v12098_v63 = vld [vmem:[%s14687_s22 + $0x3a0] ss:$16 sps:$4 sm:$0xff]  }
 0x12a   : > { %6753 = vmatprep.subr.bf16.mxu1 %v12059_v33  ;;  %v12099_v0 = vld [vmem:[%s14687_s22 + $0x1c4] ss:$16 sps:$4 sm:$0xff]   ;;  %v12103_v2 = vld [vmem:[%s14687_s22 + $0x1c0] ss:$16 sps:$4 sm:$0xff]  }
 0x12b   : > { %v12101_v1 = vld [vmem:[%s14687_s22 + $0x3c4] ss:$16 sps:$4 sm:$0xff]   ;;  %v12104_v3 = vld [vmem:[%s14687_s22 + $0x3c0] ss:$16 sps:$4 sm:$0xff]  }
 0x12c   : > { %6713 = vmatpush1.bf16.msra.mxu0 %v12061_v34  ;;  %v12105_v4 = vld [vmem:[%s14687_s22 + $0x1e4] ss:$16 sps:$4 sm:$0xff]   ;;  %v12109_v6 = vld [vmem:[%s14687_s22 + $0x1e0] ss:$16 sps:$4 sm:$0xff]  }
 0x12d   : > { %6754 = vmatpush1.bf16.msra.mxu1 %v12062_v35  ;;  %6714 = vmatprep.subr.bf16.mxu0 %v12063_v36  ;;  %v12107_v5 = vld [vmem:[%s14687_s22 + $0x3e4] ss:$16 sps:$4 sm:$0xff]   ;;  %v12110_v7 = vld [vmem:[%s14687_s22 + $0x3e0] ss:$16 sps:$4 sm:$0xff]  }
 0x12e   : > { %6755 = vmatprep.subr.bf16.mxu1 %v12065_v37  ;;  %v486_v8 = vld [vmem:[%s14680_s18] sm:$0xff]  ;;  %v488_v9 = vld [vmem:[%s14680_s18 + $0x10] sm:$0xff] }
 0x12f   : > { %v12113_v10 = vld [vmem:[%s14687_s22 + $0x404] ss:$16 sps:$4 sm:$0xff]   ;;  %v14787_v12 = vpack.c.bf16 %v486_v8, %v486_v8  ;;  %v14789_v13 = vpack.c.bf16 %v488_v9, %v488_v9  ;;  %v12111_v14 = vld [vmem:[%s14687_s22 + $0x400] ss:$16 sps:$4 sm:$0xff]  }
 0x130   : > { %6715 = vmatpush1.bf16.msra.mxu0 %v12067_v38  ;;  %v12116_v11 = vld [vmem:[%s14687_s22 + $0x604] ss:$16 sps:$4 sm:$0xff]   ;;  %v12114_v15 = vld [vmem:[%s14687_s22 + $0x600] ss:$16 sps:$4 sm:$0xff]   ;;  %v491_v38 = vld [vmem:[%s14680_s18 + $0x28] sm:$0xff] }
 0x131   : > { %6756 = vmatpush1.bf16.msra.mxu1 %v12068_v39  ;;  %6716 = vmatprep.subr.bf16.mxu0 %v12069_v40  ;;  %v12119_v16 = vld [vmem:[%s14687_s22 + $0x424] ss:$16 sps:$4 sm:$0xff]   ;;  %v12117_v18 = vld [vmem:[%s14687_s22 + $0x420] ss:$16 sps:$4 sm:$0xff]  }
 0x132   : > { %6757 = vmatprep.subr.bf16.mxu1 %v12071_v41  ;;  %v12122_v17 = vld [vmem:[%s14687_s22 + $0x624] ss:$16 sps:$4 sm:$0xff]   ;;  %v12120_v19 = vld [vmem:[%s14687_s22 + $0x620] ss:$16 sps:$4 sm:$0xff]   ;;  %v14820_v41 = vpack.c.bf16 %v491_v38, %v491_v38 }
 0x133   : > { %v12125_v20 = vld [vmem:[%s14687_s22 + $0x444] ss:$16 sps:$4 sm:$0xff]   ;;  %v12123_v22 = vld [vmem:[%s14687_s22 + $0x440] ss:$16 sps:$4 sm:$0xff]  }
 0x134   : > { %6717 = vmatpush1.bf16.msra.mxu0 %v12073_v42  ;;  %v12128_v21 = vld [vmem:[%s14687_s22 + $0x644] ss:$16 sps:$4 sm:$0xff]   ;;  %v12126_v23 = vld [vmem:[%s14687_s22 + $0x640] ss:$16 sps:$4 sm:$0xff]   ;;  %v493_v42 = vld [vmem:[%s14680_s18 + $0x38] sm:$0xff] }
 0x135   : > { %6758 = vmatpush1.bf16.msra.mxu1 %v12074_v43  ;;  %6718 = vmatprep.subr.bf16.mxu0 %v12075_v44  ;;  %v12131_v24 = vld [vmem:[%s14687_s22 + $0x464] ss:$16 sps:$4 sm:$0xff]   ;;  %v12129_v26 = vld [vmem:[%s14687_s22 + $0x460] ss:$16 sps:$4 sm:$0xff]   ;;  %v14824_v44 = vpack.c.bf16 %v493_v42, %v493_v42 }
 0x136   : > { %6759 = vmatprep.subr.bf16.mxu1 %v12077_v45  ;;  %v12134_v25 = vld [vmem:[%s14687_s22 + $0x664] ss:$16 sps:$4 sm:$0xff]   ;;  %v12132_v27 = vld [vmem:[%s14687_s22 + $0x660] ss:$16 sps:$4 sm:$0xff]  }
 0x137   : > { %v12137_v28 = vld [vmem:[%s14687_s22 + $0x484] ss:$16 sps:$4 sm:$0xff]   ;;  %v12135_v30 = vld [vmem:[%s14687_s22 + $0x480] ss:$16 sps:$4 sm:$0xff]  }
 0x138   : > { %6719 = vmatpush1.bf16.msra.mxu0 %v12079_v46  ;;  %v12140_v29 = vld [vmem:[%s14687_s22 + $0x684] ss:$16 sps:$4 sm:$0xff]   ;;  %v12138_v31 = vld [vmem:[%s14687_s22 + $0x680] ss:$16 sps:$4 sm:$0xff]  }
 0x139   : > { %6760 = vmatpush1.bf16.msra.mxu1 %v12080_v47  ;;  %6720 = vmatprep.subr.bf16.mxu0 %v12081_v48  ;;  %v12143_v32 = vld [vmem:[%s14687_s22 + $0x4a4] ss:$16 sps:$4 sm:$0xff]   ;;  %v12141_v34 = vld [vmem:[%s14687_s22 + $0x4a0] ss:$16 sps:$4 sm:$0xff]  }
 0x13a   : > { %6761 = vmatprep.subr.bf16.mxu1 %v12083_v49  ;;  %v12146_v33 = vld [vmem:[%s14687_s22 + $0x6a4] ss:$16 sps:$4 sm:$0xff]   ;;  %v12144_v35 = vld [vmem:[%s14687_s22 + $0x6a0] ss:$16 sps:$4 sm:$0xff]  }
 0x13b   : > { %v12149_v36 = vld [vmem:[%s14687_s22 + $0x4c4] ss:$16 sps:$4 sm:$0xff]   ;;  %v12147_v39 = vld [vmem:[%s14687_s22 + $0x4c0] ss:$16 sps:$4 sm:$0xff]  }
 0x13c   : > { %6721 = vmatpush1.bf16.msra.mxu0 %v12085_v51  ;;  %v12152_v37 = vld [vmem:[%s14687_s22 + $0x6c4] ss:$16 sps:$4 sm:$0xff]   ;;  %v12150_v40 = vld [vmem:[%s14687_s22 + $0x6c0] ss:$16 sps:$4 sm:$0xff]  }
 0x13d   : > { %6762 = vmatpush1.bf16.msra.mxu1 %v12086_v52  ;;  %6722 = vmatprep.subr.bf16.mxu0 %v12087_v55  ;;  %v12155_v43 = vld [vmem:[%s14687_s22 + $0x4e4] ss:$16 sps:$4 sm:$0xff]   ;;  %v12153_v46 = vld [vmem:[%s14687_s22 + $0x4e0] ss:$16 sps:$4 sm:$0xff]  }
 0x13e   : > { %6763 = vmatprep.subr.bf16.mxu1 %v12089_v57  ;;  %v12158_v45 = vld [vmem:[%s14687_s22 + $0x6e4] ss:$16 sps:$4 sm:$0xff]   ;;  %v12156_v47 = vld [vmem:[%s14687_s22 + $0x6e0] ss:$16 sps:$4 sm:$0xff]  }
 0x13f   : > { %v12161_v48 = vld [vmem:[%s14687_s22 + $0x504] ss:$16 sps:$4 sm:$0xff]   ;;  %v12159_v50 = vld [vmem:[%s14687_s22 + $0x500] ss:$16 sps:$4 sm:$0xff]  }
 0x140   : > { %6723 = vmatpush1.bf16.msra.mxu0 %v12091_v58  ;;  %v12164_v49 = vld [vmem:[%s14687_s22 + $0x704] ss:$16 sps:$4 sm:$0xff]   ;;  %v12162_v51 = vld [vmem:[%s14687_s22 + $0x700] ss:$16 sps:$4 sm:$0xff]  }
 0x141   : > { %6764 = vmatpush1.bf16.msra.mxu1 %v12092_v59  ;;  %6724 = vmatprep.subr.bf16.mxu0 %v12093_v60  ;;  %v12167_v52 = vld [vmem:[%s14687_s22 + $0x524] ss:$16 sps:$4 sm:$0xff]   ;;  %v12165_v55 = vld [vmem:[%s14687_s22 + $0x520] ss:$16 sps:$4 sm:$0xff]  }
 0x142   : > { %6765 = vmatprep.subr.bf16.mxu1 %v12095_v61  ;;  %v12170_v54 = vld [vmem:[%s14687_s22 + $0x724] ss:$16 sps:$4 sm:$0xff]   ;;  %v12168_v57 = vld [vmem:[%s14687_s22 + $0x720] ss:$16 sps:$4 sm:$0xff]  }
 0x143   : > { %v12173_v58 = vld [vmem:[%s14687_s22 + $0x544] ss:$16 sps:$4 sm:$0xff]   ;;  %v12171_v60 = vld [vmem:[%s14687_s22 + $0x540] ss:$16 sps:$4 sm:$0xff]  }
 0x144   : > { %6725 = vmatpush1.bf16.msra.mxu0 %v12097_v62  ;;  %v12176_v59 = vld [vmem:[%s14687_s22 + $0x744] ss:$16 sps:$4 sm:$0xff]   ;;  %v12174_v61 = vld [vmem:[%s14687_s22 + $0x740] ss:$16 sps:$4 sm:$0xff]  }
 0x145   : > { %6766 = vmatpush1.bf16.msra.mxu1 %v12098_v63  ;;  %6726 = vmatprep.subr.bf16.mxu0 %v12099_v0  ;;  %v12179_v62 = vld [vmem:[%s14687_s22 + $0x564] ss:$16 sps:$4 sm:$0xff]   ;;  %v12177_v0 = vld [vmem:[%s14687_s22 + $0x560] ss:$16 sps:$4 sm:$0xff]  }
 0x146   : > { %6767 = vmatprep.subr.bf16.mxu1 %v12101_v1  ;;  %v12182_v63 = vld [vmem:[%s14687_s22 + $0x764] ss:$16 sps:$4 sm:$0xff]   ;;  %v12180_v1 = vld [vmem:[%s14687_s22 + $0x760] ss:$16 sps:$4 sm:$0xff]  }
 0x147   : > { %v12189_v8 = vld [vmem:[%s14687_s22 + $0x5a0] ss:$16 sps:$4 sm:$0xff]   ;;  %v12230_v42 = vld [vmem:[%s14687_s22 + $0xa64] ss:$16 sps:$4 sm:$0xff]  }
 0x148   : > { %6727 = vmatpush1.bf16.msra.mxu0 %v12103_v2  ;;  %v12185_v2 = vld [vmem:[%s14687_s22 + $0x584] ss:$16 sps:$4 sm:$0xff]   ;;  %v12192_v9 = vld [vmem:[%s14687_s22 + $0x7a0] ss:$16 sps:$4 sm:$0xff]  }
 0x149   : > { %6768 = vmatpush1.bf16.msra.mxu1 %v12104_v3  ;;  %6728 = vmatprep.subr.bf16.mxu0 %v12105_v4  ;;  %v12188_v3 = vld [vmem:[%s14687_s22 + $0x784] ss:$16 sps:$4 sm:$0xff]   ;;  %v12183_v4 = vld [vmem:[%s14687_s22 + $0x580] ss:$16 sps:$4 sm:$0xff]  }
 0x14a   : > { %6769 = vmatprep.subr.bf16.mxu1 %v12107_v5  ;;  %v12186_v5 = vld [vmem:[%s14687_s22 + $0x780] ss:$16 sps:$4 sm:$0xff]  }
 0x14b   : > { %v12219_v38 = vld [vmem:[%s14687_s22 + $0x840] ss:$16 sps:$4 sm:$0xff]  }
 0x14c   : > { %6729 = vmatpush1.bf16.msra.mxu0 %v12109_v6  ;;  %v12191_v6 = vld [vmem:[%s14687_s22 + $0x5a4] ss:$16 sps:$4 sm:$0xff]  }
 0x14d   : > { %6770 = vmatpush1.bf16.msra.mxu1 %v12110_v7  ;;  %6780 = vmatprep.subr.bf16.mxu0 %v12113_v10  ;;  %v12194_v7 = vld [vmem:[%s14687_s22 + $0x7a4] ss:$16 sps:$4 sm:$0xff]  }
 0x14e   : > { %6821 = vmatprep.subr.bf16.mxu1 %v12116_v11  ;;  %v12197_v10 = vld [vmem:[%s14687_s22 + $0x5c4] ss:$16 sps:$4 sm:$0xff]  }
 0x14f   : > { %6731 = vmatmul.mubr.bf16.vlgmr.msra.gmra.mrb[0].mxu0 %v14787_v12  ;;  %v12200_v11 = vld [vmem:[%s14687_s22 + $0x7c4] ss:$16 sps:$4 sm:$0xff]  }
 0x150   : > { %6772 = vmatmul.mubr.bf16.vlgmr.msra.gmra.mrb[0].mxu1 %v14789_v13  ;;  %6781 = vmatpush1.bf16.msra.mxu0 %v12111_v14  ;;  %v12195_v14 = vld [vmem:[%s14687_s22 + $0x5c0] ss:$16 sps:$4 sm:$0xff]  }
 0x151   : > { %6822 = vmatpush1.bf16.msra.mxu1 %v12114_v15  ;;  %6782 = vmatprep.subr.bf16.mxu0 %v12119_v16  ;;  %v12198_v15 = vld [vmem:[%s14687_s22 + $0x7c0] ss:$16 sps:$4 sm:$0xff]   ;;  %v12203_v16 = vld [vmem:[%s14687_s22 + $0x5e4] ss:$16 sps:$4 sm:$0xff]  }
 0x152   : > { %6823 = vmatprep.subr.bf16.mxu1 %v12122_v17  ;;  %6812 = vmatprep.mubr.bf16.mxu0 %v14820_v41  ;;  %v12206_v17 = vld [vmem:[%s14687_s22 + $0x7e4] ss:$16 sps:$4 sm:$0xff]  }
 0x153   : > { %6853 = vmatprep.mubr.bf16.mxu1 %v14824_v44 }
 0x154   : > { %6783 = vmatpush1.bf16.msra.mxu0 %v12117_v18  ;;  %v12201_v18 = vld [vmem:[%s14687_s22 + $0x5e0] ss:$16 sps:$4 sm:$0xff]  }
 0x155   : > { %6824 = vmatpush1.bf16.msra.mxu1 %v12120_v19  ;;  %6784 = vmatprep.subr.bf16.mxu0 %v12125_v20  ;;  %v12204_v19 = vld [vmem:[%s14687_s22 + $0x7e0] ss:$16 sps:$4 sm:$0xff]  }
 0x156   : > { %6825 = vmatprep.subr.bf16.mxu1 %v12128_v21  ;;  %v490_v20 = vld [vmem:[%s14680_s18 + $0x20] sm:$0xff]  ;;  %v492_v21 = vld [vmem:[%s14680_s18 + $0x30] sm:$0xff] }
 0x158   : > { %6785 = vmatpush1.bf16.msra.mxu0 %v12123_v22  ;;  %v12209_v22 = vld [vmem:[%s14687_s22 + $0x804] ss:$16 sps:$4 sm:$0xff]  }
 0x159   : > { %6826 = vmatpush1.bf16.msra.mxu1 %v12126_v23  ;;  %6786 = vmatprep.subr.bf16.mxu0 %v12131_v24  ;;  %v12212_v23 = vld [vmem:[%s14687_s22 + $0xa04] ss:$16 sps:$4 sm:$0xff]   ;;  %v14867_v24 = vpack.c.bf16 %v490_v20, %v490_v20  ;;  %v12279_v20 = vld [vmem:[%s14687_s22 + $0x980] ss:$16 sps:$4 sm:$0xff]  }
 0x15a   : > { %6827 = vmatprep.subr.bf16.mxu1 %v12134_v25  ;;  %v14869_v25 = vpack.c.bf16 %v492_v21, %v492_v21  ;;  %v12282_v21 = vld [vmem:[%s14687_s22 + $0xb80] ss:$16 sps:$4 sm:$0xff]  }
 0x15c   : > { %6787 = vmatpush1.bf16.msra.mxu0 %v12129_v26  ;;  %v12207_v26 = vld [vmem:[%s14687_s22 + $0x800] ss:$16 sps:$4 sm:$0xff]  }
 0x15d   : > { %6828 = vmatpush1.bf16.msra.mxu1 %v12132_v27  ;;  %6788 = vmatprep.subr.bf16.mxu0 %v12137_v28  ;;  %v12210_v27 = vld [vmem:[%s14687_s22 + $0xa00] ss:$16 sps:$4 sm:$0xff]   ;;  %v12215_v28 = vld [vmem:[%s14687_s22 + $0x824] ss:$16 sps:$4 sm:$0xff]  }
 0x15e   : > { %6829 = vmatprep.subr.bf16.mxu1 %v12140_v29  ;;  %v12218_v29 = vld [vmem:[%s14687_s22 + $0xa24] ss:$16 sps:$4 sm:$0xff]  }
 0x160   : > { %6789 = vmatpush1.bf16.msra.mxu0 %v12135_v30  ;;  %v495_v30 = vld [vmem:[%s14680_s18 + $0x48] sm:$0xff] }
 0x161   : > { %6830 = vmatpush1.bf16.msra.mxu1 %v12138_v31  ;;  %6790 = vmatprep.subr.bf16.mxu0 %v12143_v32  ;;  %v12213_v31 = vld [vmem:[%s14687_s22 + $0x820] ss:$16 sps:$4 sm:$0xff]  }
 0x162   : > { %6831 = vmatprep.subr.bf16.mxu1 %v12146_v33  ;;  %v12216_v32 = vld [vmem:[%s14687_s22 + $0xa20] ss:$16 sps:$4 sm:$0xff]   ;;  %v14880_v33 = vpack.c.bf16 %v495_v30, %v495_v30 }
 0x163   : > { %v12291_v30 = vld [vmem:[%s14687_s22 + $0x9c0] ss:$16 sps:$4 sm:$0xff]  }
 0x164   : > { %6791 = vmatpush1.bf16.msra.mxu0 %v12141_v34  ;;  %v497_v34 = vld [vmem:[%s14680_s18 + $0x58] sm:$0xff] }
 0x165   : > { %6832 = vmatpush1.bf16.msra.mxu1 %v12144_v35  ;;  %6792 = vmatprep.subr.bf16.mxu0 %v12149_v36  ;;  %v12221_v35 = vld [vmem:[%s14687_s22 + $0x844] ss:$16 sps:$4 sm:$0xff]   ;;  %v14884_v36 = vpack.c.bf16 %v497_v34, %v497_v34 }
 0x166   : > { %6833 = vmatprep.subr.bf16.mxu1 %v12152_v37  ;;  %v12224_v37 = vld [vmem:[%s14687_s22 + $0xa44] ss:$16 sps:$4 sm:$0xff]  }
 0x167   : > { %v12302_v34 = vld [vmem:[%s14687_s22 + $0xbe4] ss:$16 sps:$4 sm:$0xff]  }
 0x168   : > { %6793 = vmatpush1.bf16.msra.mxu0 %v12147_v39  ;;  %v12222_v39 = vld [vmem:[%s14687_s22 + $0xa40] ss:$16 sps:$4 sm:$0xff]  }
 0x169   : > { %6834 = vmatpush1.bf16.msra.mxu1 %v12150_v40  ;;  %6794 = vmatprep.subr.bf16.mxu0 %v12155_v43  ;;  %v12227_v40 = vld [vmem:[%s14687_s22 + $0x864] ss:$16 sps:$4 sm:$0xff]   ;;  %v12225_v43 = vld [vmem:[%s14687_s22 + $0x860] ss:$16 sps:$4 sm:$0xff]  }
 0x16a   : > { %6835 = vmatprep.subr.bf16.mxu1 %v12158_v45  ;;  %v12228_v45 = vld [vmem:[%s14687_s22 + $0xa60] ss:$16 sps:$4 sm:$0xff]  }
 0x16c   : > { %6795 = vmatpush1.bf16.msra.mxu0 %v12153_v46  ;;  %v12233_v46 = vld [vmem:[%s14687_s22 + $0x884] ss:$16 sps:$4 sm:$0xff]  }
 0x16d   : > { %6836 = vmatpush1.bf16.msra.mxu1 %v12156_v47  ;;  %6796 = vmatprep.subr.bf16.mxu0 %v12161_v48  ;;  %v12236_v47 = vld [vmem:[%s14687_s22 + $0xa84] ss:$16 sps:$4 sm:$0xff]   ;;  %v12231_v48 = vld [vmem:[%s14687_s22 + $0x880] ss:$16 sps:$4 sm:$0xff]  }
 0x16e   : > { %6837 = vmatprep.subr.bf16.mxu1 %v12164_v49  ;;  %v12234_v49 = vld [vmem:[%s14687_s22 + $0xa80] ss:$16 sps:$4 sm:$0xff]  }
 0x170   : > { %6797 = vmatpush1.bf16.msra.mxu0 %v12159_v50  ;;  %v12239_v50 = vld [vmem:[%s14687_s22 + $0x8a4] ss:$16 sps:$4 sm:$0xff]  }
 0x171   : > { %6838 = vmatpush1.bf16.msra.mxu1 %v12162_v51  ;;  %6798 = vmatprep.subr.bf16.mxu0 %v12167_v52  ;;  %v12242_v51 = vld [vmem:[%s14687_s22 + $0xaa4] ss:$16 sps:$4 sm:$0xff]   ;;  %v12237_v52 = vld [vmem:[%s14687_s22 + $0x8a0] ss:$16 sps:$4 sm:$0xff]  }
 0x172   : > { %6839 = vmatprep.subr.bf16.mxu1 %v12170_v54  ;;  %v12240_v54 = vld [vmem:[%s14687_s22 + $0xaa0] ss:$16 sps:$4 sm:$0xff]  }
 0x174   : > { %6799 = vmatpush1.bf16.msra.mxu0 %v12165_v55  ;;  %v12245_v55 = vld [vmem:[%s14687_s22 + $0x8c4] ss:$16 sps:$4 sm:$0xff]  }
 0x175   : > { %6840 = vmatpush1.bf16.msra.mxu1 %v12168_v57  ;;  %6800 = vmatprep.subr.bf16.mxu0 %v12173_v58  ;;  %v12248_v57 = vld [vmem:[%s14687_s22 + $0xac4] ss:$16 sps:$4 sm:$0xff]   ;;  %v12243_v58 = vld [vmem:[%s14687_s22 + $0x8c0] ss:$16 sps:$4 sm:$0xff]  }
 0x176   : > { %6841 = vmatprep.subr.bf16.mxu1 %v12176_v59  ;;  %v12246_v59 = vld [vmem:[%s14687_s22 + $0xac0] ss:$16 sps:$4 sm:$0xff]  }
 0x178   : > { %6801 = vmatpush1.bf16.msra.mxu0 %v12171_v60  ;;  %v12251_v60 = vld [vmem:[%s14687_s22 + $0x8e4] ss:$16 sps:$4 sm:$0xff]  }
 0x179   : > { %6842 = vmatpush1.bf16.msra.mxu1 %v12174_v61  ;;  %6802 = vmatprep.subr.bf16.mxu0 %v12179_v62  ;;  %v12254_v61 = vld [vmem:[%s14687_s22 + $0xae4] ss:$16 sps:$4 sm:$0xff]   ;;  %v12249_v62 = vld [vmem:[%s14687_s22 + $0x8e0] ss:$16 sps:$4 sm:$0xff]  }
 0x17a   : > { %6843 = vmatprep.subr.bf16.mxu1 %v12182_v63  ;;  %v12252_v63 = vld [vmem:[%s14687_s22 + $0xae0] ss:$16 sps:$4 sm:$0xff]  }
 0x17c   : > { %6803 = vmatpush1.bf16.msra.mxu0 %v12177_v0  ;;  %v12257_v0 = vld [vmem:[%s14687_s22 + $0x904] ss:$16 sps:$4 sm:$0xff]  }
 0x17d   : > { %6844 = vmatpush1.bf16.msra.mxu1 %v12180_v1  ;;  %6804 = vmatprep.subr.bf16.mxu0 %v12185_v2  ;;  %v12260_v1 = vld [vmem:[%s14687_s22 + $0xb04] ss:$16 sps:$4 sm:$0xff]   ;;  %v12255_v2 = vld [vmem:[%s14687_s22 + $0x900] ss:$16 sps:$4 sm:$0xff]  }
 0x17e   : > { %6845 = vmatprep.subr.bf16.mxu1 %v12188_v3  ;;  %v12258_v3 = vld [vmem:[%s14687_s22 + $0xb00] ss:$16 sps:$4 sm:$0xff]  }
 0x180   : > { %6805 = vmatpush1.bf16.msra.mxu0 %v12183_v4  ;;  %v12263_v4 = vld [vmem:[%s14687_s22 + $0x924] ss:$16 sps:$4 sm:$0xff]  }
 0x181   : > { %6846 = vmatpush1.bf16.msra.mxu1 %v12186_v5  ;;  %6806 = vmatprep.subr.bf16.mxu0 %v12191_v6  ;;  %v12266_v5 = vld [vmem:[%s14687_s22 + $0xb24] ss:$16 sps:$4 sm:$0xff]   ;;  %v12261_v6 = vld [vmem:[%s14687_s22 + $0x920] ss:$16 sps:$4 sm:$0xff]  }
 0x182   : > { %6847 = vmatprep.subr.bf16.mxu1 %v12194_v7  ;;  %v12264_v7 = vld [vmem:[%s14687_s22 + $0xb20] ss:$16 sps:$4 sm:$0xff]  }
 0x184   : > { %6807 = vmatpush1.bf16.msra.mxu0 %v12189_v8  ;;  %v12269_v8 = vld [vmem:[%s14687_s22 + $0x944] ss:$16 sps:$4 sm:$0xff]  }
 0x185   : > { %6848 = vmatpush1.bf16.msra.mxu1 %v12192_v9  ;;  %6808 = vmatprep.subr.bf16.mxu0 %v12197_v10  ;;  %v12272_v9 = vld [vmem:[%s14687_s22 + $0xb44] ss:$16 sps:$4 sm:$0xff]   ;;  %v12267_v10 = vld [vmem:[%s14687_s22 + $0x940] ss:$16 sps:$4 sm:$0xff]  }
 0x186   : > { %6849 = vmatprep.subr.bf16.mxu1 %v12200_v11  ;;  %v12270_v11 = vld [vmem:[%s14687_s22 + $0xb40] ss:$16 sps:$4 sm:$0xff]  }
 0x188   : > { %6809 = vmatpush1.bf16.msra.mxu0 %v12195_v14  ;;  %v12275_v14 = vld [vmem:[%s14687_s22 + $0x964] ss:$16 sps:$4 sm:$0xff]  }
 0x189   : > { %6850 = vmatpush1.bf16.msra.mxu1 %v12198_v15  ;;  %6810 = vmatprep.subr.bf16.mxu0 %v12203_v16  ;;  %v12278_v15 = vld [vmem:[%s14687_s22 + $0xb64] ss:$16 sps:$4 sm:$0xff]   ;;  %v12273_v16 = vld [vmem:[%s14687_s22 + $0x960] ss:$16 sps:$4 sm:$0xff]  }
 0x18a   : > { %6851 = vmatprep.subr.bf16.mxu1 %v12206_v17  ;;  %v12276_v17 = vld [vmem:[%s14687_s22 + $0xb60] ss:$16 sps:$4 sm:$0xff]  }
 0x18c   : > { %6811 = vmatpush1.bf16.msra.mxu0 %v12201_v18  ;;  %v12281_v18 = vld [vmem:[%s14687_s22 + $0x984] ss:$16 sps:$4 sm:$0xff]  }
 0x18d   : > { %6852 = vmatpush1.bf16.msra.mxu1 %v12204_v19  ;;  %6862 = vmatprep.subr.bf16.mxu0 %v12209_v22  ;;  %v12284_v19 = vld [vmem:[%s14687_s22 + $0xb84] ss:$16 sps:$4 sm:$0xff]  }
 0x18e   : > { %6903 = vmatprep.subr.bf16.mxu1 %v12212_v23  ;;  %v12287_v22 = vld [vmem:[%s14687_s22 + $0x9a4] ss:$16 sps:$4 sm:$0xff]  }
 0x18f   : > { %6813 = vmatmul.mubr.bf16.vlgmr.msra.gmra.mrb[4].mxu0 %v14867_v24  ;;  %v12290_v23 = vld [vmem:[%s14687_s22 + $0xba4] ss:$16 sps:$4 sm:$0xff]  }
 0x190   : > { %6854 = vmatmul.mubr.bf16.vlgmr.msra.gmra.mrb[4].mxu1 %v14869_v25  ;;  %6863 = vmatpush1.bf16.msra.mxu0 %v12207_v26  ;;  %v12285_v26 = vld [vmem:[%s14687_s22 + $0x9a0] ss:$16 sps:$4 sm:$0xff]  }
 0x191   : > { %6904 = vmatpush1.bf16.msra.mxu1 %v12210_v27  ;;  %6864 = vmatprep.subr.bf16.mxu0 %v12215_v28  ;;  %v12288_v27 = vld [vmem:[%s14687_s22 + $0xba0] ss:$16 sps:$4 sm:$0xff]   ;;  %v12293_v28 = vld [vmem:[%s14687_s22 + $0x9c4] ss:$16 sps:$4 sm:$0xff]  }
 0x192   : > { %6905 = vmatprep.subr.bf16.mxu1 %v12218_v29  ;;  %6894 = vmatprep.mubr.bf16.mxu0 %v14880_v33  ;;  %v12296_v29 = vld [vmem:[%s14687_s22 + $0xbc4] ss:$16 sps:$4 sm:$0xff]  }
 0x193   : > { %6935 = vmatprep.mubr.bf16.mxu1 %v14884_v36 }
 0x194   : > { %6865 = vmatpush1.bf16.msra.mxu0 %v12213_v31  ;;  %v12294_v31 = vld [vmem:[%s14687_s22 + $0xbc0] ss:$16 sps:$4 sm:$0xff]  }
 0x195   : > { %6906 = vmatpush1.bf16.msra.mxu1 %v12216_v32  ;;  %6866 = vmatprep.subr.bf16.mxu0 %v12221_v35  ;;  %v12299_v32 = vld [vmem:[%s14687_s22 + $0x9e4] ss:$16 sps:$4 sm:$0xff]   ;;  %v12297_v35 = vld [vmem:[%s14687_s22 + $0x9e0] ss:$16 sps:$4 sm:$0xff]  }
 0x196   : > { %6907 = vmatprep.subr.bf16.mxu1 %v12224_v37  ;;  %v12300_v37 = vld [vmem:[%s14687_s22 + $0xbe0] ss:$16 sps:$4 sm:$0xff]  }
 0x198   : > { %6867 = vmatpush1.bf16.msra.mxu0 %v12219_v38  ;;  %v494_v38 = vld [vmem:[%s14680_s18 + $0x40] sm:$0xff] }
 0x199   : > { %6908 = vmatpush1.bf16.msra.mxu1 %v12222_v39  ;;  %6868 = vmatprep.subr.bf16.mxu0 %v12227_v40  ;;  %v496_v39 = vld [vmem:[%s14680_s18 + $0x50] sm:$0xff] }
 0x19a   : > { %6909 = vmatprep.subr.bf16.mxu1 %v12230_v42  ;;  %v12305_v40 = vld [vmem:[%s14687_s22 + $0xc04] ss:$16 sps:$4 sm:$0xff]  }
 0x19b   : > { %v12308_v42 = vld [vmem:[%s14687_s22 + $0xe04] ss:$16 sps:$4 sm:$0xff]  }
 0x19c   : > { %6869 = vmatpush1.bf16.msra.mxu0 %v12225_v43  ;;  %v12303_v43 = vld [vmem:[%s14687_s22 + $0xc00] ss:$16 sps:$4 sm:$0xff]  }
 0x19d   : > { %6910 = vmatpush1.bf16.msra.mxu1 %v12228_v45  ;;  %6870 = vmatprep.subr.bf16.mxu0 %v12233_v46  ;;  %v12306_v45 = vld [vmem:[%s14687_s22 + $0xe00] ss:$16 sps:$4 sm:$0xff]   ;;  %v14949_v46 = vpack.c.bf16 %v494_v38, %v494_v38 }
 0x19e   : > { %6911 = vmatprep.subr.bf16.mxu1 %v12236_v47  ;;  %v14951_v47 = vpack.c.bf16 %v496_v39, %v496_v39  ;;  %v12369_v38 = vld [vmem:[%s14687_s22 + $0xd60] ss:$16 sps:$4 sm:$0xff]  }
 0x19f   : > { %v12372_v39 = vld [vmem:[%s14687_s22 + $0xf60] ss:$16 sps:$4 sm:$0xff]  }
 0x1a0   : > { %6871 = vmatpush1.bf16.msra.mxu0 %v12231_v48  ;;  %v499_v48 = vld [vmem:[%s14680_s18 + $0x68] sm:$0xff] }
 0x1a1   : > { %6912 = vmatpush1.bf16.msra.mxu1 %v12234_v49  ;;  %6872 = vmatprep.subr.bf16.mxu0 %v12239_v50  ;;  %v501_v49 = vld [vmem:[%s14680_s18 + $0x78] sm:$0xff]  ;;  %v12311_v50 = vld [vmem:[%s14687_s22 + $0xc24] ss:$16 sps:$4 sm:$0xff]  }
 0x1a2   : > { %6913 = vmatprep.subr.bf16.mxu1 %v12242_v51  ;;  %v12314_v51 = vld [vmem:[%s14687_s22 + $0xe24] ss:$16 sps:$4 sm:$0xff]  }
 0x1a4   : > { %6873 = vmatpush1.bf16.msra.mxu0 %v12237_v52  ;;  %v14957_v52 = vpack.c.bf16 %v499_v48, %v499_v48  ;;  %v12383_v48 = vld [vmem:[%s14687_s22 + $0xda4] ss:$16 sps:$4 sm:$0xff]  }
 0x1a5   : > { %6914 = vmatpush1.bf16.msra.mxu1 %v12240_v54  ;;  %6874 = vmatprep.subr.bf16.mxu0 %v12245_v55  ;;  %v14959_v54 = vpack.c.bf16 %v501_v49, %v501_v49  ;;  %v12309_v55 = vld [vmem:[%s14687_s22 + $0xc20] ss:$16 sps:$4 sm:$0xff]   ;;  %v12386_v49 = vld [vmem:[%s14687_s22 + $0xfa4] ss:$16 sps:$4 sm:$0xff]  }
 0x1a6   : > { %6915 = vmatprep.subr.bf16.mxu1 %v12248_v57  ;;  %v12312_v57 = vld [vmem:[%s14687_s22 + $0xe20] ss:$16 sps:$4 sm:$0xff]  }
 0x1a8   : > { %6875 = vmatpush1.bf16.msra.mxu0 %v12243_v58  ;;  %v12317_v58 = vld [vmem:[%s14687_s22 + $0xc44] ss:$16 sps:$4 sm:$0xff]  }
 0x1a9   : > { %6916 = vmatpush1.bf16.msra.mxu1 %v12246_v59  ;;  %6876 = vmatprep.subr.bf16.mxu0 %v12251_v60  ;;  %v12320_v59 = vld [vmem:[%s14687_s22 + $0xe44] ss:$16 sps:$4 sm:$0xff]   ;;  %v12315_v60 = vld [vmem:[%s14687_s22 + $0xc40] ss:$16 sps:$4 sm:$0xff]  }
 0x1aa   : > { %6917 = vmatprep.subr.bf16.mxu1 %v12254_v61  ;;  %v12318_v61 = vld [vmem:[%s14687_s22 + $0xe40] ss:$16 sps:$4 sm:$0xff]  }
 0x1ac   : > { %6877 = vmatpush1.bf16.msra.mxu0 %v12249_v62  ;;  %v12323_v62 = vld [vmem:[%s14687_s22 + $0xc64] ss:$16 sps:$4 sm:$0xff]  }
 0x1ad   : > { %6918 = vmatpush1.bf16.msra.mxu1 %v12252_v63  ;;  %6878 = vmatprep.subr.bf16.mxu0 %v12257_v0  ;;  %v12326_v63 = vld [vmem:[%s14687_s22 + $0xe64] ss:$16 sps:$4 sm:$0xff]   ;;  %v12321_v0 = vld [vmem:[%s14687_s22 + $0xc60] ss:$16 sps:$4 sm:$0xff]  }
 0x1ae   : > { %6919 = vmatprep.subr.bf16.mxu1 %v12260_v1  ;;  %v12324_v1 = vld [vmem:[%s14687_s22 + $0xe60] ss:$16 sps:$4 sm:$0xff]  }
 0x1b0   : > { %6879 = vmatpush1.bf16.msra.mxu0 %v12255_v2  ;;  %v12329_v2 = vld [vmem:[%s14687_s22 + $0xc84] ss:$16 sps:$4 sm:$0xff]  }
 0x1b1   : > { %6920 = vmatpush1.bf16.msra.mxu1 %v12258_v3  ;;  %6880 = vmatprep.subr.bf16.mxu0 %v12263_v4  ;;  %v12332_v3 = vld [vmem:[%s14687_s22 + $0xe84] ss:$16 sps:$4 sm:$0xff]   ;;  %v12327_v4 = vld [vmem:[%s14687_s22 + $0xc80] ss:$16 sps:$4 sm:$0xff]  }
 0x1b2   : > { %6921 = vmatprep.subr.bf16.mxu1 %v12266_v5  ;;  %v12330_v5 = vld [vmem:[%s14687_s22 + $0xe80] ss:$16 sps:$4 sm:$0xff]  }
 0x1b4   : > { %6881 = vmatpush1.bf16.msra.mxu0 %v12261_v6  ;;  %v12335_v6 = vld [vmem:[%s14687_s22 + $0xca4] ss:$16 sps:$4 sm:$0xff]  }
 0x1b5   : > { %6922 = vmatpush1.bf16.msra.mxu1 %v12264_v7  ;;  %6882 = vmatprep.subr.bf16.mxu0 %v12269_v8  ;;  %v12338_v7 = vld [vmem:[%s14687_s22 + $0xea4] ss:$16 sps:$4 sm:$0xff]   ;;  %v12333_v8 = vld [vmem:[%s14687_s22 + $0xca0] ss:$16 sps:$4 sm:$0xff]  }
 0x1b6   : > { %6923 = vmatprep.subr.bf16.mxu1 %v12272_v9  ;;  %v12336_v9 = vld [vmem:[%s14687_s22 + $0xea0] ss:$16 sps:$4 sm:$0xff]  }
 0x1b8   : > { %6883 = vmatpush1.bf16.msra.mxu0 %v12267_v10  ;;  %v12341_v10 = vld [vmem:[%s14687_s22 + $0xcc4] ss:$16 sps:$4 sm:$0xff]  }
 0x1b9   : > { %6924 = vmatpush1.bf16.msra.mxu1 %v12270_v11  ;;  %6884 = vmatprep.subr.bf16.mxu0 %v12275_v14  ;;  %v12344_v11 = vld [vmem:[%s14687_s22 + $0xec4] ss:$16 sps:$4 sm:$0xff]   ;;  %v12339_v14 = vld [vmem:[%s14687_s22 + $0xcc0] ss:$16 sps:$4 sm:$0xff]  }
 0x1ba   : > { %6925 = vmatprep.subr.bf16.mxu1 %v12278_v15  ;;  %v12342_v15 = vld [vmem:[%s14687_s22 + $0xec0] ss:$16 sps:$4 sm:$0xff]  }
 0x1bc   : > { %6885 = vmatpush1.bf16.msra.mxu0 %v12273_v16  ;;  %v12347_v16 = vld [vmem:[%s14687_s22 + $0xce4] ss:$16 sps:$4 sm:$0xff]  }
 0x1bd   : > { %6926 = vmatpush1.bf16.msra.mxu1 %v12276_v17  ;;  %6886 = vmatprep.subr.bf16.mxu0 %v12281_v18  ;;  %v12350_v17 = vld [vmem:[%s14687_s22 + $0xee4] ss:$16 sps:$4 sm:$0xff]   ;;  %v12345_v18 = vld [vmem:[%s14687_s22 + $0xce0] ss:$16 sps:$4 sm:$0xff]  }
 0x1be   : > { %6927 = vmatprep.subr.bf16.mxu1 %v12284_v19  ;;  %v12348_v19 = vld [vmem:[%s14687_s22 + $0xee0] ss:$16 sps:$4 sm:$0xff]  }
 0x1c0   : > { %6887 = vmatpush1.bf16.msra.mxu0 %v12279_v20  ;;  %v12353_v20 = vld [vmem:[%s14687_s22 + $0xd04] ss:$16 sps:$4 sm:$0xff]  }
 0x1c1   : > { %6928 = vmatpush1.bf16.msra.mxu1 %v12282_v21  ;;  %6888 = vmatprep.subr.bf16.mxu0 %v12287_v22  ;;  %v12356_v21 = vld [vmem:[%s14687_s22 + $0xf04] ss:$16 sps:$4 sm:$0xff]   ;;  %v12351_v22 = vld [vmem:[%s14687_s22 + $0xd00] ss:$16 sps:$4 sm:$0xff]  }
 0x1c2   : > { %6929 = vmatprep.subr.bf16.mxu1 %v12290_v23  ;;  %v12354_v23 = vld [vmem:[%s14687_s22 + $0xf00] ss:$16 sps:$4 sm:$0xff]  }
 0x1c4   : > { %6889 = vmatpush1.bf16.msra.mxu0 %v12285_v26  ;;  %v12359_v26 = vld [vmem:[%s14687_s22 + $0xd24] ss:$16 sps:$4 sm:$0xff]  }
 0x1c5   : > { %6930 = vmatpush1.bf16.msra.mxu1 %v12288_v27  ;;  %6890 = vmatprep.subr.bf16.mxu0 %v12293_v28  ;;  %v12362_v27 = vld [vmem:[%s14687_s22 + $0xf24] ss:$16 sps:$4 sm:$0xff]   ;;  %v12357_v28 = vld [vmem:[%s14687_s22 + $0xd20] ss:$16 sps:$4 sm:$0xff]  }
 0x1c6   : > { %6931 = vmatprep.subr.bf16.mxu1 %v12296_v29  ;;  %v12360_v29 = vld [vmem:[%s14687_s22 + $0xf20] ss:$16 sps:$4 sm:$0xff]  }
 0x1c8   : > { %6891 = vmatpush1.bf16.msra.mxu0 %v12291_v30  ;;  %v12365_v30 = vld [vmem:[%s14687_s22 + $0xd44] ss:$16 sps:$4 sm:$0xff]  }
 0x1c9   : > { %6932 = vmatpush1.bf16.msra.mxu1 %v12294_v31  ;;  %6892 = vmatprep.subr.bf16.mxu0 %v12299_v32  ;;  %v12368_v31 = vld [vmem:[%s14687_s22 + $0xf44] ss:$16 sps:$4 sm:$0xff]   ;;  %v12363_v32 = vld [vmem:[%s14687_s22 + $0xd40] ss:$16 sps:$4 sm:$0xff]  }
 0x1ca   : > { %6933 = vmatprep.subr.bf16.mxu1 %v12302_v34  ;;  %v12366_v34 = vld [vmem:[%s14687_s22 + $0xf40] ss:$16 sps:$4 sm:$0xff]  }
 0x1cc   : > { %6893 = vmatpush1.bf16.msra.mxu0 %v12297_v35  ;;  %v12371_v35 = vld [vmem:[%s14687_s22 + $0xd64] ss:$16 sps:$4 sm:$0xff]  }
 0x1cd   : > { %6934 = vmatpush1.bf16.msra.mxu1 %v12300_v37  ;;  %6944 = vmatprep.subr.bf16.mxu0 %v12305_v40  ;;  %v12374_v37 = vld [vmem:[%s14687_s22 + $0xf64] ss:$16 sps:$4 sm:$0xff]  }
 0x1ce   : > { %6985 = vmatprep.subr.bf16.mxu1 %v12308_v42  ;;  %v12377_v40 = vld [vmem:[%s14687_s22 + $0xd84] ss:$16 sps:$4 sm:$0xff]  }
 0x1cf   : > { %6895 = vmatmul.mubr.bf16.vlgmr.msra.gmra.mrb[8].mxu0 %v14949_v46  ;;  %v12380_v42 = vld [vmem:[%s14687_s22 + $0xf84] ss:$16 sps:$4 sm:$0xff]  }
 0x1d0   : > { %6936 = vmatmul.mubr.bf16.vlgmr.msra.gmra.mrb[8].mxu1 %v14951_v47  ;;  %6945 = vmatpush1.bf16.msra.mxu0 %v12303_v43  ;;  %v12375_v43 = vld [vmem:[%s14687_s22 + $0xd80] ss:$16 sps:$4 sm:$0xff]  }
 0x1d1   : > { %6986 = vmatpush1.bf16.msra.mxu1 %v12306_v45  ;;  %6946 = vmatprep.subr.bf16.mxu0 %v12311_v50  ;;  %v12378_v45 = vld [vmem:[%s14687_s22 + $0xf80] ss:$16 sps:$4 sm:$0xff]  }
 0x1d2   : > { %6987 = vmatprep.subr.bf16.mxu1 %v12314_v51  ;;  %6976 = vmatprep.mubr.bf16.mxu0 %v14957_v52  ;;  %v12381_v50 = vld [vmem:[%s14687_s22 + $0xda0] ss:$16 sps:$4 sm:$0xff]  }
 0x1d3   : > { %7017 = vmatprep.mubr.bf16.mxu1 %v14959_v54  ;;  %v12384_v51 = vld [vmem:[%s14687_s22 + $0xfa0] ss:$16 sps:$4 sm:$0xff]  }
 0x1d4   : > { %6947 = vmatpush1.bf16.msra.mxu0 %v12309_v55  ;;  %v12389_v55 = vld [vmem:[%s14687_s22 + $0xdc4] ss:$16 sps:$4 sm:$0xff]  }
 0x1d5   : > { %6988 = vmatpush1.bf16.msra.mxu1 %v12312_v57  ;;  %6948 = vmatprep.subr.bf16.mxu0 %v12317_v58  ;;  %v12392_v57 = vld [vmem:[%s14687_s22 + $0xfc4] ss:$16 sps:$4 sm:$0xff]   ;;  %v12387_v58 = vld [vmem:[%s14687_s22 + $0xdc0] ss:$16 sps:$4 sm:$0xff]  }
 0x1d6   : > { %6989 = vmatprep.subr.bf16.mxu1 %v12320_v59  ;;  %v12390_v59 = vld [vmem:[%s14687_s22 + $0xfc0] ss:$16 sps:$4 sm:$0xff]  }
 0x1d8   : > { %6949 = vmatpush1.bf16.msra.mxu0 %v12315_v60  ;;  %v12395_v60 = vld [vmem:[%s14687_s22 + $0xde4] ss:$16 sps:$4 sm:$0xff]  }
 0x1d9   : > { %6990 = vmatpush1.bf16.msra.mxu1 %v12318_v61  ;;  %6950 = vmatprep.subr.bf16.mxu0 %v12323_v62  ;;  %v12398_v61 = vld [vmem:[%s14687_s22 + $0xfe4] ss:$16 sps:$4 sm:$0xff]   ;;  %v12393_v62 = vld [vmem:[%s14687_s22 + $0xde0] ss:$16 sps:$4 sm:$0xff]  }
 0x1da   : > { %6991 = vmatprep.subr.bf16.mxu1 %v12326_v63  ;;  %v12396_v63 = vld [vmem:[%s14687_s22 + $0xfe0] ss:$16 sps:$4 sm:$0xff]  }
 0x1dc   : > { %6951 = vmatpush1.bf16.msra.mxu0 %v12321_v0  ;;  %v498_v0 = vld [vmem:[%s14680_s18 + $0x60] sm:$0xff] }
 0x1dd   : > { %6992 = vmatpush1.bf16.msra.mxu1 %v12324_v1  ;;  %6952 = vmatprep.subr.bf16.mxu0 %v12329_v2  ;;  %v500_v1 = vld [vmem:[%s14680_s18 + $0x70] sm:$0xff] }
 0x1de   : > { %6993 = vmatprep.subr.bf16.mxu1 %v12332_v3  ;;  %v12401_v2 = vld [vmem:[%s14687_s22 + $0x1004] ss:$16 sps:$4 sm:$0xff]  }
 0x1df   : > { %v12404_v3 = vld [vmem:[%s14687_s22 + $0x1204] ss:$16 sps:$4 sm:$0xff]  }
 0x1e0   : > { %6953 = vmatpush1.bf16.msra.mxu0 %v12327_v4  ;;  %v12399_v4 = vld [vmem:[%s14687_s22 + $0x1000] ss:$16 sps:$4 sm:$0xff]  }
 0x1e1   : > { %6994 = vmatpush1.bf16.msra.mxu1 %v12330_v5  ;;  %6954 = vmatprep.subr.bf16.mxu0 %v12335_v6  ;;  %v12402_v5 = vld [vmem:[%s14687_s22 + $0x1200] ss:$16 sps:$4 sm:$0xff]   ;;  %v15029_v6 = vpack.c.bf16 %v498_v0, %v498_v0  ;;  %v12449_v0 = vld [vmem:[%s14687_s22 + $0x1104] ss:$16 sps:$4 sm:$0xff]  }
 0x1e2   : > { %6995 = vmatprep.subr.bf16.mxu1 %v12338_v7  ;;  %v15031_v7 = vpack.c.bf16 %v500_v1, %v500_v1  ;;  %v12452_v1 = vld [vmem:[%s14687_s22 + $0x1304] ss:$16 sps:$4 sm:$0xff]  }
 0x1e4   : > { %6955 = vmatpush1.bf16.msra.mxu0 %v12333_v8  ;;  %v503_v8 = vld [vmem:[%s14680_s18 + $0x88] sm:$0xff] }
 0x1e5   : > { %6996 = vmatpush1.bf16.msra.mxu1 %v12336_v9  ;;  %6956 = vmatprep.subr.bf16.mxu0 %v12341_v10  ;;  %v505_v9 = vld [vmem:[%s14680_s18 + $0x98] sm:$0xff]  ;;  %v12407_v10 = vld [vmem:[%s14687_s22 + $0x1024] ss:$16 sps:$4 sm:$0xff]  }
 0x1e6   : > { %6997 = vmatprep.subr.bf16.mxu1 %v12344_v11  ;;  %v12410_v11 = vld [vmem:[%s14687_s22 + $0x1224] ss:$16 sps:$4 sm:$0xff]  }
 0x1e8   : > { %6957 = vmatpush1.bf16.msra.mxu0 %v12339_v14  ;;  %v15037_v14 = vpack.c.bf16 %v503_v8, %v503_v8  ;;  %v12453_v8 = vld [vmem:[%s14687_s22 + $0x1120] ss:$16 sps:$4 sm:$0xff]  }
 0x1e9   : > { %6998 = vmatpush1.bf16.msra.mxu1 %v12342_v15  ;;  %6958 = vmatprep.subr.bf16.mxu0 %v12347_v16  ;;  %v15039_v15 = vpack.c.bf16 %v505_v9, %v505_v9  ;;  %v12405_v16 = vld [vmem:[%s14687_s22 + $0x1020] ss:$16 sps:$4 sm:$0xff]  }
 0x1ea   : > { %6999 = vmatprep.subr.bf16.mxu1 %v12350_v17  ;;  %v12408_v17 = vld [vmem:[%s14687_s22 + $0x1220] ss:$16 sps:$4 sm:$0xff]  }
 0x1eb   : > { %v12456_v9 = vld [vmem:[%s14687_s22 + $0x1320] ss:$16 sps:$4 sm:$0xff]  }
 0x1ec   : > { %6959 = vmatpush1.bf16.msra.mxu0 %v12345_v18  ;;  %v12413_v18 = vld [vmem:[%s14687_s22 + $0x1044] ss:$16 sps:$4 sm:$0xff]  }
 0x1ed   : > { %7000 = vmatpush1.bf16.msra.mxu1 %v12348_v19  ;;  %6960 = vmatprep.subr.bf16.mxu0 %v12353_v20  ;;  %v12416_v19 = vld [vmem:[%s14687_s22 + $0x1244] ss:$16 sps:$4 sm:$0xff]   ;;  %v12411_v20 = vld [vmem:[%s14687_s22 + $0x1040] ss:$16 sps:$4 sm:$0xff]  }
 0x1ee   : > { %7001 = vmatprep.subr.bf16.mxu1 %v12356_v21  ;;  %v12414_v21 = vld [vmem:[%s14687_s22 + $0x1240] ss:$16 sps:$4 sm:$0xff]  }
 0x1f0   : > { %6961 = vmatpush1.bf16.msra.mxu0 %v12351_v22  ;;  %v12419_v22 = vld [vmem:[%s14687_s22 + $0x1064] ss:$16 sps:$4 sm:$0xff]  }
 0x1f1   : > { %7002 = vmatpush1.bf16.msra.mxu1 %v12354_v23  ;;  %6962 = vmatprep.subr.bf16.mxu0 %v12359_v26  ;;  %v12422_v23 = vld [vmem:[%s14687_s22 + $0x1264] ss:$16 sps:$4 sm:$0xff]   ;;  %v12417_v26 = vld [vmem:[%s14687_s22 + $0x1060] ss:$16 sps:$4 sm:$0xff]  }
 0x1f2   : > { %7003 = vmatprep.subr.bf16.mxu1 %v12362_v27  ;;  %v12420_v27 = vld [vmem:[%s14687_s22 + $0x1260] ss:$16 sps:$4 sm:$0xff]  }
 0x1f4   : > { %6963 = vmatpush1.bf16.msra.mxu0 %v12357_v28  ;;  %v12425_v28 = vld [vmem:[%s14687_s22 + $0x1084] ss:$16 sps:$4 sm:$0xff]  }
 0x1f5   : > { %7004 = vmatpush1.bf16.msra.mxu1 %v12360_v29  ;;  %6964 = vmatprep.subr.bf16.mxu0 %v12365_v30  ;;  %v12428_v29 = vld [vmem:[%s14687_s22 + $0x1284] ss:$16 sps:$4 sm:$0xff]   ;;  %v12423_v30 = vld [vmem:[%s14687_s22 + $0x1080] ss:$16 sps:$4 sm:$0xff]  }
 0x1f6   : > { %7005 = vmatprep.subr.bf16.mxu1 %v12368_v31  ;;  %v12426_v31 = vld [vmem:[%s14687_s22 + $0x1280] ss:$16 sps:$4 sm:$0xff]  }
 0x1f8   : > { %6965 = vmatpush1.bf16.msra.mxu0 %v12363_v32  ;;  %v12431_v32 = vld [vmem:[%s14687_s22 + $0x10a4] ss:$16 sps:$4 sm:$0xff]  }
 0x1f9   : > { %7006 = vmatpush1.bf16.msra.mxu1 %v12366_v34  ;;  %6966 = vmatprep.subr.bf16.mxu0 %v12371_v35  ;;  %v12434_v34 = vld [vmem:[%s14687_s22 + $0x12a4] ss:$16 sps:$4 sm:$0xff]   ;;  %v12429_v35 = vld [vmem:[%s14687_s22 + $0x10a0] ss:$16 sps:$4 sm:$0xff]  }
 0x1fa   : > { %7007 = vmatprep.subr.bf16.mxu1 %v12374_v37  ;;  %v12432_v37 = vld [vmem:[%s14687_s22 + $0x12a0] ss:$16 sps:$4 sm:$0xff]  }
 0x1fc   : > { %6967 = vmatpush1.bf16.msra.mxu0 %v12369_v38  ;;  %v12437_v38 = vld [vmem:[%s14687_s22 + $0x10c4] ss:$16 sps:$4 sm:$0xff]  }
 0x1fd   : > { %7008 = vmatpush1.bf16.msra.mxu1 %v12372_v39  ;;  %6968 = vmatprep.subr.bf16.mxu0 %v12377_v40  ;;  %v12440_v39 = vld [vmem:[%s14687_s22 + $0x12c4] ss:$16 sps:$4 sm:$0xff]  }
 0x1fe   : > { %7009 = vmatprep.subr.bf16.mxu1 %v12380_v42 }
 0x200   : > { %6969 = vmatpush1.bf16.msra.mxu0 %v12375_v43  ;;  %v12435_v43 = vld [vmem:[%s14687_s22 + $0x10c0] ss:$16 sps:$4 sm:$0xff]  }
 0x201   : > { %7010 = vmatpush1.bf16.msra.mxu1 %v12378_v45  ;;  %6970 = vmatprep.subr.bf16.mxu0 %v12383_v48 }
 0x202   : > { %7011 = vmatprep.subr.bf16.mxu1 %v12386_v49 }
 0x204   : > { %6971 = vmatpush1.bf16.msra.mxu0 %v12381_v50  ;;  %v12438_v50 = vld [vmem:[%s14687_s22 + $0x12c0] ss:$16 sps:$4 sm:$0xff]  }
 0x205   : > { %7012 = vmatpush1.bf16.msra.mxu1 %v12384_v51  ;;  %6972 = vmatprep.subr.bf16.mxu0 %v12389_v55 }
 0x206   : > { %7013 = vmatprep.subr.bf16.mxu1 %v12392_v57 }
 0x208   : > { %6973 = vmatpush1.bf16.msra.mxu0 %v12387_v58  ;;  %v12443_v58 = vld [vmem:[%s14687_s22 + $0x10e4] ss:$16 sps:$4 sm:$0xff]  }
 0x209   : > { %7014 = vmatpush1.bf16.msra.mxu1 %v12390_v59  ;;  %6974 = vmatprep.subr.bf16.mxu0 %v12395_v60 }
 0x20a   : > { %7015 = vmatprep.subr.bf16.mxu1 %v12398_v61  ;;  %v12446_v61 = vld [vmem:[%s14687_s22 + $0x12e4] ss:$16 sps:$4 sm:$0xff]  }
 0x20c   : > { %6975 = vmatpush1.bf16.msra.mxu0 %v12393_v62  ;;  %v12441_v62 = vld [vmem:[%s14687_s22 + $0x10e0] ss:$16 sps:$4 sm:$0xff]  }
 0x20d   : > { %7016 = vmatpush1.bf16.msra.mxu1 %v12396_v63  ;;  %7026 = vmatprep.subr.bf16.mxu0 %v12401_v2  ;;  %v12444_v63 = vld [vmem:[%s14687_s22 + $0x12e0] ss:$16 sps:$4 sm:$0xff]  }
 0x20e   : > { %7067 = vmatprep.subr.bf16.mxu1 %v12404_v3  ;;  %v12447_v2 = vld [vmem:[%s14687_s22 + $0x1100] ss:$16 sps:$4 sm:$0xff]  }
 0x20f   : > { %6977 = vmatmul.mubr.bf16.vlgmr.msra.gmra.mrb[12].mxu0 %v15029_v6  ;;  %v12450_v3 = vld [vmem:[%s14687_s22 + $0x1300] ss:$16 sps:$4 sm:$0xff]  }
 0x210   : > { %7018 = vmatmul.mubr.bf16.vlgmr.msra.gmra.mrb[12].mxu1 %v15031_v7  ;;  %7027 = vmatpush1.bf16.msra.mxu0 %v12399_v4  ;;  %v12455_v4 = vld [vmem:[%s14687_s22 + $0x1124] ss:$16 sps:$4 sm:$0xff]  }
 0x211   : > { %7068 = vmatpush1.bf16.msra.mxu1 %v12402_v5  ;;  %7028 = vmatprep.subr.bf16.mxu0 %v12407_v10  ;;  %v12458_v5 = vld [vmem:[%s14687_s22 + $0x1324] ss:$16 sps:$4 sm:$0xff]  }
 0x212   : > { %7069 = vmatprep.subr.bf16.mxu1 %v12410_v11  ;;  %7058 = vmatprep.mubr.bf16.mxu0 %v15037_v14  ;;  %v12461_v10 = vld [vmem:[%s14687_s22 + $0x1144] ss:$16 sps:$4 sm:$0xff]  }
 0x213   : > { %7099 = vmatprep.mubr.bf16.mxu1 %v15039_v15  ;;  %v12464_v11 = vld [vmem:[%s14687_s22 + $0x1344] ss:$16 sps:$4 sm:$0xff]  }
 0x214   : > { %7029 = vmatpush1.bf16.msra.mxu0 %v12405_v16  ;;  %v12459_v16 = vld [vmem:[%s14687_s22 + $0x1140] ss:$16 sps:$4 sm:$0xff]  }
 0x215   : > { %7070 = vmatpush1.bf16.msra.mxu1 %v12408_v17  ;;  %7030 = vmatprep.subr.bf16.mxu0 %v12413_v18  ;;  %v12462_v17 = vld [vmem:[%s14687_s22 + $0x1340] ss:$16 sps:$4 sm:$0xff]   ;;  %v12467_v18 = vld [vmem:[%s14687_s22 + $0x1164] ss:$16 sps:$4 sm:$0xff]  }
 0x216   : > { %7071 = vmatprep.subr.bf16.mxu1 %v12416_v19  ;;  %v12470_v19 = vld [vmem:[%s14687_s22 + $0x1364] ss:$16 sps:$4 sm:$0xff]  }
 0x218   : > { %7031 = vmatpush1.bf16.msra.mxu0 %v12411_v20  ;;  %v12465_v20 = vld [vmem:[%s14687_s22 + $0x1160] ss:$16 sps:$4 sm:$0xff]  }
 0x219   : > { %7072 = vmatpush1.bf16.msra.mxu1 %v12414_v21  ;;  %7032 = vmatprep.subr.bf16.mxu0 %v12419_v22  ;;  %v12468_v21 = vld [vmem:[%s14687_s22 + $0x1360] ss:$16 sps:$4 sm:$0xff]   ;;  %v12473_v22 = vld [vmem:[%s14687_s22 + $0x1184] ss:$16 sps:$4 sm:$0xff]  }
 0x21a   : > { %7073 = vmatprep.subr.bf16.mxu1 %v12422_v23  ;;  %v12476_v23 = vld [vmem:[%s14687_s22 + $0x1384] ss:$16 sps:$4 sm:$0xff]  }
 0x21c   : > { %7033 = vmatpush1.bf16.msra.mxu0 %v12417_v26  ;;  %v12471_v26 = vld [vmem:[%s14687_s22 + $0x1180] ss:$16 sps:$4 sm:$0xff]  }
 0x21d   : > { %7074 = vmatpush1.bf16.msra.mxu1 %v12420_v27  ;;  %7034 = vmatprep.subr.bf16.mxu0 %v12425_v28  ;;  %v12474_v27 = vld [vmem:[%s14687_s22 + $0x1380] ss:$16 sps:$4 sm:$0xff]   ;;  %v12479_v28 = vld [vmem:[%s14687_s22 + $0x11a4] ss:$16 sps:$4 sm:$0xff]  }
 0x21e   : > { %7075 = vmatprep.subr.bf16.mxu1 %v12428_v29  ;;  %v12482_v29 = vld [vmem:[%s14687_s22 + $0x13a4] ss:$16 sps:$4 sm:$0xff]  }
 0x220   : > { %7035 = vmatpush1.bf16.msra.mxu0 %v12423_v30  ;;  %v12477_v30 = vld [vmem:[%s14687_s22 + $0x11a0] ss:$16 sps:$4 sm:$0xff]  }
 0x221   : > { %7076 = vmatpush1.bf16.msra.mxu1 %v12426_v31  ;;  %7036 = vmatprep.subr.bf16.mxu0 %v12431_v32  ;;  %v12480_v31 = vld [vmem:[%s14687_s22 + $0x13a0] ss:$16 sps:$4 sm:$0xff]   ;;  %v12485_v32 = vld [vmem:[%s14687_s22 + $0x11c4] ss:$16 sps:$4 sm:$0xff]  }
 0x222   : > { %7077 = vmatprep.subr.bf16.mxu1 %v12434_v34  ;;  %v6732_v40 = vpop.f32.mrb[0].mxu0  ;;  %v12488_v34 = vld [vmem:[%s14687_s22 + $0x13c4] ss:$16 sps:$4 sm:$0xff]  }
 0x223   : > { %v6773_v42 = vpop.f32.mrb[0].mxu1  ;;  %v6734_v48 = vpop.f32.mrb[1].mxu0 }
 0x224   : > { %v15066_v45 = vadd.f32 %v6773_v42, %v6732_v40  ;;  %v6775_v49 = vpop.f32.mrb[1].mxu1  ;;  %v6736_v55 = vpop.f32.mrb[2].mxu0  ;;  %7037 = vmatpush1.bf16.msra.mxu0 %v12429_v35  ;;  %v12483_v35 = vld [vmem:[%s14687_s22 + $0x11c0] ss:$16 sps:$4 sm:$0xff]  }
 0x225   : > { %v15069_v51 = vadd.f32 %v6775_v49, %v6734_v48  ;;  %v6777_v57 = vpop.f32.mrb[2].mxu1  ;;  %7078 = vmatpush1.bf16.msra.mxu1 %v12432_v37  ;;  %v6737_v59 = vpop.f32.mrb[3].mxu0  ;;  %7038 = vmatprep.subr.bf16.mxu0 %v12437_v38  ;;  %v12486_v37 = vld [vmem:[%s14687_s22 + $0x13c0] ss:$16 sps:$4 sm:$0xff]   ;;  %v12491_v38 = vld [vmem:[%s14687_s22 + $0x11e4] ss:$16 sps:$4 sm:$0xff]  }
 0x226   : > { %v6778_v60 = vpop.f32.mrb[3].mxu1  ;;  %7079 = vmatprep.subr.bf16.mxu1 %v12440_v39  ;;  %v12494_v39 = vld [vmem:[%s14687_s22 + $0x13e4] ss:$16 sps:$4 sm:$0xff]   ;;  %v12489_v40 = vld [vmem:[%s14687_s22 + $0x11e0] ss:$16 sps:$4 sm:$0xff]   ;;  %v509_v59 = vld [vmem:[%s14680_s18 + $0xb8] sm:$0xff] }
 0x227   : > { %v12492_v42 = vld [vmem:[%s14687_s22 + $0x13e0] ss:$16 sps:$4 sm:$0xff]   ;;  %v12497_v49 = vld [vmem:[%s14687_s22 + $0x1404] ss:$16 sps:$4 sm:$0xff]  }
 0x228   : > { %7039 = vmatpush1.bf16.msra.mxu0 %v12435_v43  ;;  %v502_v43 = vld [vmem:[%s14680_s18 + $0x80] sm:$0xff]  ;;  %v504_v48 = vld [vmem:[%s14680_s18 + $0x90] sm:$0xff] }
 0x229   : > { %7080 = vmatpush1.bf16.msra.mxu1 %v12438_v50  ;;  %7040 = vmatprep.subr.bf16.mxu0 %v12443_v58  ;;  %v12500_v50 = vld [vmem:[%s14687_s22 + $0x1604] ss:$16 sps:$4 sm:$0xff]   ;;  %v15111_v55 = vpack.c.bf16 %v502_v43, %v502_v43  ;;  %v15113_v57 = vpack.c.bf16 %v504_v48, %v504_v48  ;;  %v507_v58 = vld [vmem:[%s14680_s18 + $0xa8] sm:$0xff]  ;;  %v12495_v60 = vld [vmem:[%s14687_s22 + $0x1400] ss:$16 sps:$4 sm:$0xff]  }
 0x22a   : > { %7081 = vmatprep.subr.bf16.mxu1 %v12446_v61  ;;  %v12498_v61 = vld [vmem:[%s14687_s22 + $0x1600] ss:$16 sps:$4 sm:$0xff]  }
 0x22c   : > { %7041 = vmatpush1.bf16.msra.mxu0 %v12441_v62  ;;  %v12503_v62 = vld [vmem:[%s14687_s22 + $0x1424] ss:$16 sps:$4 sm:$0xff]  }
 0x22d   : > { %7082 = vmatpush1.bf16.msra.mxu1 %v12444_v63  ;;  %7042 = vmatprep.subr.bf16.mxu0 %v12449_v0  ;;  %v12506_v63 = vld [vmem:[%s14687_s22 + $0x1624] ss:$16 sps:$4 sm:$0xff]   ;;  %v15121_v0 = vpack.c.bf16 %v507_v58, %v507_v58 }
 0x22e   : > { %7083 = vmatprep.subr.bf16.mxu1 %v12452_v1  ;;  %v15123_v1 = vpack.c.bf16 %v509_v59, %v509_v59  ;;  %v12540_v59 = vld [vmem:[%s14687_s22 + $0x16e0] ss:$16 sps:$4 sm:$0xff]  }
 0x230   : > { %7043 = vmatpush1.bf16.msra.mxu0 %v12447_v2  ;;  %v12501_v2 = vld [vmem:[%s14687_s22 + $0x1420] ss:$16 sps:$4 sm:$0xff]  }
 0x231   : > { %7084 = vmatpush1.bf16.msra.mxu1 %v12450_v3  ;;  %7044 = vmatprep.subr.bf16.mxu0 %v12455_v4  ;;  %v12504_v3 = vld [vmem:[%s14687_s22 + $0x1620] ss:$16 sps:$4 sm:$0xff]   ;;  %v12509_v4 = vld [vmem:[%s14687_s22 + $0x1444] ss:$16 sps:$4 sm:$0xff]  }
 0x232   : > { %7085 = vmatprep.subr.bf16.mxu1 %v12458_v5  ;;  %v12512_v5 = vld [vmem:[%s14687_s22 + $0x1644] ss:$16 sps:$4 sm:$0xff]  }
 0x234   : > { %7045 = vmatpush1.bf16.msra.mxu0 %v12453_v8  ;;  %v12507_v8 = vld [vmem:[%s14687_s22 + $0x1440] ss:$16 sps:$4 sm:$0xff]  }
 0x235   : > { %7086 = vmatpush1.bf16.msra.mxu1 %v12456_v9  ;;  %7046 = vmatprep.subr.bf16.mxu0 %v12461_v10  ;;  %v12510_v9 = vld [vmem:[%s14687_s22 + $0x1640] ss:$16 sps:$4 sm:$0xff]   ;;  %v12515_v10 = vld [vmem:[%s14687_s22 + $0x1464] ss:$16 sps:$4 sm:$0xff]  }
 0x236   : > { %7087 = vmatprep.subr.bf16.mxu1 %v12464_v11  ;;  %v12518_v11 = vld [vmem:[%s14687_s22 + $0x1664] ss:$16 sps:$4 sm:$0xff]  }
 0x238   : > { %7047 = vmatpush1.bf16.msra.mxu0 %v12459_v16  ;;  %v12513_v16 = vld [vmem:[%s14687_s22 + $0x1460] ss:$16 sps:$4 sm:$0xff]  }
 0x239   : > { %7088 = vmatpush1.bf16.msra.mxu1 %v12462_v17  ;;  %7048 = vmatprep.subr.bf16.mxu0 %v12467_v18  ;;  %v12516_v17 = vld [vmem:[%s14687_s22 + $0x1660] ss:$16 sps:$4 sm:$0xff]   ;;  %v12521_v18 = vld [vmem:[%s14687_s22 + $0x1484] ss:$16 sps:$4 sm:$0xff]  }
 0x23a   : > { %7089 = vmatprep.subr.bf16.mxu1 %v12470_v19  ;;  %v12524_v19 = vld [vmem:[%s14687_s22 + $0x1684] ss:$16 sps:$4 sm:$0xff]  }
 0x23c   : > { %7049 = vmatpush1.bf16.msra.mxu0 %v12465_v20  ;;  %v12519_v20 = vld [vmem:[%s14687_s22 + $0x1480] ss:$16 sps:$4 sm:$0xff]  }
 0x23d   : > { %7090 = vmatpush1.bf16.msra.mxu1 %v12468_v21  ;;  %7050 = vmatprep.subr.bf16.mxu0 %v12473_v22  ;;  %v12522_v21 = vld [vmem:[%s14687_s22 + $0x1680] ss:$16 sps:$4 sm:$0xff]   ;;  %v12527_v22 = vld [vmem:[%s14687_s22 + $0x14a4] ss:$16 sps:$4 sm:$0xff]  }
 0x23e   : > { %7091 = vmatprep.subr.bf16.mxu1 %v12476_v23  ;;  %v12530_v23 = vld [vmem:[%s14687_s22 + $0x16a4] ss:$16 sps:$4 sm:$0xff]  }
 0x240   : > { %7051 = vmatpush1.bf16.msra.mxu0 %v12471_v26  ;;  %v12525_v26 = vld [vmem:[%s14687_s22 + $0x14a0] ss:$16 sps:$4 sm:$0xff]  }
 0x241   : > { %7092 = vmatpush1.bf16.msra.mxu1 %v12474_v27  ;;  %7052 = vmatprep.subr.bf16.mxu0 %v12479_v28  ;;  %v12528_v27 = vld [vmem:[%s14687_s22 + $0x16a0] ss:$16 sps:$4 sm:$0xff]   ;;  %v12533_v28 = vld [vmem:[%s14687_s22 + $0x14c4] ss:$16 sps:$4 sm:$0xff]  }
 0x242   : > { %7093 = vmatprep.subr.bf16.mxu1 %v12482_v29  ;;  %v12536_v29 = vld [vmem:[%s14687_s22 + $0x16c4] ss:$16 sps:$4 sm:$0xff]  }
 0x244   : > { %7053 = vmatpush1.bf16.msra.mxu0 %v12477_v30 }
 0x245   : > { %7094 = vmatpush1.bf16.msra.mxu1 %v12480_v31  ;;  %7054 = vmatprep.subr.bf16.mxu0 %v12485_v32  ;;  %v12531_v32 = vld [vmem:[%s14687_s22 + $0x14c0] ss:$16 sps:$4 sm:$0xff]  }
 0x246   : > { %7095 = vmatprep.subr.bf16.mxu1 %v12488_v34  ;;  %v12534_v34 = vld [vmem:[%s14687_s22 + $0x16c0] ss:$16 sps:$4 sm:$0xff]  }
 0x248   : > { %7055 = vmatpush1.bf16.msra.mxu0 %v12483_v35 }
 0x249   : > { %7096 = vmatpush1.bf16.msra.mxu1 %v12486_v37  ;;  %7056 = vmatprep.subr.bf16.mxu0 %v12491_v38 }
 0x24a   : > { %7097 = vmatprep.subr.bf16.mxu1 %v12494_v39 }
 0x24c   : > { %7057 = vmatpush1.bf16.msra.mxu0 %v12489_v40 }
 0x24d   : > { %7098 = vmatpush1.bf16.msra.mxu1 %v12492_v42  ;;  %7108 = vmatprep.subr.bf16.mxu0 %v12497_v49 }
 0x24e   : > { %7149 = vmatprep.subr.bf16.mxu1 %v12500_v50  ;;  %v12542_v50 = vld [vmem:[%s14687_s22 + $0x16e4] ss:$16 sps:$4 sm:$0xff]  }
 0x24f   : > { %7059 = vmatmul.mubr.bf16.vlgmr.msra.gmra.mrb[16].mxu0 %v15111_v55 }
 0x250   : > { %7100 = vmatmul.mubr.bf16.vlgmr.msra.gmra.mrb[16].mxu1 %v15113_v57  ;;  %7109 = vmatpush1.bf16.msra.mxu0 %v12495_v60  ;;  %v12545_v60 = vld [vmem:[%s14687_s22 + $0x1504] ss:$16 sps:$4 sm:$0xff]  }
 0x251   : > { %7150 = vmatpush1.bf16.msra.mxu1 %v12498_v61  ;;  %7110 = vmatprep.subr.bf16.mxu0 %v12503_v62  ;;  %v12548_v61 = vld [vmem:[%s14687_s22 + $0x1704] ss:$16 sps:$4 sm:$0xff]   ;;  %v12543_v62 = vld [vmem:[%s14687_s22 + $0x1500] ss:$16 sps:$4 sm:$0xff]  }
 0x252   : > { %7151 = vmatprep.subr.bf16.mxu1 %v12506_v63  ;;  %7140 = vmatprep.mubr.bf16.mxu0 %v15121_v0  ;;  %v12546_v63 = vld [vmem:[%s14687_s22 + $0x1700] ss:$16 sps:$4 sm:$0xff]  }
 0x253   : > { %7181 = vmatprep.mubr.bf16.mxu1 %v15123_v1 }
 0x254   : > { %7111 = vmatpush1.bf16.msra.mxu0 %v12501_v2  ;;  %v12551_v2 = vld [vmem:[%s14687_s22 + $0x1524] ss:$16 sps:$4 sm:$0xff]  }
 0x255   : > { %7152 = vmatpush1.bf16.msra.mxu1 %v12504_v3  ;;  %7112 = vmatprep.subr.bf16.mxu0 %v12509_v4  ;;  %v12554_v3 = vld [vmem:[%s14687_s22 + $0x1724] ss:$16 sps:$4 sm:$0xff]   ;;  %v12549_v4 = vld [vmem:[%s14687_s22 + $0x1520] ss:$16 sps:$4 sm:$0xff]  }
 0x256   : > { %7153 = vmatprep.subr.bf16.mxu1 %v12512_v5  ;;  %v12552_v5 = vld [vmem:[%s14687_s22 + $0x1720] ss:$16 sps:$4 sm:$0xff]  }
 0x258   : > { %7113 = vmatpush1.bf16.msra.mxu0 %v12507_v8  ;;  %v12557_v8 = vld [vmem:[%s14687_s22 + $0x1544] ss:$16 sps:$4 sm:$0xff]  }
 0x259   : > { %7154 = vmatpush1.bf16.msra.mxu1 %v12510_v9  ;;  %7114 = vmatprep.subr.bf16.mxu0 %v12515_v10  ;;  %v12560_v9 = vld [vmem:[%s14687_s22 + $0x1744] ss:$16 sps:$4 sm:$0xff]   ;;  %v12555_v10 = vld [vmem:[%s14687_s22 + $0x1540] ss:$16 sps:$4 sm:$0xff]  }
 0x25a   : > { %7155 = vmatprep.subr.bf16.mxu1 %v12518_v11  ;;  %v12558_v11 = vld [vmem:[%s14687_s22 + $0x1740] ss:$16 sps:$4 sm:$0xff]  }
 0x25c   : > { %7115 = vmatpush1.bf16.msra.mxu0 %v12513_v16  ;;  %v12563_v16 = vld [vmem:[%s14687_s22 + $0x1564] ss:$16 sps:$4 sm:$0xff]  }
 0x25d   : > { %7156 = vmatpush1.bf16.msra.mxu1 %v12516_v17  ;;  %7116 = vmatprep.subr.bf16.mxu0 %v12521_v18  ;;  %v12566_v17 = vld [vmem:[%s14687_s22 + $0x1764] ss:$16 sps:$4 sm:$0xff]   ;;  %v12561_v18 = vld [vmem:[%s14687_s22 + $0x1560] ss:$16 sps:$4 sm:$0xff]  }
 0x25e   : > { %7157 = vmatprep.subr.bf16.mxu1 %v12524_v19  ;;  %v12564_v19 = vld [vmem:[%s14687_s22 + $0x1760] ss:$16 sps:$4 sm:$0xff]  }
 0x260   : > { %7117 = vmatpush1.bf16.msra.mxu0 %v12519_v20  ;;  %v12569_v20 = vld [vmem:[%s14687_s22 + $0x1584] ss:$16 sps:$4 sm:$0xff]  }
 0x261   : > { %7158 = vmatpush1.bf16.msra.mxu1 %v12522_v21  ;;  %7118 = vmatprep.subr.bf16.mxu0 %v12527_v22  ;;  %v12572_v21 = vld [vmem:[%s14687_s22 + $0x1784] ss:$16 sps:$4 sm:$0xff]   ;;  %v12567_v22 = vld [vmem:[%s14687_s22 + $0x1580] ss:$16 sps:$4 sm:$0xff]  }
 0x262   : > { %7159 = vmatprep.subr.bf16.mxu1 %v12530_v23  ;;  %v6814_v30 = vpop.f32.mrb[4].mxu0  ;;  %v12570_v23 = vld [vmem:[%s14687_s22 + $0x1780] ss:$16 sps:$4 sm:$0xff]  }
 0x263   : > { %v6855_v31 = vpop.f32.mrb[4].mxu1  ;;  %v6815_v35 = vadd.f32 %v6814_v30, %v15066_v45  ;;  %v6816_v37 = vpop.f32.mrb[5].mxu0  ;;  %v12539_v45 = vld [vmem:[%s14687_s22 + $0x14e4] ss:$16 sps:$4 sm:$0xff]  }
 0x264   : > { %v6857_v38 = vpop.f32.mrb[5].mxu1  ;;  %v6817_v39 = vadd.f32 %v6816_v37, %v15069_v51  ;;  %v6818_v40 = vpop.f32.mrb[6].mxu0  ;;  %7119 = vmatpush1.bf16.msra.mxu0 %v12525_v26  ;;  %v12537_v51 = vld [vmem:[%s14687_s22 + $0x14e0] ss:$16 sps:$4 sm:$0xff]   ;;  %v12575_v26 = vld [vmem:[%s14687_s22 + $0x15a4] ss:$16 sps:$4 sm:$0xff]  }
 0x265   : > { %v6859_v42 = vpop.f32.mrb[6].mxu1  ;;  %7160 = vmatpush1.bf16.msra.mxu1 %v12528_v27  ;;  %v15153_v43 = vadd.f32 %v6855_v31, %v6815_v35  ;;  %v6819_v48 = vpop.f32.mrb[7].mxu0  ;;  %7120 = vmatprep.subr.bf16.mxu0 %v12533_v28  ;;  %v12578_v27 = vld [vmem:[%s14687_s22 + $0x17a4] ss:$16 sps:$4 sm:$0xff]   ;;  %v12573_v28 = vld [vmem:[%s14687_s22 + $0x15a0] ss:$16 sps:$4 sm:$0xff]  }
 0x266   : > { %v6860_v49 = vpop.f32.mrb[7].mxu1  ;;  %7161 = vmatprep.subr.bf16.mxu1 %v12536_v29  ;;  %v15157_v58 = vadd.f32 %v6857_v38, %v6817_v39  ;;  %v12576_v29 = vld [vmem:[%s14687_s22 + $0x17a0] ss:$16 sps:$4 sm:$0xff]   ;;  %v12581_v30 = vld [vmem:[%s14687_s22 + $0x15c4] ss:$16 sps:$4 sm:$0xff]  }
 0x267   : > { %v12584_v31 = vld [vmem:[%s14687_s22 + $0x17c4] ss:$16 sps:$4 sm:$0xff]   ;;  %v12585_v38 = vld [vmem:[%s14687_s22 + $0x15e0] ss:$16 sps:$4 sm:$0xff]  }
 0x268   : > { %7121 = vmatpush1.bf16.msra.mxu0 %v12531_v32  ;;  %v12579_v32 = vld [vmem:[%s14687_s22 + $0x15c0] ss:$16 sps:$4 sm:$0xff]   ;;  %v12587_v35 = vld [vmem:[%s14687_s22 + $0x15e4] ss:$16 sps:$4 sm:$0xff]  }
 0x269   : > { %7162 = vmatpush1.bf16.msra.mxu1 %v12534_v34  ;;  %7122 = vmatprep.subr.bf16.mxu0 %v12539_v45  ;;  %v12582_v34 = vld [vmem:[%s14687_s22 + $0x17c0] ss:$16 sps:$4 sm:$0xff]   ;;  %v12590_v37 = vld [vmem:[%s14687_s22 + $0x17e4] ss:$16 sps:$4 sm:$0xff]  }
 0x26a   : > { %7163 = vmatprep.subr.bf16.mxu1 %v12542_v50  ;;  %v12588_v39 = vld [vmem:[%s14687_s22 + $0x17e0] ss:$16 sps:$4 sm:$0xff]   ;;  %v12593_v48 = vld [vmem:[%s14687_s22 + $0x1804] ss:$16 sps:$4 sm:$0xff]  }
 0x26b   : > { %v506_v40 = vld [vmem:[%s14680_s18 + $0xa0] sm:$0xff]  ;;  %v508_v42 = vld [vmem:[%s14680_s18 + $0xb0] sm:$0xff] }
 0x26c   : > { %7123 = vmatpush1.bf16.msra.mxu0 %v12537_v51  ;;  %v12596_v49 = vld [vmem:[%s14687_s22 + $0x1a04] ss:$16 sps:$4 sm:$0xff]   ;;  %v15197_v45 = vpack.c.bf16 %v506_v40, %v506_v40  ;;  %v15199_v50 = vpack.c.bf16 %v508_v42, %v508_v42  ;;  %v511_v51 = vld [vmem:[%s14680_s18 + $0xc8] sm:$0xff] }
 0x26d   : > { %7164 = vmatpush1.bf16.msra.mxu1 %v12540_v59  ;;  %7124 = vmatprep.subr.bf16.mxu0 %v12545_v60  ;;  %v513_v59 = vld [vmem:[%s14680_s18 + $0xd8] sm:$0xff]  ;;  %v12591_v60 = vld [vmem:[%s14687_s22 + $0x1800] ss:$16 sps:$4 sm:$0xff]  }
 0x26e   : > { %7165 = vmatprep.subr.bf16.mxu1 %v12548_v61  ;;  %v12594_v61 = vld [vmem:[%s14687_s22 + $0x1a00] ss:$16 sps:$4 sm:$0xff]  }
 0x270   : > { %7125 = vmatpush1.bf16.msra.mxu0 %v12543_v62  ;;  %v12599_v62 = vld [vmem:[%s14687_s22 + $0x1824] ss:$16 sps:$4 sm:$0xff]  }
 0x271   : > { %7166 = vmatpush1.bf16.msra.mxu1 %v12546_v63  ;;  %7126 = vmatprep.subr.bf16.mxu0 %v12551_v2  ;;  %v12602_v63 = vld [vmem:[%s14687_s22 + $0x1a24] ss:$16 sps:$4 sm:$0xff]   ;;  %v15207_v2 = vpack.c.bf16 %v511_v51, %v511_v51 }
 0x272   : > { %7167 = vmatprep.subr.bf16.mxu1 %v12554_v3  ;;  %v15209_v3 = vpack.c.bf16 %v513_v59, %v513_v59 }
 0x274   : > { %7127 = vmatpush1.bf16.msra.mxu0 %v12549_v4  ;;  %v12597_v4 = vld [vmem:[%s14687_s22 + $0x1820] ss:$16 sps:$4 sm:$0xff]  }
 0x275   : > { %7168 = vmatpush1.bf16.msra.mxu1 %v12552_v5  ;;  %7128 = vmatprep.subr.bf16.mxu0 %v12557_v8  ;;  %v12600_v5 = vld [vmem:[%s14687_s22 + $0x1a20] ss:$16 sps:$4 sm:$0xff]   ;;  %v12605_v8 = vld [vmem:[%s14687_s22 + $0x1844] ss:$16 sps:$4 sm:$0xff]  }
 0x276   : > { %7169 = vmatprep.subr.bf16.mxu1 %v12560_v9  ;;  %v12608_v9 = vld [vmem:[%s14687_s22 + $0x1a44] ss:$16 sps:$4 sm:$0xff]  }
 0x278   : > { %7129 = vmatpush1.bf16.msra.mxu0 %v12555_v10  ;;  %v12603_v10 = vld [vmem:[%s14687_s22 + $0x1840] ss:$16 sps:$4 sm:$0xff]  }
 0x279   : > { %7170 = vmatpush1.bf16.msra.mxu1 %v12558_v11  ;;  %7130 = vmatprep.subr.bf16.mxu0 %v12563_v16  ;;  %v12606_v11 = vld [vmem:[%s14687_s22 + $0x1a40] ss:$16 sps:$4 sm:$0xff]   ;;  %v12611_v16 = vld [vmem:[%s14687_s22 + $0x1864] ss:$16 sps:$4 sm:$0xff]  }
 0x27a   : > { %7171 = vmatprep.subr.bf16.mxu1 %v12566_v17  ;;  %v12614_v17 = vld [vmem:[%s14687_s22 + $0x1a64] ss:$16 sps:$4 sm:$0xff]  }
 0x27c   : > { %7131 = vmatpush1.bf16.msra.mxu0 %v12561_v18  ;;  %v12609_v18 = vld [vmem:[%s14687_s22 + $0x1860] ss:$16 sps:$4 sm:$0xff]  }
 0x27d   : > { %7172 = vmatpush1.bf16.msra.mxu1 %v12564_v19  ;;  %7132 = vmatprep.subr.bf16.mxu0 %v12569_v20  ;;  %v12612_v19 = vld [vmem:[%s14687_s22 + $0x1a60] ss:$16 sps:$4 sm:$0xff]   ;;  %v12617_v20 = vld [vmem:[%s14687_s22 + $0x1884] ss:$16 sps:$4 sm:$0xff]  }
 0x27e   : > { %7173 = vmatprep.subr.bf16.mxu1 %v12572_v21  ;;  %v12620_v21 = vld [vmem:[%s14687_s22 + $0x1a84] ss:$16 sps:$4 sm:$0xff]  }
 0x280   : > { %7133 = vmatpush1.bf16.msra.mxu0 %v12567_v22  ;;  %v12615_v22 = vld [vmem:[%s14687_s22 + $0x1880] ss:$16 sps:$4 sm:$0xff]  }
 0x281   : > { %7174 = vmatpush1.bf16.msra.mxu1 %v12570_v23  ;;  %7134 = vmatprep.subr.bf16.mxu0 %v12575_v26  ;;  %v12618_v23 = vld [vmem:[%s14687_s22 + $0x1a80] ss:$16 sps:$4 sm:$0xff]   ;;  %v12623_v26 = vld [vmem:[%s14687_s22 + $0x18a4] ss:$16 sps:$4 sm:$0xff]  }
 0x282   : > { %7175 = vmatprep.subr.bf16.mxu1 %v12578_v27  ;;  %v12626_v27 = vld [vmem:[%s14687_s22 + $0x1aa4] ss:$16 sps:$4 sm:$0xff]  }
 0x284   : > { %7135 = vmatpush1.bf16.msra.mxu0 %v12573_v28  ;;  %v12621_v28 = vld [vmem:[%s14687_s22 + $0x18a0] ss:$16 sps:$4 sm:$0xff]  }
 0x285   : > { %7176 = vmatpush1.bf16.msra.mxu1 %v12576_v29  ;;  %7136 = vmatprep.subr.bf16.mxu0 %v12581_v30  ;;  %v12624_v29 = vld [vmem:[%s14687_s22 + $0x1aa0] ss:$16 sps:$4 sm:$0xff]   ;;  %v12629_v30 = vld [vmem:[%s14687_s22 + $0x18c4] ss:$16 sps:$4 sm:$0xff]  }
 0x286   : > { %7177 = vmatprep.subr.bf16.mxu1 %v12584_v31  ;;  %v12632_v31 = vld [vmem:[%s14687_s22 + $0x1ac4] ss:$16 sps:$4 sm:$0xff]  }
 0x288   : > { %7137 = vmatpush1.bf16.msra.mxu0 %v12579_v32 }
 0x289   : > { %7178 = vmatpush1.bf16.msra.mxu1 %v12582_v34  ;;  %7138 = vmatprep.subr.bf16.mxu0 %v12587_v35  ;;  %v12627_v35 = vld [vmem:[%s14687_s22 + $0x18c0] ss:$16 sps:$4 sm:$0xff]  }
 0x28a   : > { %7179 = vmatprep.subr.bf16.mxu1 %v12590_v37  ;;  %v12630_v37 = vld [vmem:[%s14687_s22 + $0x1ac0] ss:$16 sps:$4 sm:$0xff]  }
 0x28c   : > { %7139 = vmatpush1.bf16.msra.mxu0 %v12585_v38 }
 0x28d   : > { %7180 = vmatpush1.bf16.msra.mxu1 %v12588_v39  ;;  %7190 = vmatprep.subr.bf16.mxu0 %v12593_v48 }
 0x28e   : > { %7231 = vmatprep.subr.bf16.mxu1 %v12596_v49 }
 0x28f   : > { %7141 = vmatmul.mubr.bf16.vlgmr.msra.gmra.mrb[20].mxu0 %v15197_v45 }
 0x290   : > { %7182 = vmatmul.mubr.bf16.vlgmr.msra.gmra.mrb[20].mxu1 %v15199_v50  ;;  %7191 = vmatpush1.bf16.msra.mxu0 %v12591_v60 }
 0x291   : > { %7232 = vmatpush1.bf16.msra.mxu1 %v12594_v61  ;;  %7192 = vmatprep.subr.bf16.mxu0 %v12599_v62  ;;  %v12638_v61 = vld [vmem:[%s14687_s22 + $0x1ae4] ss:$16 sps:$4 sm:$0xff]  }
 0x292   : > { %7233 = vmatprep.subr.bf16.mxu1 %v12602_v63  ;;  %7222 = vmatprep.mubr.bf16.mxu0 %v15207_v2  ;;  %v12636_v63 = vld [vmem:[%s14687_s22 + $0x1ae0] ss:$16 sps:$4 sm:$0xff]  }
 0x293   : > { %7263 = vmatprep.mubr.bf16.mxu1 %v15209_v3 }
 0x294   : > { %7193 = vmatpush1.bf16.msra.mxu0 %v12597_v4  ;;  %v12641_v4 = vld [vmem:[%s14687_s22 + $0x1904] ss:$16 sps:$4 sm:$0xff]  }
 0x295   : > { %7234 = vmatpush1.bf16.msra.mxu1 %v12600_v5  ;;  %7194 = vmatprep.subr.bf16.mxu0 %v12605_v8  ;;  %v12644_v5 = vld [vmem:[%s14687_s22 + $0x1b04] ss:$16 sps:$4 sm:$0xff]   ;;  %v12639_v8 = vld [vmem:[%s14687_s22 + $0x1900] ss:$16 sps:$4 sm:$0xff]  }
 0x296   : > { %7235 = vmatprep.subr.bf16.mxu1 %v12608_v9  ;;  %v12642_v9 = vld [vmem:[%s14687_s22 + $0x1b00] ss:$16 sps:$4 sm:$0xff]  }
 0x298   : > { %7195 = vmatpush1.bf16.msra.mxu0 %v12603_v10  ;;  %v12647_v10 = vld [vmem:[%s14687_s22 + $0x1924] ss:$16 sps:$4 sm:$0xff]  }
 0x299   : > { %7236 = vmatpush1.bf16.msra.mxu1 %v12606_v11  ;;  %7196 = vmatprep.subr.bf16.mxu0 %v12611_v16  ;;  %v12650_v11 = vld [vmem:[%s14687_s22 + $0x1b24] ss:$16 sps:$4 sm:$0xff]   ;;  %v12645_v16 = vld [vmem:[%s14687_s22 + $0x1920] ss:$16 sps:$4 sm:$0xff]  }
 0x29a   : > { %7237 = vmatprep.subr.bf16.mxu1 %v12614_v17  ;;  %v12648_v17 = vld [vmem:[%s14687_s22 + $0x1b20] ss:$16 sps:$4 sm:$0xff]  }
 0x29c   : > { %7197 = vmatpush1.bf16.msra.mxu0 %v12609_v18  ;;  %v12653_v18 = vld [vmem:[%s14687_s22 + $0x1944] ss:$16 sps:$4 sm:$0xff]  }
 0x29d   : > { %7238 = vmatpush1.bf16.msra.mxu1 %v12612_v19  ;;  %7198 = vmatprep.subr.bf16.mxu0 %v12617_v20  ;;  %v12656_v19 = vld [vmem:[%s14687_s22 + $0x1b44] ss:$16 sps:$4 sm:$0xff]   ;;  %v12651_v20 = vld [vmem:[%s14687_s22 + $0x1940] ss:$16 sps:$4 sm:$0xff]  }
 0x29e   : > { %7239 = vmatprep.subr.bf16.mxu1 %v12620_v21  ;;  %v12654_v21 = vld [vmem:[%s14687_s22 + $0x1b40] ss:$16 sps:$4 sm:$0xff]  }
 0x2a0   : > { %7199 = vmatpush1.bf16.msra.mxu0 %v12615_v22  ;;  %v12659_v22 = vld [vmem:[%s14687_s22 + $0x1964] ss:$16 sps:$4 sm:$0xff]  }
 0x2a1   : > { %7240 = vmatpush1.bf16.msra.mxu1 %v12618_v23  ;;  %7200 = vmatprep.subr.bf16.mxu0 %v12623_v26  ;;  %v12662_v23 = vld [vmem:[%s14687_s22 + $0x1b64] ss:$16 sps:$4 sm:$0xff]   ;;  %v12657_v26 = vld [vmem:[%s14687_s22 + $0x1960] ss:$16 sps:$4 sm:$0xff]  }
 0x2a2   : > { %7241 = vmatprep.subr.bf16.mxu1 %v12626_v27  ;;  %v6896_v32 = vpop.f32.mrb[8].mxu0  ;;  %v12660_v27 = vld [vmem:[%s14687_s22 + $0x1b60] ss:$16 sps:$4 sm:$0xff]  }
 0x2a3   : > { %v6937_v34 = vpop.f32.mrb[8].mxu1  ;;  %v6897_v38 = vadd.f32 %v6896_v32, %v15153_v43  ;;  %v6898_v39 = vpop.f32.mrb[9].mxu0  ;;  %v12635_v43 = vld [vmem:[%s14687_s22 + $0x18e4] ss:$16 sps:$4 sm:$0xff]  }
 0x2a4   : > { %v6939_v40 = vpop.f32.mrb[9].mxu1  ;;  %v6899_v42 = vadd.f32 %v6898_v39, %v15157_v58  ;;  %v6900_v48 = vpop.f32.mrb[10].mxu0  ;;  %7201 = vmatpush1.bf16.msra.mxu0 %v12621_v28  ;;  %v12633_v58 = vld [vmem:[%s14687_s22 + $0x18e0] ss:$16 sps:$4 sm:$0xff]   ;;  %v12665_v28 = vld [vmem:[%s14687_s22 + $0x1984] ss:$16 sps:$4 sm:$0xff]  }
 0x2a5   : > { %v6941_v49 = vpop.f32.mrb[10].mxu1  ;;  %7242 = vmatpush1.bf16.msra.mxu1 %v12624_v29  ;;  %v15239_v51 = vadd.f32 %v6937_v34, %v6897_v38  ;;  %v6901_v59 = vpop.f32.mrb[11].mxu0  ;;  %7202 = vmatprep.subr.bf16.mxu0 %v12629_v30  ;;  %v12668_v29 = vld [vmem:[%s14687_s22 + $0x1b84] ss:$16 sps:$4 sm:$0xff]   ;;  %v12663_v30 = vld [vmem:[%s14687_s22 + $0x1980] ss:$16 sps:$4 sm:$0xff]  }
 0x2a6   : > { %v6942_v60 = vpop.f32.mrb[11].mxu1  ;;  %7243 = vmatprep.subr.bf16.mxu1 %v12632_v31  ;;  %v15243_v62 = vadd.f32 %v6939_v40, %v6899_v42  ;;  %v12666_v31 = vld [vmem:[%s14687_s22 + $0x1b80] ss:$16 sps:$4 sm:$0xff]   ;;  %v12671_v32 = vld [vmem:[%s14687_s22 + $0x19a4] ss:$16 sps:$4 sm:$0xff]  }
 0x2a7   : > { %v12674_v34 = vld [vmem:[%s14687_s22 + $0x1ba4] ss:$16 sps:$4 sm:$0xff]   ;;  %v12675_v40 = vld [vmem:[%s14687_s22 + $0x19c0] ss:$16 sps:$4 sm:$0xff]  }
 0x2a8   : > { %7203 = vmatpush1.bf16.msra.mxu0 %v12627_v35  ;;  %v12669_v35 = vld [vmem:[%s14687_s22 + $0x19a0] ss:$16 sps:$4 sm:$0xff]   ;;  %v12677_v38 = vld [vmem:[%s14687_s22 + $0x19c4] ss:$16 sps:$4 sm:$0xff]  }
 0x2a9   : > { %7244 = vmatpush1.bf16.msra.mxu1 %v12630_v37  ;;  %7204 = vmatprep.subr.bf16.mxu0 %v12635_v43  ;;  %v12672_v37 = vld [vmem:[%s14687_s22 + $0x1ba0] ss:$16 sps:$4 sm:$0xff]   ;;  %v12680_v39 = vld [vmem:[%s14687_s22 + $0x1bc4] ss:$16 sps:$4 sm:$0xff]  }
 0x2aa   : > { %7245 = vmatprep.subr.bf16.mxu1 %v12638_v61  ;;  %v12678_v42 = vld [vmem:[%s14687_s22 + $0x1bc0] ss:$16 sps:$4 sm:$0xff]   ;;  %v12683_v48 = vld [vmem:[%s14687_s22 + $0x19e4] ss:$16 sps:$4 sm:$0xff]  }
 0x2ab   : > { %v12686_v49 = vld [vmem:[%s14687_s22 + $0x1be4] ss:$16 sps:$4 sm:$0xff]   ;;  %v12681_v59 = vld [vmem:[%s14687_s22 + $0x19e0] ss:$16 sps:$4 sm:$0xff]  }
 0x2ac   : > { %7205 = vmatpush1.bf16.msra.mxu0 %v12633_v58  ;;  %v12684_v60 = vld [vmem:[%s14687_s22 + $0x1be0] ss:$16 sps:$4 sm:$0xff]   ;;  %v12689_v58 = vld [vmem:[%s14687_s22 + $0x1c04] ss:$16 sps:$4 sm:$0xff]  }
 0x2ad   : > { %7246 = vmatpush1.bf16.msra.mxu1 %v12636_v63  ;;  %7206 = vmatprep.subr.bf16.mxu0 %v12641_v4  ;;  %v510_v43 = vld [vmem:[%s14680_s18 + $0xc0] sm:$0xff]  ;;  %v512_v61 = vld [vmem:[%s14680_s18 + $0xd0] sm:$0xff]  ;;  %v515_v4 = vld [vmem:[%s14680_s18 + $0xe8] sm:$0xff] }
 0x2ae   : > { %7247 = vmatprep.subr.bf16.mxu1 %v12644_v5  ;;  %v12692_v63 = vld [vmem:[%s14687_s22 + $0x1e04] ss:$16 sps:$4 sm:$0xff]   ;;  %v517_v5 = vld [vmem:[%s14680_s18 + $0xf8] sm:$0xff] }
 0x2b0   : > { %7207 = vmatpush1.bf16.msra.mxu0 %v12639_v8  ;;  %v12687_v8 = vld [vmem:[%s14687_s22 + $0x1c00] ss:$16 sps:$4 sm:$0xff]  }
 0x2b1   : > { %7248 = vmatpush1.bf16.msra.mxu1 %v12642_v9  ;;  %7208 = vmatprep.subr.bf16.mxu0 %v12647_v10  ;;  %v12690_v9 = vld [vmem:[%s14687_s22 + $0x1e00] ss:$16 sps:$4 sm:$0xff]   ;;  %v15287_v10 = vpack.c.bf16 %v510_v43, %v510_v43 }
 0x2b2   : > { %7249 = vmatprep.subr.bf16.mxu1 %v12650_v11  ;;  %v15289_v11 = vpack.c.bf16 %v512_v61, %v512_v61  ;;  %v12723_v43 = vld [vmem:[%s14687_s22 + $0x1cc0] ss:$16 sps:$4 sm:$0xff]  }
 0x2b3   : > { %v12726_v61 = vld [vmem:[%s14687_s22 + $0x1ec0] ss:$16 sps:$4 sm:$0xff]  }
 0x2b4   : > { %7209 = vmatpush1.bf16.msra.mxu0 %v12645_v16  ;;  %v12695_v16 = vld [vmem:[%s14687_s22 + $0x1c24] ss:$16 sps:$4 sm:$0xff]  }
 0x2b5   : > { %7250 = vmatpush1.bf16.msra.mxu1 %v12648_v17  ;;  %7210 = vmatprep.subr.bf16.mxu0 %v12653_v18  ;;  %v12698_v17 = vld [vmem:[%s14687_s22 + $0x1e24] ss:$16 sps:$4 sm:$0xff]   ;;  %v15293_v18 = vpack.c.bf16 %v515_v4, %v515_v4 }
 0x2b6   : > { %7251 = vmatprep.subr.bf16.mxu1 %v12656_v19  ;;  %v15295_v19 = vpack.c.bf16 %v517_v5, %v517_v5 }
 0x2b8   : > { %7211 = vmatpush1.bf16.msra.mxu0 %v12651_v20  ;;  %v12693_v20 = vld [vmem:[%s14687_s22 + $0x1c20] ss:$16 sps:$4 sm:$0xff]  }
 0x2b9   : > { %7252 = vmatpush1.bf16.msra.mxu1 %v12654_v21  ;;  %7212 = vmatprep.subr.bf16.mxu0 %v12659_v22  ;;  %v12696_v21 = vld [vmem:[%s14687_s22 + $0x1e20] ss:$16 sps:$4 sm:$0xff]   ;;  %v12701_v22 = vld [vmem:[%s14687_s22 + $0x1c44] ss:$16 sps:$4 sm:$0xff]  }
 0x2ba   : > { %7253 = vmatprep.subr.bf16.mxu1 %v12662_v23  ;;  %v12704_v23 = vld [vmem:[%s14687_s22 + $0x1e44] ss:$16 sps:$4 sm:$0xff]  }
 0x2bc   : > { %7213 = vmatpush1.bf16.msra.mxu0 %v12657_v26  ;;  %v12699_v26 = vld [vmem:[%s14687_s22 + $0x1c40] ss:$16 sps:$4 sm:$0xff]  }
 0x2bd   : > { %7254 = vmatpush1.bf16.msra.mxu1 %v12660_v27  ;;  %7214 = vmatprep.subr.bf16.mxu0 %v12665_v28  ;;  %v12702_v27 = vld [vmem:[%s14687_s22 + $0x1e40] ss:$16 sps:$4 sm:$0xff]   ;;  %v12707_v28 = vld [vmem:[%s14687_s22 + $0x1c64] ss:$16 sps:$4 sm:$0xff]  }
 0x2be   : > { %7255 = vmatprep.subr.bf16.mxu1 %v12668_v29  ;;  %v12710_v29 = vld [vmem:[%s14687_s22 + $0x1e64] ss:$16 sps:$4 sm:$0xff]  }
 0x2c0   : > { %7215 = vmatpush1.bf16.msra.mxu0 %v12663_v30  ;;  %v12705_v30 = vld [vmem:[%s14687_s22 + $0x1c60] ss:$16 sps:$4 sm:$0xff]  }
 0x2c1   : > { %7256 = vmatpush1.bf16.msra.mxu1 %v12666_v31  ;;  %7216 = vmatprep.subr.bf16.mxu0 %v12671_v32  ;;  %v12708_v31 = vld [vmem:[%s14687_s22 + $0x1e60] ss:$16 sps:$4 sm:$0xff]   ;;  %v12713_v32 = vld [vmem:[%s14687_s22 + $0x1c84] ss:$16 sps:$4 sm:$0xff]  }
 0x2c2   : > { %7257 = vmatprep.subr.bf16.mxu1 %v12674_v34  ;;  %v12716_v34 = vld [vmem:[%s14687_s22 + $0x1e84] ss:$16 sps:$4 sm:$0xff]  }
 0x2c4   : > { %7217 = vmatpush1.bf16.msra.mxu0 %v12669_v35  ;;  %v12711_v35 = vld [vmem:[%s14687_s22 + $0x1c80] ss:$16 sps:$4 sm:$0xff]  }
 0x2c5   : > { %7258 = vmatpush1.bf16.msra.mxu1 %v12672_v37  ;;  %7218 = vmatprep.subr.bf16.mxu0 %v12677_v38  ;;  %v12714_v37 = vld [vmem:[%s14687_s22 + $0x1e80] ss:$16 sps:$4 sm:$0xff]   ;;  %v12719_v38 = vld [vmem:[%s14687_s22 + $0x1ca4] ss:$16 sps:$4 sm:$0xff]  }
 0x2c6   : > { %7259 = vmatprep.subr.bf16.mxu1 %v12680_v39  ;;  %v12722_v39 = vld [vmem:[%s14687_s22 + $0x1ea4] ss:$16 sps:$4 sm:$0xff]  }
 0x2c8   : > { %7219 = vmatpush1.bf16.msra.mxu0 %v12675_v40  ;;  %v12717_v40 = vld [vmem:[%s14687_s22 + $0x1ca0] ss:$16 sps:$4 sm:$0xff]  }
 0x2c9   : > { %7260 = vmatpush1.bf16.msra.mxu1 %v12678_v42  ;;  %7220 = vmatprep.subr.bf16.mxu0 %v12683_v48  ;;  %v12720_v42 = vld [vmem:[%s14687_s22 + $0x1ea0] ss:$16 sps:$4 sm:$0xff]   ;;  %v12725_v48 = vld [vmem:[%s14687_s22 + $0x1cc4] ss:$16 sps:$4 sm:$0xff]  }
 0x2ca   : > { %7261 = vmatprep.subr.bf16.mxu1 %v12686_v49  ;;  %v12728_v49 = vld [vmem:[%s14687_s22 + $0x1ec4] ss:$16 sps:$4 sm:$0xff]  }
 0x2cc   : > { %7221 = vmatpush1.bf16.msra.mxu0 %v12681_v59 }
 0x2cd   : > { %7262 = vmatpush1.bf16.msra.mxu1 %v12684_v60  ;;  %7272 = vmatprep.subr.bf16.mxu0 %v12689_v58 }
 0x2ce   : > { %7313 = vmatprep.subr.bf16.mxu1 %v12692_v63 }
 0x2cf   : > { %7223 = vmatmul.mubr.bf16.vlgmr.msra.gmra.mrb[24].mxu0 %v15287_v10 }
 0x2d0   : > { %7264 = vmatmul.mubr.bf16.vlgmr.msra.gmra.mrb[24].mxu1 %v15289_v11  ;;  %7273 = vmatpush1.bf16.msra.mxu0 %v12687_v8 }
 0x2d1   : > { %7314 = vmatpush1.bf16.msra.mxu1 %v12690_v9  ;;  %7274 = vmatprep.subr.bf16.mxu0 %v12695_v16 }
 0x2d2   : > { %7315 = vmatprep.subr.bf16.mxu1 %v12698_v17  ;;  %7304 = vmatprep.mubr.bf16.mxu0 %v15293_v18 }
 0x2d3   : > { %7345 = vmatprep.mubr.bf16.mxu1 %v15295_v19 }
 0x2d4   : > { %7275 = vmatpush1.bf16.msra.mxu0 %v12693_v20 }
 0x2d5   : > { %7316 = vmatpush1.bf16.msra.mxu1 %v12696_v21  ;;  %7276 = vmatprep.subr.bf16.mxu0 %v12701_v22  ;;  %v12734_v21 = vld [vmem:[%s14687_s22 + $0x1ee4] ss:$16 sps:$4 sm:$0xff]  }
 0x2d6   : > { %7317 = vmatprep.subr.bf16.mxu1 %v12704_v23  ;;  %v12732_v23 = vld [vmem:[%s14687_s22 + $0x1ee0] ss:$16 sps:$4 sm:$0xff]  }
 0x2d8   : > { %7277 = vmatpush1.bf16.msra.mxu0 %v12699_v26  ;;  %v12737_v26 = vld [vmem:[%s14687_s22 + $0x1d04] ss:$16 sps:$4 sm:$0xff]  }
 0x2d9   : > { %7318 = vmatpush1.bf16.msra.mxu1 %v12702_v27  ;;  %7278 = vmatprep.subr.bf16.mxu0 %v12707_v28  ;;  %v12740_v27 = vld [vmem:[%s14687_s22 + $0x1f04] ss:$16 sps:$4 sm:$0xff]   ;;  %v12735_v28 = vld [vmem:[%s14687_s22 + $0x1d00] ss:$16 sps:$4 sm:$0xff]  }
 0x2da   : > { %7319 = vmatprep.subr.bf16.mxu1 %v12710_v29  ;;  %v12738_v29 = vld [vmem:[%s14687_s22 + $0x1f00] ss:$16 sps:$4 sm:$0xff]  }
 0x2dc   : > { %7279 = vmatpush1.bf16.msra.mxu0 %v12705_v30  ;;  %v12743_v30 = vld [vmem:[%s14687_s22 + $0x1d24] ss:$16 sps:$4 sm:$0xff]  }
 0x2dd   : > { %7320 = vmatpush1.bf16.msra.mxu1 %v12708_v31  ;;  %7280 = vmatprep.subr.bf16.mxu0 %v12713_v32  ;;  %v12746_v31 = vld [vmem:[%s14687_s22 + $0x1f24] ss:$16 sps:$4 sm:$0xff]   ;;  %v12741_v32 = vld [vmem:[%s14687_s22 + $0x1d20] ss:$16 sps:$4 sm:$0xff]  }
 0x2de   : > { %7321 = vmatprep.subr.bf16.mxu1 %v12716_v34  ;;  %v12744_v34 = vld [vmem:[%s14687_s22 + $0x1f20] ss:$16 sps:$4 sm:$0xff]  }
 0x2e0   : > { %7281 = vmatpush1.bf16.msra.mxu0 %v12711_v35  ;;  %v12749_v35 = vld [vmem:[%s14687_s22 + $0x1d44] ss:$16 sps:$4 sm:$0xff]  }
 0x2e1   : > { %7322 = vmatpush1.bf16.msra.mxu1 %v12714_v37  ;;  %7282 = vmatprep.subr.bf16.mxu0 %v12719_v38  ;;  %v12752_v37 = vld [vmem:[%s14687_s22 + $0x1f44] ss:$16 sps:$4 sm:$0xff]   ;;  %v12747_v38 = vld [vmem:[%s14687_s22 + $0x1d40] ss:$16 sps:$4 sm:$0xff]  }
 0x2e2   : > { %7323 = vmatprep.subr.bf16.mxu1 %v12722_v39  ;;  %v6978_v59 = vpop.f32.mrb[12].mxu0  ;;  %v12750_v39 = vld [vmem:[%s14687_s22 + $0x1f40] ss:$16 sps:$4 sm:$0xff]  }
 0x2e3   : > { %v7019_v60 = vpop.f32.mrb[12].mxu1  ;;  %v6979_v58 = vadd.f32 %v6978_v59, %v15239_v51  ;;  %v6980_v63 = vpop.f32.mrb[13].mxu0  ;;  %v12731_v51 = vld [vmem:[%s14687_s22 + $0x1ce4] ss:$16 sps:$4 sm:$0xff]  }
 0x2e4   : > { %v7021_v4 = vpop.f32.mrb[13].mxu1  ;;  %v6981_v5 = vadd.f32 %v6980_v63, %v15243_v62  ;;  %v6982_v8 = vpop.f32.mrb[14].mxu0  ;;  %7283 = vmatpush1.bf16.msra.mxu0 %v12717_v40  ;;  %v12729_v62 = vld [vmem:[%s14687_s22 + $0x1ce0] ss:$16 sps:$4 sm:$0xff]   ;;  %v12755_v40 = vld [vmem:[%s14687_s22 + $0x1d64] ss:$16 sps:$4 sm:$0xff]  }
 0x2e5   : > { %v7023_v9 = vpop.f32.mrb[14].mxu1  ;;  %7324 = vmatpush1.bf16.msra.mxu1 %v12720_v42  ;;  %v15325_v16 = vadd.f32 %v7019_v60, %v6979_v58  ;;  %v6983_v17 = vpop.f32.mrb[15].mxu0  ;;  %7284 = vmatprep.subr.bf16.mxu0 %v12725_v48  ;;  %v12758_v42 = vld [vmem:[%s14687_s22 + $0x1f64] ss:$16 sps:$4 sm:$0xff]   ;;  %v12753_v48 = vld [vmem:[%s14687_s22 + $0x1d60] ss:$16 sps:$4 sm:$0xff]  }
 0x2e6   : > { %v7024_v20 = vpop.f32.mrb[15].mxu1  ;;  %7325 = vmatprep.subr.bf16.mxu1 %v12728_v49  ;;  %v15329_v22 = vadd.f32 %v7021_v4, %v6981_v5  ;;  %v12756_v49 = vld [vmem:[%s14687_s22 + $0x1f60] ss:$16 sps:$4 sm:$0xff]   ;;  %v12761_v59 = vld [vmem:[%s14687_s22 + $0x1d84] ss:$16 sps:$4 sm:$0xff]  }
 0x2e7   : > { %v12764_v60 = vld [vmem:[%s14687_s22 + $0x1f84] ss:$16 sps:$4 sm:$0xff]   ;;  %v12765_v4 = vld [vmem:[%s14687_s22 + $0x1da0] ss:$16 sps:$4 sm:$0xff]  }
 0x2e8   : > { %7285 = vmatpush1.bf16.msra.mxu0 %v12723_v43  ;;  %v12759_v43 = vld [vmem:[%s14687_s22 + $0x1d80] ss:$16 sps:$4 sm:$0xff]   ;;  %v12767_v58 = vld [vmem:[%s14687_s22 + $0x1da4] ss:$16 sps:$4 sm:$0xff]  }
 0x2e9   : > { %7326 = vmatpush1.bf16.msra.mxu1 %v12726_v61  ;;  %7286 = vmatprep.subr.bf16.mxu0 %v12731_v51  ;;  %v12762_v61 = vld [vmem:[%s14687_s22 + $0x1f80] ss:$16 sps:$4 sm:$0xff]   ;;  %v12770_v63 = vld [vmem:[%s14687_s22 + $0x1fa4] ss:$16 sps:$4 sm:$0xff]  }
 0x2ea   : > { %7327 = vmatprep.subr.bf16.mxu1 %v12734_v21  ;;  %v12768_v5 = vld [vmem:[%s14687_s22 + $0x1fa0] ss:$16 sps:$4 sm:$0xff]   ;;  %v12773_v8 = vld [vmem:[%s14687_s22 + $0x1dc4] ss:$16 sps:$4 sm:$0xff]  }
 0x2eb   : > { %v12776_v9 = vld [vmem:[%s14687_s22 + $0x1fc4] ss:$16 sps:$4 sm:$0xff]   ;;  %v12771_v17 = vld [vmem:[%s14687_s22 + $0x1dc0] ss:$16 sps:$4 sm:$0xff]  }
 0x2ec   : > { %7287 = vmatpush1.bf16.msra.mxu0 %v12729_v62  ;;  %v12774_v20 = vld [vmem:[%s14687_s22 + $0x1fc0] ss:$16 sps:$4 sm:$0xff]   ;;  %v12779_v51 = vld [vmem:[%s14687_s22 + $0x1de4] ss:$16 sps:$4 sm:$0xff]  }
 0x2ed   : > { %7328 = vmatpush1.bf16.msra.mxu1 %v12732_v23  ;;  %7288 = vmatprep.subr.bf16.mxu0 %v12737_v26  ;;  %v12782_v21 = vld [vmem:[%s14687_s22 + $0x1fe4] ss:$16 sps:$4 sm:$0xff]   ;;  %v12777_v62 = vld [vmem:[%s14687_s22 + $0x1de0] ss:$16 sps:$4 sm:$0xff]  }
 0x2ee   : > { %7329 = vmatprep.subr.bf16.mxu1 %v12740_v27  ;;  %v12780_v23 = vld [vmem:[%s14687_s22 + $0x1fe0] ss:$16 sps:$4 sm:$0xff]  }
 0x2ef   : > { %v514_v26 = vld [vmem:[%s14680_s18 + $0xe0] sm:$0xff]  ;;  %v516_v27 = vld [vmem:[%s14680_s18 + $0xf0] sm:$0xff] }
 0x2f0   : > { %7289 = vmatpush1.bf16.msra.mxu0 %v12735_v28  ;;  %v12785_v28 = vld [vmem:[%s14687_s22 + $0xc] ss:$16 sps:$4 sm:$0xff]  }
 0x2f1   : > { %7330 = vmatpush1.bf16.msra.mxu1 %v12738_v29  ;;  %7290 = vmatprep.subr.bf16.mxu0 %v12743_v30  ;;  %v12788_v29 = vld [vmem:[%s14687_s22 + $0x20c] ss:$16 sps:$4 sm:$0xff]   ;;  %v12783_v30 = vld [vmem:[%s14687_s22 + $0x8] ss:$16 sps:$4 sm:$0xff]  }
 0x2f2   : > { %7331 = vmatprep.subr.bf16.mxu1 %v12746_v31  ;;  %v12786_v31 = vld [vmem:[%s14687_s22 + $0x208] ss:$16 sps:$4 sm:$0xff]  }
 0x2f4   : > { %7291 = vmatpush1.bf16.msra.mxu0 %v12741_v32  ;;  %v15371_v32 = vpack.c.bf16 %v514_v26, %v514_v26 }
 0x2f5   : > { %7332 = vmatpush1.bf16.msra.mxu1 %v12744_v34  ;;  %7292 = vmatprep.subr.bf16.mxu0 %v12749_v35  ;;  %v15373_v34 = vpack.c.bf16 %v516_v27, %v516_v27  ;;  %v12791_v35 = vld [vmem:[%s14687_s22 + $0x2c] ss:$16 sps:$4 sm:$0xff]  }
 0x2f6   : > { %7333 = vmatprep.subr.bf16.mxu1 %v12752_v37  ;;  %v12794_v37 = vld [vmem:[%s14687_s22 + $0x22c] ss:$16 sps:$4 sm:$0xff]  }
 0x2f8   : > { %7293 = vmatpush1.bf16.msra.mxu0 %v12747_v38  ;;  %v12789_v38 = vld [vmem:[%s14687_s22 + $0x28] ss:$16 sps:$4 sm:$0xff]  }
 0x2f9   : > { %7334 = vmatpush1.bf16.msra.mxu1 %v12750_v39  ;;  %7294 = vmatprep.subr.bf16.mxu0 %v12755_v40  ;;  %v12792_v39 = vld [vmem:[%s14687_s22 + $0x228] ss:$16 sps:$4 sm:$0xff]   ;;  %v12797_v40 = vld [vmem:[%s14687_s22 + $0x4c] ss:$16 sps:$4 sm:$0xff]  }
 0x2fa   : > { %7335 = vmatprep.subr.bf16.mxu1 %v12758_v42  ;;  %v12800_v42 = vld [vmem:[%s14687_s22 + $0x24c] ss:$16 sps:$4 sm:$0xff]  }
 0x2fc   : > { %7295 = vmatpush1.bf16.msra.mxu0 %v12753_v48  ;;  %v12795_v48 = vld [vmem:[%s14687_s22 + $0x48] ss:$16 sps:$4 sm:$0xff]  }
 0x2fd   : > { %7336 = vmatpush1.bf16.msra.mxu1 %v12756_v49  ;;  %7296 = vmatprep.subr.bf16.mxu0 %v12761_v59  ;;  %v12798_v49 = vld [vmem:[%s14687_s22 + $0x248] ss:$16 sps:$4 sm:$0xff]   ;;  %v12803_v59 = vld [vmem:[%s14687_s22 + $0x6c] ss:$16 sps:$4 sm:$0xff]  }
 0x2fe   : > { %7337 = vmatprep.subr.bf16.mxu1 %v12764_v60  ;;  %v12806_v60 = vld [vmem:[%s14687_s22 + $0x26c] ss:$16 sps:$4 sm:$0xff]  }
 0x300   : > { %7297 = vmatpush1.bf16.msra.mxu0 %v12759_v43  ;;  %v12804_v43 = vld [vmem:[%s14687_s22 + $0x268] ss:$16 sps:$4 sm:$0xff]  }
 0x301   : > { %7338 = vmatpush1.bf16.msra.mxu1 %v12762_v61  ;;  %7298 = vmatprep.subr.bf16.mxu0 %v12767_v58  ;;  %v12812_v61 = vld [vmem:[%s14687_s22 + $0x28c] ss:$16 sps:$4 sm:$0xff]   ;;  %v12807_v58 = vld [vmem:[%s14687_s22 + $0x88] ss:$16 sps:$4 sm:$0xff]  }
 0x302   : > { %7339 = vmatprep.subr.bf16.mxu1 %v12770_v63  ;;  %v12810_v63 = vld [vmem:[%s14687_s22 + $0x288] ss:$16 sps:$4 sm:$0xff]  }
 0x304   : > { %7299 = vmatpush1.bf16.msra.mxu0 %v12765_v4  ;;  %v12815_v4 = vld [vmem:[%s14687_s22 + $0xac] ss:$16 sps:$4 sm:$0xff]  }
 0x305   : > { %7340 = vmatpush1.bf16.msra.mxu1 %v12768_v5  ;;  %7300 = vmatprep.subr.bf16.mxu0 %v12773_v8  ;;  %v12818_v5 = vld [vmem:[%s14687_s22 + $0x2ac] ss:$16 sps:$4 sm:$0xff]   ;;  %v12813_v8 = vld [vmem:[%s14687_s22 + $0xa8] ss:$16 sps:$4 sm:$0xff]  }
 0x306   : > { %7341 = vmatprep.subr.bf16.mxu1 %v12776_v9  ;;  %v12816_v9 = vld [vmem:[%s14687_s22 + $0x2a8] ss:$16 sps:$4 sm:$0xff]  }
 0x308   : > { %7301 = vmatpush1.bf16.msra.mxu0 %v12771_v17  ;;  %v12821_v17 = vld [vmem:[%s14687_s22 + $0xcc] ss:$16 sps:$4 sm:$0xff]  }
 0x309   : > { %7342 = vmatpush1.bf16.msra.mxu1 %v12774_v20  ;;  %7302 = vmatprep.subr.bf16.mxu0 %v12779_v51  ;;  %v12824_v20 = vld [vmem:[%s14687_s22 + $0x2cc] ss:$16 sps:$4 sm:$0xff]  }
 0x30a   : > { %7343 = vmatprep.subr.bf16.mxu1 %v12782_v21 }
 0x30c   : > { %7303 = vmatpush1.bf16.msra.mxu0 %v12777_v62  ;;  %v12819_v62 = vld [vmem:[%s14687_s22 + $0xc8] ss:$16 sps:$4 sm:$0xff]  }
 0x30d   : > { %7344 = vmatpush1.bf16.msra.mxu1 %v12780_v23  ;;  %7354 = vmatprep.subr.bf16.mxu0 %v12785_v28  ;;  %v12822_v23 = vld [vmem:[%s14687_s22 + $0x2c8] ss:$16 sps:$4 sm:$0xff]  }
 0x30e   : > { %7395 = vmatprep.subr.bf16.mxu1 %v12788_v29 }
 0x30f   : > { %7305 = vmatmul.mubr.bf16.vlgmr.msra.gmra.mrb[28].mxu0 %v15371_v32 }
 0x310   : > { %7346 = vmatmul.mubr.bf16.vlgmr.msra.gmra.mrb[28].mxu1 %v15373_v34  ;;  %7355 = vmatpush1.bf16.msra.mxu0 %v12783_v30 }
 0x311   : > { %7396 = vmatpush1.bf16.msra.mxu1 %v12786_v31  ;;  %7356 = vmatprep.subr.bf16.mxu0 %v12791_v35 }
 0x312   : > { %7397 = vmatprep.subr.bf16.mxu1 %v12794_v37  ;;  %7386 = vmatprep.mubr.bf16.mxu0 %v14760_v53  ;;  %v12801_v53 = vld [vmem:[%s14687_s22 + $0x68] ss:$16 sps:$4 sm:$0xff]  }
 0x313   : > { %7427 = vmatprep.mubr.bf16.mxu1 %v14764_v56  ;;  %v12809_v56 = vld [vmem:[%s14687_s22 + $0x8c] ss:$16 sps:$4 sm:$0xff]  }
 0x314   : > { %7357 = vmatpush1.bf16.msra.mxu0 %v12789_v38 }
 0x315   : > { %7398 = vmatpush1.bf16.msra.mxu1 %v12792_v39  ;;  %7358 = vmatprep.subr.bf16.mxu0 %v12797_v40  ;;  %v12830_v39 = vld [vmem:[%s14687_s22 + $0x2ec] ss:$16 sps:$4 sm:$0xff]  }
 0x316   : > { %7399 = vmatprep.subr.bf16.mxu1 %v12800_v42  ;;  %v12828_v42 = vld [vmem:[%s14687_s22 + $0x2e8] ss:$16 sps:$4 sm:$0xff]  }
 0x318   : > { %7359 = vmatpush1.bf16.msra.mxu0 %v12795_v48  ;;  %v12833_v48 = vld [vmem:[%s14687_s22 + $0x10c] ss:$16 sps:$4 sm:$0xff]  }
 0x319   : > { %7400 = vmatpush1.bf16.msra.mxu1 %v12798_v49  ;;  %7360 = vmatprep.subr.bf16.mxu0 %v12803_v59  ;;  %v12836_v49 = vld [vmem:[%s14687_s22 + $0x30c] ss:$16 sps:$4 sm:$0xff]   ;;  %v12831_v59 = vld [vmem:[%s14687_s22 + $0x108] ss:$16 sps:$4 sm:$0xff]  }
 0x31a   : > { %7401 = vmatprep.subr.bf16.mxu1 %v12806_v60  ;;  %v12834_v60 = vld [vmem:[%s14687_s22 + $0x308] ss:$16 sps:$4 sm:$0xff]  }
 0x31c   : > { %7361 = vmatpush1.bf16.msra.mxu0 %v12801_v53  ;;  %v12839_v53 = vld [vmem:[%s14687_s22 + $0x12c] ss:$16 sps:$4 sm:$0xff]  }
 0x31d   : > { %7402 = vmatpush1.bf16.msra.mxu1 %v12804_v43  ;;  %7362 = vmatprep.subr.bf16.mxu0 %v12809_v56  ;;  %v12842_v43 = vld [vmem:[%s14687_s22 + $0x32c] ss:$16 sps:$4 sm:$0xff]   ;;  %v12837_v56 = vld [vmem:[%s14687_s22 + $0x128] ss:$16 sps:$4 sm:$0xff]  }
 0x31e   : > { %7403 = vmatprep.subr.bf16.mxu1 %v12812_v61  ;;  %v12840_v61 = vld [vmem:[%s14687_s22 + $0x328] ss:$16 sps:$4 sm:$0xff]  }
 0x320   : > { %7363 = vmatpush1.bf16.msra.mxu0 %v12807_v58  ;;  %v12845_v58 = vld [vmem:[%s14687_s22 + $0x14c] ss:$16 sps:$4 sm:$0xff]  }
 0x321   : > { %7404 = vmatpush1.bf16.msra.mxu1 %v12810_v63  ;;  %7364 = vmatprep.subr.bf16.mxu0 %v12815_v4  ;;  %v12848_v63 = vld [vmem:[%s14687_s22 + $0x34c] ss:$16 sps:$4 sm:$0xff]   ;;  %v12843_v4 = vld [vmem:[%s14687_s22 + $0x148] ss:$16 sps:$4 sm:$0xff]  }
 0x322   : > { %7405 = vmatprep.subr.bf16.mxu1 %v12818_v5  ;;  %v7060_v51 = vpop.f32.mrb[16].mxu0  ;;  %v12846_v5 = vld [vmem:[%s14687_s22 + $0x348] ss:$16 sps:$4 sm:$0xff]  }
 0x323   : > { %v7101_v21 = vpop.f32.mrb[16].mxu1  ;;  %v7061_v26 = vadd.f32 %v7060_v51, %v15325_v16  ;;  %v7062_v27 = vpop.f32.mrb[17].mxu0  ;;  %v12827_v16 = vld [vmem:[%s14687_s22 + $0xec] ss:$16 sps:$4 sm:$0xff]  }
 0x324   : > { %v7103_v28 = vpop.f32.mrb[17].mxu1  ;;  %v7063_v29 = vadd.f32 %v7062_v27, %v15329_v22  ;;  %v7064_v30 = vpop.f32.mrb[18].mxu0  ;;  %7365 = vmatpush1.bf16.msra.mxu0 %v12813_v8  ;;  %v12825_v22 = vld [vmem:[%s14687_s22 + $0xe8] ss:$16 sps:$4 sm:$0xff]   ;;  %v12851_v8 = vld [vmem:[%s14687_s22 + $0x16c] ss:$16 sps:$4 sm:$0xff]  }
 0x325   : > { %v7105_v31 = vpop.f32.mrb[18].mxu1  ;;  %7406 = vmatpush1.bf16.msra.mxu1 %v12816_v9  ;;  %v15405_v35 = vadd.f32 %v7101_v21, %v7061_v26  ;;  %v7065_v37 = vpop.f32.mrb[19].mxu0  ;;  %7366 = vmatprep.subr.bf16.mxu0 %v12821_v17  ;;  %v12854_v9 = vld [vmem:[%s14687_s22 + $0x36c] ss:$16 sps:$4 sm:$0xff]   ;;  %v12849_v17 = vld [vmem:[%s14687_s22 + $0x168] ss:$16 sps:$4 sm:$0xff]  }
 0x326   : > { %v7106_v38 = vpop.f32.mrb[19].mxu1  ;;  %7407 = vmatprep.subr.bf16.mxu1 %v12824_v20  ;;  %v15409_v40 = vadd.f32 %v7103_v28, %v7063_v29  ;;  %v12852_v20 = vld [vmem:[%s14687_s22 + $0x368] ss:$16 sps:$4 sm:$0xff]   ;;  %v12857_v51 = vld [vmem:[%s14687_s22 + $0x18c] ss:$16 sps:$4 sm:$0xff]  }
 0x327   : > { %v12860_v21 = vld [vmem:[%s14687_s22 + $0x38c] ss:$16 sps:$4 sm:$0xff]   ;;  %v12861_v28 = vld [vmem:[%s14687_s22 + $0x1a8] ss:$16 sps:$4 sm:$0xff]  }
 0x328   : > { %7367 = vmatpush1.bf16.msra.mxu0 %v12819_v62  ;;  %v12855_v62 = vld [vmem:[%s14687_s22 + $0x188] ss:$16 sps:$4 sm:$0xff]   ;;  %v12863_v26 = vld [vmem:[%s14687_s22 + $0x1ac] ss:$16 sps:$4 sm:$0xff]  }
 0x329   : > { %7408 = vmatpush1.bf16.msra.mxu1 %v12822_v23  ;;  %7368 = vmatprep.subr.bf16.mxu0 %v12827_v16  ;;  %v12858_v23 = vld [vmem:[%s14687_s22 + $0x388] ss:$16 sps:$4 sm:$0xff]   ;;  %v12866_v27 = vld [vmem:[%s14687_s22 + $0x3ac] ss:$16 sps:$4 sm:$0xff]  }
 0x32a   : > { %7409 = vmatprep.subr.bf16.mxu1 %v12830_v39  ;;  %v12864_v29 = vld [vmem:[%s14687_s22 + $0x3a8] ss:$16 sps:$4 sm:$0xff]   ;;  %v12869_v30 = vld [vmem:[%s14687_s22 + $0x1cc] ss:$16 sps:$4 sm:$0xff]  }
 0x32b   : > { %v12872_v31 = vld [vmem:[%s14687_s22 + $0x3cc] ss:$16 sps:$4 sm:$0xff]   ;;  %v12867_v37 = vld [vmem:[%s14687_s22 + $0x1c8] ss:$16 sps:$4 sm:$0xff]  }
 0x32c   : > { %7369 = vmatpush1.bf16.msra.mxu0 %v12825_v22  ;;  %v12870_v38 = vld [vmem:[%s14687_s22 + $0x3c8] ss:$16 sps:$4 sm:$0xff]   ;;  %v12875_v16 = vld [vmem:[%s14687_s22 + $0x1ec] ss:$16 sps:$4 sm:$0xff]  }
 0x32d   : > { %7410 = vmatpush1.bf16.msra.mxu1 %v12828_v42  ;;  %7370 = vmatprep.subr.bf16.mxu0 %v12833_v48  ;;  %v12878_v39 = vld [vmem:[%s14687_s22 + $0x3ec] ss:$16 sps:$4 sm:$0xff]   ;;  %v12873_v22 = vld [vmem:[%s14687_s22 + $0x1e8] ss:$16 sps:$4 sm:$0xff]  }
 0x32e   : > { %7411 = vmatprep.subr.bf16.mxu1 %v12836_v49  ;;  %v12876_v42 = vld [vmem:[%s14687_s22 + $0x3e8] ss:$16 sps:$4 sm:$0xff]   ;;  %v12881_v48 = vld [vmem:[%s14687_s22 + $0x40c] ss:$16 sps:$4 sm:$0xff]  }
 0x32f   : > { %v12884_v49 = vld [vmem:[%s14687_s22 + $0x60c] ss:$16 sps:$4 sm:$0xff]  }
 0x330   : > { %7371 = vmatpush1.bf16.msra.mxu0 %v12831_v59  ;;  %v12879_v59 = vld [vmem:[%s14687_s22 + $0x408] ss:$16 sps:$4 sm:$0xff]  }
 0x331   : > { %7412 = vmatpush1.bf16.msra.mxu1 %v12834_v60  ;;  %7372 = vmatprep.subr.bf16.mxu0 %v12839_v53  ;;  %v12882_v60 = vld [vmem:[%s14687_s22 + $0x608] ss:$16 sps:$4 sm:$0xff]   ;;  %v12887_v53 = vld [vmem:[%s14687_s22 + $0x42c] ss:$16 sps:$4 sm:$0xff]  }
 0x332   : > { %7413 = vmatprep.subr.bf16.mxu1 %v12842_v43  ;;  %v12890_v43 = vld [vmem:[%s14687_s22 + $0x62c] ss:$16 sps:$4 sm:$0xff]  }
 0x334   : > { %7373 = vmatpush1.bf16.msra.mxu0 %v12837_v56  ;;  %v12885_v56 = vld [vmem:[%s14687_s22 + $0x428] ss:$16 sps:$4 sm:$0xff]  }
 0x335   : > { %7414 = vmatpush1.bf16.msra.mxu1 %v12840_v61  ;;  %7374 = vmatprep.subr.bf16.mxu0 %v12845_v58  ;;  %v12888_v61 = vld [vmem:[%s14687_s22 + $0x628] ss:$16 sps:$4 sm:$0xff]   ;;  %v12893_v58 = vld [vmem:[%s14687_s22 + $0x44c] ss:$16 sps:$4 sm:$0xff]  }
 0x336   : > { %7415 = vmatprep.subr.bf16.mxu1 %v12848_v63  ;;  %v12896_v63 = vld [vmem:[%s14687_s22 + $0x64c] ss:$16 sps:$4 sm:$0xff]  }
 0x338   : > { %7375 = vmatpush1.bf16.msra.mxu0 %v12843_v4  ;;  %v12899_v4 = vld [vmem:[%s14687_s22 + $0x46c] ss:$16 sps:$4 sm:$0xff]  }
 0x339   : > { %7416 = vmatpush1.bf16.msra.mxu1 %v12846_v5  ;;  %7376 = vmatprep.subr.bf16.mxu0 %v12851_v8  ;;  %v12902_v5 = vld [vmem:[%s14687_s22 + $0x66c] ss:$16 sps:$4 sm:$0xff]   ;;  %v12897_v8 = vld [vmem:[%s14687_s22 + $0x468] ss:$16 sps:$4 sm:$0xff]  }
 0x33a   : > { %7417 = vmatprep.subr.bf16.mxu1 %v12854_v9  ;;  %v12908_v9 = vld [vmem:[%s14687_s22 + $0x68c] ss:$16 sps:$4 sm:$0xff]  }
 0x33c   : > { %7377 = vmatpush1.bf16.msra.mxu0 %v12849_v17  ;;  %v12903_v17 = vld [vmem:[%s14687_s22 + $0x488] ss:$16 sps:$4 sm:$0xff]  }
 0x33d   : > { %7418 = vmatpush1.bf16.msra.mxu1 %v12852_v20  ;;  %7378 = vmatprep.subr.bf16.mxu0 %v12857_v51  ;;  %v12906_v20 = vld [vmem:[%s14687_s22 + $0x688] ss:$16 sps:$4 sm:$0xff]   ;;  %v12911_v51 = vld [vmem:[%s14687_s22 + $0x4ac] ss:$16 sps:$4 sm:$0xff]  }
 0x33e   : > { %7419 = vmatprep.subr.bf16.mxu1 %v12860_v21  ;;  %v12914_v21 = vld [vmem:[%s14687_s22 + $0x6ac] ss:$16 sps:$4 sm:$0xff]  }
 0x340   : > { %7379 = vmatpush1.bf16.msra.mxu0 %v12855_v62  ;;  %v12909_v62 = vld [vmem:[%s14687_s22 + $0x4a8] ss:$16 sps:$4 sm:$0xff]  }
 0x341   : > { %7420 = vmatpush1.bf16.msra.mxu1 %v12858_v23  ;;  %7380 = vmatprep.subr.bf16.mxu0 %v12863_v26  ;;  %v12912_v23 = vld [vmem:[%s14687_s22 + $0x6a8] ss:$16 sps:$4 sm:$0xff]   ;;  %v12917_v26 = vld [vmem:[%s14687_s22 + $0x4cc] ss:$16 sps:$4 sm:$0xff]  }
 0x342   : > { %7421 = vmatprep.subr.bf16.mxu1 %v12866_v27  ;;  %v12920_v27 = vld [vmem:[%s14687_s22 + $0x6cc] ss:$16 sps:$4 sm:$0xff]  }
 0x344   : > { %7381 = vmatpush1.bf16.msra.mxu0 %v12861_v28 }
 0x345   : > { %7422 = vmatpush1.bf16.msra.mxu1 %v12864_v29  ;;  %7382 = vmatprep.subr.bf16.mxu0 %v12869_v30 }
 0x346   : > { %7423 = vmatprep.subr.bf16.mxu1 %v12872_v31 }
 0x348   : > { %7383 = vmatpush1.bf16.msra.mxu0 %v12867_v37 }
 0x349   : > { %7424 = vmatpush1.bf16.msra.mxu1 %v12870_v38  ;;  %7384 = vmatprep.subr.bf16.mxu0 %v12875_v16 }
 0x34a   : > { %7425 = vmatprep.subr.bf16.mxu1 %v12878_v39 }
 0x34c   : > { %7385 = vmatpush1.bf16.msra.mxu0 %v12873_v22  ;;  %v12915_v22 = vld [vmem:[%s14687_s22 + $0x4c8] ss:$16 sps:$4 sm:$0xff]  }
 0x34d   : > { %7426 = vmatpush1.bf16.msra.mxu1 %v12876_v42  ;;  %7436 = vmatprep.subr.bf16.mxu0 %v12881_v48  ;;  %v12918_v42 = vld [vmem:[%s14687_s22 + $0x6c8] ss:$16 sps:$4 sm:$0xff]  }
 0x34e   : > { %7477 = vmatprep.subr.bf16.mxu1 %v12884_v49 }
 0x34f   : > { %7387 = vmatmul.mubr.bf16.vlgmr.msra.gmra.mrb[32].mxu0 %v14787_v12  ;;  %v12891_v12 = vld [vmem:[%s14687_s22 + $0x448] ss:$16 sps:$4 sm:$0xff]  }
 0x350   : > { %7428 = vmatmul.mubr.bf16.vlgmr.msra.gmra.mrb[32].mxu1 %v14789_v13  ;;  %7437 = vmatpush1.bf16.msra.mxu0 %v12879_v59  ;;  %v12894_v13 = vld [vmem:[%s14687_s22 + $0x648] ss:$16 sps:$4 sm:$0xff]  }
 0x351   : > { %7478 = vmatpush1.bf16.msra.mxu1 %v12882_v60  ;;  %7438 = vmatprep.subr.bf16.mxu0 %v12887_v53  ;;  %v12921_v53 = vld [vmem:[%s14687_s22 + $0x4e8] ss:$16 sps:$4 sm:$0xff]  }
 0x352   : > { %7479 = vmatprep.subr.bf16.mxu1 %v12890_v43  ;;  %7468 = vmatprep.mubr.bf16.mxu0 %v14820_v41  ;;  %v12900_v41 = vld [vmem:[%s14687_s22 + $0x668] ss:$16 sps:$4 sm:$0xff]  }
 0x353   : > { %7509 = vmatprep.mubr.bf16.mxu1 %v14824_v44  ;;  %v12905_v44 = vld [vmem:[%s14687_s22 + $0x48c] ss:$16 sps:$4 sm:$0xff]   ;;  %v12924_v43 = vld [vmem:[%s14687_s22 + $0x6e8] ss:$16 sps:$4 sm:$0xff]  }
 0x354   : > { %7439 = vmatpush1.bf16.msra.mxu0 %v12885_v56  ;;  %v12929_v56 = vld [vmem:[%s14687_s22 + $0x50c] ss:$16 sps:$4 sm:$0xff]  }
 0x355   : > { %7480 = vmatpush1.bf16.msra.mxu1 %v12888_v61  ;;  %7440 = vmatprep.subr.bf16.mxu0 %v12893_v58  ;;  %v12932_v61 = vld [vmem:[%s14687_s22 + $0x70c] ss:$16 sps:$4 sm:$0xff]   ;;  %v12927_v58 = vld [vmem:[%s14687_s22 + $0x508] ss:$16 sps:$4 sm:$0xff]  }
 0x356   : > { %7481 = vmatprep.subr.bf16.mxu1 %v12896_v63  ;;  %v12930_v63 = vld [vmem:[%s14687_s22 + $0x708] ss:$16 sps:$4 sm:$0xff]  }
 0x358   : > { %7441 = vmatpush1.bf16.msra.mxu0 %v12891_v12  ;;  %v12935_v12 = vld [vmem:[%s14687_s22 + $0x52c] ss:$16 sps:$4 sm:$0xff]  }
 0x359   : > { %7482 = vmatpush1.bf16.msra.mxu1 %v12894_v13  ;;  %7442 = vmatprep.subr.bf16.mxu0 %v12899_v4  ;;  %v12938_v13 = vld [vmem:[%s14687_s22 + $0x72c] ss:$16 sps:$4 sm:$0xff]   ;;  %v12933_v4 = vld [vmem:[%s14687_s22 + $0x528] ss:$16 sps:$4 sm:$0xff]  }
 0x35a   : > { %7483 = vmatprep.subr.bf16.mxu1 %v12902_v5  ;;  %v12936_v5 = vld [vmem:[%s14687_s22 + $0x728] ss:$16 sps:$4 sm:$0xff]  }
 0x35c   : > { %7443 = vmatpush1.bf16.msra.mxu0 %v12897_v8  ;;  %v12941_v8 = vld [vmem:[%s14687_s22 + $0x54c] ss:$16 sps:$4 sm:$0xff]  }
 0x35d   : > { %7484 = vmatpush1.bf16.msra.mxu1 %v12900_v41  ;;  %7444 = vmatprep.subr.bf16.mxu0 %v12905_v44  ;;  %v12944_v41 = vld [vmem:[%s14687_s22 + $0x74c] ss:$16 sps:$4 sm:$0xff]   ;;  %v12939_v44 = vld [vmem:[%s14687_s22 + $0x548] ss:$16 sps:$4 sm:$0xff]  }
 0x35e   : > { %7485 = vmatprep.subr.bf16.mxu1 %v12908_v9  ;;  %v12942_v9 = vld [vmem:[%s14687_s22 + $0x748] ss:$16 sps:$4 sm:$0xff]  }
 0x360   : > { %7445 = vmatpush1.bf16.msra.mxu0 %v12903_v17  ;;  %v12947_v17 = vld [vmem:[%s14687_s22 + $0x56c] ss:$16 sps:$4 sm:$0xff]  }
 0x361   : > { %7486 = vmatpush1.bf16.msra.mxu1 %v12906_v20  ;;  %7446 = vmatprep.subr.bf16.mxu0 %v12911_v51  ;;  %v12950_v20 = vld [vmem:[%s14687_s22 + $0x76c] ss:$16 sps:$4 sm:$0xff]   ;;  %v12945_v51 = vld [vmem:[%s14687_s22 + $0x568] ss:$16 sps:$4 sm:$0xff]  }
 0x362   : > { %7487 = vmatprep.subr.bf16.mxu1 %v12914_v21  ;;  %v7142_v28 = vpop.f32.mrb[20].mxu0  ;;  %v12948_v21 = vld [vmem:[%s14687_s22 + $0x768] ss:$16 sps:$4 sm:$0xff]  }
 0x363   : > { %v7183_v29 = vpop.f32.mrb[20].mxu1  ;;  %v7143_v30 = vadd.f32 %v7142_v28, %v15405_v35  ;;  %v7144_v31 = vpop.f32.mrb[21].mxu0  ;;  %v12923_v35 = vld [vmem:[%s14687_s22 + $0x4ec] ss:$16 sps:$4 sm:$0xff]  }
 0x364   : > { %v7185_v37 = vpop.f32.mrb[21].mxu1  ;;  %v7145_v38 = vadd.f32 %v7144_v31, %v15409_v40  ;;  %v7146_v16 = vpop.f32.mrb[22].mxu0  ;;  %7447 = vmatpush1.bf16.msra.mxu0 %v12909_v62  ;;  %v12926_v40 = vld [vmem:[%s14687_s22 + $0x6ec] ss:$16 sps:$4 sm:$0xff]   ;;  %v12960_v31 = vld [vmem:[%s14687_s22 + $0x7a8] ss:$16 sps:$4 sm:$0xff]  }
 0x365   : > { %v7187_v39 = vpop.f32.mrb[22].mxu1  ;;  %7488 = vmatpush1.bf16.msra.mxu1 %v12912_v23  ;;  %v15479_v48 = vadd.f32 %v7183_v29, %v7143_v30  ;;  %v7147_v49 = vpop.f32.mrb[23].mxu0  ;;  %7448 = vmatprep.subr.bf16.mxu0 %v12917_v26  ;;  %v12953_v62 = vld [vmem:[%s14687_s22 + $0x58c] ss:$16 sps:$4 sm:$0xff]   ;;  %v12951_v26 = vld [vmem:[%s14687_s22 + $0x588] ss:$16 sps:$4 sm:$0xff]  }
 0x366   : > { %v7188_v59 = vpop.f32.mrb[23].mxu1  ;;  %7489 = vmatprep.subr.bf16.mxu1 %v12920_v27  ;;  %v15483_v60 = vadd.f32 %v7185_v37, %v7145_v38  ;;  %v12956_v23 = vld [vmem:[%s14687_s22 + $0x78c] ss:$16 sps:$4 sm:$0xff]   ;;  %v12954_v27 = vld [vmem:[%s14687_s22 + $0x788] ss:$16 sps:$4 sm:$0xff]  }
 0x367   : > { %v12959_v28 = vld [vmem:[%s14687_s22 + $0x5ac] ss:$16 sps:$4 sm:$0xff]   ;;  %v12957_v30 = vld [vmem:[%s14687_s22 + $0x5a8] ss:$16 sps:$4 sm:$0xff]  }
 0x368   : > { %7449 = vmatpush1.bf16.msra.mxu0 %v12915_v22  ;;  %v12962_v29 = vld [vmem:[%s14687_s22 + $0x7ac] ss:$16 sps:$4 sm:$0xff]   ;;  %v12963_v16 = vld [vmem:[%s14687_s22 + $0x5c8] ss:$16 sps:$4 sm:$0xff]  }
 0x369   : > { %7490 = vmatpush1.bf16.msra.mxu1 %v12918_v42  ;;  %7450 = vmatprep.subr.bf16.mxu0 %v12923_v35  ;;  %v12965_v37 = vld [vmem:[%s14687_s22 + $0x5cc] ss:$16 sps:$4 sm:$0xff]   ;;  %v12966_v39 = vld [vmem:[%s14687_s22 + $0x7c8] ss:$16 sps:$4 sm:$0xff]  }
 0x36a   : > { %7491 = vmatprep.subr.bf16.mxu1 %v12926_v40  ;;  %v12968_v38 = vld [vmem:[%s14687_s22 + $0x7cc] ss:$16 sps:$4 sm:$0xff]   ;;  %v12969_v49 = vld [vmem:[%s14687_s22 + $0x5e8] ss:$16 sps:$4 sm:$0xff]  }
 0x36b   : > { %v12971_v22 = vld [vmem:[%s14687_s22 + $0x5ec] ss:$16 sps:$4 sm:$0xff]   ;;  %v12972_v59 = vld [vmem:[%s14687_s22 + $0x7e8] ss:$16 sps:$4 sm:$0xff]  }
 0x36c   : > { %7451 = vmatpush1.bf16.msra.mxu0 %v12921_v53  ;;  %v12974_v42 = vld [vmem:[%s14687_s22 + $0x7ec] ss:$16 sps:$4 sm:$0xff]   ;;  %v12975_v53 = vld [vmem:[%s14687_s22 + $0x808] ss:$16 sps:$4 sm:$0xff]  }
 0x36d   : > { %7492 = vmatpush1.bf16.msra.mxu1 %v12924_v43  ;;  %7452 = vmatprep.subr.bf16.mxu0 %v12929_v56  ;;  %v12977_v35 = vld [vmem:[%s14687_s22 + $0x80c] ss:$16 sps:$4 sm:$0xff]   ;;  %v12978_v43 = vld [vmem:[%s14687_s22 + $0xa08] ss:$16 sps:$4 sm:$0xff]  }
 0x36e   : > { %7493 = vmatprep.subr.bf16.mxu1 %v12932_v61  ;;  %v12980_v40 = vld [vmem:[%s14687_s22 + $0xa0c] ss:$16 sps:$4 sm:$0xff]  }
 0x36f   : > { %v12983_v56 = vld [vmem:[%s14687_s22 + $0x82c] ss:$16 sps:$4 sm:$0xff]  }
 0x370   : > { %7453 = vmatpush1.bf16.msra.mxu0 %v12927_v58  ;;  %v12986_v61 = vld [vmem:[%s14687_s22 + $0xa2c] ss:$16 sps:$4 sm:$0xff]   ;;  %v12981_v58 = vld [vmem:[%s14687_s22 + $0x828] ss:$16 sps:$4 sm:$0xff]  }
 0x371   : > { %7494 = vmatpush1.bf16.msra.mxu1 %v12930_v63  ;;  %7454 = vmatprep.subr.bf16.mxu0 %v12935_v12  ;;  %v12984_v63 = vld [vmem:[%s14687_s22 + $0xa28] ss:$16 sps:$4 sm:$0xff]   ;;  %v12989_v12 = vld [vmem:[%s14687_s22 + $0x84c] ss:$16 sps:$4 sm:$0xff]  }
 0x372   : > { %7495 = vmatprep.subr.bf16.mxu1 %v12938_v13  ;;  %v12992_v13 = vld [vmem:[%s14687_s22 + $0xa4c] ss:$16 sps:$4 sm:$0xff]  }
 0x374   : > { %7455 = vmatpush1.bf16.msra.mxu0 %v12933_v4  ;;  %v12995_v4 = vld [vmem:[%s14687_s22 + $0x86c] ss:$16 sps:$4 sm:$0xff]  }
 0x375   : > { %7496 = vmatpush1.bf16.msra.mxu1 %v12936_v5  ;;  %7456 = vmatprep.subr.bf16.mxu0 %v12941_v8  ;;  %v12998_v5 = vld [vmem:[%s14687_s22 + $0xa6c] ss:$16 sps:$4 sm:$0xff]   ;;  %v12993_v8 = vld [vmem:[%s14687_s22 + $0x868] ss:$16 sps:$4 sm:$0xff]  }
 0x376   : > { %7497 = vmatprep.subr.bf16.mxu1 %v12944_v41  ;;  %v13004_v41 = vld [vmem:[%s14687_s22 + $0xa8c] ss:$16 sps:$4 sm:$0xff]  }
 0x378   : > { %7457 = vmatpush1.bf16.msra.mxu0 %v12939_v44  ;;  %v12999_v44 = vld [vmem:[%s14687_s22 + $0x888] ss:$16 sps:$4 sm:$0xff]  }
 0x379   : > { %7498 = vmatpush1.bf16.msra.mxu1 %v12942_v9  ;;  %7458 = vmatprep.subr.bf16.mxu0 %v12947_v17  ;;  %v13002_v9 = vld [vmem:[%s14687_s22 + $0xa88] ss:$16 sps:$4 sm:$0xff]   ;;  %v13007_v17 = vld [vmem:[%s14687_s22 + $0x8ac] ss:$16 sps:$4 sm:$0xff]  }
 0x37a   : > { %7499 = vmatprep.subr.bf16.mxu1 %v12950_v20  ;;  %v13010_v20 = vld [vmem:[%s14687_s22 + $0xaac] ss:$16 sps:$4 sm:$0xff]  }
 0x37c   : > { %7459 = vmatpush1.bf16.msra.mxu0 %v12945_v51  ;;  %v13005_v51 = vld [vmem:[%s14687_s22 + $0x8a8] ss:$16 sps:$4 sm:$0xff]  }
 0x37d   : > { %7500 = vmatpush1.bf16.msra.mxu1 %v12948_v21  ;;  %7460 = vmatprep.subr.bf16.mxu0 %v12953_v62  ;;  %v13008_v21 = vld [vmem:[%s14687_s22 + $0xaa8] ss:$16 sps:$4 sm:$0xff]   ;;  %v13013_v62 = vld [vmem:[%s14687_s22 + $0x8cc] ss:$16 sps:$4 sm:$0xff]  }
 0x37e   : > { %7501 = vmatprep.subr.bf16.mxu1 %v12956_v23  ;;  %v13016_v23 = vld [vmem:[%s14687_s22 + $0xacc] ss:$16 sps:$4 sm:$0xff]  }
 0x380   : > { %7461 = vmatpush1.bf16.msra.mxu0 %v12951_v26 }
 0x381   : > { %7502 = vmatpush1.bf16.msra.mxu1 %v12954_v27  ;;  %7462 = vmatprep.subr.bf16.mxu0 %v12959_v28 }
 0x382   : > { %7503 = vmatprep.subr.bf16.mxu1 %v12962_v29 }
 0x384   : > { %7463 = vmatpush1.bf16.msra.mxu0 %v12957_v30 }
 0x385   : > { %7504 = vmatpush1.bf16.msra.mxu1 %v12960_v31  ;;  %7464 = vmatprep.subr.bf16.mxu0 %v12965_v37 }
 0x386   : > { %7505 = vmatprep.subr.bf16.mxu1 %v12968_v38 }
 0x388   : > { %7465 = vmatpush1.bf16.msra.mxu0 %v12963_v16  ;;  %v13011_v16 = vld [vmem:[%s14687_s22 + $0x8c8] ss:$16 sps:$4 sm:$0xff]  }
 0x389   : > { %7506 = vmatpush1.bf16.msra.mxu1 %v12966_v39  ;;  %7466 = vmatprep.subr.bf16.mxu0 %v12971_v22  ;;  %v13014_v39 = vld [vmem:[%s14687_s22 + $0xac8] ss:$16 sps:$4 sm:$0xff]  }
 0x38a   : > { %7507 = vmatprep.subr.bf16.mxu1 %v12974_v42 }
 0x38c   : > { %7467 = vmatpush1.bf16.msra.mxu0 %v12969_v49 }
 0x38d   : > { %7508 = vmatpush1.bf16.msra.mxu1 %v12972_v59  ;;  %7518 = vmatprep.subr.bf16.mxu0 %v12977_v35  ;;  %v13017_v35 = vld [vmem:[%s14687_s22 + $0x8e8] ss:$16 sps:$4 sm:$0xff]  }
 0x38e   : > { %7559 = vmatprep.subr.bf16.mxu1 %v12980_v40  ;;  %v13020_v40 = vld [vmem:[%s14687_s22 + $0xae8] ss:$16 sps:$4 sm:$0xff]  }
 0x38f   : > { %7469 = vmatmul.mubr.bf16.vlgmr.msra.gmra.mrb[36].mxu0 %v14867_v24  ;;  %v12987_v24 = vld [vmem:[%s14687_s22 + $0x848] ss:$16 sps:$4 sm:$0xff]  }
 0x390   : > { %7510 = vmatmul.mubr.bf16.vlgmr.msra.gmra.mrb[36].mxu1 %v14869_v25  ;;  %7519 = vmatpush1.bf16.msra.mxu0 %v12975_v53  ;;  %v12990_v25 = vld [vmem:[%s14687_s22 + $0xa48] ss:$16 sps:$4 sm:$0xff]   ;;  %v13025_v53 = vld [vmem:[%s14687_s22 + $0x90c] ss:$16 sps:$4 sm:$0xff]  }
 0x391   : > { %7560 = vmatpush1.bf16.msra.mxu1 %v12978_v43  ;;  %7520 = vmatprep.subr.bf16.mxu0 %v12983_v56  ;;  %v13028_v43 = vld [vmem:[%s14687_s22 + $0xb0c] ss:$16 sps:$4 sm:$0xff]   ;;  %v13023_v56 = vld [vmem:[%s14687_s22 + $0x908] ss:$16 sps:$4 sm:$0xff]  }
 0x392   : > { %7561 = vmatprep.subr.bf16.mxu1 %v12986_v61  ;;  %7550 = vmatprep.mubr.bf16.mxu0 %v14880_v33  ;;  %v12996_v33 = vld [vmem:[%s14687_s22 + $0xa68] ss:$16 sps:$4 sm:$0xff]  }
 0x393   : > { %7591 = vmatprep.mubr.bf16.mxu1 %v14884_v36  ;;  %v13001_v36 = vld [vmem:[%s14687_s22 + $0x88c] ss:$16 sps:$4 sm:$0xff]   ;;  %v13026_v61 = vld [vmem:[%s14687_s22 + $0xb08] ss:$16 sps:$4 sm:$0xff]  }
 0x394   : > { %7521 = vmatpush1.bf16.msra.mxu0 %v12981_v58  ;;  %v13031_v58 = vld [vmem:[%s14687_s22 + $0x92c] ss:$16 sps:$4 sm:$0xff]  }
 0x395   : > { %7562 = vmatpush1.bf16.msra.mxu1 %v12984_v63  ;;  %7522 = vmatprep.subr.bf16.mxu0 %v12989_v12  ;;  %v13034_v63 = vld [vmem:[%s14687_s22 + $0xb2c] ss:$16 sps:$4 sm:$0xff]   ;;  %v13029_v12 = vld [vmem:[%s14687_s22 + $0x928] ss:$16 sps:$4 sm:$0xff]  }
 0x396   : > { %7563 = vmatprep.subr.bf16.mxu1 %v12992_v13  ;;  %v13032_v13 = vld [vmem:[%s14687_s22 + $0xb28] ss:$16 sps:$4 sm:$0xff]  }
 0x398   : > { %7523 = vmatpush1.bf16.msra.mxu0 %v12987_v24  ;;  %v13037_v24 = vld [vmem:[%s14687_s22 + $0x94c] ss:$16 sps:$4 sm:$0xff]  }
 0x399   : > { %7564 = vmatpush1.bf16.msra.mxu1 %v12990_v25  ;;  %7524 = vmatprep.subr.bf16.mxu0 %v12995_v4  ;;  %v13040_v25 = vld [vmem:[%s14687_s22 + $0xb4c] ss:$16 sps:$4 sm:$0xff]   ;;  %v13035_v4 = vld [vmem:[%s14687_s22 + $0x948] ss:$16 sps:$4 sm:$0xff]  }
 0x39a   : > { %7565 = vmatprep.subr.bf16.mxu1 %v12998_v5  ;;  %v13038_v5 = vld [vmem:[%s14687_s22 + $0xb48] ss:$16 sps:$4 sm:$0xff]  }
 0x39c   : > { %7525 = vmatpush1.bf16.msra.mxu0 %v12993_v8  ;;  %v13043_v8 = vld [vmem:[%s14687_s22 + $0x96c] ss:$16 sps:$4 sm:$0xff]  }
 0x39d   : > { %7566 = vmatpush1.bf16.msra.mxu1 %v12996_v33  ;;  %7526 = vmatprep.subr.bf16.mxu0 %v13001_v36  ;;  %v13046_v33 = vld [vmem:[%s14687_s22 + $0xb6c] ss:$16 sps:$4 sm:$0xff]   ;;  %v13041_v36 = vld [vmem:[%s14687_s22 + $0x968] ss:$16 sps:$4 sm:$0xff]  }
 0x39e   : > { %7567 = vmatprep.subr.bf16.mxu1 %v13004_v41  ;;  %v13044_v41 = vld [vmem:[%s14687_s22 + $0xb68] ss:$16 sps:$4 sm:$0xff]  }
 0x3a0   : > { %7527 = vmatpush1.bf16.msra.mxu0 %v12999_v44  ;;  %v13049_v44 = vld [vmem:[%s14687_s22 + $0x98c] ss:$16 sps:$4 sm:$0xff]  }
 0x3a1   : > { %7568 = vmatpush1.bf16.msra.mxu1 %v13002_v9  ;;  %7528 = vmatprep.subr.bf16.mxu0 %v13007_v17  ;;  %v13052_v9 = vld [vmem:[%s14687_s22 + $0xb8c] ss:$16 sps:$4 sm:$0xff]   ;;  %v13047_v17 = vld [vmem:[%s14687_s22 + $0x988] ss:$16 sps:$4 sm:$0xff]  }
 0x3a2   : > { %7569 = vmatprep.subr.bf16.mxu1 %v13010_v20  ;;  %v7224_v26 = vpop.f32.mrb[24].mxu0  ;;  %v13050_v20 = vld [vmem:[%s14687_s22 + $0xb88] ss:$16 sps:$4 sm:$0xff]  }
 0x3a3   : > { %v7265_v27 = vpop.f32.mrb[24].mxu1  ;;  %v7225_v28 = vadd.f32 %v7224_v26, %v15479_v48  ;;  %v7226_v29 = vpop.f32.mrb[25].mxu0  ;;  %v13019_v48 = vld [vmem:[%s14687_s22 + $0x8ec] ss:$16 sps:$4 sm:$0xff]  }
 0x3a4   : > { %v7267_v30 = vpop.f32.mrb[25].mxu1  ;;  %v7227_v31 = vadd.f32 %v7226_v29, %v15483_v60  ;;  %v7228_v37 = vpop.f32.mrb[26].mxu0  ;;  %7529 = vmatpush1.bf16.msra.mxu0 %v13005_v51  ;;  %v13022_v60 = vld [vmem:[%s14687_s22 + $0xaec] ss:$16 sps:$4 sm:$0xff]   ;;  %v13062_v29 = vld [vmem:[%s14687_s22 + $0xbc8] ss:$16 sps:$4 sm:$0xff]  }
 0x3a5   : > { %v7269_v38 = vpop.f32.mrb[26].mxu1  ;;  %7570 = vmatpush1.bf16.msra.mxu1 %v13008_v21  ;;  %v15553_v22 = vadd.f32 %v7265_v27, %v7225_v28  ;;  %v7229_v42 = vpop.f32.mrb[27].mxu0  ;;  %7530 = vmatprep.subr.bf16.mxu0 %v13013_v62  ;;  %v13055_v51 = vld [vmem:[%s14687_s22 + $0x9ac] ss:$16 sps:$4 sm:$0xff]   ;;  %v13053_v62 = vld [vmem:[%s14687_s22 + $0x9a8] ss:$16 sps:$4 sm:$0xff]  }
 0x3a6   : > { %v7270_v49 = vpop.f32.mrb[27].mxu1  ;;  %7571 = vmatprep.subr.bf16.mxu1 %v13016_v23  ;;  %v15557_v59 = vadd.f32 %v7267_v30, %v7227_v31  ;;  %v13058_v21 = vld [vmem:[%s14687_s22 + $0xbac] ss:$16 sps:$4 sm:$0xff]   ;;  %v13056_v23 = vld [vmem:[%s14687_s22 + $0xba8] ss:$16 sps:$4 sm:$0xff]  }
 0x3a7   : > { %v13061_v26 = vld [vmem:[%s14687_s22 + $0x9cc] ss:$16 sps:$4 sm:$0xff]   ;;  %v13059_v28 = vld [vmem:[%s14687_s22 + $0x9c8] ss:$16 sps:$4 sm:$0xff]  }
 0x3a8   : > { %7531 = vmatpush1.bf16.msra.mxu0 %v13011_v16  ;;  %v13064_v27 = vld [vmem:[%s14687_s22 + $0xbcc] ss:$16 sps:$4 sm:$0xff]   ;;  %v13065_v37 = vld [vmem:[%s14687_s22 + $0x9e8] ss:$16 sps:$4 sm:$0xff]  }
 0x3a9   : > { %7572 = vmatpush1.bf16.msra.mxu1 %v13014_v39  ;;  %7532 = vmatprep.subr.bf16.mxu0 %v13019_v48  ;;  %v13067_v30 = vld [vmem:[%s14687_s22 + $0x9ec] ss:$16 sps:$4 sm:$0xff]   ;;  %v13068_v38 = vld [vmem:[%s14687_s22 + $0xbe8] ss:$16 sps:$4 sm:$0xff]  }
 0x3aa   : > { %7573 = vmatprep.subr.bf16.mxu1 %v13022_v60  ;;  %v13070_v31 = vld [vmem:[%s14687_s22 + $0xbec] ss:$16 sps:$4 sm:$0xff]   ;;  %v13071_v42 = vld [vmem:[%s14687_s22 + $0xc08] ss:$16 sps:$4 sm:$0xff]  }
 0x3ab   : > { %v13073_v16 = vld [vmem:[%s14687_s22 + $0xc0c] ss:$16 sps:$4 sm:$0xff]   ;;  %v13074_v49 = vld [vmem:[%s14687_s22 + $0xe08] ss:$16 sps:$4 sm:$0xff]  }
 0x3ac   : > { %7533 = vmatpush1.bf16.msra.mxu0 %v13017_v35  ;;  %v13076_v39 = vld [vmem:[%s14687_s22 + $0xe0c] ss:$16 sps:$4 sm:$0xff]   ;;  %v13077_v35 = vld [vmem:[%s14687_s22 + $0xc28] ss:$16 sps:$4 sm:$0xff]  }
 0x3ad   : > { %7574 = vmatpush1.bf16.msra.mxu1 %v13020_v40  ;;  %7534 = vmatprep.subr.bf16.mxu0 %v13025_v53  ;;  %v13079_v48 = vld [vmem:[%s14687_s22 + $0xc2c] ss:$16 sps:$4 sm:$0xff]   ;;  %v13080_v40 = vld [vmem:[%s14687_s22 + $0xe28] ss:$16 sps:$4 sm:$0xff]  }
 0x3ae   : > { %7575 = vmatprep.subr.bf16.mxu1 %v13028_v43  ;;  %v13082_v60 = vld [vmem:[%s14687_s22 + $0xe2c] ss:$16 sps:$4 sm:$0xff]  }
 0x3af   : > { %v13085_v53 = vld [vmem:[%s14687_s22 + $0xc4c] ss:$16 sps:$4 sm:$0xff]  }
 0x3b0   : > { %7535 = vmatpush1.bf16.msra.mxu0 %v13023_v56  ;;  %v13088_v43 = vld [vmem:[%s14687_s22 + $0xe4c] ss:$16 sps:$4 sm:$0xff]  }
 0x3b1   : > { %7576 = vmatpush1.bf16.msra.mxu1 %v13026_v61  ;;  %7536 = vmatprep.subr.bf16.mxu0 %v13031_v58  ;;  %v13091_v56 = vld [vmem:[%s14687_s22 + $0xc6c] ss:$16 sps:$4 sm:$0xff]   ;;  %v13089_v58 = vld [vmem:[%s14687_s22 + $0xc68] ss:$16 sps:$4 sm:$0xff]  }
 0x3b2   : > { %7577 = vmatprep.subr.bf16.mxu1 %v13034_v63  ;;  %v13094_v61 = vld [vmem:[%s14687_s22 + $0xe6c] ss:$16 sps:$4 sm:$0xff]  }
 0x3b3   : > { %v13100_v63 = vld [vmem:[%s14687_s22 + $0xe8c] ss:$16 sps:$4 sm:$0xff]  }
 0x3b4   : > { %7537 = vmatpush1.bf16.msra.mxu0 %v13029_v12  ;;  %v13095_v12 = vld [vmem:[%s14687_s22 + $0xc88] ss:$16 sps:$4 sm:$0xff]  }
 0x3b5   : > { %7578 = vmatpush1.bf16.msra.mxu1 %v13032_v13  ;;  %7538 = vmatprep.subr.bf16.mxu0 %v13037_v24  ;;  %v13098_v13 = vld [vmem:[%s14687_s22 + $0xe88] ss:$16 sps:$4 sm:$0xff]   ;;  %v13103_v24 = vld [vmem:[%s14687_s22 + $0xcac] ss:$16 sps:$4 sm:$0xff]  }
 0x3b6   : > { %7579 = vmatprep.subr.bf16.mxu1 %v13040_v25  ;;  %v13106_v25 = vld [vmem:[%s14687_s22 + $0xeac] ss:$16 sps:$4 sm:$0xff]  }
 0x3b8   : > { %7539 = vmatpush1.bf16.msra.mxu0 %v13035_v4  ;;  %v13101_v4 = vld [vmem:[%s14687_s22 + $0xca8] ss:$16 sps:$4 sm:$0xff]  }
 0x3b9   : > { %7580 = vmatpush1.bf16.msra.mxu1 %v13038_v5  ;;  %7540 = vmatprep.subr.bf16.mxu0 %v13043_v8  ;;  %v13104_v5 = vld [vmem:[%s14687_s22 + $0xea8] ss:$16 sps:$4 sm:$0xff]   ;;  %v13109_v8 = vld [vmem:[%s14687_s22 + $0xccc] ss:$16 sps:$4 sm:$0xff]  }
 0x3ba   : > { %7581 = vmatprep.subr.bf16.mxu1 %v13046_v33  ;;  %v13112_v33 = vld [vmem:[%s14687_s22 + $0xecc] ss:$16 sps:$4 sm:$0xff]  }
 0x3bc   : > { %7541 = vmatpush1.bf16.msra.mxu0 %v13041_v36 }
 0x3bd   : > { %7582 = vmatpush1.bf16.msra.mxu1 %v13044_v41  ;;  %7542 = vmatprep.subr.bf16.mxu0 %v13049_v44 }
 0x3be   : > { %7583 = vmatprep.subr.bf16.mxu1 %v13052_v9 }
 0x3c0   : > { %7543 = vmatpush1.bf16.msra.mxu0 %v13047_v17 }
 0x3c1   : > { %7584 = vmatpush1.bf16.msra.mxu1 %v13050_v20  ;;  %7544 = vmatprep.subr.bf16.mxu0 %v13055_v51  ;;  %v13107_v20 = vld [vmem:[%s14687_s22 + $0xcc8] ss:$16 sps:$4 sm:$0xff]   ;;  %v550_v51 = vld [vmem:[#allocation2] sm:$0xff] }
 0x3c2   : > { %7585 = vmatprep.subr.bf16.mxu1 %v13058_v21 }
 0x3c4   : > { %7545 = vmatpush1.bf16.msra.mxu0 %v13053_v62  ;;  %v551_v62 = vld [vmem:[#allocation2 + $0x8] sm:$0xff] }
 0x3c5   : > { %7586 = vmatpush1.bf16.msra.mxu1 %v13056_v23  ;;  %7546 = vmatprep.subr.bf16.mxu0 %v13061_v26 }
 0x3c6   : > { %7587 = vmatprep.subr.bf16.mxu1 %v13064_v27  ;;  %v13110_v27 = vld [vmem:[%s14687_s22 + $0xec8] ss:$16 sps:$4 sm:$0xff]  }
 0x3c8   : > { %7547 = vmatpush1.bf16.msra.mxu0 %v13059_v28 }
 0x3c9   : > { %7588 = vmatpush1.bf16.msra.mxu1 %v13062_v29  ;;  %7548 = vmatprep.subr.bf16.mxu0 %v13067_v30  ;;  %v13115_v30 = vld [vmem:[%s14687_s22 + $0xcec] ss:$16 sps:$4 sm:$0xff]  }
 0x3ca   : > { %7589 = vmatprep.subr.bf16.mxu1 %v13070_v31  ;;  %v13118_v31 = vld [vmem:[%s14687_s22 + $0xeec] ss:$16 sps:$4 sm:$0xff]  }
 0x3cc   : > { %7549 = vmatpush1.bf16.msra.mxu0 %v13065_v37 }
 0x3cd   : > { %7590 = vmatpush1.bf16.msra.mxu1 %v13068_v38  ;;  %7600 = vmatprep.subr.bf16.mxu0 %v13073_v16  ;;  %v13113_v16 = vld [vmem:[%s14687_s22 + $0xce8] ss:$16 sps:$4 sm:$0xff]  }
 0x3ce   : > { %7641 = vmatprep.subr.bf16.mxu1 %v13076_v39  ;;  %v13116_v39 = vld [vmem:[%s14687_s22 + $0xee8] ss:$16 sps:$4 sm:$0xff]  }
 0x3cf   : > { %7551 = vmatmul.mubr.bf16.vlgmr.msra.gmra.mrb[40].mxu0 %v14949_v46  ;;  %v13083_v46 = vld [vmem:[%s14687_s22 + $0xc48] ss:$16 sps:$4 sm:$0xff]  }
 0x3d0   : > { %7592 = vmatmul.mubr.bf16.vlgmr.msra.gmra.mrb[40].mxu1 %v14951_v47  ;;  %7601 = vmatpush1.bf16.msra.mxu0 %v13071_v42  ;;  %v13086_v47 = vld [vmem:[%s14687_s22 + $0xe48] ss:$16 sps:$4 sm:$0xff]   ;;  %v13121_v42 = vld [vmem:[%s14687_s22 + $0xd0c] ss:$16 sps:$4 sm:$0xff]  }
 0x3d1   : > { %7642 = vmatpush1.bf16.msra.mxu1 %v13074_v49  ;;  %7602 = vmatprep.subr.bf16.mxu0 %v13079_v48  ;;  %v13124_v49 = vld [vmem:[%s14687_s22 + $0xf0c] ss:$16 sps:$4 sm:$0xff]   ;;  %v13119_v48 = vld [vmem:[%s14687_s22 + $0xd08] ss:$16 sps:$4 sm:$0xff]  }
 0x3d2   : > { %7643 = vmatprep.subr.bf16.mxu1 %v13082_v60  ;;  %7632 = vmatprep.mubr.bf16.mxu0 %v14957_v52  ;;  %v13092_v52 = vld [vmem:[%s14687_s22 + $0xe68] ss:$16 sps:$4 sm:$0xff]  }
 0x3d3   : > { %7673 = vmatprep.mubr.bf16.mxu1 %v14959_v54  ;;  %v13097_v54 = vld [vmem:[%s14687_s22 + $0xc8c] ss:$16 sps:$4 sm:$0xff]   ;;  %v13122_v60 = vld [vmem:[%s14687_s22 + $0xf08] ss:$16 sps:$4 sm:$0xff]  }
 0x3d4   : > { %7603 = vmatpush1.bf16.msra.mxu0 %v13077_v35  ;;  %v13127_v35 = vld [vmem:[%s14687_s22 + $0xd2c] ss:$16 sps:$4 sm:$0xff]  }
 0x3d5   : > { %7644 = vmatpush1.bf16.msra.mxu1 %v13080_v40  ;;  %7604 = vmatprep.subr.bf16.mxu0 %v13085_v53  ;;  %v13130_v40 = vld [vmem:[%s14687_s22 + $0xf2c] ss:$16 sps:$4 sm:$0xff]   ;;  %v13125_v53 = vld [vmem:[%s14687_s22 + $0xd28] ss:$16 sps:$4 sm:$0xff]  }
 0x3d6   : > { %7645 = vmatprep.subr.bf16.mxu1 %v13088_v43  ;;  %v13128_v43 = vld [vmem:[%s14687_s22 + $0xf28] ss:$16 sps:$4 sm:$0xff]  }
 0x3d8   : > { %7605 = vmatpush1.bf16.msra.mxu0 %v13083_v46  ;;  %v13133_v46 = vld [vmem:[%s14687_s22 + $0xd4c] ss:$16 sps:$4 sm:$0xff]  }
 0x3d9   : > { %7646 = vmatpush1.bf16.msra.mxu1 %v13086_v47  ;;  %7606 = vmatprep.subr.bf16.mxu0 %v13091_v56  ;;  %v13136_v47 = vld [vmem:[%s14687_s22 + $0xf4c] ss:$16 sps:$4 sm:$0xff]   ;;  %v13131_v56 = vld [vmem:[%s14687_s22 + $0xd48] ss:$16 sps:$4 sm:$0xff]  }
 0x3da   : > { %7647 = vmatprep.subr.bf16.mxu1 %v13094_v61  ;;  %v13134_v61 = vld [vmem:[%s14687_s22 + $0xf48] ss:$16 sps:$4 sm:$0xff]  }
 0x3dc   : > { %7607 = vmatpush1.bf16.msra.mxu0 %v13089_v58  ;;  %v13139_v58 = vld [vmem:[%s14687_s22 + $0xd6c] ss:$16 sps:$4 sm:$0xff]  }
 0x3dd   : > { %7648 = vmatpush1.bf16.msra.mxu1 %v13092_v52  ;;  %7608 = vmatprep.subr.bf16.mxu0 %v13097_v54  ;;  %v13142_v52 = vld [vmem:[%s14687_s22 + $0xf6c] ss:$16 sps:$4 sm:$0xff]   ;;  %v13137_v54 = vld [vmem:[%s14687_s22 + $0xd68] ss:$16 sps:$4 sm:$0xff]  }
 0x3de   : > { %7649 = vmatprep.subr.bf16.mxu1 %v13100_v63  ;;  %v13140_v63 = vld [vmem:[%s14687_s22 + $0xf68] ss:$16 sps:$4 sm:$0xff]  }
 0x3e0   : > { %7609 = vmatpush1.bf16.msra.mxu0 %v13095_v12  ;;  %v13145_v12 = vld [vmem:[%s14687_s22 + $0xd8c] ss:$16 sps:$4 sm:$0xff]  }
 0x3e1   : > { %7650 = vmatpush1.bf16.msra.mxu1 %v13098_v13  ;;  %7610 = vmatprep.subr.bf16.mxu0 %v13103_v24  ;;  %v13148_v13 = vld [vmem:[%s14687_s22 + $0xf8c] ss:$16 sps:$4 sm:$0xff]   ;;  %v13143_v24 = vld [vmem:[%s14687_s22 + $0xd88] ss:$16 sps:$4 sm:$0xff]  }
 0x3e2   : > { %7651 = vmatprep.subr.bf16.mxu1 %v13106_v25  ;;  %v7306_v36 = vpop.f32.mrb[28].mxu0  ;;  %v13146_v25 = vld [vmem:[%s14687_s22 + $0xf88] ss:$16 sps:$4 sm:$0xff]  }
 0x3e3   : > { %v7347_v41 = vpop.f32.mrb[28].mxu1  ;;  %v7307_v44 = vadd.f32 %v7306_v36, %v15553_v22  ;;  %v7308_v9 = vpop.f32.mrb[29].mxu0  ;;  %v13157_v36 = vld [vmem:[%s14687_s22 + $0xdcc] ss:$16 sps:$4 sm:$0xff]  }
 0x3e4   : > { %v7349_v17 = vpop.f32.mrb[29].mxu1  ;;  %v7309_v21 = vadd.f32 %v7308_v9, %v15557_v59  ;;  %v7310_v23 = vpop.f32.mrb[30].mxu0  ;;  %7611 = vmatpush1.bf16.msra.mxu0 %v13101_v4  ;;  %v13151_v4 = vld [vmem:[%s14687_s22 + $0xdac] ss:$16 sps:$4 sm:$0xff]   ;;  %v13158_v9 = vld [vmem:[%s14687_s22 + $0xfc8] ss:$16 sps:$4 sm:$0xff]  }
 0x3e5   : > { %v7351_v26 = vpop.f32.mrb[30].mxu1  ;;  %7652 = vmatpush1.bf16.msra.mxu1 %v13104_v5  ;;  %v7348_v28 = vadd.f32 %v7347_v41, %v7307_v44  ;;  %v7311_v29 = vpop.f32.mrb[31].mxu0  ;;  %7612 = vmatprep.subr.bf16.mxu0 %v13109_v8  ;;  %v13154_v5 = vld [vmem:[%s14687_s22 + $0xfac] ss:$16 sps:$4 sm:$0xff]   ;;  %v13149_v8 = vld [vmem:[%s14687_s22 + $0xda8] ss:$16 sps:$4 sm:$0xff]  }
 0x3e6   : > { %v7352_v22 = vpop.f32.mrb[31].mxu1  ;;  %7653 = vmatprep.subr.bf16.mxu1 %v13112_v33  ;;  %v7350_v37 = vadd.f32 %v7349_v17, %v7309_v21  ;;  %v13152_v33 = vld [vmem:[%s14687_s22 + $0xfa8] ss:$16 sps:$4 sm:$0xff]   ;;  %v13160_v41 = vld [vmem:[%s14687_s22 + $0xfcc] ss:$16 sps:$4 sm:$0xff]  }
 0x3e7   : > { %v8010_v59 = vadd.f32 %v7348_v28, %v550_v51  ;;  %v13155_v44 = vld [vmem:[%s14687_s22 + $0xdc8] ss:$16 sps:$4 sm:$0xff]   ;;  %v13163_v17 = vld [vmem:[%s14687_s22 + $0xdec] ss:$16 sps:$4 sm:$0xff]  }
 0x3e8   : > { %v8011_v38 = vadd.f32 %v7350_v37, %v551_v62  ;;  %7613 = vmatpush1.bf16.msra.mxu0 %v13107_v20  ;;  %v13166_v20 = vld [vmem:[%s14687_s22 + $0xfec] ss:$16 sps:$4 sm:$0xff]   ;;  %v13161_v51 = vld [vmem:[%s14687_s22 + $0xde8] ss:$16 sps:$4 sm:$0xff]  }
 0x3e9   : > { %7654 = vmatpush1.bf16.msra.mxu1 %v13110_v27  ;;  %8014 = vst [vmem:[#allocation2] sm:$0xff] %v8010_v59  ;;  %7614 = vmatprep.subr.bf16.mxu0 %v13115_v30  ;;  %v13164_v21 = vld [vmem:[%s14687_s22 + $0xfe8] ss:$16 sps:$4 sm:$0xff]   ;;  %v13169_v62 = vld [vmem:[%s14687_s22 + $0x100c] ss:$16 sps:$4 sm:$0xff]  }
 0x3ea   : > { %7655 = vmatprep.subr.bf16.mxu1 %v13118_v31  ;;  %8015 = vst [vmem:[#allocation2 + $0x8] sm:$0xff] %v8011_v38  ;;  %v13172_v23 = vld [vmem:[%s14687_s22 + $0x120c] ss:$16 sps:$4 sm:$0xff]   ;;  %v13167_v26 = vld [vmem:[%s14687_s22 + $0x1008] ss:$16 sps:$4 sm:$0xff]  }
 0x3eb   : > { %v13170_v27 = vld [vmem:[%s14687_s22 + $0x1208] ss:$16 sps:$4 sm:$0xff]   ;;  %v13175_v28 = vld [vmem:[%s14687_s22 + $0x102c] ss:$16 sps:$4 sm:$0xff]  }
 0x3ec   : > { %7615 = vmatpush1.bf16.msra.mxu0 %v13113_v16  ;;  %v13178_v29 = vld [vmem:[%s14687_s22 + $0x122c] ss:$16 sps:$4 sm:$0xff]   ;;  %v13173_v22 = vld [vmem:[%s14687_s22 + $0x1028] ss:$16 sps:$4 sm:$0xff]  }
 0x3ed   : > { %7656 = vmatpush1.bf16.msra.mxu1 %v13116_v39  ;;  %7616 = vmatprep.subr.bf16.mxu0 %v13121_v42  ;;  %v13176_v30 = vld [vmem:[%s14687_s22 + $0x1228] ss:$16 sps:$4 sm:$0xff]   ;;  %v13181_v31 = vld [vmem:[%s14687_s22 + $0x104c] ss:$16 sps:$4 sm:$0xff]  }
 0x3ee   : > { %7657 = vmatprep.subr.bf16.mxu1 %v13124_v49  ;;  %v13184_v37 = vld [vmem:[%s14687_s22 + $0x124c] ss:$16 sps:$4 sm:$0xff]   ;;  %v13185_v16 = vld [vmem:[%s14687_s22 + $0x1068] ss:$16 sps:$4 sm:$0xff]  }
 0x3ef   : > { %v13187_v59 = vld [vmem:[%s14687_s22 + $0x106c] ss:$16 sps:$4 sm:$0xff]   ;;  %v13191_v42 = vld [vmem:[%s14687_s22 + $0x1088] ss:$16 sps:$4 sm:$0xff]  }
 0x3f0   : > { %7617 = vmatpush1.bf16.msra.mxu0 %v13119_v48  ;;  %v13190_v38 = vld [vmem:[%s14687_s22 + $0x126c] ss:$16 sps:$4 sm:$0xff]   ;;  %v13194_v49 = vld [vmem:[%s14687_s22 + $0x1288] ss:$16 sps:$4 sm:$0xff]  }
 0x3f1   : > { %7658 = vmatpush1.bf16.msra.mxu1 %v13122_v60  ;;  %7618 = vmatprep.subr.bf16.mxu0 %v13127_v35  ;;  %v13196_v39 = vld [vmem:[%s14687_s22 + $0x128c] ss:$16 sps:$4 sm:$0xff]   ;;  %v13197_v35 = vld [vmem:[%s14687_s22 + $0x10a8] ss:$16 sps:$4 sm:$0xff]  }
 0x3f2   : > { %7659 = vmatprep.subr.bf16.mxu1 %v13130_v40  ;;  %v13199_v48 = vld [vmem:[%s14687_s22 + $0x10ac] ss:$16 sps:$4 sm:$0xff]   ;;  %v13200_v40 = vld [vmem:[%s14687_s22 + $0x12a8] ss:$16 sps:$4 sm:$0xff]  }
 0x3f3   : > { %v13202_v60 = vld [vmem:[%s14687_s22 + $0x12ac] ss:$16 sps:$4 sm:$0xff]  }
 0x3f4   : > { %7619 = vmatpush1.bf16.msra.mxu0 %v13125_v53  ;;  %v13205_v53 = vld [vmem:[%s14687_s22 + $0x10cc] ss:$16 sps:$4 sm:$0xff]  }
 0x3f5   : > { %7660 = vmatpush1.bf16.msra.mxu1 %v13128_v43  ;;  %7620 = vmatprep.subr.bf16.mxu0 %v13133_v46  ;;  %v13208_v43 = vld [vmem:[%s14687_s22 + $0x12cc] ss:$16 sps:$4 sm:$0xff]  }
 0x3f6   : > { %7661 = vmatprep.subr.bf16.mxu1 %v13136_v47 }
 0x3f8   : > { %7621 = vmatpush1.bf16.msra.mxu0 %v13131_v56 }
 0x3f9   : > { %7662 = vmatpush1.bf16.msra.mxu1 %v13134_v61  ;;  %7622 = vmatprep.subr.bf16.mxu0 %v13139_v58 }
 0x3fa   : > { %7663 = vmatprep.subr.bf16.mxu1 %v13142_v52 }
 0x3fc   : > { %7623 = vmatpush1.bf16.msra.mxu0 %v13137_v54 }
 0x3fd   : > { %7664 = vmatpush1.bf16.msra.mxu1 %v13140_v63  ;;  %7624 = vmatprep.subr.bf16.mxu0 %v13145_v12  ;;  %v13203_v12 = vld [vmem:[%s14687_s22 + $0x10c8] ss:$16 sps:$4 sm:$0xff]  }
 0x3fe   : > { %7665 = vmatprep.subr.bf16.mxu1 %v13148_v13  ;;  %v13206_v13 = vld [vmem:[%s14687_s22 + $0x12c8] ss:$16 sps:$4 sm:$0xff]  }
 0x400   : > { %7625 = vmatpush1.bf16.msra.mxu0 %v13143_v24 }
 0x401   : > { %7666 = vmatpush1.bf16.msra.mxu1 %v13146_v25  ;;  %7626 = vmatprep.subr.bf16.mxu0 %v13151_v4  ;;  %v13211_v4 = vld [vmem:[%s14687_s22 + $0x10ec] ss:$16 sps:$4 sm:$0xff]  }
 0x402   : > { %7667 = vmatprep.subr.bf16.mxu1 %v13154_v5  ;;  %v13214_v5 = vld [vmem:[%s14687_s22 + $0x12ec] ss:$16 sps:$4 sm:$0xff]  }
 0x404   : > { %7627 = vmatpush1.bf16.msra.mxu0 %v13149_v8  ;;  %v13209_v8 = vld [vmem:[%s14687_s22 + $0x10e8] ss:$16 sps:$4 sm:$0xff]  }
 0x405   : > { %7668 = vmatpush1.bf16.msra.mxu1 %v13152_v33  ;;  %7628 = vmatprep.subr.bf16.mxu0 %v13157_v36  ;;  %v13212_v33 = vld [vmem:[%s14687_s22 + $0x12e8] ss:$16 sps:$4 sm:$0xff]   ;;  %v13217_v36 = vld [vmem:[%s14687_s22 + $0x110c] ss:$16 sps:$4 sm:$0xff]  }
 0x406   : > { %7669 = vmatprep.subr.bf16.mxu1 %v13160_v41  ;;  %v13220_v41 = vld [vmem:[%s14687_s22 + $0x130c] ss:$16 sps:$4 sm:$0xff]  }
 0x408   : > { %7629 = vmatpush1.bf16.msra.mxu0 %v13155_v44  ;;  %v13215_v44 = vld [vmem:[%s14687_s22 + $0x1108] ss:$16 sps:$4 sm:$0xff]  }
 0x409   : > { %7670 = vmatpush1.bf16.msra.mxu1 %v13158_v9  ;;  %7630 = vmatprep.subr.bf16.mxu0 %v13163_v17  ;;  %v13218_v9 = vld [vmem:[%s14687_s22 + $0x1308] ss:$16 sps:$4 sm:$0xff]   ;;  %v13223_v17 = vld [vmem:[%s14687_s22 + $0x112c] ss:$16 sps:$4 sm:$0xff]  }
 0x40a   : > { %7671 = vmatprep.subr.bf16.mxu1 %v13166_v20  ;;  %v13226_v20 = vld [vmem:[%s14687_s22 + $0x132c] ss:$16 sps:$4 sm:$0xff]  }
 0x40c   : > { %7631 = vmatpush1.bf16.msra.mxu0 %v13161_v51  ;;  %v13221_v51 = vld [vmem:[%s14687_s22 + $0x1128] ss:$16 sps:$4 sm:$0xff]  }
 0x40d   : > { %7672 = vmatpush1.bf16.msra.mxu1 %v13164_v21  ;;  %7682 = vmatprep.subr.bf16.mxu0 %v13169_v62  ;;  %v13224_v21 = vld [vmem:[%s14687_s22 + $0x1328] ss:$16 sps:$4 sm:$0xff]   ;;  %v13229_v62 = vld [vmem:[%s14687_s22 + $0x114c] ss:$16 sps:$4 sm:$0xff]  }
 0x40e   : > { %7723 = vmatprep.subr.bf16.mxu1 %v13172_v23  ;;  %v13232_v23 = vld [vmem:[%s14687_s22 + $0x134c] ss:$16 sps:$4 sm:$0xff]  }
 0x40f   : > { %7633 = vmatmul.mubr.bf16.vlgmr.msra.gmra.mrb[44].mxu0 %v15029_v6  ;;  %v13179_v6 = vld [vmem:[%s14687_s22 + $0x1048] ss:$16 sps:$4 sm:$0xff]  }
 0x410   : > { %7674 = vmatmul.mubr.bf16.vlgmr.msra.gmra.mrb[44].mxu1 %v15031_v7  ;;  %7683 = vmatpush1.bf16.msra.mxu0 %v13167_v26  ;;  %v13182_v7 = vld [vmem:[%s14687_s22 + $0x1248] ss:$16 sps:$4 sm:$0xff]  }
 0x411   : > { %7724 = vmatpush1.bf16.msra.mxu1 %v13170_v27  ;;  %7684 = vmatprep.subr.bf16.mxu0 %v13175_v28  ;;  %v13227_v26 = vld [vmem:[%s14687_s22 + $0x1148] ss:$16 sps:$4 sm:$0xff]   ;;  %v13235_v28 = vld [vmem:[%s14687_s22 + $0x116c] ss:$16 sps:$4 sm:$0xff]  }
 0x412   : > { %7725 = vmatprep.subr.bf16.mxu1 %v13178_v29  ;;  %7714 = vmatprep.mubr.bf16.mxu0 %v15037_v14  ;;  %v13188_v14 = vld [vmem:[%s14687_s22 + $0x1268] ss:$16 sps:$4 sm:$0xff]   ;;  %v13238_v29 = vld [vmem:[%s14687_s22 + $0x136c] ss:$16 sps:$4 sm:$0xff]  }
 0x413   : > { %7755 = vmatprep.mubr.bf16.mxu1 %v15039_v15  ;;  %v13193_v15 = vld [vmem:[%s14687_s22 + $0x108c] ss:$16 sps:$4 sm:$0xff]   ;;  %v13230_v27 = vld [vmem:[%s14687_s22 + $0x1348] ss:$16 sps:$4 sm:$0xff]  }
 0x414   : > { %7685 = vmatpush1.bf16.msra.mxu0 %v13173_v22  ;;  %v13233_v22 = vld [vmem:[%s14687_s22 + $0x1168] ss:$16 sps:$4 sm:$0xff]  }
 0x415   : > { %7726 = vmatpush1.bf16.msra.mxu1 %v13176_v30  ;;  %7686 = vmatprep.subr.bf16.mxu0 %v13181_v31  ;;  %v13236_v30 = vld [vmem:[%s14687_s22 + $0x1368] ss:$16 sps:$4 sm:$0xff]   ;;  %v13241_v31 = vld [vmem:[%s14687_s22 + $0x118c] ss:$16 sps:$4 sm:$0xff]  }
 0x416   : > { %7727 = vmatprep.subr.bf16.mxu1 %v13184_v37  ;;  %v13244_v37 = vld [vmem:[%s14687_s22 + $0x138c] ss:$16 sps:$4 sm:$0xff]  }
 0x418   : > { %7687 = vmatpush1.bf16.msra.mxu0 %v13179_v6  ;;  %v13239_v6 = vld [vmem:[%s14687_s22 + $0x1188] ss:$16 sps:$4 sm:$0xff]  }
 0x419   : > { %7728 = vmatpush1.bf16.msra.mxu1 %v13182_v7  ;;  %7688 = vmatprep.subr.bf16.mxu0 %v13187_v59  ;;  %v13242_v7 = vld [vmem:[%s14687_s22 + $0x1388] ss:$16 sps:$4 sm:$0xff]   ;;  %v13247_v59 = vld [vmem:[%s14687_s22 + $0x11ac] ss:$16 sps:$4 sm:$0xff]  }
 0x41a   : > { %7729 = vmatprep.subr.bf16.mxu1 %v13190_v38  ;;  %v13250_v38 = vld [vmem:[%s14687_s22 + $0x13ac] ss:$16 sps:$4 sm:$0xff]  }
 0x41c   : > { %7689 = vmatpush1.bf16.msra.mxu0 %v13185_v16  ;;  %v13245_v16 = vld [vmem:[%s14687_s22 + $0x11a8] ss:$16 sps:$4 sm:$0xff]  }
 0x41d   : > { %7730 = vmatpush1.bf16.msra.mxu1 %v13188_v14  ;;  %7690 = vmatprep.subr.bf16.mxu0 %v13193_v15  ;;  %v13248_v14 = vld [vmem:[%s14687_s22 + $0x13a8] ss:$16 sps:$4 sm:$0xff]   ;;  %v13253_v15 = vld [vmem:[%s14687_s22 + $0x11cc] ss:$16 sps:$4 sm:$0xff]  }
 0x41e   : > { %7731 = vmatprep.subr.bf16.mxu1 %v13196_v39  ;;  %v13256_v39 = vld [vmem:[%s14687_s22 + $0x13cc] ss:$16 sps:$4 sm:$0xff]  }
 0x420   : > { %7691 = vmatpush1.bf16.msra.mxu0 %v13191_v42  ;;  %v13251_v42 = vld [vmem:[%s14687_s22 + $0x11c8] ss:$16 sps:$4 sm:$0xff]  }
 0x421   : > { %7732 = vmatpush1.bf16.msra.mxu1 %v13194_v49  ;;  %7692 = vmatprep.subr.bf16.mxu0 %v13199_v48  ;;  %v13254_v49 = vld [vmem:[%s14687_s22 + $0x13c8] ss:$16 sps:$4 sm:$0xff]   ;;  %v13259_v48 = vld [vmem:[%s14687_s22 + $0x11ec] ss:$16 sps:$4 sm:$0xff]  }
 0x422   : > { %7733 = vmatprep.subr.bf16.mxu1 %v13202_v60  ;;  %v7388_v46 = vpop.f32.mrb[32].mxu0  ;;  %v13262_v60 = vld [vmem:[%s14687_s22 + $0x13ec] ss:$16 sps:$4 sm:$0xff]  }
 0x423   : > { %v7429_v47 = vpop.f32.mrb[32].mxu1  ;;  %v7390_v61 = vpop.f32.mrb[33].mxu0 }
 0x424   : > { %v15693_v56 = vadd.f32 %v7429_v47, %v7388_v46  ;;  %v7431_v58 = vpop.f32.mrb[33].mxu1  ;;  %v7392_v54 = vpop.f32.mrb[34].mxu0  ;;  %7693 = vmatpush1.bf16.msra.mxu0 %v13197_v35  ;;  %v13257_v35 = vld [vmem:[%s14687_s22 + $0x11e8] ss:$16 sps:$4 sm:$0xff]  }
 0x425   : > { %v15695_v52 = vadd.f32 %v7431_v58, %v7390_v61  ;;  %v7433_v63 = vpop.f32.mrb[34].mxu1  ;;  %7734 = vmatpush1.bf16.msra.mxu1 %v13200_v40  ;;  %v7393_v24 = vpop.f32.mrb[35].mxu0  ;;  %7694 = vmatprep.subr.bf16.mxu0 %v13205_v53  ;;  %v13260_v40 = vld [vmem:[%s14687_s22 + $0x13e8] ss:$16 sps:$4 sm:$0xff]   ;;  %v13265_v53 = vld [vmem:[%s14687_s22 + $0x140c] ss:$16 sps:$4 sm:$0xff]  }
 0x426   : > { %v7434_v25 = vpop.f32.mrb[35].mxu1  ;;  %7735 = vmatprep.subr.bf16.mxu1 %v13208_v43  ;;  %v13268_v43 = vld [vmem:[%s14687_s22 + $0x160c] ss:$16 sps:$4 sm:$0xff]   ;;  %v13263_v46 = vld [vmem:[%s14687_s22 + $0x1408] ss:$16 sps:$4 sm:$0xff]  }
 0x427   : > { %v13266_v47 = vld [vmem:[%s14687_s22 + $0x1608] ss:$16 sps:$4 sm:$0xff]   ;;  %v13271_v61 = vld [vmem:[%s14687_s22 + $0x142c] ss:$16 sps:$4 sm:$0xff]  }
 0x428   : > { %7695 = vmatpush1.bf16.msra.mxu0 %v13203_v12  ;;  %v13274_v58 = vld [vmem:[%s14687_s22 + $0x162c] ss:$16 sps:$4 sm:$0xff]   ;;  %v13269_v54 = vld [vmem:[%s14687_s22 + $0x1428] ss:$16 sps:$4 sm:$0xff]  }
 0x429   : > { %7736 = vmatpush1.bf16.msra.mxu1 %v13206_v13  ;;  %7696 = vmatprep.subr.bf16.mxu0 %v13211_v4  ;;  %v13272_v63 = vld [vmem:[%s14687_s22 + $0x1628] ss:$16 sps:$4 sm:$0xff]   ;;  %v13277_v12 = vld [vmem:[%s14687_s22 + $0x144c] ss:$16 sps:$4 sm:$0xff]  }
 0x42a   : > { %7737 = vmatprep.subr.bf16.mxu1 %v13214_v5  ;;  %v13280_v13 = vld [vmem:[%s14687_s22 + $0x164c] ss:$16 sps:$4 sm:$0xff]   ;;  %v13281_v4 = vld [vmem:[%s14687_s22 + $0x1468] ss:$16 sps:$4 sm:$0xff]  }
 0x42b   : > { %v13283_v24 = vld [vmem:[%s14687_s22 + $0x146c] ss:$16 sps:$4 sm:$0xff]  }
 0x42c   : > { %7697 = vmatpush1.bf16.msra.mxu0 %v13209_v8  ;;  %v13286_v25 = vld [vmem:[%s14687_s22 + $0x166c] ss:$16 sps:$4 sm:$0xff]   ;;  %v13287_v8 = vld [vmem:[%s14687_s22 + $0x1488] ss:$16 sps:$4 sm:$0xff]  }
 0x42d   : > { %7738 = vmatpush1.bf16.msra.mxu1 %v13212_v33  ;;  %7698 = vmatprep.subr.bf16.mxu0 %v13217_v36  ;;  %v13292_v5 = vld [vmem:[%s14687_s22 + $0x168c] ss:$16 sps:$4 sm:$0xff]   ;;  %v13290_v33 = vld [vmem:[%s14687_s22 + $0x1688] ss:$16 sps:$4 sm:$0xff]  }
 0x42e   : > { %7739 = vmatprep.subr.bf16.mxu1 %v13220_v41  ;;  %v13295_v36 = vld [vmem:[%s14687_s22 + $0x14ac] ss:$16 sps:$4 sm:$0xff]  }
 0x42f   : > { %v13298_v41 = vld [vmem:[%s14687_s22 + $0x16ac] ss:$16 sps:$4 sm:$0xff]  }
 0x430   : > { %7699 = vmatpush1.bf16.msra.mxu0 %v13215_v44  ;;  %v13293_v44 = vld [vmem:[%s14687_s22 + $0x14a8] ss:$16 sps:$4 sm:$0xff]  }
 0x431   : > { %7740 = vmatpush1.bf16.msra.mxu1 %v13218_v9  ;;  %7700 = vmatprep.subr.bf16.mxu0 %v13223_v17  ;;  %v13296_v9 = vld [vmem:[%s14687_s22 + $0x16a8] ss:$16 sps:$4 sm:$0xff]   ;;  %v13301_v17 = vld [vmem:[%s14687_s22 + $0x14cc] ss:$16 sps:$4 sm:$0xff]  }
 0x432   : > { %7741 = vmatprep.subr.bf16.mxu1 %v13226_v20  ;;  %v13304_v20 = vld [vmem:[%s14687_s22 + $0x16cc] ss:$16 sps:$4 sm:$0xff]  }
 0x434   : > { %7701 = vmatpush1.bf16.msra.mxu0 %v13221_v51 }
 0x435   : > { %7742 = vmatpush1.bf16.msra.mxu1 %v13224_v21  ;;  %7702 = vmatprep.subr.bf16.mxu0 %v13229_v62 }
 0x436   : > { %7743 = vmatprep.subr.bf16.mxu1 %v13232_v23 }
 0x438   : > { %7703 = vmatpush1.bf16.msra.mxu0 %v13227_v26 }
 0x439   : > { %7744 = vmatpush1.bf16.msra.mxu1 %v13230_v27  ;;  %7704 = vmatprep.subr.bf16.mxu0 %v13235_v28 }
 0x43a   : > { %7745 = vmatprep.subr.bf16.mxu1 %v13238_v29 }
 0x43c   : > { %7705 = vmatpush1.bf16.msra.mxu0 %v13233_v22  ;;  %v13299_v22 = vld [vmem:[%s14687_s22 + $0x14c8] ss:$16 sps:$4 sm:$0xff]  }
 0x43d   : > { %7746 = vmatpush1.bf16.msra.mxu1 %v13236_v30  ;;  %7706 = vmatprep.subr.bf16.mxu0 %v13241_v31  ;;  %v13302_v30 = vld [vmem:[%s14687_s22 + $0x16c8] ss:$16 sps:$4 sm:$0xff]  }
 0x43e   : > { %7747 = vmatprep.subr.bf16.mxu1 %v13244_v37 }
 0x440   : > { %7707 = vmatpush1.bf16.msra.mxu0 %v13239_v6 }
 0x441   : > { %7748 = vmatpush1.bf16.msra.mxu1 %v13242_v7  ;;  %7708 = vmatprep.subr.bf16.mxu0 %v13247_v59  ;;  %v13305_v59 = vld [vmem:[%s14687_s22 + $0x14e8] ss:$16 sps:$4 sm:$0xff]  }
 0x442   : > { %7749 = vmatprep.subr.bf16.mxu1 %v13250_v38  ;;  %v13308_v38 = vld [vmem:[%s14687_s22 + $0x16e8] ss:$16 sps:$4 sm:$0xff]  }
 0x444   : > { %7709 = vmatpush1.bf16.msra.mxu0 %v13245_v16  ;;  %v13313_v16 = vld [vmem:[%s14687_s22 + $0x150c] ss:$16 sps:$4 sm:$0xff]  }
 0x445   : > { %7750 = vmatpush1.bf16.msra.mxu1 %v13248_v14  ;;  %7710 = vmatprep.subr.bf16.mxu0 %v13253_v15  ;;  %v13316_v14 = vld [vmem:[%s14687_s22 + $0x170c] ss:$16 sps:$4 sm:$0xff]   ;;  %v13311_v15 = vld [vmem:[%s14687_s22 + $0x1508] ss:$16 sps:$4 sm:$0xff]  }
 0x446   : > { %7751 = vmatprep.subr.bf16.mxu1 %v13256_v39  ;;  %v13314_v39 = vld [vmem:[%s14687_s22 + $0x1708] ss:$16 sps:$4 sm:$0xff]  }
 0x448   : > { %7711 = vmatpush1.bf16.msra.mxu0 %v13251_v42  ;;  %v13319_v42 = vld [vmem:[%s14687_s22 + $0x152c] ss:$16 sps:$4 sm:$0xff]  }
 0x449   : > { %7752 = vmatpush1.bf16.msra.mxu1 %v13254_v49  ;;  %7712 = vmatprep.subr.bf16.mxu0 %v13259_v48  ;;  %v13322_v49 = vld [vmem:[%s14687_s22 + $0x172c] ss:$16 sps:$4 sm:$0xff]   ;;  %v13317_v48 = vld [vmem:[%s14687_s22 + $0x1528] ss:$16 sps:$4 sm:$0xff]  }
 0x44a   : > { %7753 = vmatprep.subr.bf16.mxu1 %v13262_v60  ;;  %v13320_v60 = vld [vmem:[%s14687_s22 + $0x1728] ss:$16 sps:$4 sm:$0xff]  }
 0x44c   : > { %7713 = vmatpush1.bf16.msra.mxu0 %v13257_v35  ;;  %v13325_v35 = vld [vmem:[%s14687_s22 + $0x154c] ss:$16 sps:$4 sm:$0xff]  }
 0x44d   : > { %7754 = vmatpush1.bf16.msra.mxu1 %v13260_v40  ;;  %7764 = vmatprep.subr.bf16.mxu0 %v13265_v53  ;;  %v13328_v40 = vld [vmem:[%s14687_s22 + $0x174c] ss:$16 sps:$4 sm:$0xff]   ;;  %v13323_v53 = vld [vmem:[%s14687_s22 + $0x1548] ss:$16 sps:$4 sm:$0xff]  }
 0x44e   : > { %7805 = vmatprep.subr.bf16.mxu1 %v13268_v43  ;;  %v13326_v43 = vld [vmem:[%s14687_s22 + $0x1748] ss:$16 sps:$4 sm:$0xff]  }
 0x44f   : > { %7715 = vmatmul.mubr.bf16.vlgmr.msra.gmra.mrb[48].mxu0 %v15111_v55  ;;  %v13275_v55 = vld [vmem:[%s14687_s22 + $0x1448] ss:$16 sps:$4 sm:$0xff]  }
 0x450   : > { %7756 = vmatmul.mubr.bf16.vlgmr.msra.gmra.mrb[48].mxu1 %v15113_v57  ;;  %7765 = vmatpush1.bf16.msra.mxu0 %v13263_v46  ;;  %v13278_v57 = vld [vmem:[%s14687_s22 + $0x1648] ss:$16 sps:$4 sm:$0xff]   ;;  %v13331_v46 = vld [vmem:[%s14687_s22 + $0x156c] ss:$16 sps:$4 sm:$0xff]  }
 0x451   : > { %7806 = vmatpush1.bf16.msra.mxu1 %v13266_v47  ;;  %7766 = vmatprep.subr.bf16.mxu0 %v13271_v61  ;;  %v13334_v47 = vld [vmem:[%s14687_s22 + $0x176c] ss:$16 sps:$4 sm:$0xff]   ;;  %v13329_v61 = vld [vmem:[%s14687_s22 + $0x1568] ss:$16 sps:$4 sm:$0xff]  }
 0x452   : > { %7807 = vmatprep.subr.bf16.mxu1 %v13274_v58  ;;  %7796 = vmatprep.mubr.bf16.mxu0 %v15121_v0  ;;  %v13284_v0 = vld [vmem:[%s14687_s22 + $0x1668] ss:$16 sps:$4 sm:$0xff]  }
 0x453   : > { %7837 = vmatprep.mubr.bf16.mxu1 %v15123_v1  ;;  %v13289_v1 = vld [vmem:[%s14687_s22 + $0x148c] ss:$16 sps:$4 sm:$0xff]   ;;  %v13332_v58 = vld [vmem:[%s14687_s22 + $0x1768] ss:$16 sps:$4 sm:$0xff]  }
 0x454   : > { %7767 = vmatpush1.bf16.msra.mxu0 %v13269_v54  ;;  %v13337_v54 = vld [vmem:[%s14687_s22 + $0x158c] ss:$16 sps:$4 sm:$0xff]  }
 0x455   : > { %7808 = vmatpush1.bf16.msra.mxu1 %v13272_v63  ;;  %7768 = vmatprep.subr.bf16.mxu0 %v13277_v12  ;;  %v13340_v63 = vld [vmem:[%s14687_s22 + $0x178c] ss:$16 sps:$4 sm:$0xff]   ;;  %v13335_v12 = vld [vmem:[%s14687_s22 + $0x1588] ss:$16 sps:$4 sm:$0xff]  }
 0x456   : > { %7809 = vmatprep.subr.bf16.mxu1 %v13280_v13  ;;  %v13338_v13 = vld [vmem:[%s14687_s22 + $0x1788] ss:$16 sps:$4 sm:$0xff]  }
 0x458   : > { %7769 = vmatpush1.bf16.msra.mxu0 %v13275_v55  ;;  %v13343_v55 = vld [vmem:[%s14687_s22 + $0x15ac] ss:$16 sps:$4 sm:$0xff]  }
 0x459   : > { %7810 = vmatpush1.bf16.msra.mxu1 %v13278_v57  ;;  %7770 = vmatprep.subr.bf16.mxu0 %v13283_v24  ;;  %v13346_v57 = vld [vmem:[%s14687_s22 + $0x17ac] ss:$16 sps:$4 sm:$0xff]   ;;  %v13341_v24 = vld [vmem:[%s14687_s22 + $0x15a8] ss:$16 sps:$4 sm:$0xff]  }
 0x45a   : > { %7811 = vmatprep.subr.bf16.mxu1 %v13286_v25  ;;  %v13344_v25 = vld [vmem:[%s14687_s22 + $0x17a8] ss:$16 sps:$4 sm:$0xff]  }
 0x45c   : > { %7771 = vmatpush1.bf16.msra.mxu0 %v13281_v4  ;;  %v13349_v4 = vld [vmem:[%s14687_s22 + $0x15cc] ss:$16 sps:$4 sm:$0xff]  }
 0x45d   : > { %7812 = vmatpush1.bf16.msra.mxu1 %v13284_v0  ;;  %7772 = vmatprep.subr.bf16.mxu0 %v13289_v1  ;;  %v13352_v0 = vld [vmem:[%s14687_s22 + $0x17cc] ss:$16 sps:$4 sm:$0xff]   ;;  %v13347_v1 = vld [vmem:[%s14687_s22 + $0x15c8] ss:$16 sps:$4 sm:$0xff]  }
 0x45e   : > { %7813 = vmatprep.subr.bf16.mxu1 %v13292_v5  ;;  %v13350_v5 = vld [vmem:[%s14687_s22 + $0x17c8] ss:$16 sps:$4 sm:$0xff]  }
 0x460   : > { %7773 = vmatpush1.bf16.msra.mxu0 %v13287_v8  ;;  %v13355_v8 = vld [vmem:[%s14687_s22 + $0x15ec] ss:$16 sps:$4 sm:$0xff]  }
 0x461   : > { %7814 = vmatpush1.bf16.msra.mxu1 %v13290_v33  ;;  %7774 = vmatprep.subr.bf16.mxu0 %v13295_v36  ;;  %v13358_v33 = vld [vmem:[%s14687_s22 + $0x17ec] ss:$16 sps:$4 sm:$0xff]   ;;  %v13353_v36 = vld [vmem:[%s14687_s22 + $0x15e8] ss:$16 sps:$4 sm:$0xff]  }
 0x462   : > { %7815 = vmatprep.subr.bf16.mxu1 %v13298_v41  ;;  %v7470_v51 = vpop.f32.mrb[36].mxu0  ;;  %v13356_v41 = vld [vmem:[%s14687_s22 + $0x17e8] ss:$16 sps:$4 sm:$0xff]  }
 0x463   : > { %v7511_v21 = vpop.f32.mrb[36].mxu1  ;;  %v7471_v62 = vadd.f32 %v7470_v51, %v15693_v56  ;;  %v7472_v23 = vpop.f32.mrb[37].mxu0  ;;  %v13307_v56 = vld [vmem:[%s14687_s22 + $0x14ec] ss:$16 sps:$4 sm:$0xff]  }
 0x464   : > { %v7513_v26 = vpop.f32.mrb[37].mxu1  ;;  %v7473_v27 = vadd.f32 %v7472_v23, %v15695_v52  ;;  %v7474_v28 = vpop.f32.mrb[38].mxu0  ;;  %7775 = vmatpush1.bf16.msra.mxu0 %v13293_v44  ;;  %v13310_v52 = vld [vmem:[%s14687_s22 + $0x16ec] ss:$16 sps:$4 sm:$0xff]   ;;  %v13368_v23 = vld [vmem:[%s14687_s22 + $0x1a28] ss:$16 sps:$4 sm:$0xff]  }
 0x465   : > { %v7515_v29 = vpop.f32.mrb[38].mxu1  ;;  %7816 = vmatpush1.bf16.msra.mxu1 %v13296_v9  ;;  %v15769_v31 = vadd.f32 %v7511_v21, %v7471_v62  ;;  %v7475_v37 = vpop.f32.mrb[39].mxu0  ;;  %7776 = vmatprep.subr.bf16.mxu0 %v13301_v17  ;;  %v13361_v44 = vld [vmem:[%s14687_s22 + $0x180c] ss:$16 sps:$4 sm:$0xff]   ;;  %v13359_v17 = vld [vmem:[%s14687_s22 + $0x1808] ss:$16 sps:$4 sm:$0xff]  }
 0x466   : > { %v7516_v6 = vpop.f32.mrb[39].mxu1  ;;  %7817 = vmatprep.subr.bf16.mxu1 %v13304_v20  ;;  %v15773_v7 = vadd.f32 %v7513_v26, %v7473_v27  ;;  %v13364_v9 = vld [vmem:[%s14687_s22 + $0x1a0c] ss:$16 sps:$4 sm:$0xff]   ;;  %v13362_v20 = vld [vmem:[%s14687_s22 + $0x1a08] ss:$16 sps:$4 sm:$0xff]  }
 0x467   : > { %v13367_v51 = vld [vmem:[%s14687_s22 + $0x182c] ss:$16 sps:$4 sm:$0xff]   ;;  %v13365_v62 = vld [vmem:[%s14687_s22 + $0x1828] ss:$16 sps:$4 sm:$0xff]  }
 0x468   : > { %7777 = vmatpush1.bf16.msra.mxu0 %v13299_v22  ;;  %v13370_v21 = vld [vmem:[%s14687_s22 + $0x1a2c] ss:$16 sps:$4 sm:$0xff]   ;;  %v13377_v22 = vld [vmem:[%s14687_s22 + $0x1868] ss:$16 sps:$4 sm:$0xff]  }
 0x469   : > { %7818 = vmatpush1.bf16.msra.mxu1 %v13302_v30  ;;  %7778 = vmatprep.subr.bf16.mxu0 %v13307_v56  ;;  %v13373_v26 = vld [vmem:[%s14687_s22 + $0x184c] ss:$16 sps:$4 sm:$0xff]   ;;  %v13383_v37 = vld [vmem:[%s14687_s22 + $0x1888] ss:$16 sps:$4 sm:$0xff]  }
 0x46a   : > { %7819 = vmatprep.subr.bf16.mxu1 %v13310_v52  ;;  %v13376_v27 = vld [vmem:[%s14687_s22 + $0x1a4c] ss:$16 sps:$4 sm:$0xff]   ;;  %v13386_v6 = vld [vmem:[%s14687_s22 + $0x1a88] ss:$16 sps:$4 sm:$0xff]  }
 0x46b   : > { %v13379_v28 = vld [vmem:[%s14687_s22 + $0x186c] ss:$16 sps:$4 sm:$0xff]  }
 0x46c   : > { %7779 = vmatpush1.bf16.msra.mxu0 %v13305_v59  ;;  %v13382_v29 = vld [vmem:[%s14687_s22 + $0x1a6c] ss:$16 sps:$4 sm:$0xff]   ;;  %v13389_v59 = vld [vmem:[%s14687_s22 + $0x18a8] ss:$16 sps:$4 sm:$0xff]  }
 0x46d   : > { %7820 = vmatpush1.bf16.msra.mxu1 %v13308_v38  ;;  %7780 = vmatprep.subr.bf16.mxu0 %v13313_v16  ;;  %v13388_v30 = vld [vmem:[%s14687_s22 + $0x1a8c] ss:$16 sps:$4 sm:$0xff]   ;;  %v13392_v38 = vld [vmem:[%s14687_s22 + $0x1aa8] ss:$16 sps:$4 sm:$0xff]  }
 0x46e   : > { %7821 = vmatprep.subr.bf16.mxu1 %v13316_v14  ;;  %v13391_v56 = vld [vmem:[%s14687_s22 + $0x18ac] ss:$16 sps:$4 sm:$0xff]  }
 0x46f   : > { %v13394_v52 = vld [vmem:[%s14687_s22 + $0x1aac] ss:$16 sps:$4 sm:$0xff]  }
 0x470   : > { %7781 = vmatpush1.bf16.msra.mxu0 %v13311_v15  ;;  %v13397_v16 = vld [vmem:[%s14687_s22 + $0x18cc] ss:$16 sps:$4 sm:$0xff]  }
 0x471   : > { %7822 = vmatpush1.bf16.msra.mxu1 %v13314_v39  ;;  %7782 = vmatprep.subr.bf16.mxu0 %v13319_v42  ;;  %v13400_v14 = vld [vmem:[%s14687_s22 + $0x1acc] ss:$16 sps:$4 sm:$0xff]  }
 0x472   : > { %7823 = vmatprep.subr.bf16.mxu1 %v13322_v49 }
 0x474   : > { %7783 = vmatpush1.bf16.msra.mxu0 %v13317_v48 }
 0x475   : > { %7824 = vmatpush1.bf16.msra.mxu1 %v13320_v60  ;;  %7784 = vmatprep.subr.bf16.mxu0 %v13325_v35 }
 0x476   : > { %7825 = vmatprep.subr.bf16.mxu1 %v13328_v40 }
 0x478   : > { %7785 = vmatpush1.bf16.msra.mxu0 %v13323_v53  ;;  %v13395_v53 = vld [vmem:[%s14687_s22 + $0x18c8] ss:$16 sps:$4 sm:$0xff]  }
 0x479   : > { %7826 = vmatpush1.bf16.msra.mxu1 %v13326_v43  ;;  %7786 = vmatprep.subr.bf16.mxu0 %v13331_v46  ;;  %v13398_v43 = vld [vmem:[%s14687_s22 + $0x1ac8] ss:$16 sps:$4 sm:$0xff]  }
 0x47a   : > { %7827 = vmatprep.subr.bf16.mxu1 %v13334_v47 }
 0x47c   : > { %7787 = vmatpush1.bf16.msra.mxu0 %v13329_v61 }
 0x47d   : > { %7828 = vmatpush1.bf16.msra.mxu1 %v13332_v58  ;;  %7788 = vmatprep.subr.bf16.mxu0 %v13337_v54  ;;  %v13401_v54 = vld [vmem:[%s14687_s22 + $0x18e8] ss:$16 sps:$4 sm:$0xff]  }
 0x47e   : > { %7829 = vmatprep.subr.bf16.mxu1 %v13340_v63  ;;  %v13404_v63 = vld [vmem:[%s14687_s22 + $0x1ae8] ss:$16 sps:$4 sm:$0xff]  }
 0x480   : > { %7789 = vmatpush1.bf16.msra.mxu0 %v13335_v12  ;;  %v13409_v12 = vld [vmem:[%s14687_s22 + $0x190c] ss:$16 sps:$4 sm:$0xff]  }
 0x481   : > { %7830 = vmatpush1.bf16.msra.mxu1 %v13338_v13  ;;  %7790 = vmatprep.subr.bf16.mxu0 %v13343_v55  ;;  %v13412_v13 = vld [vmem:[%s14687_s22 + $0x1b0c] ss:$16 sps:$4 sm:$0xff]   ;;  %v13407_v55 = vld [vmem:[%s14687_s22 + $0x1908] ss:$16 sps:$4 sm:$0xff]  }
 0x482   : > { %7831 = vmatprep.subr.bf16.mxu1 %v13346_v57  ;;  %v13410_v57 = vld [vmem:[%s14687_s22 + $0x1b08] ss:$16 sps:$4 sm:$0xff]  }
 0x484   : > { %7791 = vmatpush1.bf16.msra.mxu0 %v13341_v24  ;;  %v13415_v24 = vld [vmem:[%s14687_s22 + $0x192c] ss:$16 sps:$4 sm:$0xff]  }
 0x485   : > { %7832 = vmatpush1.bf16.msra.mxu1 %v13344_v25  ;;  %7792 = vmatprep.subr.bf16.mxu0 %v13349_v4  ;;  %v13418_v25 = vld [vmem:[%s14687_s22 + $0x1b2c] ss:$16 sps:$4 sm:$0xff]   ;;  %v13413_v4 = vld [vmem:[%s14687_s22 + $0x1928] ss:$16 sps:$4 sm:$0xff]  }
 0x486   : > { %7833 = vmatprep.subr.bf16.mxu1 %v13352_v0  ;;  %v13416_v0 = vld [vmem:[%s14687_s22 + $0x1b28] ss:$16 sps:$4 sm:$0xff]  }
 0x488   : > { %7793 = vmatpush1.bf16.msra.mxu0 %v13347_v1  ;;  %v13421_v1 = vld [vmem:[%s14687_s22 + $0x194c] ss:$16 sps:$4 sm:$0xff]  }
 0x489   : > { %7834 = vmatpush1.bf16.msra.mxu1 %v13350_v5  ;;  %7794 = vmatprep.subr.bf16.mxu0 %v13355_v8  ;;  %v13424_v5 = vld [vmem:[%s14687_s22 + $0x1b4c] ss:$16 sps:$4 sm:$0xff]   ;;  %v13419_v8 = vld [vmem:[%s14687_s22 + $0x1948] ss:$16 sps:$4 sm:$0xff]  }
 0x48a   : > { %7835 = vmatprep.subr.bf16.mxu1 %v13358_v33  ;;  %v13422_v33 = vld [vmem:[%s14687_s22 + $0x1b48] ss:$16 sps:$4 sm:$0xff]  }
 0x48c   : > { %7795 = vmatpush1.bf16.msra.mxu0 %v13353_v36  ;;  %v13427_v36 = vld [vmem:[%s14687_s22 + $0x196c] ss:$16 sps:$4 sm:$0xff]  }
 0x48d   : > { %7836 = vmatpush1.bf16.msra.mxu1 %v13356_v41  ;;  %7846 = vmatprep.subr.bf16.mxu0 %v13361_v44  ;;  %v13430_v41 = vld [vmem:[%s14687_s22 + $0x1b6c] ss:$16 sps:$4 sm:$0xff]   ;;  %v13425_v44 = vld [vmem:[%s14687_s22 + $0x1968] ss:$16 sps:$4 sm:$0xff]  }
 0x48e   : > { %7887 = vmatprep.subr.bf16.mxu1 %v13364_v9  ;;  %v13428_v9 = vld [vmem:[%s14687_s22 + $0x1b68] ss:$16 sps:$4 sm:$0xff]  }
 0x48f   : > { %7797 = vmatmul.mubr.bf16.vlgmr.msra.gmra.mrb[52].mxu0 %v15197_v45  ;;  %v13371_v45 = vld [vmem:[%s14687_s22 + $0x1848] ss:$16 sps:$4 sm:$0xff]  }
 0x490   : > { %7838 = vmatmul.mubr.bf16.vlgmr.msra.gmra.mrb[52].mxu1 %v15199_v50  ;;  %7847 = vmatpush1.bf16.msra.mxu0 %v13359_v17  ;;  %v13374_v50 = vld [vmem:[%s14687_s22 + $0x1a48] ss:$16 sps:$4 sm:$0xff]   ;;  %v13433_v17 = vld [vmem:[%s14687_s22 + $0x198c] ss:$16 sps:$4 sm:$0xff]  }
 0x491   : > { %7888 = vmatpush1.bf16.msra.mxu1 %v13362_v20  ;;  %7848 = vmatprep.subr.bf16.mxu0 %v13367_v51  ;;  %v13436_v20 = vld [vmem:[%s14687_s22 + $0x1b8c] ss:$16 sps:$4 sm:$0xff]   ;;  %v13431_v51 = vld [vmem:[%s14687_s22 + $0x1988] ss:$16 sps:$4 sm:$0xff]  }
 0x492   : > { %7889 = vmatprep.subr.bf16.mxu1 %v13370_v21  ;;  %7878 = vmatprep.mubr.bf16.mxu0 %v15207_v2  ;;  %v13380_v2 = vld [vmem:[%s14687_s22 + $0x1a68] ss:$16 sps:$4 sm:$0xff]  }
 0x493   : > { %7919 = vmatprep.mubr.bf16.mxu1 %v15209_v3  ;;  %v13385_v3 = vld [vmem:[%s14687_s22 + $0x188c] ss:$16 sps:$4 sm:$0xff]   ;;  %v13434_v21 = vld [vmem:[%s14687_s22 + $0x1b88] ss:$16 sps:$4 sm:$0xff]  }
 0x494   : > { %7849 = vmatpush1.bf16.msra.mxu0 %v13365_v62  ;;  %v13439_v62 = vld [vmem:[%s14687_s22 + $0x19ac] ss:$16 sps:$4 sm:$0xff]  }
 0x495   : > { %7890 = vmatpush1.bf16.msra.mxu1 %v13368_v23  ;;  %7850 = vmatprep.subr.bf16.mxu0 %v13373_v26  ;;  %v13442_v23 = vld [vmem:[%s14687_s22 + $0x1bac] ss:$16 sps:$4 sm:$0xff]   ;;  %v13437_v26 = vld [vmem:[%s14687_s22 + $0x19a8] ss:$16 sps:$4 sm:$0xff]  }
 0x496   : > { %7891 = vmatprep.subr.bf16.mxu1 %v13376_v27  ;;  %v13440_v27 = vld [vmem:[%s14687_s22 + $0x1ba8] ss:$16 sps:$4 sm:$0xff]  }
 0x498   : > { %7851 = vmatpush1.bf16.msra.mxu0 %v13371_v45  ;;  %v13445_v45 = vld [vmem:[%s14687_s22 + $0x19cc] ss:$16 sps:$4 sm:$0xff]  }
 0x499   : > { %7892 = vmatpush1.bf16.msra.mxu1 %v13374_v50  ;;  %7852 = vmatprep.subr.bf16.mxu0 %v13379_v28  ;;  %v13448_v50 = vld [vmem:[%s14687_s22 + $0x1bcc] ss:$16 sps:$4 sm:$0xff]   ;;  %v13443_v28 = vld [vmem:[%s14687_s22 + $0x19c8] ss:$16 sps:$4 sm:$0xff]  }
 0x49a   : > { %7893 = vmatprep.subr.bf16.mxu1 %v13382_v29  ;;  %v13446_v29 = vld [vmem:[%s14687_s22 + $0x1bc8] ss:$16 sps:$4 sm:$0xff]  }
 0x49c   : > { %7853 = vmatpush1.bf16.msra.mxu0 %v13377_v22  ;;  %v13451_v22 = vld [vmem:[%s14687_s22 + $0x19ec] ss:$16 sps:$4 sm:$0xff]  }
 0x49d   : > { %7894 = vmatpush1.bf16.msra.mxu1 %v13380_v2  ;;  %7854 = vmatprep.subr.bf16.mxu0 %v13385_v3  ;;  %v13454_v2 = vld [vmem:[%s14687_s22 + $0x1bec] ss:$16 sps:$4 sm:$0xff]   ;;  %v13449_v3 = vld [vmem:[%s14687_s22 + $0x19e8] ss:$16 sps:$4 sm:$0xff]  }
 0x49e   : > { %7895 = vmatprep.subr.bf16.mxu1 %v13388_v30  ;;  %v13452_v30 = vld [vmem:[%s14687_s22 + $0x1be8] ss:$16 sps:$4 sm:$0xff]  }
 0x4a0   : > { %7855 = vmatpush1.bf16.msra.mxu0 %v13383_v37  ;;  %v13457_v37 = vld [vmem:[%s14687_s22 + $0x1c0c] ss:$16 sps:$4 sm:$0xff]  }
 0x4a1   : > { %7896 = vmatpush1.bf16.msra.mxu1 %v13386_v6  ;;  %7856 = vmatprep.subr.bf16.mxu0 %v13391_v56  ;;  %v13460_v6 = vld [vmem:[%s14687_s22 + $0x1e0c] ss:$16 sps:$4 sm:$0xff]   ;;  %v13455_v56 = vld [vmem:[%s14687_s22 + $0x1c08] ss:$16 sps:$4 sm:$0xff]  }
 0x4a2   : > { %7897 = vmatprep.subr.bf16.mxu1 %v13394_v52  ;;  %v7552_v15 = vpop.f32.mrb[40].mxu0  ;;  %v13458_v52 = vld [vmem:[%s14687_s22 + $0x1e08] ss:$16 sps:$4 sm:$0xff]  }
 0x4a3   : > { %v7593_v39 = vpop.f32.mrb[40].mxu1  ;;  %v7553_v42 = vadd.f32 %v7552_v15, %v15769_v31  ;;  %v7554_v49 = vpop.f32.mrb[41].mxu0  ;;  %v13403_v31 = vld [vmem:[%s14687_s22 + $0x18ec] ss:$16 sps:$4 sm:$0xff]  }
 0x4a4   : > { %v7595_v48 = vpop.f32.mrb[41].mxu1  ;;  %v7555_v60 = vadd.f32 %v7554_v49, %v15773_v7  ;;  %v7556_v35 = vpop.f32.mrb[42].mxu0  ;;  %7857 = vmatpush1.bf16.msra.mxu0 %v13389_v59  ;;  %v13406_v7 = vld [vmem:[%s14687_s22 + $0x1aec] ss:$16 sps:$4 sm:$0xff]  }
 0x4a5   : > { %v7597_v40 = vpop.f32.mrb[42].mxu1  ;;  %7898 = vmatpush1.bf16.msra.mxu1 %v13392_v38  ;;  %v15843_v46 = vadd.f32 %v7593_v39, %v7553_v42  ;;  %v7557_v47 = vpop.f32.mrb[43].mxu0  ;;  %7858 = vmatprep.subr.bf16.mxu0 %v13397_v16  ;;  %v13463_v59 = vld [vmem:[%s14687_s22 + $0x1c2c] ss:$16 sps:$4 sm:$0xff]   ;;  %v13461_v16 = vld [vmem:[%s14687_s22 + $0x1c28] ss:$16 sps:$4 sm:$0xff]  }
 0x4a6   : > { %v7598_v61 = vpop.f32.mrb[43].mxu1  ;;  %7899 = vmatprep.subr.bf16.mxu1 %v13400_v14  ;;  %v15847_v58 = vadd.f32 %v7595_v48, %v7555_v60  ;;  %v13466_v38 = vld [vmem:[%s14687_s22 + $0x1e2c] ss:$16 sps:$4 sm:$0xff]   ;;  %v13464_v14 = vld [vmem:[%s14687_s22 + $0x1e28] ss:$16 sps:$4 sm:$0xff]  }
 0x4a7   : > { %v13469_v15 = vld [vmem:[%s14687_s22 + $0x1c4c] ss:$16 sps:$4 sm:$0xff]   ;;  %v13473_v48 = vld [vmem:[%s14687_s22 + $0x1c68] ss:$16 sps:$4 sm:$0xff]  }
 0x4a8   : > { %7859 = vmatpush1.bf16.msra.mxu0 %v13395_v53  ;;  %v13472_v39 = vld [vmem:[%s14687_s22 + $0x1e4c] ss:$16 sps:$4 sm:$0xff]   ;;  %v13479_v35 = vld [vmem:[%s14687_s22 + $0x1c88] ss:$16 sps:$4 sm:$0xff]  }
 0x4a9   : > { %7900 = vmatpush1.bf16.msra.mxu1 %v13398_v43  ;;  %7860 = vmatprep.subr.bf16.mxu0 %v13403_v31  ;;  %v13475_v42 = vld [vmem:[%s14687_s22 + $0x1c6c] ss:$16 sps:$4 sm:$0xff]   ;;  %v13482_v40 = vld [vmem:[%s14687_s22 + $0x1e88] ss:$16 sps:$4 sm:$0xff]  }
 0x4aa   : > { %7901 = vmatprep.subr.bf16.mxu1 %v13406_v7  ;;  %v13478_v49 = vld [vmem:[%s14687_s22 + $0x1e6c] ss:$16 sps:$4 sm:$0xff]   ;;  %v13485_v47 = vld [vmem:[%s14687_s22 + $0x1ca8] ss:$16 sps:$4 sm:$0xff]  }
 0x4ab   : > { %v13484_v60 = vld [vmem:[%s14687_s22 + $0x1e8c] ss:$16 sps:$4 sm:$0xff]   ;;  %v13488_v61 = vld [vmem:[%s14687_s22 + $0x1ea8] ss:$16 sps:$4 sm:$0xff]  }
 0x4ac   : > { %7861 = vmatpush1.bf16.msra.mxu0 %v13401_v54  ;;  %v13487_v53 = vld [vmem:[%s14687_s22 + $0x1cac] ss:$16 sps:$4 sm:$0xff]  }
 0x4ad   : > { %7902 = vmatpush1.bf16.msra.mxu1 %v13404_v63  ;;  %7862 = vmatprep.subr.bf16.mxu0 %v13409_v12  ;;  %v13490_v43 = vld [vmem:[%s14687_s22 + $0x1eac] ss:$16 sps:$4 sm:$0xff]  }
 0x4ae   : > { %7903 = vmatprep.subr.bf16.mxu1 %v13412_v13  ;;  %v13493_v31 = vld [vmem:[%s14687_s22 + $0x1ccc] ss:$16 sps:$4 sm:$0xff]  }
 0x4af   : > { %v13496_v7 = vld [vmem:[%s14687_s22 + $0x1ecc] ss:$16 sps:$4 sm:$0xff]  }
 0x4b0   : > { %7863 = vmatpush1.bf16.msra.mxu0 %v13407_v55 }
 0x4b1   : > { %7904 = vmatpush1.bf16.msra.mxu1 %v13410_v57  ;;  %7864 = vmatprep.subr.bf16.mxu0 %v13415_v24 }
 0x4b2   : > { %7905 = vmatprep.subr.bf16.mxu1 %v13418_v25 }
 0x4b4   : > { %7865 = vmatpush1.bf16.msra.mxu0 %v13413_v4  ;;  %v13491_v4 = vld [vmem:[%s14687_s22 + $0x1cc8] ss:$16 sps:$4 sm:$0xff]  }
 0x4b5   : > { %7906 = vmatpush1.bf16.msra.mxu1 %v13416_v0  ;;  %7866 = vmatprep.subr.bf16.mxu0 %v13421_v1  ;;  %v13494_v0 = vld [vmem:[%s14687_s22 + $0x1ec8] ss:$16 sps:$4 sm:$0xff]  }
 0x4b6   : > { %7907 = vmatprep.subr.bf16.mxu1 %v13424_v5 }
 0x4b8   : > { %7867 = vmatpush1.bf16.msra.mxu0 %v13419_v8 }
 0x4b9   : > { %7908 = vmatpush1.bf16.msra.mxu1 %v13422_v33  ;;  %7868 = vmatprep.subr.bf16.mxu0 %v13427_v36  ;;  %v13497_v36 = vld [vmem:[%s14687_s22 + $0x1ce8] ss:$16 sps:$4 sm:$0xff]  }
 0x4ba   : > { %7909 = vmatprep.subr.bf16.mxu1 %v13430_v41  ;;  %v13500_v41 = vld [vmem:[%s14687_s22 + $0x1ee8] ss:$16 sps:$4 sm:$0xff]  }
 0x4bc   : > { %7869 = vmatpush1.bf16.msra.mxu0 %v13425_v44  ;;  %v13505_v44 = vld [vmem:[%s14687_s22 + $0x1d0c] ss:$16 sps:$4 sm:$0xff]  }
 0x4bd   : > { %7910 = vmatpush1.bf16.msra.mxu1 %v13428_v9  ;;  %7870 = vmatprep.subr.bf16.mxu0 %v13433_v17  ;;  %v13508_v9 = vld [vmem:[%s14687_s22 + $0x1f0c] ss:$16 sps:$4 sm:$0xff]   ;;  %v13503_v17 = vld [vmem:[%s14687_s22 + $0x1d08] ss:$16 sps:$4 sm:$0xff]  }
 0x4be   : > { %7911 = vmatprep.subr.bf16.mxu1 %v13436_v20  ;;  %v13506_v20 = vld [vmem:[%s14687_s22 + $0x1f08] ss:$16 sps:$4 sm:$0xff]  }
 0x4c0   : > { %7871 = vmatpush1.bf16.msra.mxu0 %v13431_v51  ;;  %v13511_v51 = vld [vmem:[%s14687_s22 + $0x1d2c] ss:$16 sps:$4 sm:$0xff]  }
 0x4c1   : > { %7912 = vmatpush1.bf16.msra.mxu1 %v13434_v21  ;;  %7872 = vmatprep.subr.bf16.mxu0 %v13439_v62  ;;  %v13514_v21 = vld [vmem:[%s14687_s22 + $0x1f2c] ss:$16 sps:$4 sm:$0xff]   ;;  %v13509_v62 = vld [vmem:[%s14687_s22 + $0x1d28] ss:$16 sps:$4 sm:$0xff]  }
 0x4c2   : > { %7913 = vmatprep.subr.bf16.mxu1 %v13442_v23  ;;  %v13512_v23 = vld [vmem:[%s14687_s22 + $0x1f28] ss:$16 sps:$4 sm:$0xff]  }
 0x4c4   : > { %7873 = vmatpush1.bf16.msra.mxu0 %v13437_v26  ;;  %v13517_v26 = vld [vmem:[%s14687_s22 + $0x1d4c] ss:$16 sps:$4 sm:$0xff]  }
 0x4c5   : > { %7914 = vmatpush1.bf16.msra.mxu1 %v13440_v27  ;;  %7874 = vmatprep.subr.bf16.mxu0 %v13445_v45  ;;  %v13520_v27 = vld [vmem:[%s14687_s22 + $0x1f4c] ss:$16 sps:$4 sm:$0xff]   ;;  %v13515_v45 = vld [vmem:[%s14687_s22 + $0x1d48] ss:$16 sps:$4 sm:$0xff]  }
 0x4c6   : > { %7915 = vmatprep.subr.bf16.mxu1 %v13448_v50  ;;  %v13518_v50 = vld [vmem:[%s14687_s22 + $0x1f48] ss:$16 sps:$4 sm:$0xff]  }
 0x4c8   : > { %7875 = vmatpush1.bf16.msra.mxu0 %v13443_v28  ;;  %v13523_v28 = vld [vmem:[%s14687_s22 + $0x1d6c] ss:$16 sps:$4 sm:$0xff]  }
 0x4c9   : > { %7916 = vmatpush1.bf16.msra.mxu1 %v13446_v29  ;;  %7876 = vmatprep.subr.bf16.mxu0 %v13451_v22  ;;  %v13526_v29 = vld [vmem:[%s14687_s22 + $0x1f6c] ss:$16 sps:$4 sm:$0xff]   ;;  %v13521_v22 = vld [vmem:[%s14687_s22 + $0x1d68] ss:$16 sps:$4 sm:$0xff]  }
 0x4ca   : > { %7917 = vmatprep.subr.bf16.mxu1 %v13454_v2  ;;  %v13524_v2 = vld [vmem:[%s14687_s22 + $0x1f68] ss:$16 sps:$4 sm:$0xff]  }
 0x4cc   : > { %7877 = vmatpush1.bf16.msra.mxu0 %v13449_v3  ;;  %v13529_v3 = vld [vmem:[%s14687_s22 + $0x1d8c] ss:$16 sps:$4 sm:$0xff]  }
 0x4cd   : > { %7918 = vmatpush1.bf16.msra.mxu1 %v13452_v30  ;;  %7928 = vmatprep.subr.bf16.mxu0 %v13457_v37  ;;  %v13532_v30 = vld [vmem:[%s14687_s22 + $0x1f8c] ss:$16 sps:$4 sm:$0xff]   ;;  %v13527_v37 = vld [vmem:[%s14687_s22 + $0x1d88] ss:$16 sps:$4 sm:$0xff]  }
 0x4ce   : > { %7969 = vmatprep.subr.bf16.mxu1 %v13460_v6  ;;  %v13530_v6 = vld [vmem:[%s14687_s22 + $0x1f88] ss:$16 sps:$4 sm:$0xff]  }
 0x4cf   : > { %7879 = vmatmul.mubr.bf16.vlgmr.msra.gmra.mrb[56].mxu0 %v15287_v10  ;;  %v13467_v10 = vld [vmem:[%s14687_s22 + $0x1c48] ss:$16 sps:$4 sm:$0xff]  }
 0x4d0   : > { %7920 = vmatmul.mubr.bf16.vlgmr.msra.gmra.mrb[56].mxu1 %v15289_v11  ;;  %7929 = vmatpush1.bf16.msra.mxu0 %v13455_v56  ;;  %v13470_v11 = vld [vmem:[%s14687_s22 + $0x1e48] ss:$16 sps:$4 sm:$0xff]   ;;  %v13535_v56 = vld [vmem:[%s14687_s22 + $0x1dac] ss:$16 sps:$4 sm:$0xff]  }
 0x4d1   : > { %7970 = vmatpush1.bf16.msra.mxu1 %v13458_v52  ;;  %7930 = vmatprep.subr.bf16.mxu0 %v13463_v59  ;;  %v13538_v52 = vld [vmem:[%s14687_s22 + $0x1fac] ss:$16 sps:$4 sm:$0xff]   ;;  %v13533_v59 = vld [vmem:[%s14687_s22 + $0x1da8] ss:$16 sps:$4 sm:$0xff]  }
 0x4d2   : > { %7971 = vmatprep.subr.bf16.mxu1 %v13466_v38  ;;  %7960 = vmatprep.mubr.bf16.mxu0 %v15293_v18  ;;  %v13476_v18 = vld [vmem:[%s14687_s22 + $0x1e68] ss:$16 sps:$4 sm:$0xff]  }
 0x4d3   : > { %8001 = vmatprep.mubr.bf16.mxu1 %v15295_v19  ;;  %v13481_v19 = vld [vmem:[%s14687_s22 + $0x1c8c] ss:$16 sps:$4 sm:$0xff]   ;;  %v13536_v38 = vld [vmem:[%s14687_s22 + $0x1fa8] ss:$16 sps:$4 sm:$0xff]  }
 0x4d4   : > { %7931 = vmatpush1.bf16.msra.mxu0 %v13461_v16  ;;  %v13541_v16 = vld [vmem:[%s14687_s22 + $0x1dcc] ss:$16 sps:$4 sm:$0xff]  }
 0x4d5   : > { %7972 = vmatpush1.bf16.msra.mxu1 %v13464_v14  ;;  %7932 = vmatprep.subr.bf16.mxu0 %v13469_v15  ;;  %v13544_v14 = vld [vmem:[%s14687_s22 + $0x1fcc] ss:$16 sps:$4 sm:$0xff]   ;;  %v13539_v15 = vld [vmem:[%s14687_s22 + $0x1dc8] ss:$16 sps:$4 sm:$0xff]  }
 0x4d6   : > { %7973 = vmatprep.subr.bf16.mxu1 %v13472_v39  ;;  %v13542_v39 = vld [vmem:[%s14687_s22 + $0x1fc8] ss:$16 sps:$4 sm:$0xff]  }
 0x4d8   : > { %7933 = vmatpush1.bf16.msra.mxu0 %v13467_v10  ;;  %v13547_v10 = vld [vmem:[%s14687_s22 + $0x1dec] ss:$16 sps:$4 sm:$0xff]  }
 0x4d9   : > { %7974 = vmatpush1.bf16.msra.mxu1 %v13470_v11  ;;  %7934 = vmatprep.subr.bf16.mxu0 %v13475_v42  ;;  %v13550_v11 = vld [vmem:[%s14687_s22 + $0x1fec] ss:$16 sps:$4 sm:$0xff]   ;;  %v13545_v42 = vld [vmem:[%s14687_s22 + $0x1de8] ss:$16 sps:$4 sm:$0xff]  }
 0x4da   : > { %7975 = vmatprep.subr.bf16.mxu1 %v13478_v49  ;;  %v13548_v49 = vld [vmem:[%s14687_s22 + $0x1fe8] ss:$16 sps:$4 sm:$0xff]  }
 0x4dc   : > { %7935 = vmatpush1.bf16.msra.mxu0 %v13473_v48 }
 0x4dd   : > { %7976 = vmatpush1.bf16.msra.mxu1 %v13476_v18  ;;  %7936 = vmatprep.subr.bf16.mxu0 %v13481_v19 }
 0x4de   : > { %7977 = vmatprep.subr.bf16.mxu1 %v13484_v60 }
 0x4e0   : > { %7937 = vmatpush1.bf16.msra.mxu0 %v13479_v35 }
 0x4e1   : > { %7978 = vmatpush1.bf16.msra.mxu1 %v13482_v40  ;;  %7938 = vmatprep.subr.bf16.mxu0 %v13487_v53 }
 0x4e2   : > { %7979 = vmatprep.subr.bf16.mxu1 %v13490_v43  ;;  %v7634_v54 = vpop.f32.mrb[44].mxu0 }
 0x4e3   : > { %v7675_v63 = vpop.f32.mrb[44].mxu1  ;;  %v7635_v12 = vadd.f32 %v7634_v54, %v15843_v46  ;;  %v7636_v13 = vpop.f32.mrb[45].mxu0  ;;  %v13499_v46 = vld [vmem:[%s14687_s22 + $0x1cec] ss:$16 sps:$4 sm:$0xff]  }
 0x4e4   : > { %v7677_v55 = vpop.f32.mrb[45].mxu1  ;;  %v7637_v57 = vadd.f32 %v7636_v13, %v15847_v58  ;;  %v7638_v24 = vpop.f32.mrb[46].mxu0  ;;  %7939 = vmatpush1.bf16.msra.mxu0 %v13485_v47  ;;  %v13502_v58 = vld [vmem:[%s14687_s22 + $0x1eec] ss:$16 sps:$4 sm:$0xff]  }
 0x4e5   : > { %v7679_v25 = vpop.f32.mrb[46].mxu1  ;;  %7980 = vmatpush1.bf16.msra.mxu1 %v13488_v61  ;;  %v15917_v1 = vadd.f32 %v7675_v63, %v7635_v12  ;;  %v7639_v5 = vpop.f32.mrb[47].mxu0  ;;  %7940 = vmatprep.subr.bf16.mxu0 %v13493_v31 }
 0x4e6   : > { %v7680_v8 = vpop.f32.mrb[47].mxu1  ;;  %7981 = vmatprep.subr.bf16.mxu1 %v13496_v7  ;;  %v15921_v33 = vadd.f32 %v7677_v55, %v7637_v57 }
 0x4e8   : > { %7941 = vmatpush1.bf16.msra.mxu0 %v13491_v4 }
 0x4e9   : > { %7982 = vmatpush1.bf16.msra.mxu1 %v13494_v0  ;;  %7942 = vmatprep.subr.bf16.mxu0 %v13499_v46 }
 0x4ea   : > { %7983 = vmatprep.subr.bf16.mxu1 %v13502_v58 }
 0x4ec   : > { %7943 = vmatpush1.bf16.msra.mxu0 %v13497_v36 }
 0x4ed   : > { %7984 = vmatpush1.bf16.msra.mxu1 %v13500_v41  ;;  %7944 = vmatprep.subr.bf16.mxu0 %v13505_v44 }
 0x4ee   : > { %7985 = vmatprep.subr.bf16.mxu1 %v13508_v9 }
 0x4f0   : > { %7945 = vmatpush1.bf16.msra.mxu0 %v13503_v17 }
 0x4f1   : > { %7986 = vmatpush1.bf16.msra.mxu1 %v13506_v20  ;;  %7946 = vmatprep.subr.bf16.mxu0 %v13511_v51 }
 0x4f2   : > { %7987 = vmatprep.subr.bf16.mxu1 %v13514_v21 }
 0x4f4   : > { %7947 = vmatpush1.bf16.msra.mxu0 %v13509_v62 }
 0x4f5   : > { %7988 = vmatpush1.bf16.msra.mxu1 %v13512_v23  ;;  %7948 = vmatprep.subr.bf16.mxu0 %v13517_v26 }
 0x4f6   : > { %7989 = vmatprep.subr.bf16.mxu1 %v13520_v27  ;;  %v552_v27 = vld [vmem:[#allocation2 + $0x10] sm:$0xff] }
 0x4f8   : > { %7949 = vmatpush1.bf16.msra.mxu0 %v13515_v45 }
 0x4f9   : > { %7990 = vmatpush1.bf16.msra.mxu1 %v13518_v50  ;;  %7950 = vmatprep.subr.bf16.mxu0 %v13523_v28 }
 0x4fa   : > { %7991 = vmatprep.subr.bf16.mxu1 %v13526_v29 }
 0x4fc   : > { %7951 = vmatpush1.bf16.msra.mxu0 %v13521_v22  ;;  %v553_v22 = vld [vmem:[#allocation2 + $0x18] sm:$0xff] }
 0x4fd   : > { %7992 = vmatpush1.bf16.msra.mxu1 %v13524_v2  ;;  %7952 = vmatprep.subr.bf16.mxu0 %v13529_v3 }
 0x4fe   : > { %7993 = vmatprep.subr.bf16.mxu1 %v13532_v30 }
 0x500   : > { %7953 = vmatpush1.bf16.msra.mxu0 %v13527_v37 }
 0x501   : > { %7994 = vmatpush1.bf16.msra.mxu1 %v13530_v6  ;;  %7954 = vmatprep.subr.bf16.mxu0 %v13535_v56  ;;  %v13551_v56 = vld [vmem:[#allocation9 + $0x4] ss:$16 sps:$4 sm:$0xff] (!%p11524_p9)  }
 0x502   : > { %7995 = vmatprep.subr.bf16.mxu1 %v13538_v52  ;;  %v13553_v52 = vld [vmem:[#allocation9 + $0xc] ss:$16 sps:$4 sm:$0xff] (!%p11524_p9)  }
 0x504   : > { %7955 = vmatpush1.bf16.msra.mxu0 %v13533_v59  ;;  %v13555_v59 = vld [vmem:[#allocation9] ss:$16 sps:$4 sm:$0xff] (!%p11524_p9)  }
 0x505   : > { %7996 = vmatpush1.bf16.msra.mxu1 %v13536_v38  ;;  %7956 = vmatprep.subr.bf16.mxu0 %v13541_v16  ;;  %v13556_v38 = vld [vmem:[#allocation9 + $0x8] ss:$16 sps:$4 sm:$0xff] (!%p11524_p9)   ;;  %v13557_v16 = vld [vmem:[#allocation9 + $0x24] ss:$16 sps:$4 sm:$0xff] (!%p11524_p9)  }
 0x506   : > { %7997 = vmatprep.subr.bf16.mxu1 %v13544_v14  ;;  %v13559_v14 = vld [vmem:[#allocation9 + $0x2c] ss:$16 sps:$4 sm:$0xff] (!%p11524_p9)  }
 0x508   : > { %7957 = vmatpush1.bf16.msra.mxu0 %v13539_v15  ;;  %v13561_v15 = vld [vmem:[#allocation9 + $0x20] ss:$16 sps:$4 sm:$0xff] (!%p11524_p9)  }
 0x509   : > { %7998 = vmatpush1.bf16.msra.mxu1 %v13542_v39  ;;  %7958 = vmatprep.subr.bf16.mxu0 %v13547_v10  ;;  %v13562_v39 = vld [vmem:[#allocation9 + $0x28] ss:$16 sps:$4 sm:$0xff] (!%p11524_p9)   ;;  %v13563_v10 = vld [vmem:[#allocation9 + $0x44] ss:$16 sps:$4 sm:$0xff] (!%p11524_p9)  }
 0x50a   : > { %7999 = vmatprep.subr.bf16.mxu1 %v13550_v11  ;;  %v13565_v11 = vld [vmem:[#allocation9 + $0x4c] ss:$16 sps:$4 sm:$0xff] (!%p11524_p9)  }
 0x50c   : > { %7959 = vmatpush1.bf16.msra.mxu0 %v13545_v42  ;;  %v13567_v42 = vld [vmem:[#allocation9 + $0x40] ss:$16 sps:$4 sm:$0xff] (!%p11524_p9)  }
 0x50d   : > { %8000 = vmatpush1.bf16.msra.mxu1 %v13548_v49  ;;  %8832 = vmatprep.subr.bf16.mxu0 (!%p11524_p9), %v13551_v56  ;;  %v13568_v49 = vld [vmem:[#allocation9 + $0x48] ss:$16 sps:$4 sm:$0xff] (!%p11524_p9)  }
 0x50e   : > { %8914 = vmatprep.subr.bf16.mxu1 (!%p11524_p9), %v13553_v52  ;;  %v13640_v56 = vld [vmem:[#allocation9 + $0x1c8] ss:$16 sps:$4 sm:$0xff] (!%p11524_p9)  }
 0x50f   : > { %7961 = vmatmul.mubr.bf16.vlgmr.msra.gmra.mrb[60].mxu0 %v15371_v32 }
 0x510   : > { %8002 = vmatmul.mubr.bf16.vlgmr.msra.gmra.mrb[60].mxu1 %v15373_v34  ;;  %8833 = vmatpush1.bf16.msra.mxu0 (!%p11524_p9), %v13555_v59  ;;  %v13641_v59 = vld [vmem:[#allocation9 + $0x1e4] ss:$16 sps:$4 sm:$0xff] (!%p11524_p9)  }
 0x511   : > { %8915 = vmatpush1.bf16.msra.mxu1 (!%p11524_p9), %v13556_v38  ;;  %8834 = vmatprep.subr.bf16.mxu0 (!%p11524_p9), %v13557_v16  ;;  %v13643_v38 = vld [vmem:[#allocation9 + $0x1ec] ss:$16 sps:$4 sm:$0xff] (!%p11524_p9)   ;;  %v13645_v16 = vld [vmem:[#allocation9 + $0x1e0] ss:$16 sps:$4 sm:$0xff] (!%p11524_p9)  }
 0x512   : > { %8916 = vmatprep.subr.bf16.mxu1 (!%p11524_p9), %v13559_v14  ;;  %v13646_v14 = vld [vmem:[#allocation9 + $0x1e8] ss:$16 sps:$4 sm:$0xff] (!%p11524_p9)  }
 0x514   : > { %8835 = vmatpush1.bf16.msra.mxu0 (!%p11524_p9), %v13561_v15 }
 0x515   : > { %8917 = vmatpush1.bf16.msra.mxu1 (!%p11524_p9), %v13562_v39  ;;  %8836 = vmatprep.subr.bf16.mxu0 (!%p11524_p9), %v13563_v10  ;;  %v13649_v39 = vld [vmem:[#allocation9 + $0x204] ss:$16 sps:$4 sm:$0xff] (!%p11524_p9)   ;;  %v13652_v10 = vld [vmem:[#allocation9 + $0x20c] ss:$16 sps:$4 sm:$0xff] (!%p11524_p9)  }
 0x516   : > { %8918 = vmatprep.subr.bf16.mxu1 (!%p11524_p9), %v13565_v11 }
 0x518   : > { %8837 = vmatpush1.bf16.msra.mxu0 (!%p11524_p9), %v13567_v42  ;;  %v13647_v42 = vld [vmem:[#allocation9 + $0x200] ss:$16 sps:$4 sm:$0xff] (!%p11524_p9)  }
 0x519   : > { %8919 = vmatpush1.bf16.msra.mxu1 (!%p11524_p9), %v13568_v49  ;;  %v13650_v49 = vld [vmem:[#allocation9 + $0x208] ss:$16 sps:$4 sm:$0xff] (!%p11524_p9)  }
 0x522   : > { %v7716_v48 = vpop.f32.mrb[48].mxu0 }
 0x523   : > { %v7757_v18 = vpop.f32.mrb[48].mxu1  ;;  %v7717_v19 = vadd.f32 %v7716_v48, %v15917_v1  ;;  %v7718_v60 = vpop.f32.mrb[49].mxu0  ;;  %v13569_v48 = vld [vmem:[#allocation9 + $0x64] ss:$16 sps:$4 sm:$0xff] (!%p11524_p9)  }
 0x524   : > { %v7759_v35 = vpop.f32.mrb[49].mxu1  ;;  %v7719_v40 = vadd.f32 %v7718_v60, %v15921_v33  ;;  %v7720_v53 = vpop.f32.mrb[50].mxu0  ;;  %v13574_v60 = vld [vmem:[#allocation9 + $0x68] ss:$16 sps:$4 sm:$0xff] (!%p11524_p9)   ;;  %8838 = vmatprep.subr.bf16.mxu0 (!%p11524_p9), %v13569_v48  ;;  %v13655_v48 = vld [vmem:[#allocation9 + $0x224] ss:$16 sps:$4 sm:$0xff] (!%p11524_p9)  }
 0x525   : > { %v7761_v43 = vpop.f32.mrb[50].mxu1  ;;  %v7758_v47 = vadd.f32 %v7757_v18, %v7717_v19  ;;  %v7721_v61 = vpop.f32.mrb[51].mxu0  ;;  %v13571_v18 = vld [vmem:[#allocation9 + $0x6c] ss:$16 sps:$4 sm:$0xff] (!%p11524_p9)   ;;  %v13573_v19 = vld [vmem:[#allocation9 + $0x60] ss:$16 sps:$4 sm:$0xff] (!%p11524_p9)  }
 0x526   : > { %v7762_v31 = vpop.f32.mrb[51].mxu1  ;;  %v7760_v7 = vadd.f32 %v7759_v35, %v7719_v40  ;;  %v13575_v35 = vld [vmem:[#allocation9 + $0x84] ss:$16 sps:$4 sm:$0xff] (!%p11524_p9)   ;;  %8920 = vmatprep.subr.bf16.mxu1 (!%p11524_p9), %v13571_v18  ;;  %v13577_v40 = vld [vmem:[#allocation9 + $0x8c] ss:$16 sps:$4 sm:$0xff] (!%p11524_p9)   ;;  %8839 = vmatpush1.bf16.msra.mxu0 (!%p11524_p9), %v13573_v19 }
 0x527   : > { %v13579_v53 = vld [vmem:[#allocation9 + $0x80] ss:$16 sps:$4 sm:$0xff] (!%p11524_p9)   ;;  %v13580_v43 = vld [vmem:[#allocation9 + $0x88] ss:$16 sps:$4 sm:$0xff] (!%p11524_p9)   ;;  %8921 = vmatpush1.bf16.msra.mxu1 (!%p11524_p9), %v13574_v60  ;;  %8840 = vmatprep.subr.bf16.mxu0 (!%p11524_p9), %v13575_v35  ;;  %v13583_v61 = vld [vmem:[#allocation9 + $0xac] ss:$16 sps:$4 sm:$0xff] (!%p11524_p9)  }
 0x528   : > { %8922 = vmatprep.subr.bf16.mxu1 (!%p11524_p9), %v13577_v40  ;;  %v13585_v31 = vld [vmem:[#allocation9 + $0xa0] ss:$16 sps:$4 sm:$0xff] (!%p11524_p9)   ;;  %v13658_v18 = vld [vmem:[#allocation9 + $0x22c] ss:$16 sps:$4 sm:$0xff] (!%p11524_p9)   ;;  %v13656_v60 = vld [vmem:[#allocation9 + $0x228] ss:$16 sps:$4 sm:$0xff] (!%p11524_p9)  }
 0x529   : > { %v13653_v19 = vld [vmem:[#allocation9 + $0x220] ss:$16 sps:$4 sm:$0xff] (!%p11524_p9)   ;;  %v13661_v35 = vld [vmem:[#allocation9 + $0x244] ss:$16 sps:$4 sm:$0xff] (!%p11524_p9)   ;;  %v13664_v40 = vld [vmem:[#allocation9 + $0x24c] ss:$16 sps:$4 sm:$0xff] (!%p11524_p9)  }
 0x52a   : > { %8841 = vmatpush1.bf16.msra.mxu0 (!%p11524_p9), %v13579_v53  ;;  %v13659_v53 = vld [vmem:[#allocation9 + $0x240] ss:$16 sps:$4 sm:$0xff] (!%p11524_p9)  }
 0x52b   : > { %8923 = vmatpush1.bf16.msra.mxu1 (!%p11524_p9), %v13580_v43  ;;  %v13662_v43 = vld [vmem:[#allocation9 + $0x248] ss:$16 sps:$4 sm:$0xff] (!%p11524_p9)  }
 0x52c   : > { %8924 = vmatprep.subr.bf16.mxu1 (!%p11524_p9), %v13583_v61  ;;  %v13670_v61 = vld [vmem:[#allocation9 + $0x26c] ss:$16 sps:$4 sm:$0xff] (!%p11524_p9)  }
 0x562   : > { %v7798_v54 = vpop.f32.mrb[52].mxu0 }
 0x563   : > { %v7839_v63 = vpop.f32.mrb[52].mxu1  ;;  %v7799_v12 = vadd.f32 %v7798_v54, %v7758_v47  ;;  %v7800_v32 = vpop.f32.mrb[53].mxu0  ;;  %v13581_v47 = vld [vmem:[#allocation9 + $0xa4] ss:$16 sps:$4 sm:$0xff] (!%p11524_p9)  }
 0x564   : > { %v7841_v13 = vpop.f32.mrb[53].mxu1  ;;  %v7801_v34 = vadd.f32 %v7800_v32, %v7760_v7  ;;  %v7802_v55 = vpop.f32.mrb[54].mxu0  ;;  %v13586_v7 = vld [vmem:[#allocation9 + $0xa8] ss:$16 sps:$4 sm:$0xff] (!%p11524_p9)   ;;  %v13587_v54 = vld [vmem:[#allocation9 + $0xc4] ss:$16 sps:$4 sm:$0xff] (!%p11524_p9)   ;;  %8842 = vmatprep.subr.bf16.mxu0 (!%p11524_p9), %v13581_v47 }
 0x565   : > { %v7843_v57 = vpop.f32.mrb[54].mxu1  ;;  %v7840_v24 = vadd.f32 %v7839_v63, %v7799_v12  ;;  %v7803_v25 = vpop.f32.mrb[55].mxu0  ;;  %v13589_v63 = vld [vmem:[#allocation9 + $0xcc] ss:$16 sps:$4 sm:$0xff] (!%p11524_p9)   ;;  %v13591_v12 = vld [vmem:[#allocation9 + $0xc0] ss:$16 sps:$4 sm:$0xff] (!%p11524_p9)   ;;  %8843 = vmatpush1.bf16.msra.mxu0 (!%p11524_p9), %v13585_v31  ;;  %8925 = vmatpush1.bf16.msra.mxu1 (!%p11524_p9), %v13586_v7 }
 0x566   : > { %v7844_v4 = vpop.f32.mrb[55].mxu1  ;;  %v7842_v0 = vadd.f32 %v7841_v13, %v7801_v34  ;;  %v13592_v32 = vld [vmem:[#allocation9 + $0xc8] ss:$16 sps:$4 sm:$0xff] (!%p11524_p9)   ;;  %v13593_v13 = vld [vmem:[#allocation9 + $0xe4] ss:$16 sps:$4 sm:$0xff] (!%p11524_p9)   ;;  %8844 = vmatprep.subr.bf16.mxu0 (!%p11524_p9), %v13587_v54  ;;  %8926 = vmatprep.subr.bf16.mxu1 (!%p11524_p9), %v13589_v63 }
 0x567   : > { %v13595_v34 = vld [vmem:[#allocation9 + $0xec] ss:$16 sps:$4 sm:$0xff] (!%p11524_p9)   ;;  %v13597_v55 = vld [vmem:[#allocation9 + $0xe0] ss:$16 sps:$4 sm:$0xff] (!%p11524_p9)   ;;  %v13598_v57 = vld [vmem:[#allocation9 + $0xe8] ss:$16 sps:$4 sm:$0xff] (!%p11524_p9)  }
 0x568   : > { %v13601_v25 = vld [vmem:[#allocation9 + $0x10c] ss:$16 sps:$4 sm:$0xff] (!%p11524_p9)   ;;  %v13603_v4 = vld [vmem:[#allocation9 + $0x100] ss:$16 sps:$4 sm:$0xff] (!%p11524_p9)   ;;  %v13667_v47 = vld [vmem:[#allocation9 + $0x264] ss:$16 sps:$4 sm:$0xff] (!%p11524_p9)  }
 0x569   : > { %8845 = vmatpush1.bf16.msra.mxu0 (!%p11524_p9), %v13591_v12  ;;  %8927 = vmatpush1.bf16.msra.mxu1 (!%p11524_p9), %v13592_v32  ;;  %v13665_v31 = vld [vmem:[#allocation9 + $0x260] ss:$16 sps:$4 sm:$0xff] (!%p11524_p9)   ;;  %v13668_v7 = vld [vmem:[#allocation9 + $0x268] ss:$16 sps:$4 sm:$0xff] (!%p11524_p9)   ;;  %v13673_v54 = vld [vmem:[#allocation9 + $0x284] ss:$16 sps:$4 sm:$0xff] (!%p11524_p9)  }
 0x56a   : > { %8846 = vmatprep.subr.bf16.mxu0 (!%p11524_p9), %v13593_v13  ;;  %8928 = vmatprep.subr.bf16.mxu1 (!%p11524_p9), %v13595_v34  ;;  %v13676_v63 = vld [vmem:[#allocation9 + $0x28c] ss:$16 sps:$4 sm:$0xff] (!%p11524_p9)   ;;  %v13671_v12 = vld [vmem:[#allocation9 + $0x280] ss:$16 sps:$4 sm:$0xff] (!%p11524_p9)   ;;  %v13674_v32 = vld [vmem:[#allocation9 + $0x288] ss:$16 sps:$4 sm:$0xff] (!%p11524_p9)  }
 0x56b   : > { %v13679_v13 = vld [vmem:[#allocation9 + $0x2a4] ss:$16 sps:$4 sm:$0xff] (!%p11524_p9)   ;;  %v13682_v34 = vld [vmem:[#allocation9 + $0x2ac] ss:$16 sps:$4 sm:$0xff] (!%p11524_p9)  }
 0x56d   : > { %8847 = vmatpush1.bf16.msra.mxu0 (!%p11524_p9), %v13597_v55  ;;  %8929 = vmatpush1.bf16.msra.mxu1 (!%p11524_p9), %v13598_v57  ;;  %v13677_v55 = vld [vmem:[#allocation9 + $0x2a0] ss:$16 sps:$4 sm:$0xff] (!%p11524_p9)   ;;  %v13680_v57 = vld [vmem:[#allocation9 + $0x2a8] ss:$16 sps:$4 sm:$0xff] (!%p11524_p9)  }
 0x56e   : > { %8930 = vmatprep.subr.bf16.mxu1 (!%p11524_p9), %v13601_v25  ;;  %v13688_v25 = vld [vmem:[#allocation9 + $0x2cc] ss:$16 sps:$4 sm:$0xff] (!%p11524_p9)  }
 0x5a2   : > { %v7880_v1 = vpop.f32.mrb[56].mxu0 }
 0x5a3   : > { %v7921_v5 = vpop.f32.mrb[56].mxu1  ;;  %v7881_v8 = vadd.f32 %v7880_v1, %v7840_v24  ;;  %v7882_v46 = vpop.f32.mrb[57].mxu0  ;;  %v13599_v24 = vld [vmem:[#allocation9 + $0x104] ss:$16 sps:$4 sm:$0xff] (!%p11524_p9)  }
 0x5a4   : > { %v7923_v58 = vpop.f32.mrb[57].mxu1  ;;  %v7883_v33 = vadd.f32 %v7882_v46, %v7842_v0  ;;  %v7884_v36 = vpop.f32.mrb[58].mxu0  ;;  %v13604_v0 = vld [vmem:[#allocation9 + $0x108] ss:$16 sps:$4 sm:$0xff] (!%p11524_p9)   ;;  %v13605_v1 = vld [vmem:[#allocation9 + $0x124] ss:$16 sps:$4 sm:$0xff] (!%p11524_p9)   ;;  %8848 = vmatprep.subr.bf16.mxu0 (!%p11524_p9), %v13599_v24 }
 0x5a5   : > { %v7925_v41 = vpop.f32.mrb[58].mxu1  ;;  %v7922_v44 = vadd.f32 %v7921_v5, %v7881_v8  ;;  %v7885_v9 = vpop.f32.mrb[59].mxu0  ;;  %v13607_v5 = vld [vmem:[#allocation9 + $0x12c] ss:$16 sps:$4 sm:$0xff] (!%p11524_p9)   ;;  %v13609_v8 = vld [vmem:[#allocation9 + $0x120] ss:$16 sps:$4 sm:$0xff] (!%p11524_p9)   ;;  %8849 = vmatpush1.bf16.msra.mxu0 (!%p11524_p9), %v13603_v4  ;;  %8931 = vmatpush1.bf16.msra.mxu1 (!%p11524_p9), %v13604_v0 }
 0x5a6   : > { %v7926_v17 = vpop.f32.mrb[59].mxu1  ;;  %v7924_v20 = vadd.f32 %v7923_v58, %v7883_v33  ;;  %v13610_v46 = vld [vmem:[#allocation9 + $0x128] ss:$16 sps:$4 sm:$0xff] (!%p11524_p9)   ;;  %v13611_v58 = vld [vmem:[#allocation9 + $0x144] ss:$16 sps:$4 sm:$0xff] (!%p11524_p9)   ;;  %8850 = vmatprep.subr.bf16.mxu0 (!%p11524_p9), %v13605_v1  ;;  %8932 = vmatprep.subr.bf16.mxu1 (!%p11524_p9), %v13607_v5 }
 0x5a7   : > { %v13613_v33 = vld [vmem:[#allocation9 + $0x14c] ss:$16 sps:$4 sm:$0xff] (!%p11524_p9)   ;;  %v13615_v36 = vld [vmem:[#allocation9 + $0x140] ss:$16 sps:$4 sm:$0xff] (!%p11524_p9)   ;;  %v13616_v41 = vld [vmem:[#allocation9 + $0x148] ss:$16 sps:$4 sm:$0xff] (!%p11524_p9)  }
 0x5a8   : > { %v13619_v9 = vld [vmem:[#allocation9 + $0x16c] ss:$16 sps:$4 sm:$0xff] (!%p11524_p9)   ;;  %v13685_v24 = vld [vmem:[#allocation9 + $0x2c4] ss:$16 sps:$4 sm:$0xff] (!%p11524_p9)   ;;  %v13683_v0 = vld [vmem:[#allocation9 + $0x2c0] ss:$16 sps:$4 sm:$0xff] (!%p11524_p9)  }
 0x5a9   : > { %8851 = vmatpush1.bf16.msra.mxu0 (!%p11524_p9), %v13609_v8  ;;  %8933 = vmatpush1.bf16.msra.mxu1 (!%p11524_p9), %v13610_v46  ;;  %v8023_v17 = vld [vmem:[#allocation2 + $0x8] sm:$0xff] (!%p11524_p9)  ;;  %v13691_v8 = vld [vmem:[#allocation9 + $0x2e4] ss:$16 sps:$4 sm:$0xff] (!%p11524_p9)  }
 0x5aa   : > { %8852 = vmatprep.subr.bf16.mxu0 (!%p11524_p9), %v13611_v58  ;;  %8934 = vmatprep.subr.bf16.mxu1 (!%p11524_p9), %v13613_v33  ;;  %vm8027_vm0 = vcmp.gt.f32.partialorder (!%p11524_p9), %v8023_v17, 0.0  ;;  %v13686_v5 = vld [vmem:[#allocation9 + $0x2c8] ss:$16 sps:$4 sm:$0xff] (!%p11524_p9)   ;;  %v13694_v46 = vld [vmem:[#allocation9 + $0x2ec] ss:$16 sps:$4 sm:$0xff] (!%p11524_p9)  }
 0x5ad   : > { %8853 = vmatpush1.bf16.msra.mxu0 (!%p11524_p9), %v13615_v36  ;;  %8935 = vmatpush1.bf16.msra.mxu1 (!%p11524_p9), %v13616_v41  ;;  %v13689_v36 = vld [vmem:[#allocation9 + $0x2e0] ss:$16 sps:$4 sm:$0xff] (!%p11524_p9)   ;;  %v13692_v41 = vld [vmem:[#allocation9 + $0x2e8] ss:$16 sps:$4 sm:$0xff] (!%p11524_p9)  }
 0x5ae   : > { %8936 = vmatprep.subr.bf16.mxu1 (!%p11524_p9), %v13619_v9  ;;  %v13700_v9 = vld [vmem:[#allocation9 + $0x30c] ss:$16 sps:$4 sm:$0xff] (!%p11524_p9)  }
 0x5e2   : > { %v7962_v51 = vpop.f32.mrb[60].mxu0 }
 0x5e3   : > { %v8003_v21 = vpop.f32.mrb[60].mxu1  ;;  %v7963_v62 = vadd.f32 %v7962_v51, %v7922_v44  ;;  %v7964_v23 = vpop.f32.mrb[61].mxu0  ;;  %v13617_v44 = vld [vmem:[#allocation9 + $0x164] ss:$16 sps:$4 sm:$0xff] (!%p11524_p9)   ;;  %v13621_v51 = vld [vmem:[#allocation9 + $0x160] ss:$16 sps:$4 sm:$0xff] (!%p11524_p9)  }
 0x5e4   : > { %v8005_v26 = vpop.f32.mrb[61].mxu1  ;;  %v7965_v45 = vadd.f32 %v7964_v23, %v7924_v20  ;;  %v7966_v50 = vpop.f32.mrb[62].mxu0  ;;  %8021 = sbr.rel (%p11524_p9) target bundleno = 2319 (0x90f), region = 100  ;;  %v8031_v20 = vmul.f32 (!%p11524_p9), 0.2, %v8023_v17  ;;  %8854 = vmatprep.subr.bf16.mxu0 (!%p11524_p9), %v13617_v44 }
 0x5e5   : > { %v8007_v28 = vpop.f32.mrb[62].mxu1  ;;  %v8004_v29 = vadd.f32 %v8003_v21, %v7963_v62  ;;  %v7967_v2 = vpop.f32.mrb[63].mxu0  ;;  %v13622_v21 = vld [vmem:[#allocation9 + $0x168] ss:$16 sps:$4 sm:$0xff] (!%p11524_p9)   ;;  %v13623_v62 = vld [vmem:[#allocation9 + $0x184] ss:$16 sps:$4 sm:$0xff] (!%p11524_p9)   ;;  %8855 = vmatpush1.bf16.msra.mxu0 (!%p11524_p9), %v13621_v51 }
 0x5e6   : > { %v8008_v3 = vpop.f32.mrb[63].mxu1  ;;  %v8006_v30 = vadd.f32 %v8005_v26, %v7965_v45  ;;  %v13625_v23 = vld [vmem:[#allocation9 + $0x18c] ss:$16 sps:$4 sm:$0xff] (!%p11524_p9)   ;;  %v8035_v26 = vsel (!%p11524_p9), %vm8027_vm0, %v8023_v17, %v8031_v20  ;;  %8937 = vmatpush1.bf16.msra.mxu1 (!%p11524_p9), %v13622_v21  ;;  %v13627_v45 = vld [vmem:[#allocation9 + $0x180] ss:$16 sps:$4 sm:$0xff] (!%p11524_p9)   ;;  %8856 = vmatprep.subr.bf16.mxu0 (!%p11524_p9), %v13623_v62 }
 0x5e7   : > { %v8012_v37 = vadd.f32 %v8004_v29, %v552_v27  ;;  %v8039_v27 = vpack.c.bf16 (!%p11524_p9), %v8035_v26, %v8035_v26  ;;  %v13628_v50 = vld [vmem:[#allocation9 + $0x188] ss:$16 sps:$4 sm:$0xff] (!%p11524_p9)   ;;  %8938 = vmatprep.subr.bf16.mxu1 (!%p11524_p9), %v13625_v23  ;;  %v13629_v28 = vld [vmem:[#allocation9 + $0x1a4] ss:$16 sps:$4 sm:$0xff] (!%p11524_p9)   ;;  %v13631_v29 = vld [vmem:[#allocation9 + $0x1ac] ss:$16 sps:$4 sm:$0xff] (!%p11524_p9)  }
 0x5e8   : > { %v8013_v6 = vadd.f32 %v8006_v30, %v553_v22  ;;  %v13633_v22 = vld [vmem:[#allocation9 + $0x1a0] ss:$16 sps:$4 sm:$0xff] (!%p11524_p9)   ;;  %v13634_v2 = vld [vmem:[#allocation9 + $0x1a8] ss:$16 sps:$4 sm:$0xff] (!%p11524_p9)   ;;  %v13635_v3 = vld [vmem:[#allocation9 + $0x1c4] ss:$16 sps:$4 sm:$0xff] (!%p11524_p9)  }
 0x5e9   : > { %8016 = vst [vmem:[#allocation2 + $0x10] sm:$0xff] %v8012_v37  ;;  %8864 = vmatprep.mubr.bf16.mxu0 (!%p11524_p9), %v8039_v27  ;;  %8946 = vmatprep.mubr.bf16.mxu1 (!%p11524_p9), %v8039_v27  ;;  %v13637_v30 = vld [vmem:[#allocation9 + $0x1cc] ss:$16 sps:$4 sm:$0xff] (!%p11524_p9)   ;;  %v8022_v37 = vld [vmem:[#allocation2] sm:$0xff] (!%p11524_p9)  ;;  %v13698_v20 = vld [vmem:[#allocation9 + $0x308] ss:$16 sps:$4 sm:$0xff] (!%p11524_p9)  }
 0x5ea   : > { %8017 = vst [vmem:[#allocation2 + $0x18] sm:$0xff] %v8013_v6  ;;  %8857 = vmatpush1.bf16.msra.mxu0 (!%p11524_p9), %v13627_v45  ;;  %8939 = vmatpush1.bf16.msra.mxu1 (!%p11524_p9), %v13628_v50  ;;  %v13639_v6 = vld [vmem:[#allocation9 + $0x1c0] ss:$16 sps:$4 sm:$0xff] (!%p11524_p9)   ;;  %v8030_v52 = vmul.f32 (!%p11524_p9), 0.2, %v8022_v37  ;;  %vm8026_vm1 = vcmp.gt.f32.partialorder (!%p11524_p9), %v8022_v37, 0.0 }
 0x5eb   : > { %8858 = vmatprep.subr.bf16.mxu0 %v13629_v28  ;;  %8940 = vmatprep.subr.bf16.mxu1 %v13631_v29  ;;  %v13697_v44 = vld [vmem:[#allocation9 + $0x304] ss:$16 sps:$4 sm:$0xff]   ;;  %v13695_v17 = vld [vmem:[#allocation9 + $0x300] ss:$16 sps:$4 sm:$0xff]   ;;  %v13706_v21 = vld [vmem:[#allocation9 + $0x32c] ss:$16 sps:$4 sm:$0xff]  }
 0x5ec   : > { %v8034_v15 = vsel %vm8026_vm1, %v8022_v37, %v8030_v52  ;;  %v13703_v51 = vld [vmem:[#allocation9 + $0x324] ss:$16 sps:$4 sm:$0xff]   ;;  %v13701_v62 = vld [vmem:[#allocation9 + $0x320] ss:$16 sps:$4 sm:$0xff]   ;;  %v13704_v23 = vld [vmem:[#allocation9 + $0x328] ss:$16 sps:$4 sm:$0xff]  }
 0x5ed   : > { %v8038_v11 = vpack.c.bf16 %v8034_v15, %v8034_v15  ;;  %v13709_v26 = vld [vmem:[#allocation9 + $0x344] ss:$16 sps:$4 sm:$0xff]   ;;  %v13712_v27 = vld [vmem:[#allocation9 + $0x34c] ss:$16 sps:$4 sm:$0xff]   ;;  %v13707_v45 = vld [vmem:[#allocation9 + $0x340] ss:$16 sps:$4 sm:$0xff]  }
 0x5ee   : > { %8859 = vmatpush1.bf16.msra.mxu0 %v13633_v22  ;;  %8941 = vmatpush1.bf16.msra.mxu1 %v13634_v2  ;;  %v13710_v50 = vld [vmem:[#allocation9 + $0x348] ss:$16 sps:$4 sm:$0xff]   ;;  %v13715_v28 = vld [vmem:[#allocation9 + $0x364] ss:$16 sps:$4 sm:$0xff]   ;;  %v13718_v29 = vld [vmem:[#allocation9 + $0x36c] ss:$16 sps:$4 sm:$0xff]  }
 0x5ef   : > { %8860 = vmatprep.subr.bf16.mxu0 %v13635_v3  ;;  %8942 = vmatprep.subr.bf16.mxu1 %v13637_v30  ;;  %v13713_v22 = vld [vmem:[#allocation9 + $0x360] ss:$16 sps:$4 sm:$0xff]   ;;  %v13716_v2 = vld [vmem:[#allocation9 + $0x368] ss:$16 sps:$4 sm:$0xff]   ;;  %v13721_v3 = vld [vmem:[#allocation9 + $0x384] ss:$16 sps:$4 sm:$0xff]  }
 0x5f0   : > { %v13724_v30 = vld [vmem:[#allocation9 + $0x38c] ss:$16 sps:$4 sm:$0xff]   ;;  %v13719_v37 = vld [vmem:[#allocation9 + $0x380] ss:$16 sps:$4 sm:$0xff]  }
 0x5f1   : > { %v8025_v4 = vld [vmem:[#allocation2 + $0x18] sm:$0xff]  ;;  %v8024_v15 = vld [vmem:[#allocation2 + $0x10] sm:$0xff] }
 0x5f2   : > { %8861 = vmatpush1.bf16.msra.mxu0 %v13639_v6  ;;  %8943 = vmatpush1.bf16.msra.mxu1 %v13640_v56  ;;  %vm8029_vm2 = vcmp.gt.f32.partialorder %v8025_v4, 0.0  ;;  %v8033_v1 = vmul.f32 0.2, %v8025_v4  ;;  %v13722_v6 = vld [vmem:[#allocation9 + $0x388] ss:$16 sps:$4 sm:$0xff]   ;;  %vm8028_vm3 = vcmp.gt.f32.partialorder %v8024_v15, 0.0 }
 0x5f3   : > { %8862 = vmatprep.subr.bf16.mxu0 %v13641_v59  ;;  %8944 = vmatprep.subr.bf16.mxu1 %v13643_v38  ;;  %v13727_v56 = vld [vmem:[#allocation9 + $0x3a4] ss:$16 sps:$4 sm:$0xff]   ;;  %v13730_v52 = vld [vmem:[#allocation9 + $0x3ac] ss:$16 sps:$4 sm:$0xff]   ;;  %v13725_v59 = vld [vmem:[#allocation9 + $0x3a0] ss:$16 sps:$4 sm:$0xff]  }
 0x5f4   : > { %v8037_v58 = vsel %vm8029_vm2, %v8025_v4, %v8033_v1  ;;  %v13728_v38 = vld [vmem:[#allocation9 + $0x3a8] ss:$16 sps:$4 sm:$0xff]   ;;  %v13767_v4 = vld [vmem:[#allocation12 + $0x80] ss:$16 sps:$4 sm:$0xff]  }
 0x5f5   : > { %v8041_v33 = vpack.c.bf16 %v8037_v58, %v8037_v58  ;;  %v13775_v1 = vld [vmem:[#allocation12 + $0xa4] ss:$16 sps:$4 sm:$0xff]  }
 0x5f6   : > { %8863 = vmatpush1.bf16.msra.mxu0 %v13645_v16  ;;  %8945 = vmatpush1.bf16.msra.mxu1 %v13646_v14  ;;  %v13733_v16 = vld [vmem:[#allocation9 + $0x3c4] ss:$16 sps:$4 sm:$0xff]   ;;  %v13736_v14 = vld [vmem:[#allocation9 + $0x3cc] ss:$16 sps:$4 sm:$0xff]   ;;  %v13781_v58 = vld [vmem:[#allocation12 + $0xc4] ss:$16 sps:$4 sm:$0xff]  }
 0x5f7   : > { %8873 = vmatprep.subr.bf16.mxu0 %v13649_v39  ;;  %8955 = vmatprep.subr.bf16.mxu1 %v13652_v10  ;;  %v13731_v39 = vld [vmem:[#allocation9 + $0x3c0] ss:$16 sps:$4 sm:$0xff]   ;;  %v13734_v10 = vld [vmem:[#allocation9 + $0x3c8] ss:$16 sps:$4 sm:$0xff]  }
 0x5f9   : > { %8865 = vmatmul.mubr.bf16.vlgmr.msra.gmra.mrb[0].mxu0 %v8038_v11  ;;  %8947 = vmatmul.mubr.bf16.vlgmr.msra.gmra.mrb[0].mxu1 %v8038_v11  ;;  %v13739_v11 = vld [vmem:[#allocation9 + $0x3e4] ss:$16 sps:$4 sm:$0xff]  }
 0x5fa   : > { %8874 = vmatpush1.bf16.msra.mxu0 %v13647_v42  ;;  %8956 = vmatpush1.bf16.msra.mxu1 %v13650_v49  ;;  %v8032_v42 = vmul.f32 0.2, %v8024_v15  ;;  %v13742_v49 = vld [vmem:[#allocation9 + $0x3ec] ss:$16 sps:$4 sm:$0xff]  }
 0x5fb   : > { %8875 = vmatprep.subr.bf16.mxu0 %v13655_v48  ;;  %8957 = vmatprep.subr.bf16.mxu1 %v13658_v18  ;;  %v13737_v48 = vld [vmem:[#allocation9 + $0x3e0] ss:$16 sps:$4 sm:$0xff]   ;;  %v13740_v18 = vld [vmem:[#allocation9 + $0x3e8] ss:$16 sps:$4 sm:$0xff]  }
 0x5fc   : > { %8905 = vmatprep.mubr.bf16.mxu0 %v8041_v33  ;;  %8987 = vmatprep.mubr.bf16.mxu1 %v8041_v33  ;;  %v13784_v33 = vld [vmem:[#allocation12 + $0xcc] ss:$16 sps:$4 sm:$0xff]  }
 0x5fe   : > { %8876 = vmatpush1.bf16.msra.mxu0 %v13653_v19  ;;  %8958 = vmatpush1.bf16.msra.mxu1 %v13656_v60  ;;  %v8036_v19 = vsel %vm8028_vm3, %v8024_v15, %v8032_v42  ;;  %v13745_v60 = vld [vmem:[#allocation12 + $0x4] ss:$16 sps:$4 sm:$0xff]   ;;  %v13821_v15 = vld [vmem:[#allocation12 + $0x1a0] ss:$16 sps:$4 sm:$0xff]  }
 0x5ff   : > { %8877 = vmatprep.subr.bf16.mxu0 %v13661_v35  ;;  %8959 = vmatprep.subr.bf16.mxu1 %v13664_v40  ;;  %v13748_v35 = vld [vmem:[#allocation12 + $0xc] ss:$16 sps:$4 sm:$0xff]   ;;  %v13743_v40 = vld [vmem:[#allocation12] ss:$16 sps:$4 sm:$0xff]  }
 0x600   : > { %v13827_v42 = vld [vmem:[#allocation12 + $0x1c0] ss:$16 sps:$4 sm:$0xff]  }
 0x602   : > { %8878 = vmatpush1.bf16.msra.mxu0 %v13659_v53  ;;  %8960 = vmatpush1.bf16.msra.mxu1 %v13662_v43  ;;  %v13746_v53 = vld [vmem:[#allocation12 + $0x8] ss:$16 sps:$4 sm:$0xff]   ;;  %v8040_v43 = vpack.c.bf16 %v8036_v19, %v8036_v19  ;;  %v13833_v19 = vld [vmem:[#allocation12 + $0x1e0] ss:$16 sps:$4 sm:$0xff]  }
 0x603   : > { %8879 = vmatprep.subr.bf16.mxu0 %v13667_v47  ;;  %8961 = vmatprep.subr.bf16.mxu1 %v13670_v61  ;;  %v13751_v47 = vld [vmem:[#allocation12 + $0x24] ss:$16 sps:$4 sm:$0xff]   ;;  %v13754_v61 = vld [vmem:[#allocation12 + $0x2c] ss:$16 sps:$4 sm:$0xff]  }
 0x606   : > { %8880 = vmatpush1.bf16.msra.mxu0 %v13665_v31  ;;  %8962 = vmatpush1.bf16.msra.mxu1 %v13668_v7  ;;  %v13749_v31 = vld [vmem:[#allocation12 + $0x20] ss:$16 sps:$4 sm:$0xff]   ;;  %v13752_v7 = vld [vmem:[#allocation12 + $0x28] ss:$16 sps:$4 sm:$0xff]  }
 0x607   : > { %8881 = vmatprep.subr.bf16.mxu0 %v13673_v54  ;;  %8963 = vmatprep.subr.bf16.mxu1 %v13676_v63  ;;  %v13757_v54 = vld [vmem:[#allocation12 + $0x44] ss:$16 sps:$4 sm:$0xff]   ;;  %v13760_v63 = vld [vmem:[#allocation12 + $0x4c] ss:$16 sps:$4 sm:$0xff]  }
 0x60a   : > { %8882 = vmatpush1.bf16.msra.mxu0 %v13671_v12  ;;  %8964 = vmatpush1.bf16.msra.mxu1 %v13674_v32  ;;  %v13755_v12 = vld [vmem:[#allocation12 + $0x40] ss:$16 sps:$4 sm:$0xff]   ;;  %v13758_v32 = vld [vmem:[#allocation12 + $0x48] ss:$16 sps:$4 sm:$0xff]  }
 0x60b   : > { %8883 = vmatprep.subr.bf16.mxu0 %v13679_v13  ;;  %8965 = vmatprep.subr.bf16.mxu1 %v13682_v34  ;;  %v13763_v13 = vld [vmem:[#allocation12 + $0x64] ss:$16 sps:$4 sm:$0xff]   ;;  %v13766_v34 = vld [vmem:[#allocation12 + $0x6c] ss:$16 sps:$4 sm:$0xff]  }
 0x60e   : > { %8884 = vmatpush1.bf16.msra.mxu0 %v13677_v55  ;;  %8966 = vmatpush1.bf16.msra.mxu1 %v13680_v57  ;;  %v13761_v55 = vld [vmem:[#allocation12 + $0x60] ss:$16 sps:$4 sm:$0xff]   ;;  %v13764_v57 = vld [vmem:[#allocation12 + $0x68] ss:$16 sps:$4 sm:$0xff]  }
 0x60f   : > { %8885 = vmatprep.subr.bf16.mxu0 %v13685_v24  ;;  %8967 = vmatprep.subr.bf16.mxu1 %v13688_v25  ;;  %v13769_v24 = vld [vmem:[#allocation12 + $0x84] ss:$16 sps:$4 sm:$0xff]   ;;  %v13772_v25 = vld [vmem:[#allocation12 + $0x8c] ss:$16 sps:$4 sm:$0xff]  }
 0x612   : > { %8886 = vmatpush1.bf16.msra.mxu0 %v13683_v0  ;;  %8968 = vmatpush1.bf16.msra.mxu1 %v13686_v5  ;;  %v13770_v0 = vld [vmem:[#allocation12 + $0x88] ss:$16 sps:$4 sm:$0xff]   ;;  %v13778_v5 = vld [vmem:[#allocation12 + $0xac] ss:$16 sps:$4 sm:$0xff]  }
 0x613   : > { %8887 = vmatprep.subr.bf16.mxu0 %v13691_v8  ;;  %8969 = vmatprep.subr.bf16.mxu1 %v13694_v46  ;;  %v13773_v8 = vld [vmem:[#allocation12 + $0xa0] ss:$16 sps:$4 sm:$0xff]   ;;  %v13776_v46 = vld [vmem:[#allocation12 + $0xa8] ss:$16 sps:$4 sm:$0xff]  }
 0x616   : > { %8888 = vmatpush1.bf16.msra.mxu0 %v13689_v36  ;;  %8970 = vmatpush1.bf16.msra.mxu1 %v13692_v41  ;;  %v13779_v36 = vld [vmem:[#allocation12 + $0xc0] ss:$16 sps:$4 sm:$0xff]   ;;  %v13782_v41 = vld [vmem:[#allocation12 + $0xc8] ss:$16 sps:$4 sm:$0xff]  }
 0x617   : > { %8889 = vmatprep.subr.bf16.mxu0 %v13697_v44  ;;  %8971 = vmatprep.subr.bf16.mxu1 %v13700_v9  ;;  %v13787_v44 = vld [vmem:[#allocation12 + $0xe4] ss:$16 sps:$4 sm:$0xff]   ;;  %v13790_v9 = vld [vmem:[#allocation12 + $0xec] ss:$16 sps:$4 sm:$0xff]  }
 0x61a   : > { %8890 = vmatpush1.bf16.msra.mxu0 %v13695_v17  ;;  %8972 = vmatpush1.bf16.msra.mxu1 %v13698_v20  ;;  %v13785_v17 = vld [vmem:[#allocation12 + $0xe0] ss:$16 sps:$4 sm:$0xff]   ;;  %v13788_v20 = vld [vmem:[#allocation12 + $0xe8] ss:$16 sps:$4 sm:$0xff]  }
 0x61b   : > { %8891 = vmatprep.subr.bf16.mxu0 %v13703_v51  ;;  %8973 = vmatprep.subr.bf16.mxu1 %v13706_v21  ;;  %v13793_v51 = vld [vmem:[#allocation12 + $0x104] ss:$16 sps:$4 sm:$0xff]   ;;  %v13796_v21 = vld [vmem:[#allocation12 + $0x10c] ss:$16 sps:$4 sm:$0xff]  }
 0x61e   : > { %8892 = vmatpush1.bf16.msra.mxu0 %v13701_v62  ;;  %8974 = vmatpush1.bf16.msra.mxu1 %v13704_v23  ;;  %v13791_v62 = vld [vmem:[#allocation12 + $0x100] ss:$16 sps:$4 sm:$0xff]   ;;  %v13794_v23 = vld [vmem:[#allocation12 + $0x108] ss:$16 sps:$4 sm:$0xff]  }
 0x61f   : > { %8893 = vmatprep.subr.bf16.mxu0 %v13709_v26  ;;  %8975 = vmatprep.subr.bf16.mxu1 %v13712_v27  ;;  %v13799_v26 = vld [vmem:[#allocation12 + $0x124] ss:$16 sps:$4 sm:$0xff]   ;;  %v13802_v27 = vld [vmem:[#allocation12 + $0x12c] ss:$16 sps:$4 sm:$0xff]  }
 0x622   : > { %8894 = vmatpush1.bf16.msra.mxu0 %v13707_v45  ;;  %8976 = vmatpush1.bf16.msra.mxu1 %v13710_v50  ;;  %v13797_v45 = vld [vmem:[#allocation12 + $0x120] ss:$16 sps:$4 sm:$0xff]   ;;  %v13800_v50 = vld [vmem:[#allocation12 + $0x128] ss:$16 sps:$4 sm:$0xff]  }
 0x623   : > { %8895 = vmatprep.subr.bf16.mxu0 %v13715_v28  ;;  %8977 = vmatprep.subr.bf16.mxu1 %v13718_v29  ;;  %v13805_v28 = vld [vmem:[#allocation12 + $0x144] ss:$16 sps:$4 sm:$0xff]   ;;  %v13808_v29 = vld [vmem:[#allocation12 + $0x14c] ss:$16 sps:$4 sm:$0xff]  }
 0x626   : > { %8896 = vmatpush1.bf16.msra.mxu0 %v13713_v22  ;;  %8978 = vmatpush1.bf16.msra.mxu1 %v13716_v2  ;;  %v13803_v22 = vld [vmem:[#allocation12 + $0x140] ss:$16 sps:$4 sm:$0xff]   ;;  %v13806_v2 = vld [vmem:[#allocation12 + $0x148] ss:$16 sps:$4 sm:$0xff]  }
 0x627   : > { %8897 = vmatprep.subr.bf16.mxu0 %v13721_v3  ;;  %8979 = vmatprep.subr.bf16.mxu1 %v13724_v30  ;;  %v13811_v3 = vld [vmem:[#allocation12 + $0x164] ss:$16 sps:$4 sm:$0xff]   ;;  %v13814_v30 = vld [vmem:[#allocation12 + $0x16c] ss:$16 sps:$4 sm:$0xff]  }
 0x62a   : > { %8898 = vmatpush1.bf16.msra.mxu0 %v13719_v37  ;;  %8980 = vmatpush1.bf16.msra.mxu1 %v13722_v6  ;;  %v13809_v37 = vld [vmem:[#allocation12 + $0x160] ss:$16 sps:$4 sm:$0xff]   ;;  %v13812_v6 = vld [vmem:[#allocation12 + $0x168] ss:$16 sps:$4 sm:$0xff]  }
 0x62b   : > { %8899 = vmatprep.subr.bf16.mxu0 %v13727_v56  ;;  %8981 = vmatprep.subr.bf16.mxu1 %v13730_v52  ;;  %v13817_v56 = vld [vmem:[#allocation12 + $0x184] ss:$16 sps:$4 sm:$0xff]   ;;  %v13820_v52 = vld [vmem:[#allocation12 + $0x18c] ss:$16 sps:$4 sm:$0xff]  }
 0x62e   : > { %8900 = vmatpush1.bf16.msra.mxu0 %v13725_v59  ;;  %8982 = vmatpush1.bf16.msra.mxu1 %v13728_v38  ;;  %v13815_v59 = vld [vmem:[#allocation12 + $0x180] ss:$16 sps:$4 sm:$0xff]   ;;  %v13818_v38 = vld [vmem:[#allocation12 + $0x188] ss:$16 sps:$4 sm:$0xff]  }
 0x62f   : > { %8901 = vmatprep.subr.bf16.mxu0 %v13733_v16  ;;  %8983 = vmatprep.subr.bf16.mxu1 %v13736_v14  ;;  %v13823_v16 = vld [vmem:[#allocation12 + $0x1a4] ss:$16 sps:$4 sm:$0xff]   ;;  %v13826_v14 = vld [vmem:[#allocation12 + $0x1ac] ss:$16 sps:$4 sm:$0xff]  }
 0x632   : > { %8902 = vmatpush1.bf16.msra.mxu0 %v13731_v39  ;;  %8984 = vmatpush1.bf16.msra.mxu1 %v13734_v10  ;;  %v13824_v39 = vld [vmem:[#allocation12 + $0x1a8] ss:$16 sps:$4 sm:$0xff]   ;;  %v13829_v10 = vld [vmem:[#allocation12 + $0x1c4] ss:$16 sps:$4 sm:$0xff]  }
 0x633   : > { %8903 = vmatprep.subr.bf16.mxu0 %v13739_v11  ;;  %8985 = vmatprep.subr.bf16.mxu1 %v13742_v49  ;;  %v13832_v11 = vld [vmem:[#allocation12 + $0x1cc] ss:$16 sps:$4 sm:$0xff]   ;;  %v13830_v49 = vld [vmem:[#allocation12 + $0x1c8] ss:$16 sps:$4 sm:$0xff]  }
 0x636   : > { %8904 = vmatpush1.bf16.msra.mxu0 %v13737_v48  ;;  %8986 = vmatpush1.bf16.msra.mxu1 %v13740_v18  ;;  %v13835_v48 = vld [vmem:[#allocation12 + $0x1e4] ss:$16 sps:$4 sm:$0xff]   ;;  %v13838_v18 = vld [vmem:[#allocation12 + $0x1ec] ss:$16 sps:$4 sm:$0xff]  }
 0x637   : > { %9802 = vmatprep.subr.bf16.mxu0 %v13745_v60  ;;  %9884 = vmatprep.subr.bf16.mxu1 %v13748_v35  ;;  %v13836_v60 = vld [vmem:[#allocation12 + $0x1e8] ss:$16 sps:$4 sm:$0xff]   ;;  %v13841_v35 = vld [vmem:[#allocation12 + $0x204] ss:$16 sps:$4 sm:$0xff]  }
 0x639   : > { %8906 = vmatmul.mubr.bf16.vlgmr.msra.gmra.mrb[0].mxu0 %v8040_v43  ;;  %8988 = vmatmul.mubr.bf16.vlgmr.msra.gmra.mrb[0].mxu1 %v8040_v43 }
 0x63a   : > { %9803 = vmatpush1.bf16.msra.mxu0 %v13743_v40  ;;  %9885 = vmatpush1.bf16.msra.mxu1 %v13746_v53  ;;  %v13844_v40 = vld [vmem:[#allocation12 + $0x20c] ss:$16 sps:$4 sm:$0xff]   ;;  %v8172_v53 = vlaneseq }
 0x63b   : > { %9804 = vmatprep.subr.bf16.mxu0 %v13751_v47  ;;  %9886 = vmatprep.subr.bf16.mxu1 %v13754_v61  ;;  %v15965_v61 = vld [vmem:[#allocation11] sm:$0xf] }
 0x63c   : > { %v15962_v43 = vshrl.u32 %v8172_v53, 7  ;;  %v13898_v53 = vld [vmem:[#allocation12 + $0x32c] ss:$16 sps:$4 sm:$0xff]  }
 0x63e   : > { %9805 = vmatpush1.bf16.msra.mxu0 %v13749_v31  ;;  %9887 = vmatpush1.bf16.msra.mxu1 %v13752_v7  ;;  %v8174_v47 = vsub.s32 0, %v15962_v43  ;;  %v8178_v31 = vsub.s32 1, %v15962_v43  ;;  %v8186_v7 = vsub.s32 3, %v15962_v43 }
 0x63f   : > { %9806 = vmatprep.subr.bf16.mxu0 %v13757_v54  ;;  %9888 = vmatprep.subr.bf16.mxu1 %v13760_v63 }
 0x640   : > { %v8175_v54 = vrot.slane %v15965_v61, %v8174_v47  ;;  %v8179_v63 = vrot.slane %v15965_v61, %v8178_v31 }
 0x642   : > { %9807 = vmatpush1.bf16.msra.mxu0 %v13755_v12  ;;  %9889 = vmatpush1.bf16.msra.mxu1 %v13758_v32  ;;  %v8187_v12 = vrot.slane %v15965_v61, %v8186_v7 }
 0x643   : > { %9808 = vmatprep.subr.bf16.mxu0 %v13763_v13  ;;  %9890 = vmatprep.subr.bf16.mxu1 %v13766_v34 }
 0x646   : > { %9809 = vmatpush1.bf16.msra.mxu0 %v13761_v55  ;;  %9891 = vmatpush1.bf16.msra.mxu1 %v13764_v57 }
 0x647   : > { %9810 = vmatprep.subr.bf16.mxu0 %v13769_v24  ;;  %9892 = vmatprep.subr.bf16.mxu1 %v13772_v25 }
 0x64a   : > { %9811 = vmatpush1.bf16.msra.mxu0 %v13767_v4  ;;  %9893 = vmatpush1.bf16.msra.mxu1 %v13770_v0 }
 0x64b   : > { %9812 = vmatprep.subr.bf16.mxu0 %v13775_v1  ;;  %9894 = vmatprep.subr.bf16.mxu1 %v13778_v5 }
 0x64e   : > { %9813 = vmatpush1.bf16.msra.mxu0 %v13773_v8  ;;  %9895 = vmatpush1.bf16.msra.mxu1 %v13776_v46 }
 0x64f   : > { %9814 = vmatprep.subr.bf16.mxu0 %v13781_v58  ;;  %9896 = vmatprep.subr.bf16.mxu1 %v13784_v33 }
 0x652   : > { %9815 = vmatpush1.bf16.msra.mxu0 %v13779_v36  ;;  %9897 = vmatpush1.bf16.msra.mxu1 %v13782_v41 }
 0x653   : > { %9816 = vmatprep.subr.bf16.mxu0 %v13787_v44  ;;  %9898 = vmatprep.subr.bf16.mxu1 %v13790_v9  ;;  %v13839_v44 = vld [vmem:[#allocation12 + $0x200] ss:$16 sps:$4 sm:$0xff]   ;;  %v13842_v9 = vld [vmem:[#allocation12 + $0x208] ss:$16 sps:$4 sm:$0xff]  }
 0x656   : > { %9817 = vmatpush1.bf16.msra.mxu0 %v13785_v17  ;;  %9899 = vmatpush1.bf16.msra.mxu1 %v13788_v20 }
 0x657   : > { %9818 = vmatprep.subr.bf16.mxu0 %v13793_v51  ;;  %9900 = vmatprep.subr.bf16.mxu1 %v13796_v21  ;;  %v13847_v51 = vld [vmem:[#allocation12 + $0x224] ss:$16 sps:$4 sm:$0xff]   ;;  %v13850_v21 = vld [vmem:[#allocation12 + $0x22c] ss:$16 sps:$4 sm:$0xff]  }
 0x65a   : > { %9819 = vmatpush1.bf16.msra.mxu0 %v13791_v62  ;;  %9901 = vmatpush1.bf16.msra.mxu1 %v13794_v23  ;;  %v13845_v23 = vld [vmem:[#allocation12 + $0x220] ss:$16 sps:$4 sm:$0xff]  }
 0x65b   : > { %9820 = vmatprep.subr.bf16.mxu0 %v13799_v26  ;;  %9902 = vmatprep.subr.bf16.mxu1 %v13802_v27  ;;  %v13848_v26 = vld [vmem:[#allocation12 + $0x228] ss:$16 sps:$4 sm:$0xff]   ;;  %v13853_v27 = vld [vmem:[#allocation12 + $0x244] ss:$16 sps:$4 sm:$0xff]  }
 0x65e   : > { %9821 = vmatpush1.bf16.msra.mxu0 %v13797_v45  ;;  %9903 = vmatpush1.bf16.msra.mxu1 %v13800_v50  ;;  %v13856_v45 = vld [vmem:[#allocation12 + $0x24c] ss:$16 sps:$4 sm:$0xff]   ;;  %v13851_v50 = vld [vmem:[#allocation12 + $0x240] ss:$16 sps:$4 sm:$0xff]  }
 0x65f   : > { %9822 = vmatprep.subr.bf16.mxu0 %v13805_v28  ;;  %9904 = vmatprep.subr.bf16.mxu1 %v13808_v29  ;;  %v13854_v28 = vld [vmem:[#allocation12 + $0x248] ss:$16 sps:$4 sm:$0xff]   ;;  %v13859_v29 = vld [vmem:[#allocation12 + $0x264] ss:$16 sps:$4 sm:$0xff]  }
 0x662   : > { %9823 = vmatpush1.bf16.msra.mxu0 %v13803_v22  ;;  %9905 = vmatpush1.bf16.msra.mxu1 %v13806_v2  ;;  %v13862_v22 = vld [vmem:[#allocation12 + $0x26c] ss:$16 sps:$4 sm:$0xff]   ;;  %v13857_v2 = vld [vmem:[#allocation12 + $0x260] ss:$16 sps:$4 sm:$0xff]  }
 0x663   : > { %9824 = vmatprep.subr.bf16.mxu0 %v13811_v3  ;;  %9906 = vmatprep.subr.bf16.mxu1 %v13814_v30  ;;  %v13860_v3 = vld [vmem:[#allocation12 + $0x268] ss:$16 sps:$4 sm:$0xff]   ;;  %v13865_v30 = vld [vmem:[#allocation12 + $0x284] ss:$16 sps:$4 sm:$0xff]  }
 0x666   : > { %9825 = vmatpush1.bf16.msra.mxu0 %v13809_v37  ;;  %9907 = vmatpush1.bf16.msra.mxu1 %v13812_v6  ;;  %v13868_v37 = vld [vmem:[#allocation12 + $0x28c] ss:$16 sps:$4 sm:$0xff]   ;;  %v13863_v6 = vld [vmem:[#allocation12 + $0x280] ss:$16 sps:$4 sm:$0xff]  }
 0x667   : > { %9826 = vmatprep.subr.bf16.mxu0 %v13817_v56  ;;  %9908 = vmatprep.subr.bf16.mxu1 %v13820_v52  ;;  %v13866_v56 = vld [vmem:[#allocation12 + $0x288] ss:$16 sps:$4 sm:$0xff]   ;;  %v13871_v52 = vld [vmem:[#allocation12 + $0x2a4] ss:$16 sps:$4 sm:$0xff]  }
 0x66a   : > { %9827 = vmatpush1.bf16.msra.mxu0 %v13815_v59  ;;  %9909 = vmatpush1.bf16.msra.mxu1 %v13818_v38  ;;  %v13874_v59 = vld [vmem:[#allocation12 + $0x2ac] ss:$16 sps:$4 sm:$0xff]   ;;  %v13869_v38 = vld [vmem:[#allocation12 + $0x2a0] ss:$16 sps:$4 sm:$0xff]  }
 0x66b   : > { %9828 = vmatprep.subr.bf16.mxu0 %v13823_v16  ;;  %9910 = vmatprep.subr.bf16.mxu1 %v13826_v14  ;;  %v13872_v16 = vld [vmem:[#allocation12 + $0x2a8] ss:$16 sps:$4 sm:$0xff]   ;;  %v13877_v14 = vld [vmem:[#allocation12 + $0x2c4] ss:$16 sps:$4 sm:$0xff]  }
 0x66e   : > { %9829 = vmatpush1.bf16.msra.mxu0 %v13821_v15  ;;  %9911 = vmatpush1.bf16.msra.mxu1 %v13824_v39  ;;  %v13880_v15 = vld [vmem:[#allocation12 + $0x2cc] ss:$16 sps:$4 sm:$0xff]   ;;  %v13875_v39 = vld [vmem:[#allocation12 + $0x2c0] ss:$16 sps:$4 sm:$0xff]  }
 0x66f   : > { %9830 = vmatprep.subr.bf16.mxu0 %v13829_v10  ;;  %9912 = vmatprep.subr.bf16.mxu1 %v13832_v11  ;;  %v13878_v10 = vld [vmem:[#allocation12 + $0x2c8] ss:$16 sps:$4 sm:$0xff]   ;;  %v13883_v11 = vld [vmem:[#allocation12 + $0x2e4] ss:$16 sps:$4 sm:$0xff]  }
 0x672   : > { %9831 = vmatpush1.bf16.msra.mxu0 %v13827_v42  ;;  %9913 = vmatpush1.bf16.msra.mxu1 %v13830_v49  ;;  %v13886_v42 = vld [vmem:[#allocation12 + $0x2ec] ss:$16 sps:$4 sm:$0xff]   ;;  %v13881_v49 = vld [vmem:[#allocation12 + $0x2e0] ss:$16 sps:$4 sm:$0xff]  }
 0x673   : > { %9832 = vmatprep.subr.bf16.mxu0 %v13835_v48  ;;  %9914 = vmatprep.subr.bf16.mxu1 %v13838_v18  ;;  %v13884_v48 = vld [vmem:[#allocation12 + $0x2e8] ss:$16 sps:$4 sm:$0xff]   ;;  %v13889_v18 = vld [vmem:[#allocation12 + $0x304] ss:$16 sps:$4 sm:$0xff]  }
 0x676   : > { %9833 = vmatpush1.bf16.msra.mxu0 %v13833_v19  ;;  %9915 = vmatpush1.bf16.msra.mxu1 %v13836_v60  ;;  %v13892_v19 = vld [vmem:[#allocation12 + $0x30c] ss:$16 sps:$4 sm:$0xff]   ;;  %v13887_v60 = vld [vmem:[#allocation12 + $0x300] ss:$16 sps:$4 sm:$0xff]  }
 0x677   : > { %9843 = vmatprep.subr.bf16.mxu0 %v13841_v35  ;;  %9925 = vmatprep.subr.bf16.mxu1 %v13844_v40  ;;  %v13890_v35 = vld [vmem:[#allocation12 + $0x308] ss:$16 sps:$4 sm:$0xff]   ;;  %v13895_v40 = vld [vmem:[#allocation12 + $0x324] ss:$16 sps:$4 sm:$0xff]  }
 0x70c   : > { %v8907_v32 = vpop.f32.mrb[0].mxu0  ;;  %v15978_v13 = vpop.f32.mrb[0].mxu1 }
 0x70d   : > { %v11865_v34 = vadd.f32 %v8907_v32, %v8175_v54  ;;  %v8909_v55 = vpop.f32.mrb[1].mxu0  ;;  %v8991_v57 = vpop.f32.mrb[1].mxu1  ;;  %v13893_v54 = vld [vmem:[#allocation12 + $0x320] ss:$16 sps:$4 sm:$0xff]   ;;  %v13904_v32 = vld [vmem:[#allocation12 + $0x34c] ss:$16 sps:$4 sm:$0xff]  }
 0x70e   : > { %v11866_v24 = vadd.f32 %v8909_v55, %v8179_v63  ;;  %v11868_v25 = vadd.f32 %v8991_v57, %v8187_v12  ;;  %v8911_v4 = vpop.f32.mrb[2].mxu0  ;;  %v8993_v0 = vpop.f32.mrb[2].mxu1  ;;  %v13896_v63 = vld [vmem:[#allocation12 + $0x328] ss:$16 sps:$4 sm:$0xff]   ;;  %v13901_v12 = vld [vmem:[#allocation12 + $0x344] ss:$16 sps:$4 sm:$0xff]  }
 0x70f   : > { %vm8996_vm4 = vcmp.gt.f32.partialorder %v11865_v34, 0.0  ;;  %v9000_v1 = vmul.f32 0.2, %v11865_v34  ;;  %v8912_v58 = vpop.f32.mrb[3].mxu0  ;;  %v8994_v33 = vpop.f32.mrb[3].mxu1 }
 0x710   : > { %vm8997_vm5 = vcmp.gt.f32.partialorder %v11866_v24, 0.0  ;;  %v9001_v5 = vmul.f32 0.2, %v11866_v24  ;;  %vm8999_vm6 = vcmp.gt.f32.partialorder %v11868_v25, 0.0  ;;  %v9003_v8 = vmul.f32 0.2, %v11868_v25 }
 0x711   : > { %v9004_v46 = vsel %vm8996_vm4, %v11865_v34, %v9000_v1  ;;  %v13899_v34 = vld [vmem:[#allocation12 + $0x340] ss:$16 sps:$4 sm:$0xff]   ;;  %v13902_v55 = vld [vmem:[#allocation12 + $0x348] ss:$16 sps:$4 sm:$0xff]   ;;  %v13907_v57 = vld [vmem:[#allocation12 + $0x364] ss:$16 sps:$4 sm:$0xff]  }
 0x712   : > { %v9005_v36 = vsel %vm8997_vm5, %v11866_v24, %v9001_v5  ;;  %v9007_v17 = vsel %vm8999_vm6, %v11868_v25, %v9003_v8  ;;  %v9008_v20 = vpack.c.bf16 %v9004_v46, %v9004_v46  ;;  %v13910_v24 = vld [vmem:[#allocation12 + $0x36c] ss:$16 sps:$4 sm:$0xff]   ;;  %v13905_v25 = vld [vmem:[#allocation12 + $0x360] ss:$16 sps:$4 sm:$0xff]   ;;  %v13908_v4 = vld [vmem:[#allocation12 + $0x368] ss:$16 sps:$4 sm:$0xff]  }
 0x713   : > { %v9009_v41 = vpack.c.bf16 %v9005_v36, %v9005_v36  ;;  %v9011_v62 = vpack.c.bf16 %v9007_v17, %v9007_v17  ;;  %v13913_v0 = vld [vmem:[#allocation12 + $0x384] ss:$16 sps:$4 sm:$0xff]   ;;  %v13916_v1 = vld [vmem:[#allocation12 + $0x38c] ss:$16 sps:$4 sm:$0xff]   ;;  %v8182_v5 = vsub.s32 2, %v15962_v43 }
 0x714   : > { %v13911_v8 = vld [vmem:[#allocation12 + $0x380] ss:$16 sps:$4 sm:$0xff]   ;;  %v13914_v46 = vld [vmem:[#allocation12 + $0x388] ss:$16 sps:$4 sm:$0xff]   ;;  %v13919_v58 = vld [vmem:[#allocation12 + $0x3a4] ss:$16 sps:$4 sm:$0xff]  }
 0x715   : > { %9834 = vmatprep.mubr.bf16.mxu0 %v9009_v41  ;;  %9916 = vmatprep.mubr.bf16.mxu1 %v9009_v41  ;;  %v13922_v33 = vld [vmem:[#allocation12 + $0x3ac] ss:$16 sps:$4 sm:$0xff]   ;;  %v8183_v36 = vrot.slane %v15965_v61, %v8182_v5  ;;  %v13917_v41 = vld [vmem:[#allocation12 + $0x3a0] ss:$16 sps:$4 sm:$0xff]  }
 0x716   : > { %9835 = vmatmul.mubr.bf16.vlgmr.msra.gmra.mrb[4].mxu0 %v9008_v20  ;;  %9917 = vmatmul.mubr.bf16.vlgmr.msra.gmra.mrb[4].mxu1 %v9008_v20  ;;  %v13928_v17 = vld [vmem:[#allocation12 + $0x3cc] ss:$16 sps:$4 sm:$0xff]   ;;  %v13929_v61 = vld [vmem:[#allocation12 + $0x3e0] ss:$16 sps:$4 sm:$0xff]  }
 0x717   : > { %9844 = vmatpush1.bf16.msra.mxu0 %v13839_v44  ;;  %9926 = vmatpush1.bf16.msra.mxu1 %v13842_v9  ;;  %v13920_v44 = vld [vmem:[#allocation12 + $0x3a8] ss:$16 sps:$4 sm:$0xff]   ;;  %v13925_v9 = vld [vmem:[#allocation12 + $0x3c4] ss:$16 sps:$4 sm:$0xff]   ;;  %v11867_v20 = vadd.f32 %v15978_v13, %v8183_v36 }
 0x718   : > { %9875 = vmatprep.mubr.bf16.mxu0 %v9011_v62  ;;  %9957 = vmatprep.mubr.bf16.mxu1 %v9011_v62  ;;  %v13931_v62 = vld [vmem:[#allocation12 + $0x3e4] ss:$16 sps:$4 sm:$0xff]  }
 0x719   : > { %9845 = vmatprep.subr.bf16.mxu0 %v13847_v51  ;;  %9927 = vmatprep.subr.bf16.mxu1 %v13850_v21  ;;  %v13923_v51 = vld [vmem:[#allocation12 + $0x3c0] ss:$16 sps:$4 sm:$0xff]   ;;  %v13926_v21 = vld [vmem:[#allocation12 + $0x3c8] ss:$16 sps:$4 sm:$0xff]   ;;  %vm8998_vm7 = vcmp.gt.f32.partialorder %v11867_v20, 0.0 }
 0x71a   : > { %v13937_v13 = vld [vmem:[#allocation15] sm:$0xff]  }
 0x71b   : > { %9846 = vmatpush1.bf16.msra.mxu0 %v13845_v23  ;;  %9928 = vmatpush1.bf16.msra.mxu1 %v13848_v26  ;;  %v13934_v23 = vld [vmem:[#allocation12 + $0x3ec] ss:$16 sps:$4 sm:$0xff]   ;;  %v9002_v26 = vmul.f32 0.2, %v11867_v20 }
 0x71c   : > { %9847 = vmatprep.subr.bf16.mxu0 %v13853_v27  ;;  %9929 = vmatprep.subr.bf16.mxu1 %v13856_v45  ;;  %v13932_v27 = vld [vmem:[#allocation12 + $0x3e8] ss:$16 sps:$4 sm:$0xff]  }
 0x71d   : > { %v13935_v45 = vld [vmem:[#allocation15 + $0x40] sm:$0xff]  }
 0x71f   : > { %9848 = vmatpush1.bf16.msra.mxu0 %v13851_v50  ;;  %9930 = vmatpush1.bf16.msra.mxu1 %v13854_v28  ;;  %v13936_v50 = vld [vmem:[#allocation15 + $0xc0] sm:$0xff]   ;;  %v9006_v28 = vsel %vm8998_vm7, %v11867_v20, %v9002_v26 }
 0x720   : > { %9849 = vmatprep.subr.bf16.mxu0 %v13859_v29  ;;  %9931 = vmatprep.subr.bf16.mxu1 %v13862_v22  ;;  %v13938_v29 = vld [vmem:[#allocation15 + $0x80] sm:$0xff]   ;;  %v9010_v22 = vpack.c.bf16 %v9006_v28, %v9006_v28 }
 0x723   : > { %9850 = vmatpush1.bf16.msra.mxu0 %v13857_v2  ;;  %9932 = vmatpush1.bf16.msra.mxu1 %v13860_v3  ;;  %v13939_v2 = vld [vmem:[#allocation15 + $0x48] sm:$0xff]  }
 0x724   : > { %9851 = vmatprep.subr.bf16.mxu0 %v13865_v30  ;;  %9933 = vmatprep.subr.bf16.mxu1 %v13868_v37  ;;  %v13940_v3 = vld [vmem:[#allocation15 + $0xc8] sm:$0xff]  }
 0x725   : > { %v13941_v30 = vld [vmem:[#allocation15 + $0x8] sm:$0xff]  }
 0x726   : > { %v13942_v37 = vld [vmem:[#allocation15 + $0x88] sm:$0xff]  }
 0x727   : > { %9852 = vmatpush1.bf16.msra.mxu0 %v13863_v6  ;;  %9934 = vmatpush1.bf16.msra.mxu1 %v13866_v56  ;;  %v13943_v6 = vld [vmem:[#allocation15 + $0x50] sm:$0xff]  }
 0x728   : > { %9853 = vmatprep.subr.bf16.mxu0 %v13871_v52  ;;  %9935 = vmatprep.subr.bf16.mxu1 %v13874_v59  ;;  %v13944_v56 = vld [vmem:[#allocation15 + $0xd0] sm:$0xff]  }
 0x729   : > { %v13945_v52 = vld [vmem:[#allocation15 + $0x10] sm:$0xff]  }
 0x72a   : > { %v13946_v59 = vld [vmem:[#allocation15 + $0x90] sm:$0xff]  }
 0x72b   : > { %9854 = vmatpush1.bf16.msra.mxu0 %v13869_v38  ;;  %9936 = vmatpush1.bf16.msra.mxu1 %v13872_v16  ;;  %v13947_v38 = vld [vmem:[#allocation15 + $0x58] sm:$0xff]  }
 0x72c   : > { %9855 = vmatprep.subr.bf16.mxu0 %v13877_v14  ;;  %9937 = vmatprep.subr.bf16.mxu1 %v13880_v15  ;;  %v13948_v16 = vld [vmem:[#allocation15 + $0xd8] sm:$0xff]  }
 0x72d   : > { %v13949_v14 = vld [vmem:[#allocation15 + $0x18] sm:$0xff]  }
 0x72e   : > { %v13950_v15 = vld [vmem:[#allocation15 + $0x98] sm:$0xff]  }
 0x72f   : > { %9856 = vmatpush1.bf16.msra.mxu0 %v13875_v39  ;;  %9938 = vmatpush1.bf16.msra.mxu1 %v13878_v10  ;;  %v13951_v39 = vld [vmem:[#allocation15 + $0x60] sm:$0xff]  }
 0x730   : > { %9857 = vmatprep.subr.bf16.mxu0 %v13883_v11  ;;  %9939 = vmatprep.subr.bf16.mxu1 %v13886_v42  ;;  %v13952_v10 = vld [vmem:[#allocation15 + $0xe0] sm:$0xff]  }
 0x731   : > { %v13953_v11 = vld [vmem:[#allocation15 + $0x20] sm:$0xff]  }
 0x732   : > { %v13954_v42 = vld [vmem:[#allocation15 + $0xa0] sm:$0xff]  }
 0x733   : > { %9858 = vmatpush1.bf16.msra.mxu0 %v13881_v49  ;;  %9940 = vmatpush1.bf16.msra.mxu1 %v13884_v48  ;;  %v13955_v49 = vld [vmem:[#allocation15 + $0x68] sm:$0xff]  }
 0x734   : > { %9859 = vmatprep.subr.bf16.mxu0 %v13889_v18  ;;  %9941 = vmatprep.subr.bf16.mxu1 %v13892_v19  ;;  %v13956_v48 = vld [vmem:[#allocation15 + $0xe8] sm:$0xff]  }
 0x735   : > { %v13957_v18 = vld [vmem:[#allocation15 + $0x28] sm:$0xff]  }
 0x736   : > { %v13958_v19 = vld [vmem:[#allocation15 + $0xa8] sm:$0xff]  }
 0x737   : > { %9860 = vmatpush1.bf16.msra.mxu0 %v13887_v60  ;;  %9942 = vmatpush1.bf16.msra.mxu1 %v13890_v35  ;;  %v13959_v60 = vld [vmem:[#allocation15 + $0x70] sm:$0xff]  }
 0x738   : > { %9861 = vmatprep.subr.bf16.mxu0 %v13895_v40  ;;  %9943 = vmatprep.subr.bf16.mxu1 %v13898_v53  ;;  %v13960_v35 = vld [vmem:[#allocation15 + $0xf0] sm:$0xff]  }
 0x739   : > { %v13961_v40 = vld [vmem:[#allocation15 + $0x30] sm:$0xff]  }
 0x73a   : > { %v13962_v53 = vld [vmem:[#allocation15 + $0xb0] sm:$0xff]  }
 0x73b   : > { %9862 = vmatpush1.bf16.msra.mxu0 %v13893_v54  ;;  %9944 = vmatpush1.bf16.msra.mxu1 %v13896_v63  ;;  %v13963_v54 = vld [vmem:[#allocation15 + $0x78] sm:$0xff]  }
 0x73c   : > { %9863 = vmatprep.subr.bf16.mxu0 %v13901_v12  ;;  %9945 = vmatprep.subr.bf16.mxu1 %v13904_v32  ;;  %v13964_v63 = vld [vmem:[#allocation15 + $0xf8] sm:$0xff]  }
 0x73d   : > { %v13965_v12 = vld [vmem:[#allocation15 + $0x38] sm:$0xff]  }
 0x73e   : > { %v13966_v32 = vld [vmem:[#allocation15 + $0xb8] sm:$0xff]  }
 0x73f   : > { %9864 = vmatpush1.bf16.msra.mxu0 %v13899_v34  ;;  %9946 = vmatpush1.bf16.msra.mxu1 %v13902_v55  ;;  %v9140_v34 = vld [vmem:[#allocation14] sm:$0xf] }
 0x740   : > { %9865 = vmatprep.subr.bf16.mxu0 %v13907_v57  ;;  %9947 = vmatprep.subr.bf16.mxu1 %v13910_v24  ;;  %v9145_v55 = vrot.slane %v9140_v34, %v8174_v47  ;;  %v9153_v57 = vrot.slane %v9140_v34, %v8182_v5  ;;  %v9149_v24 = vrot.slane %v9140_v34, %v8178_v31 }
 0x743   : > { %9866 = vmatpush1.bf16.msra.mxu0 %v13905_v25  ;;  %9948 = vmatpush1.bf16.msra.mxu1 %v13908_v4  ;;  %v9157_v25 = vrot.slane %v9140_v34, %v8186_v7 }
 0x744   : > { %9867 = vmatprep.subr.bf16.mxu0 %v13913_v0  ;;  %9949 = vmatprep.subr.bf16.mxu1 %v13916_v1 }
 0x747   : > { %9868 = vmatpush1.bf16.msra.mxu0 %v13911_v8  ;;  %9950 = vmatpush1.bf16.msra.mxu1 %v13914_v46 }
 0x748   : > { %9869 = vmatprep.subr.bf16.mxu0 %v13919_v58  ;;  %9951 = vmatprep.subr.bf16.mxu1 %v13922_v33 }
 0x74b   : > { %9870 = vmatpush1.bf16.msra.mxu0 %v13917_v41  ;;  %9952 = vmatpush1.bf16.msra.mxu1 %v13920_v44 }
 0x74c   : > { %9871 = vmatprep.subr.bf16.mxu0 %v13925_v9  ;;  %9953 = vmatprep.subr.bf16.mxu1 %v13928_v17 }
 0x74f   : > { %9872 = vmatpush1.bf16.msra.mxu0 %v13923_v51  ;;  %9954 = vmatpush1.bf16.msra.mxu1 %v13926_v21 }
 0x750   : > { %9873 = vmatprep.subr.bf16.mxu0 %v13931_v62  ;;  %9955 = vmatprep.subr.bf16.mxu1 %v13934_v23 }
 0x753   : > { %9874 = vmatpush1.bf16.msra.mxu0 %v13929_v61  ;;  %9956 = vmatpush1.bf16.msra.mxu1 %v13932_v27 }
 0x754   : > { %11821 = vmatprep.subr.bf16.mxu0 %v13935_v45  ;;  %11843 = vmatprep.subr.bf16.mxu1 %v13936_v50  ;;  %v11781_v50 = vld [vmem:[#allocation17] ss:$0 sm:$0xff] }
 0x756   : > { %9876 = vmatmul.mubr.bf16.vlgmr.msra.gmra.mrb[4].mxu0 %v9010_v22  ;;  %9958 = vmatmul.mubr.bf16.vlgmr.msra.gmra.mrb[4].mxu1 %v9010_v22 }
 0x757   : > { %11822 = vmatpush3.bf16.msra.mxu0 %v13937_v13  ;;  %11844 = vmatpush3.bf16.msra.mxu1 %v13938_v29 }
 0x758   : > { %11823 = vmatprep.subr.bf16.mxu0 %v13939_v2  ;;  %11845 = vmatprep.subr.bf16.mxu1 %v13940_v3 }
 0x75b   : > { %11824 = vmatpush3.bf16.msra.mxu0 %v13941_v30  ;;  %11846 = vmatpush3.bf16.msra.mxu1 %v13942_v37 }
 0x75c   : > { %11825 = vmatprep.subr.bf16.mxu0 %v13943_v6  ;;  %11847 = vmatprep.subr.bf16.mxu1 %v13944_v56 }
 0x75f   : > { %11826 = vmatpush3.bf16.msra.mxu0 %v13945_v52  ;;  %11848 = vmatpush3.bf16.msra.mxu1 %v13946_v59 }
 0x760   : > { %11827 = vmatprep.subr.bf16.mxu0 %v13947_v38  ;;  %11849 = vmatprep.subr.bf16.mxu1 %v13948_v16 }
 0x763   : > { %11828 = vmatpush3.bf16.msra.mxu0 %v13949_v14  ;;  %11850 = vmatpush3.bf16.msra.mxu1 %v13950_v15 }
 0x764   : > { %11829 = vmatprep.subr.bf16.mxu0 %v13951_v39  ;;  %11851 = vmatprep.subr.bf16.mxu1 %v13952_v10 }
 0x767   : > { %11830 = vmatpush3.bf16.msra.mxu0 %v13953_v11  ;;  %11852 = vmatpush3.bf16.msra.mxu1 %v13954_v42 }
 0x768   : > { %11831 = vmatprep.subr.bf16.mxu0 %v13955_v49  ;;  %11853 = vmatprep.subr.bf16.mxu1 %v13956_v48 }
 0x76b   : > { %11832 = vmatpush3.bf16.msra.mxu0 %v13957_v18  ;;  %11854 = vmatpush3.bf16.msra.mxu1 %v13958_v19 }
 0x76c   : > { %11833 = vmatprep.subr.bf16.mxu0 %v13959_v60  ;;  %11855 = vmatprep.subr.bf16.mxu1 %v13960_v35 }
 0x76f   : > { %11834 = vmatpush3.bf16.msra.mxu0 %v13961_v40  ;;  %11856 = vmatpush3.bf16.msra.mxu1 %v13962_v53 }
 0x770   : > { %11835 = vmatprep.subr.bf16.mxu0 %v13963_v54  ;;  %11857 = vmatprep.subr.bf16.mxu1 %v13964_v63 }
 0x773   : > { %11836 = vmatpush3.bf16.msra.mxu0 %v13965_v12  ;;  %11858 = vmatpush3.bf16.msra.mxu1 %v13966_v32 }
 0x829   : > { %v9877_v4 = vpop.f32.mrb[4].mxu0  ;;  %v9959_v0 = vpop.f32.mrb[4].mxu1 }
 0x82a   : > { %v11869_v1 = vadd.f32 %v9877_v4, %v9145_v55  ;;  %v11871_v8 = vadd.f32 %v9959_v0, %v9153_v57  ;;  %v9879_v46 = vpop.f32.mrb[5].mxu0  ;;  %v9961_v58 = vpop.f32.mrb[5].mxu1 }
 0x82b   : > { %v11870_v33 = vadd.f32 %v9879_v46, %v9149_v24  ;;  %v11872_v36 = vadd.f32 %v9961_v58, %v9157_v25  ;;  %v9881_v41 = vpop.f32.mrb[6].mxu0  ;;  %v9963_v44 = vpop.f32.mrb[6].mxu1 }
 0x82c   : > { %vm9966_vm8 = vcmp.gt.f32.partialorder %v11869_v1, 0.0  ;;  %v9970_v47 = vmul.f32 0.2, %v11869_v1  ;;  %vm9968_vm9 = vcmp.gt.f32.partialorder %v11871_v8, 0.0  ;;  %v9972_v5 = vmul.f32 0.2, %v11871_v8 }
 0x82d   : > { %vm9967_vm10 = vcmp.gt.f32.partialorder %v11870_v33, 0.0  ;;  %v9971_v9 = vmul.f32 0.2, %v11870_v33  ;;  %vm9969_vm11 = vcmp.gt.f32.partialorder %v11872_v36, 0.0  ;;  %v9973_v31 = vmul.f32 0.2, %v11872_v36 }
 0x82e   : > { %v9974_v43 = vsel %vm9966_vm8, %v11869_v1, %v9970_v47  ;;  %v9976_v7 = vsel %vm9968_vm9, %v11871_v8, %v9972_v5  ;;  %v9882_v17 = vpop.f32.mrb[7].mxu0  ;;  %v9964_v20 = vpop.f32.mrb[7].mxu1 }
 0x82f   : > { %v9975_v51 = vsel %vm9967_vm10, %v11870_v33, %v9971_v9  ;;  %v9977_v21 = vsel %vm9969_vm11, %v11872_v36, %v9973_v31  ;;  %v9978_v26 = vpack.c.bf16 %v9974_v43, %v9974_v43  ;;  %v9980_v61 = vpack.c.bf16 %v9976_v7, %v9976_v7 }
 0x830   : > { %v9979_v62 = vpack.c.bf16 %v9975_v51, %v9975_v51  ;;  %v9981_v23 = vpack.c.bf16 %v9977_v21, %v9977_v21 }
 0x832   : > { %10277 = vmatprep.mubr.bf16.mxu0 %v9979_v62  ;;  %10317 = vmatprep.mubr.bf16.mxu1 %v9981_v23 }
 0x833   : > { %10278 = vmatmul.mubr.bf16.vlgmr.msra.gmra.mrb[8].mxu0 %v9978_v26  ;;  %10318 = vmatmul.mubr.bf16.vlgmr.msra.gmra.mrb[8].mxu1 %v9980_v61 }
 0x906   : > { %v11837_v27 = vpop.f32.mrb[8].mxu0  ;;  %v11859_v45 = vpop.f32.mrb[8].mxu1 }
 0x907   : > { %v11838_v28 = vpop.f32.mrb[9].mxu0  ;;  %v11860_v13 = vpop.f32.mrb[9].mxu1 }
 0x908   : > { %v11839_v29 = vadd.f32 %v11838_v28, %v11837_v27  ;;  %v11861_v22 = vadd.f32 %v11860_v13, %v11859_v45  ;;  %v11840_v2 = vpop.f32.mrb[10].mxu0  ;;  %v11862_v3 = vpop.f32.mrb[10].mxu1 }
 0x909   : > { %v11841_v30 = vpop.f32.mrb[11].mxu0  ;;  %v11863_v37 = vpop.f32.mrb[11].mxu1 }
 0x90a   : > { %v10280_v6 = vadd.f32 %v11839_v29, %v11781_v50 }
 0x90c   : > { %v10320_v56 = vadd.f32 %v11861_v22, %v10280_v6 }
 0x90e   : > { %10325 = vst [vmem:[#allocation18] sm:$0xff] %v10320_v56 }
 0x90f PF: > { %p11969_p1 = scmp.eq.s32.totalorder %s14394_s15, 3  ;;  %s14322_s16 = smov [#allocation18]  }
 0x910   : > { %s10333_s17 = sshll.u32 %s14322_s16, 4  ;;  %s10334_s17 = int_to_ptr.vmem [resolvable:$true] %s10333_s17 }
 0x911   : > { %s14223_s25 = scalar_lea.vmem %s10334_s17, 128  ;;  %p14230_p6 = scmp.lt.s32.totalorder %s10334_s17, %s10334_s17 }
 0x912   : > { %p14224_p4 = scmp.ne.s32.totalorder %s10334_s17, %s14223_s25  ;;  %p14231_p3 = scmp.lt.s32.totalorder %s14223_s25, %s14223_s25 }
 0x914   : > { %p14225_p11 = pnand %p14224_p4, %p11969_p1  ;;  %p14232_p12 = por %p14231_p3, %p14230_p6 }
 0x916   : > { %p14226_p13 = pneg %p14225_p11 }
 0x918   : > { %p14233_p0 = pnand %p14232_p12, %p14226_p13 }
 0x91a   : > { %14236 = shalt.err (!%p14233_p0)
}
 0x91b   : > { %s14237_s26 = scalar_lea.hbm %s16038_s9, 128 }
 0x91c   : > { %p14238_p5 = scmp.ne.s32.totalorder %s16038_s9, %s14237_s26  ;;  %p14243_p7 = scmp.lt.u32.totalorder %s14237_s26, %s16038_s9 }
 0x91e   : > { %p14239_p8 = pnand %p14238_p5, %p11969_p1 }
 0x920   : > { %p14240_p10 = pneg %p14239_p8 }
 0x922   : > { %p14245_p2 = pnand %p14243_p7, %p14240_p10 }
 0x924   : > { %14248 = shalt.err (!%p14245_p2)
}
 0x925   : > { %11922 = dma.vmem_to_hbm [thread:$0]  (%p11969_p1), %s10334_s17, 128, %s16038_s9, [#allocation5]  }
 0x926   : > { %14290 = dma.done.wait (%p11969_p1), [#allocation5], 128  }
 0x927   : > { %14292 = vsyncadd (%p11969_p1), [#allocation5], 4294967168 }
 0x928 PF: > { %p26_p9 = scmp.ge.s32.totalorder %s14572_s27, 6   ;;  %s16065_s30 = smov %s14299_s10 }
 0x929   : > { %s16066_s10 = smov %s14303_s11  ;;  %s16067_s11 = smov %s14583_s20 }
 0x92a   : > { %s16068_s12 = smov %s14572_s27  ;;  %28 = sbr.rel (!%p26_p9) target bundleno = 12 (0xc), region = 142 }
 0x931   :  { %10346 = vsyncpa [#allocation4], 1 }
 0x932   :  { %10348 = vsyncpa [#allocation4 + $0x1], 1 }
 0x933   :  { %10349 = vsyncpa [#allocation7], 1 }
 0x934   :  { %10351 = vsyncpa [#allocation7 + $0x1], 1 }
 0x935   :  { %10352 = vsyncpa [#allocation10], 1 }
 0x936   :  { %10353 = vsyncpa [#allocation13], 1 }
 0x937   :  { %10354 = vsyncpa [#allocation16], 1 }
 0x938   :  { %10355 = vsyncpa [#allocation5], 1 }
 0x939   :  { %10357 = vsyncpa [#allocation5 + $0x1], 1 }

</bundles_post_ra>
